<compile_context>
chip_gen: v5e
topology: v5e:2x2
jax: 0.10.0
libtpu: 0.0.40
codegen_flags: <defaults>
</compile_context>

<pallas_src>
import numpy as np
import jax
import jax.numpy as jnp
from jax import lax
from jax.experimental import pallas as pl
from jax.experimental.pallas import tpu as pltpu

NUM_CLASSES = 8
FC_PAD = 128            # lane-dense FC output width (sliced to NUM_CLASSES outside)


# ------------------------------ Pallas kernel --------------------------------

def _eyebone_kernel(x_ref,
                    s1_ref, w1_ref, b1_ref,
                    s2_ref, w2_ref, b2_ref,
                    s3_ref, w3_ref, b3_ref,
                    pool_ref, wfc_ref, bfc_ref,
                    o_ref,
                    p1_ref, p2_ref, p3_ref):
    # x_ref:    (N*H*W, Cin)        bf16, rows ordered (n, h, w)
    # s*_ref:   (9, M_out, M_in)    bf16 0/1 selection matrices (one per 3x3 tap)
    # w*_ref:   (9*Cin, Cout)       bf16 conv weights, BN scale folded in, tap-major rows
    # b*_ref:   (1, Cout)           f32 folded BatchNorm shift
    # pool_ref: (8, N*P_last)       bf16 per-batch averaging matrix (1/P_last entries)
    # wfc_ref:  (512, FC_PAD) bf16, bfc_ref: (1, FC_PAD) f32   (zero-padded FC)
    # p*_ref:   (M_out, 9*Cin)      bf16 VMEM im2col scratch slabs
    def conv_bn_relu(x_bf, s_ref, w_ref, b_ref, patch_ref):
        cin = x_bf.shape[-1]
        for t in range(9):                                   # unrolled 3x3 taps
            # 0/1 row gather of the shifted / strided window (exact; zero rows = padding)
            win = jnp.dot(s_ref[t], x_bf, preferred_element_type=jnp.float32)
            patch_ref[:, t * cin:(t + 1) * cin] = win.astype(jnp.bfloat16)
        # Single conv matmul over the lane-concatenated im2col slab.
        y = jnp.dot(patch_ref[...], w_ref[...], preferred_element_type=jnp.float32)
        y = y + b_ref[...]                                   # folded BN shift (f32)
        return jnp.maximum(y, 0.0).astype(jnp.bfloat16)      # ReLU

    h = conv_bn_relu(x_ref[...], s1_ref, w1_ref, b1_ref, p1_ref)   # (N*64, 128)
    h = conv_bn_relu(h, s2_ref, w2_ref, b2_ref, p2_ref)            # (N*16, 256)
    h = conv_bn_relu(h, s3_ref, w3_ref, b3_ref, p3_ref)            # (N*4,  512)

    # Global average pool (per-batch averaging matmul) + FC epilogue.
    pooled = jnp.dot(pool_ref[...], h, preferred_element_type=jnp.float32)   # (8, 512)
    logits = jnp.dot(pooled.astype(jnp.bfloat16), wfc_ref[...],
                     preferred_element_type=jnp.float32) + bfc_ref[...]      # (8, FC_PAD)
    o_ref[...] = logits


# --------------------------- host-side packing --------------------------------

def _selection_mats(n, hin, win, hout, wout, stride, pad=1, k=3):
    """S[t] @ X gathers, for every output pixel, the input row of 3x3 tap t.
    Rows whose tap falls into the zero-padding are all-zero (== zero padding)."""
    pi, po = hin * win, hout * wout
    s = np.zeros((k * k, n * po, n * pi), dtype=np.float32)
    for ki in range(k):
        for kj in range(k):
            t = ki * k + kj
            for b in range(n):
                for ho in range(hout):
                    for wo in range(wout):
                        hi = ho * stride + ki - pad
                        wi = wo * stride + kj - pad
                        if 0 <= hi < hin and 0 <= wi < win:
                            s[t, b * po + ho * wout + wo,
                              b * pi + hi * win + wi] = 1.0
    return jnp.asarray(s, dtype=jnp.bfloat16)


def pack_params(params, n, h, w):
    """Fold BN into conv weights, cast to bf16, build constant gather / pooling mats."""
    strides = (1, 2, 2)
    layers = []
    hin, win = h, w
    for (w_hwio, scale, shift), s in zip(params["convs"], strides):
        kh, kw, cin, cout = w_hwio.shape
        pad = kh // 2
        hout = (hin + 2 * pad - kh) // s + 1
        wout = (win + 2 * pad - kw) // s + 1
        # Fold the per-output-channel BN scale into the weights (exact algebra, done once).
        w_folded = (w_hwio * scale[None, None, None, :]).reshape(kh * kw * cin, cout)
        layers.append(dict(
            sel=_selection_mats(n, hin, win, hout, wout, s, pad=pad, k=kh),
            w=w_folded.astype(jnp.bfloat16),
            shift=shift.reshape(1, cout).astype(jnp.float32),
        ))
        hin, win = hout, wout

    p_last = hin * win                       # spatial positions left after conv3
    m_out = max(8, n)                        # keep output sublane-dim >= 8
    pool = np.zeros((m_out, n * p_last), dtype=np.float32)
    for b in range(n):
        pool[b, b * p_last:(b + 1) * p_last] = 1.0 / p_last

    c_fc, n_cls = params["w_fc"].shape
    assert n_cls == NUM_CLASSES
    wfc = jnp.zeros((c_fc, FC_PAD), jnp.float32).at[:, :n_cls].set(params["w_fc"])
    bfc = jnp.zeros((1, FC_PAD), jnp.float32).at[0, :n_cls].set(params["b_fc"])

    return dict(layers=layers,
                pool=jnp.asarray(pool, dtype=jnp.bfloat16),
                wfc=wfc.astype(jnp.bfloat16),
                bfc=bfc)


# ------------------------------ forward pass ----------------------------------

def eyebone_forward(x_nchw, packed):
    n, c, h, w = x_nchw.shape
    # Layout glue only (64 KB): NCHW -> NHWC -> (N*H*W, C) bf16 rows ordered (n, h, w).
    x2d = jnp.transpose(x_nchw, (0, 2, 3, 1)).reshape(n * h * w, c).astype(jnp.bfloat16)
    L = packed["layers"]
    m_out = packed["pool"].shape[0]
    # One im2col scratch slab per layer: (M_out, 9*Cin) bf16, ~0.4 MB total.
    scratch = [pltpu.VMEM((l["sel"].shape[1], l["w"].shape[0]), jnp.bfloat16) for l in L]
    out = pl.pallas_call(
        _eyebone_kernel,
        out_shape=jax.ShapeDtypeStruct((m_out, FC_PAD), jnp.float32),
        scratch_shapes=scratch,
        compiler_params=pltpu.CompilerParams(vmem_limit_bytes=32 * 1024 * 1024),
    )(x2d,
      L[0]["sel"], L[0]["w"], L[0]["shift"],
      L[1]["sel"], L[1]["w"], L[1]["shift"],
      L[2]["sel"], L[2]["w"], L[2]["shift"],
      packed["pool"], packed["wfc"], packed["bfc"])
    return out[:n, :NUM_CLASSES]


# --------------------------- pure-JAX reference --------------------------------

def eyebone_reference(x_nchw, params):
    x = jnp.transpose(x_nchw, (0, 2, 3, 1))
    strides = (1, 2, 2)
    for (w, sc, sh), s in zip(params["convs"], strides):
        x = lax.conv_general_dilated(
            x, w, (s, s), [(1, 1), (1, 1)],
            dimension_numbers=("NHWC", "HWIO", "NHWC"),
            precision=lax.Precision.HIGHEST)
        x = jnp.maximum(x * sc + sh, 0.0)
    pooled = jnp.mean(x, axis=(1, 2))
    return pooled @ params["w_fc"] + params["b_fc"]


# ------------------------------ params / main ----------------------------------

def init_params(key):
    def conv_params(k, cin, cout):
        k1, k2, k3, k4, k5 = jax.random.split(k, 5)
        w = jax.random.normal(k1, (3, 3, cin, cout), jnp.float32) * (9 * cin) ** -0.5
        gamma = 1.0 + 0.1 * jax.random.normal(k2, (cout,), jnp.float32)
        beta = 0.1 * jax.random.normal(k3, (cout,), jnp.float32)
        mean = 0.1 * jax.random.normal(k4, (cout,), jnp.float32)
        var = jax.random.uniform(k5, (cout,), jnp.float32, minval=0.5, maxval=1.5)
        scale = gamma / jnp.sqrt(var + 1e-5)
        shift = beta - mean * scale
        return w, scale, shift

    k0, k1, k2, k3, k4 = jax.random.split(key, 5)
    convs = [conv_params(k0, 128, 128),
             conv_params(k1, 128, 256),
             conv_params(k2, 256, 512)]
    w_fc = jax.random.normal(k3, (512, NUM_CLASSES), jnp.float32) * 512 ** -0.5
    b_fc = 0.1 * jax.random.normal(k4, (NUM_CLASSES,), jnp.float32)
    return {"convs": convs, "w_fc": w_fc, "b_fc": b_fc}


if __name__ == "__main__":
    key = jax.random.PRNGKey(0)
    kp, kx = jax.random.split(key)
    params = init_params(kp)
    x = jax.random.normal(kx, (2, 128, 8, 8), jnp.float32)   # NCHW, as PyTorch expects

    packed = pack_params(params, n=2, h=8, w=8)
    fwd = jax.jit(eyebone_forward)

    out = jax.block_until_ready(fwd(x, packed))
    ref = jax.block_until_ready(eyebone_reference(x, params))

    assert out.shape == (2, NUM_CLASSES), out.shape
    assert jnp.allclose(out, ref, rtol=2e-2, atol=2e-2), (out, ref)
    print("KERNEL_OK")
</pallas_src>

<mosaic_0001>
module attributes {stable_mosaic.version = 11 : i64} {
  func.func @_eyebone_kernel(%arg0: memref<128x128xbf16, #tpu.memory_space<vmem>>, %arg1: memref<9x128x128xbf16, #tpu.memory_space<vmem>>, %arg2: memref<1152x128xbf16, #tpu.memory_space<vmem>>, %arg3: memref<1x128xf32, #tpu.memory_space<vmem>>, %arg4: memref<9x32x128xbf16, #tpu.memory_space<vmem>>, %arg5: memref<1152x256xbf16, #tpu.memory_space<vmem>>, %arg6: memref<1x256xf32, #tpu.memory_space<vmem>>, %arg7: memref<9x8x32xbf16, #tpu.memory_space<vmem>>, %arg8: memref<2304x512xbf16, #tpu.memory_space<vmem>>, %arg9: memref<1x512xf32, #tpu.memory_space<vmem>>, %arg10: memref<8x8xbf16, #tpu.memory_space<vmem>>, %arg11: memref<512x128xbf16, #tpu.memory_space<vmem>>, %arg12: memref<1x128xf32, #tpu.memory_space<vmem>>, %arg13: memref<8x128xf32, #tpu.memory_space<vmem>>, %arg14: memref<128x1152xbf16, #tpu.memory_space<vmem>>, %arg15: memref<32x1152xbf16, #tpu.memory_space<vmem>>, %arg16: memref<8x2304xbf16, #tpu.memory_space<vmem>>) attributes {dimension_semantics = [], scalar_prefetch = 0 : i64, scratch_operands = 3 : i64, tpu.core_type = #tpu.core_type<tc>} {
    %c0 = arith.constant 0 : index
    %c0_0 = arith.constant 0 : index
    %0 = vector.load %arg0[%c0, %c0_0] : memref<128x128xbf16, #tpu.memory_space<vmem>>, vector<128x128xbf16>
    %c0_1 = arith.constant 0 : index
    %c0_2 = arith.constant 0 : index
    %c0_3 = arith.constant 0 : index
    %1 = vector.load %arg1[%c0_1, %c0_2, %c0_3] : memref<9x128x128xbf16, #tpu.memory_space<vmem>>, vector<1x128x128xbf16>
    %2 = vector.shape_cast %1 : vector<1x128x128xbf16> to vector<128x128xbf16>
    %cst = arith.constant dense<0.000000e+00> : vector<128x128xf32>
    %3 = tpu.matmul %2, %0, %cst {dimension_numbers = #tpu.dot_dimension_numbers<[1], [0], [0], [1], [0, 0, 1, 1], [], []>} : vector<128x128xbf16>, vector<128x128xbf16>, vector<128x128xf32> -> vector<128x128xf32>
    %4 = arith.truncf %3 : vector<128x128xf32> to vector<128x128xbf16>
    %c0_4 = arith.constant 0 : index
    %c0_5 = arith.constant 0 : index
    %5 = vector.load %arg14[%c0_4, %c0_5] : memref<128x1152xbf16, #tpu.memory_space<vmem>>, vector<128x128xbf16>
    tpu.vector_store %arg14[%c0_4, %c0_5], %4 {strides = array<i32>} : memref<128x1152xbf16, #tpu.memory_space<vmem>>, vector<128x128xbf16>,
    %c1 = arith.constant 1 : index
    %c0_6 = arith.constant 0 : index
    %c0_7 = arith.constant 0 : index
    %6 = vector.load %arg1[%c1, %c0_6, %c0_7] : memref<9x128x128xbf16, #tpu.memory_space<vmem>>, vector<1x128x128xbf16>
    %7 = vector.shape_cast %6 : vector<1x128x128xbf16> to vector<128x128xbf16>
    %cst_8 = arith.constant dense<0.000000e+00> : vector<128x128xf32>
    %8 = tpu.matmul %7, %0, %cst_8 {dimension_numbers = #tpu.dot_dimension_numbers<[1], [0], [0], [1], [0, 0, 1, 1], [], []>} : vector<128x128xbf16>, vector<128x128xbf16>, vector<128x128xf32> -> vector<128x128xf32>
    %9 = arith.truncf %8 : vector<128x128xf32> to vector<128x128xbf16>
    %c0_9 = arith.constant 0 : index
    %c128 = arith.constant 128 : index
    %10 = vector.load %arg14[%c0_9, %c128] : memref<128x1152xbf16, #tpu.memory_space<vmem>>, vector<128x128xbf16>
    tpu.vector_store %arg14[%c0_9, %c128], %9 {strides = array<i32>} : memref<128x1152xbf16, #tpu.memory_space<vmem>>, vector<128x128xbf16>,
    %c2 = arith.constant 2 : index
    %c0_10 = arith.constant 0 : index
    %c0_11 = arith.constant 0 : index
    %11 = vector.load %arg1[%c2, %c0_10, %c0_11] : memref<9x128x128xbf16, #tpu.memory_space<vmem>>, vector<1x128x128xbf16>
    %12 = vector.shape_cast %11 : vector<1x128x128xbf16> to vector<128x128xbf16>
    %cst_12 = arith.constant dense<0.000000e+00> : vector<128x128xf32>
    %13 = tpu.matmul %12, %0, %cst_12 {dimension_numbers = #tpu.dot_dimension_numbers<[1], [0], [0], [1], [0, 0, 1, 1], [], []>} : vector<128x128xbf16>, vector<128x128xbf16>, vector<128x128xf32> -> vector<128x128xf32>
    %14 = arith.truncf %13 : vector<128x128xf32> to vector<128x128xbf16>
    %c0_13 = arith.constant 0 : index
    %c256 = arith.constant 256 : index
    %15 = vector.load %arg14[%c0_13, %c256] : memref<128x1152xbf16, #tpu.memory_space<vmem>>, vector<128x128xbf16>
    tpu.vector_store %arg14[%c0_13, %c256], %14 {strides = array<i32>} : memref<128x1152xbf16, #tpu.memory_space<vmem>>, vector<128x128xbf16>,
    %c3 = arith.constant 3 : index
    %c0_14 = arith.constant 0 : index
    %c0_15 = arith.constant 0 : index
    %16 = vector.load %arg1[%c3, %c0_14, %c0_15] : memref<9x128x128xbf16, #tpu.memory_space<vmem>>, vector<1x128x128xbf16>
    %17 = vector.shape_cast %16 : vector<1x128x128xbf16> to vector<128x128xbf16>
    %cst_16 = arith.constant dense<0.000000e+00> : vector<128x128xf32>
    %18 = tpu.matmul %17, %0, %cst_16 {dimension_numbers = #tpu.dot_dimension_numbers<[1], [0], [0], [1], [0, 0, 1, 1], [], []>} : vector<128x128xbf16>, vector<128x128xbf16>, vector<128x128xf32> -> vector<128x128xf32>
    %19 = arith.truncf %18 : vector<128x128xf32> to vector<128x128xbf16>
    %c0_17 = arith.constant 0 : index
    %c384 = arith.constant 384 : index
    %20 = vector.load %arg14[%c0_17, %c384] : memref<128x1152xbf16, #tpu.memory_space<vmem>>, vector<128x128xbf16>
    tpu.vector_store %arg14[%c0_17, %c384], %19 {strides = array<i32>} : memref<128x1152xbf16, #tpu.memory_space<vmem>>, vector<128x128xbf16>,
    %c4 = arith.constant 4 : index
    %c0_18 = arith.constant 0 : index
    %c0_19 = arith.constant 0 : index
    %21 = vector.load %arg1[%c4, %c0_18, %c0_19] : memref<9x128x128xbf16, #tpu.memory_space<vmem>>, vector<1x128x128xbf16>
    %22 = vector.shape_cast %21 : vector<1x128x128xbf16> to vector<128x128xbf16>
    %cst_20 = arith.constant dense<0.000000e+00> : vector<128x128xf32>
    %23 = tpu.matmul %22, %0, %cst_20 {dimension_numbers = #tpu.dot_dimension_numbers<[1], [0], [0], [1], [0, 0, 1, 1], [], []>} : vector<128x128xbf16>, vector<128x128xbf16>, vector<128x128xf32> -> vector<128x128xf32>
    %24 = arith.truncf %23 : vector<128x128xf32> to vector<128x128xbf16>
    %c0_21 = arith.constant 0 : index
    %c512 = arith.constant 512 : index
    %25 = vector.load %arg14[%c0_21, %c512] : memref<128x1152xbf16, #tpu.memory_space<vmem>>, vector<128x128xbf16>
    tpu.vector_store %arg14[%c0_21, %c512], %24 {strides = array<i32>} : memref<128x1152xbf16, #tpu.memory_space<vmem>>, vector<128x128xbf16>,
    %c5 = arith.constant 5 : index
    %c0_22 = arith.constant 0 : index
    %c0_23 = arith.constant 0 : index
    %26 = vector.load %arg1[%c5, %c0_22, %c0_23] : memref<9x128x128xbf16, #tpu.memory_space<vmem>>, vector<1x128x128xbf16>
    %27 = vector.shape_cast %26 : vector<1x128x128xbf16> to vector<128x128xbf16>
    %cst_24 = arith.constant dense<0.000000e+00> : vector<128x128xf32>
    %28 = tpu.matmul %27, %0, %cst_24 {dimension_numbers = #tpu.dot_dimension_numbers<[1], [0], [0], [1], [0, 0, 1, 1], [], []>} : vector<128x128xbf16>, vector<128x128xbf16>, vector<128x128xf32> -> vector<128x128xf32>
    %29 = arith.truncf %28 : vector<128x128xf32> to vector<128x128xbf16>
    %c0_25 = arith.constant 0 : index
    %c640 = arith.constant 640 : index
    %30 = vector.load %arg14[%c0_25, %c640] : memref<128x1152xbf16, #tpu.memory_space<vmem>>, vector<128x128xbf16>
    tpu.vector_store %arg14[%c0_25, %c640], %29 {strides = array<i32>} : memref<128x1152xbf16, #tpu.memory_space<vmem>>, vector<128x128xbf16>,
    %c6 = arith.constant 6 : index
    %c0_26 = arith.constant 0 : index
    %c0_27 = arith.constant 0 : index
    %31 = vector.load %arg1[%c6, %c0_26, %c0_27] : memref<9x128x128xbf16, #tpu.memory_space<vmem>>, vector<1x128x128xbf16>
    %32 = vector.shape_cast %31 : vector<1x128x128xbf16> to vector<128x128xbf16>
    %cst_28 = arith.constant dense<0.000000e+00> : vector<128x128xf32>
    %33 = tpu.matmul %32, %0, %cst_28 {dimension_numbers = #tpu.dot_dimension_numbers<[1], [0], [0], [1], [0, 0, 1, 1], [], []>} : vector<128x128xbf16>, vector<128x128xbf16>, vector<128x128xf32> -> vector<128x128xf32>
    %34 = arith.truncf %33 : vector<128x128xf32> to vector<128x128xbf16>
    %c0_29 = arith.constant 0 : index
    %c768 = arith.constant 768 : index
    %35 = vector.load %arg14[%c0_29, %c768] : memref<128x1152xbf16, #tpu.memory_space<vmem>>, vector<128x128xbf16>
    tpu.vector_store %arg14[%c0_29, %c768], %34 {strides = array<i32>} : memref<128x1152xbf16, #tpu.memory_space<vmem>>, vector<128x128xbf16>,
    %c7 = arith.constant 7 : index
    %c0_30 = arith.constant 0 : index
    %c0_31 = arith.constant 0 : index
    %36 = vector.load %arg1[%c7, %c0_30, %c0_31] : memref<9x128x128xbf16, #tpu.memory_space<vmem>>, vector<1x128x128xbf16>
    %37 = vector.shape_cast %36 : vector<1x128x128xbf16> to vector<128x128xbf16>
    %cst_32 = arith.constant dense<0.000000e+00> : vector<128x128xf32>
    %38 = tpu.matmul %37, %0, %cst_32 {dimension_numbers = #tpu.dot_dimension_numbers<[1], [0], [0], [1], [0, 0, 1, 1], [], []>} : vector<128x128xbf16>, vector<128x128xbf16>, vector<128x128xf32> -> vector<128x128xf32>
    %39 = arith.truncf %38 : vector<128x128xf32> to vector<128x128xbf16>
    %c0_33 = arith.constant 0 : index
    %c896 = arith.constant 896 : index
    %40 = vector.load %arg14[%c0_33, %c896] : memref<128x1152xbf16, #tpu.memory_space<vmem>>, vector<128x128xbf16>
    tpu.vector_store %arg14[%c0_33, %c896], %39 {strides = array<i32>} : memref<128x1152xbf16, #tpu.memory_space<vmem>>, vector<128x128xbf16>,
    %c8 = arith.constant 8 : index
    %c0_34 = arith.constant 0 : index
    %c0_35 = arith.constant 0 : index
    %41 = vector.load %arg1[%c8, %c0_34, %c0_35] : memref<9x128x128xbf16, #tpu.memory_space<vmem>>, vector<1x128x128xbf16>
    %42 = vector.shape_cast %41 : vector<1x128x128xbf16> to vector<128x128xbf16>
    %cst_36 = arith.constant dense<0.000000e+00> : vector<128x128xf32>
    %43 = tpu.matmul %42, %0, %cst_36 {dimension_numbers = #tpu.dot_dimension_numbers<[1], [0], [0], [1], [0, 0, 1, 1], [], []>} : vector<128x128xbf16>, vector<128x128xbf16>, vector<128x128xf32> -> vector<128x128xf32>
    %44 = arith.truncf %43 : vector<128x128xf32> to vector<128x128xbf16>
    %c0_37 = arith.constant 0 : index
    %c1024 = arith.constant 1024 : index
    %45 = vector.load %arg14[%c0_37, %c1024] : memref<128x1152xbf16, #tpu.memory_space<vmem>>, vector<128x128xbf16>
    tpu.vector_store %arg14[%c0_37, %c1024], %44 {strides = array<i32>} : memref<128x1152xbf16, #tpu.memory_space<vmem>>, vector<128x128xbf16>,
    %c0_38 = arith.constant 0 : index
    %c0_39 = arith.constant 0 : index
    %46 = vector.load %arg14[%c0_38, %c0_39] : memref<128x1152xbf16, #tpu.memory_space<vmem>>, vector<128x1152xbf16>
    %c0_40 = arith.constant 0 : index
    %c0_41 = arith.constant 0 : index
    %47 = vector.load %arg2[%c0_40, %c0_41] : memref<1152x128xbf16, #tpu.memory_space<vmem>>, vector<1152x128xbf16>
    %cst_42 = arith.constant dense<0.000000e+00> : vector<128x128xf32>
    %48 = tpu.matmul %46, %47, %cst_42 {dimension_numbers = #tpu.dot_dimension_numbers<[1], [0], [0], [1], [0, 0, 1, 1], [], []>} : vector<128x1152xbf16>, vector<1152x128xbf16>, vector<128x128xf32> -> vector<128x128xf32>
    %c0_43 = arith.constant 0 : index
    %c0_44 = arith.constant 0 : index
    %49 = vector.load %arg3[%c0_43, %c0_44] : memref<1x128xf32, #tpu.memory_space<vmem>>, vector<1x128xf32>
    %50 = vector.broadcast %49 : vector<1x128xf32> to vector<128x128xf32>
    %51 = arith.addf %48, %50 : vector<128x128xf32>
    %cst_45 = arith.constant 0.000000e+00 : f32
    %52 = vector.broadcast %cst_45 : f32 to vector<128x128xf32>
    %53 = arith.maximumf %51, %52 : vector<128x128xf32>
    %54 = arith.truncf %53 : vector<128x128xf32> to vector<128x128xbf16>
    %c0_46 = arith.constant 0 : index
    %c0_47 = arith.constant 0 : index
    %c0_48 = arith.constant 0 : index
    %55 = vector.load %arg4[%c0_46, %c0_47, %c0_48] : memref<9x32x128xbf16, #tpu.memory_space<vmem>>, vector<1x32x128xbf16>
    %56 = vector.shape_cast %55 : vector<1x32x128xbf16> to vector<32x128xbf16>
    %cst_49 = arith.constant dense<0.000000e+00> : vector<32x128xf32>
    %57 = tpu.matmul %56, %54, %cst_49 {dimension_numbers = #tpu.dot_dimension_numbers<[1], [0], [0], [1], [0, 0, 1, 1], [], []>} : vector<32x128xbf16>, vector<128x128xbf16>, vector<32x128xf32> -> vector<32x128xf32>
    %58 = arith.truncf %57 : vector<32x128xf32> to vector<32x128xbf16>
    %c0_50 = arith.constant 0 : index
    %c0_51 = arith.constant 0 : index
    %59 = vector.load %arg15[%c0_50, %c0_51] : memref<32x1152xbf16, #tpu.memory_space<vmem>>, vector<32x128xbf16>
    tpu.vector_store %arg15[%c0_50, %c0_51], %58 {strides = array<i32>} : memref<32x1152xbf16, #tpu.memory_space<vmem>>, vector<32x128xbf16>,
    %c1_52 = arith.constant 1 : index
    %c0_53 = arith.constant 0 : index
    %c0_54 = arith.constant 0 : index
    %60 = vector.load %arg4[%c1_52, %c0_53, %c0_54] : memref<9x32x128xbf16, #tpu.memory_space<vmem>>, vector<1x32x128xbf16>
    %61 = vector.shape_cast %60 : vector<1x32x128xbf16> to vector<32x128xbf16>
    %cst_55 = arith.constant dense<0.000000e+00> : vector<32x128xf32>
    %62 = tpu.matmul %61, %54, %cst_55 {dimension_numbers = #tpu.dot_dimension_numbers<[1], [0], [0], [1], [0, 0, 1, 1], [], []>} : vector<32x128xbf16>, vector<128x128xbf16>, vector<32x128xf32> -> vector<32x128xf32>
    %63 = arith.truncf %62 : vector<32x128xf32> to vector<32x128xbf16>
    %c0_56 = arith.constant 0 : index
    %c128_57 = arith.constant 128 : index
    %64 = vector.load %arg15[%c0_56, %c128_57] : memref<32x1152xbf16, #tpu.memory_space<vmem>>, vector<32x128xbf16>
    tpu.vector_store %arg15[%c0_56, %c128_57], %63 {strides = array<i32>} : memref<32x1152xbf16, #tpu.memory_space<vmem>>, vector<32x128xbf16>,
    %c2_58 = arith.constant 2 : index
    %c0_59 = arith.constant 0 : index
    %c0_60 = arith.constant 0 : index
    %65 = vector.load %arg4[%c2_58, %c0_59, %c0_60] : memref<9x32x128xbf16, #tpu.memory_space<vmem>>, vector<1x32x128xbf16>
    %66 = vector.shape_cast %65 : vector<1x32x128xbf16> to vector<32x128xbf16>
    %cst_61 = arith.constant dense<0.000000e+00> : vector<32x128xf32>
    %67 = tpu.matmul %66, %54, %cst_61 {dimension_numbers = #tpu.dot_dimension_numbers<[1], [0], [0], [1], [0, 0, 1, 1], [], []>} : vector<32x128xbf16>, vector<128x128xbf16>, vector<32x128xf32> -> vector<32x128xf32>
    %68 = arith.truncf %67 : vector<32x128xf32> to vector<32x128xbf16>
    %c0_62 = arith.constant 0 : index
    %c256_63 = arith.constant 256 : index
    %69 = vector.load %arg15[%c0_62, %c256_63] : memref<32x1152xbf16, #tpu.memory_space<vmem>>, vector<32x128xbf16>
    tpu.vector_store %arg15[%c0_62, %c256_63], %68 {strides = array<i32>} : memref<32x1152xbf16, #tpu.memory_space<vmem>>, vector<32x128xbf16>,
    %c3_64 = arith.constant 3 : index
    %c0_65 = arith.constant 0 : index
    %c0_66 = arith.constant 0 : index
    %70 = vector.load %arg4[%c3_64, %c0_65, %c0_66] : memref<9x32x128xbf16, #tpu.memory_space<vmem>>, vector<1x32x128xbf16>
    %71 = vector.shape_cast %70 : vector<1x32x128xbf16> to vector<32x128xbf16>
    %cst_67 = arith.constant dense<0.000000e+00> : vector<32x128xf32>
    %72 = tpu.matmul %71, %54, %cst_67 {dimension_numbers = #tpu.dot_dimension_numbers<[1], [0], [0], [1], [0, 0, 1, 1], [], []>} : vector<32x128xbf16>, vector<128x128xbf16>, vector<32x128xf32> -> vector<32x128xf32>
    %73 = arith.truncf %72 : vector<32x128xf32> to vector<32x128xbf16>
    %c0_68 = arith.constant 0 : index
    %c384_69 = arith.constant 384 : index
    %74 = vector.load %arg15[%c0_68, %c384_69] : memref<32x1152xbf16, #tpu.memory_space<vmem>>, vector<32x128xbf16>
    tpu.vector_store %arg15[%c0_68, %c384_69], %73 {strides = array<i32>} : memref<32x1152xbf16, #tpu.memory_space<vmem>>, vector<32x128xbf16>,
    %c4_70 = arith.constant 4 : index
    %c0_71 = arith.constant 0 : index
    %c0_72 = arith.constant 0 : index
    %75 = vector.load %arg4[%c4_70, %c0_71, %c0_72] : memref<9x32x128xbf16, #tpu.memory_space<vmem>>, vector<1x32x128xbf16>
    %76 = vector.shape_cast %75 : vector<1x32x128xbf16> to vector<32x128xbf16>
    %cst_73 = arith.constant dense<0.000000e+00> : vector<32x128xf32>
    %77 = tpu.matmul %76, %54, %cst_73 {dimension_numbers = #tpu.dot_dimension_numbers<[1], [0], [0], [1], [0, 0, 1, 1], [], []>} : vector<32x128xbf16>, vector<128x128xbf16>, vector<32x128xf32> -> vector<32x128xf32>
    %78 = arith.truncf %77 : vector<32x128xf32> to vector<32x128xbf16>
    %c0_74 = arith.constant 0 : index
    %c512_75 = arith.constant 512 : index
    %79 = vector.load %arg15[%c0_74, %c512_75] : memref<32x1152xbf16, #tpu.memory_space<vmem>>, vector<32x128xbf16>
    tpu.vector_store %arg15[%c0_74, %c512_75], %78 {strides = array<i32>} : memref<32x1152xbf16, #tpu.memory_space<vmem>>, vector<32x128xbf16>,
    %c5_76 = arith.constant 5 : index
    %c0_77 = arith.constant 0 : index
    %c0_78 = arith.constant 0 : index
    %80 = vector.load %arg4[%c5_76, %c0_77, %c0_78] : memref<9x32x128xbf16, #tpu.memory_space<vmem>>, vector<1x32x128xbf16>
    %81 = vector.shape_cast %80 : vector<1x32x128xbf16> to vector<32x128xbf16>
    %cst_79 = arith.constant dense<0.000000e+00> : vector<32x128xf32>
    %82 = tpu.matmul %81, %54, %cst_79 {dimension_numbers = #tpu.dot_dimension_numbers<[1], [0], [0], [1], [0, 0, 1, 1], [], []>} : vector<32x128xbf16>, vector<128x128xbf16>, vector<32x128xf32> -> vector<32x128xf32>
    %83 = arith.truncf %82 : vector<32x128xf32> to vector<32x128xbf16>
    %c0_80 = arith.constant 0 : index
    %c640_81 = arith.constant 640 : index
    %84 = vector.load %arg15[%c0_80, %c640_81] : memref<32x1152xbf16, #tpu.memory_space<vmem>>, vector<32x128xbf16>
    tpu.vector_store %arg15[%c0_80, %c640_81], %83 {strides = array<i32>} : memref<32x1152xbf16, #tpu.memory_space<vmem>>, vector<32x128xbf16>,
    %c6_82 = arith.constant 6 : index
    %c0_83 = arith.constant 0 : index
    %c0_84 = arith.constant 0 : index
    %85 = vector.load %arg4[%c6_82, %c0_83, %c0_84] : memref<9x32x128xbf16, #tpu.memory_space<vmem>>, vector<1x32x128xbf16>
    %86 = vector.shape_cast %85 : vector<1x32x128xbf16> to vector<32x128xbf16>
    %cst_85 = arith.constant dense<0.000000e+00> : vector<32x128xf32>
    %87 = tpu.matmul %86, %54, %cst_85 {dimension_numbers = #tpu.dot_dimension_numbers<[1], [0], [0], [1], [0, 0, 1, 1], [], []>} : vector<32x128xbf16>, vector<128x128xbf16>, vector<32x128xf32> -> vector<32x128xf32>
    %88 = arith.truncf %87 : vector<32x128xf32> to vector<32x128xbf16>
    %c0_86 = arith.constant 0 : index
    %c768_87 = arith.constant 768 : index
    %89 = vector.load %arg15[%c0_86, %c768_87] : memref<32x1152xbf16, #tpu.memory_space<vmem>>, vector<32x128xbf16>
    tpu.vector_store %arg15[%c0_86, %c768_87], %88 {strides = array<i32>} : memref<32x1152xbf16, #tpu.memory_space<vmem>>, vector<32x128xbf16>,
    %c7_88 = arith.constant 7 : index
    %c0_89 = arith.constant 0 : index
    %c0_90 = arith.constant 0 : index
    %90 = vector.load %arg4[%c7_88, %c0_89, %c0_90] : memref<9x32x128xbf16, #tpu.memory_space<vmem>>, vector<1x32x128xbf16>
    %91 = vector.shape_cast %90 : vector<1x32x128xbf16> to vector<32x128xbf16>
    %cst_91 = arith.constant dense<0.000000e+00> : vector<32x128xf32>
    %92 = tpu.matmul %91, %54, %cst_91 {dimension_numbers = #tpu.dot_dimension_numbers<[1], [0], [0], [1], [0, 0, 1, 1], [], []>} : vector<32x128xbf16>, vector<128x128xbf16>, vector<32x128xf32> -> vector<32x128xf32>
    %93 = arith.truncf %92 : vector<32x128xf32> to vector<32x128xbf16>
    %c0_92 = arith.constant 0 : index
    %c896_93 = arith.constant 896 : index
    %94 = vector.load %arg15[%c0_92, %c896_93] : memref<32x1152xbf16, #tpu.memory_space<vmem>>, vector<32x128xbf16>
    tpu.vector_store %arg15[%c0_92, %c896_93], %93 {strides = array<i32>} : memref<32x1152xbf16, #tpu.memory_space<vmem>>, vector<32x128xbf16>,
    %c8_94 = arith.constant 8 : index
    %c0_95 = arith.constant 0 : index
    %c0_96 = arith.constant 0 : index
    %95 = vector.load %arg4[%c8_94, %c0_95, %c0_96] : memref<9x32x128xbf16, #tpu.memory_space<vmem>>, vector<1x32x128xbf16>
    %96 = vector.shape_cast %95 : vector<1x32x128xbf16> to vector<32x128xbf16>
    %cst_97 = arith.constant dense<0.000000e+00> : vector<32x128xf32>
    %97 = tpu.matmul %96, %54, %cst_97 {dimension_numbers = #tpu.dot_dimension_numbers<[1], [0], [0], [1], [0, 0, 1, 1], [], []>} : vector<32x128xbf16>, vector<128x128xbf16>, vector<32x128xf32> -> vector<32x128xf32>
    %98 = arith.truncf %97 : vector<32x128xf32> to vector<32x128xbf16>
    %c0_98 = arith.constant 0 : index
    %c1024_99 = arith.constant 1024 : index
    %99 = vector.load %arg15[%c0_98, %c1024_99] : memref<32x1152xbf16, #tpu.memory_space<vmem>>, vector<32x128xbf16>
    tpu.vector_store %arg15[%c0_98, %c1024_99], %98 {strides = array<i32>} : memref<32x1152xbf16, #tpu.memory_space<vmem>>, vector<32x128xbf16>,
    %c0_100 = arith.constant 0 : index
    %c0_101 = arith.constant 0 : index
    %100 = vector.load %arg15[%c0_100, %c0_101] : memref<32x1152xbf16, #tpu.memory_space<vmem>>, vector<32x1152xbf16>
    %c0_102 = arith.constant 0 : index
    %c0_103 = arith.constant 0 : index
    %101 = vector.load %arg5[%c0_102, %c0_103] : memref<1152x256xbf16, #tpu.memory_space<vmem>>, vector<1152x256xbf16>
    %cst_104 = arith.constant dense<0.000000e+00> : vector<32x256xf32>
    %102 = tpu.matmul %100, %101, %cst_104 {dimension_numbers = #tpu.dot_dimension_numbers<[1], [0], [0], [1], [0, 0, 1, 1], [], []>} : vector<32x1152xbf16>, vector<1152x256xbf16>, vector<32x256xf32> -> vector<32x256xf32>
    %c0_105 = arith.constant 0 : index
    %c0_106 = arith.constant 0 : index
    %103 = vector.load %arg6[%c0_105, %c0_106] : memref<1x256xf32, #tpu.memory_space<vmem>>, vector<1x256xf32>
    %104 = vector.broadcast %103 : vector<1x256xf32> to vector<32x256xf32>
    %105 = arith.addf %102, %104 : vector<32x256xf32>
    %cst_107 = arith.constant 0.000000e+00 : f32
    %106 = vector.broadcast %cst_107 : f32 to vector<32x256xf32>
    %107 = arith.maximumf %105, %106 : vector<32x256xf32>
    %108 = arith.truncf %107 : vector<32x256xf32> to vector<32x256xbf16>
    %c0_108 = arith.constant 0 : index
    %c0_109 = arith.constant 0 : index
    %c0_110 = arith.constant 0 : index
    %109 = vector.load %arg7[%c0_108, %c0_109, %c0_110] : memref<9x8x32xbf16, #tpu.memory_space<vmem>>, vector<1x8x32xbf16>
    %110 = vector.shape_cast %109 : vector<1x8x32xbf16> to vector<8x32xbf16>
    %cst_111 = arith.constant dense<0.000000e+00> : vector<8x256xf32>
    %111 = tpu.matmul %110, %108, %cst_111 {dimension_numbers = #tpu.dot_dimension_numbers<[1], [0], [0], [1], [0, 0, 1, 1], [], []>} : vector<8x32xbf16>, vector<32x256xbf16>, vector<8x256xf32> -> vector<8x256xf32>
    %112 = arith.truncf %111 : vector<8x256xf32> to vector<8x256xbf16>
    %c0_112 = arith.constant 0 : index
    %c0_113 = arith.constant 0 : index
    %113 = vector.load %arg16[%c0_112, %c0_113] : memref<8x2304xbf16, #tpu.memory_space<vmem>>, vector<8x256xbf16>
    tpu.vector_store %arg16[%c0_112, %c0_113], %112 {strides = array<i32>} : memref<8x2304xbf16, #tpu.memory_space<vmem>>, vector<8x256xbf16>,
    %c1_114 = arith.constant 1 : index
    %c0_115 = arith.constant 0 : index
    %c0_116 = arith.constant 0 : index
    %114 = vector.load %arg7[%c1_114, %c0_115, %c0_116] : memref<9x8x32xbf16, #tpu.memory_space<vmem>>, vector<1x8x32xbf16>
    %115 = vector.shape_cast %114 : vector<1x8x32xbf16> to vector<8x32xbf16>
    %cst_117 = arith.constant dense<0.000000e+00> : vector<8x256xf32>
    %116 = tpu.matmul %115, %108, %cst_117 {dimension_numbers = #tpu.dot_dimension_numbers<[1], [0], [0], [1], [0, 0, 1, 1], [], []>} : vector<8x32xbf16>, vector<32x256xbf16>, vector<8x256xf32> -> vector<8x256xf32>
    %117 = arith.truncf %116 : vector<8x256xf32> to vector<8x256xbf16>
    %c0_118 = arith.constant 0 : index
    %c256_119 = arith.constant 256 : index
    %118 = vector.load %arg16[%c0_118, %c256_119] : memref<8x2304xbf16, #tpu.memory_space<vmem>>, vector<8x256xbf16>
    tpu.vector_store %arg16[%c0_118, %c256_119], %117 {strides = array<i32>} : memref<8x2304xbf16, #tpu.memory_space<vmem>>, vector<8x256xbf16>,
    %c2_120 = arith.constant 2 : index
    %c0_121 = arith.constant 0 : index
    %c0_122 = arith.constant 0 : index
    %119 = vector.load %arg7[%c2_120, %c0_121, %c0_122] : memref<9x8x32xbf16, #tpu.memory_space<vmem>>, vector<1x8x32xbf16>
    %120 = vector.shape_cast %119 : vector<1x8x32xbf16> to vector<8x32xbf16>
    %cst_123 = arith.constant dense<0.000000e+00> : vector<8x256xf32>
    %121 = tpu.matmul %120, %108, %cst_123 {dimension_numbers = #tpu.dot_dimension_numbers<[1], [0], [0], [1], [0, 0, 1, 1], [], []>} : vector<8x32xbf16>, vector<32x256xbf16>, vector<8x256xf32> -> vector<8x256xf32>
    %122 = arith.truncf %121 : vector<8x256xf32> to vector<8x256xbf16>
    %c0_124 = arith.constant 0 : index
    %c512_125 = arith.constant 512 : index
    %123 = vector.load %arg16[%c0_124, %c512_125] : memref<8x2304xbf16, #tpu.memory_space<vmem>>, vector<8x256xbf16>
    tpu.vector_store %arg16[%c0_124, %c512_125], %122 {strides = array<i32>} : memref<8x2304xbf16, #tpu.memory_space<vmem>>, vector<8x256xbf16>,
    %c3_126 = arith.constant 3 : index
    %c0_127 = arith.constant 0 : index
    %c0_128 = arith.constant 0 : index
    %124 = vector.load %arg7[%c3_126, %c0_127, %c0_128] : memref<9x8x32xbf16, #tpu.memory_space<vmem>>, vector<1x8x32xbf16>
    %125 = vector.shape_cast %124 : vector<1x8x32xbf16> to vector<8x32xbf16>
    %cst_129 = arith.constant dense<0.000000e+00> : vector<8x256xf32>
    %126 = tpu.matmul %125, %108, %cst_129 {dimension_numbers = #tpu.dot_dimension_numbers<[1], [0], [0], [1], [0, 0, 1, 1], [], []>} : vector<8x32xbf16>, vector<32x256xbf16>, vector<8x256xf32> -> vector<8x256xf32>
    %127 = arith.truncf %126 : vector<8x256xf32> to vector<8x256xbf16>
    %c0_130 = arith.constant 0 : index
    %c768_131 = arith.constant 768 : index
    %128 = vector.load %arg16[%c0_130, %c768_131] : memref<8x2304xbf16, #tpu.memory_space<vmem>>, vector<8x256xbf16>
    tpu.vector_store %arg16[%c0_130, %c768_131], %127 {strides = array<i32>} : memref<8x2304xbf16, #tpu.memory_space<vmem>>, vector<8x256xbf16>,
    %c4_132 = arith.constant 4 : index
    %c0_133 = arith.constant 0 : index
    %c0_134 = arith.constant 0 : index
    %129 = vector.load %arg7[%c4_132, %c0_133, %c0_134] : memref<9x8x32xbf16, #tpu.memory_space<vmem>>, vector<1x8x32xbf16>
    %130 = vector.shape_cast %129 : vector<1x8x32xbf16> to vector<8x32xbf16>
    %cst_135 = arith.constant dense<0.000000e+00> : vector<8x256xf32>
    %131 = tpu.matmul %130, %108, %cst_135 {dimension_numbers = #tpu.dot_dimension_numbers<[1], [0], [0], [1], [0, 0, 1, 1], [], []>} : vector<8x32xbf16>, vector<32x256xbf16>, vector<8x256xf32> -> vector<8x256xf32>
    %132 = arith.truncf %131 : vector<8x256xf32> to vector<8x256xbf16>
    %c0_136 = arith.constant 0 : index
    %c1024_137 = arith.constant 1024 : index
    %133 = vector.load %arg16[%c0_136, %c1024_137] : memref<8x2304xbf16, #tpu.memory_space<vmem>>, vector<8x256xbf16>
    tpu.vector_store %arg16[%c0_136, %c1024_137], %132 {strides = array<i32>} : memref<8x2304xbf16, #tpu.memory_space<vmem>>, vector<8x256xbf16>,
    %c5_138 = arith.constant 5 : index
    %c0_139 = arith.constant 0 : index
    %c0_140 = arith.constant 0 : index
    %134 = vector.load %arg7[%c5_138, %c0_139, %c0_140] : memref<9x8x32xbf16, #tpu.memory_space<vmem>>, vector<1x8x32xbf16>
    %135 = vector.shape_cast %134 : vector<1x8x32xbf16> to vector<8x32xbf16>
    %cst_141 = arith.constant dense<0.000000e+00> : vector<8x256xf32>
    %136 = tpu.matmul %135, %108, %cst_141 {dimension_numbers = #tpu.dot_dimension_numbers<[1], [0], [0], [1], [0, 0, 1, 1], [], []>} : vector<8x32xbf16>, vector<32x256xbf16>, vector<8x256xf32> -> vector<8x256xf32>
    %137 = arith.truncf %136 : vector<8x256xf32> to vector<8x256xbf16>
    %c0_142 = arith.constant 0 : index
    %c1280 = arith.constant 1280 : index
    %138 = vector.load %arg16[%c0_142, %c1280] : memref<8x2304xbf16, #tpu.memory_space<vmem>>, vector<8x256xbf16>
    tpu.vector_store %arg16[%c0_142, %c1280], %137 {strides = array<i32>} : memref<8x2304xbf16, #tpu.memory_space<vmem>>, vector<8x256xbf16>,
    %c6_143 = arith.constant 6 : index
    %c0_144 = arith.constant 0 : index
    %c0_145 = arith.constant 0 : index
    %139 = vector.load %arg7[%c6_143, %c0_144, %c0_145] : memref<9x8x32xbf16, #tpu.memory_space<vmem>>, vector<1x8x32xbf16>
    %140 = vector.shape_cast %139 : vector<1x8x32xbf16> to vector<8x32xbf16>
    %cst_146 = arith.constant dense<0.000000e+00> : vector<8x256xf32>
    %141 = tpu.matmul %140, %108, %cst_146 {dimension_numbers = #tpu.dot_dimension_numbers<[1], [0], [0], [1], [0, 0, 1, 1], [], []>} : vector<8x32xbf16>, vector<32x256xbf16>, vector<8x256xf32> -> vector<8x256xf32>
    %142 = arith.truncf %141 : vector<8x256xf32> to vector<8x256xbf16>
    %c0_147 = arith.constant 0 : index
    %c1536 = arith.constant 1536 : index
    %143 = vector.load %arg16[%c0_147, %c1536] : memref<8x2304xbf16, #tpu.memory_space<vmem>>, vector<8x256xbf16>
    tpu.vector_store %arg16[%c0_147, %c1536], %142 {strides = array<i32>} : memref<8x2304xbf16, #tpu.memory_space<vmem>>, vector<8x256xbf16>,
    %c7_148 = arith.constant 7 : index
    %c0_149 = arith.constant 0 : index
    %c0_150 = arith.constant 0 : index
    %144 = vector.load %arg7[%c7_148, %c0_149, %c0_150] : memref<9x8x32xbf16, #tpu.memory_space<vmem>>, vector<1x8x32xbf16>
    %145 = vector.shape_cast %144 : vector<1x8x32xbf16> to vector<8x32xbf16>
    %cst_151 = arith.constant dense<0.000000e+00> : vector<8x256xf32>
    %146 = tpu.matmul %145, %108, %cst_151 {dimension_numbers = #tpu.dot_dimension_numbers<[1], [0], [0], [1], [0, 0, 1, 1], [], []>} : vector<8x32xbf16>, vector<32x256xbf16>, vector<8x256xf32> -> vector<8x256xf32>
    %147 = arith.truncf %146 : vector<8x256xf32> to vector<8x256xbf16>
    %c0_152 = arith.constant 0 : index
    %c1792 = arith.constant 1792 : index
    %148 = vector.load %arg16[%c0_152, %c1792] : memref<8x2304xbf16, #tpu.memory_space<vmem>>, vector<8x256xbf16>
    tpu.vector_store %arg16[%c0_152, %c1792], %147 {strides = array<i32>} : memref<8x2304xbf16, #tpu.memory_space<vmem>>, vector<8x256xbf16>,
    %c8_153 = arith.constant 8 : index
    %c0_154 = arith.constant 0 : index
    %c0_155 = arith.constant 0 : index
    %149 = vector.load %arg7[%c8_153, %c0_154, %c0_155] : memref<9x8x32xbf16, #tpu.memory_space<vmem>>, vector<1x8x32xbf16>
    %150 = vector.shape_cast %149 : vector<1x8x32xbf16> to vector<8x32xbf16>
    %cst_156 = arith.constant dense<0.000000e+00> : vector<8x256xf32>
    %151 = tpu.matmul %150, %108, %cst_156 {dimension_numbers = #tpu.dot_dimension_numbers<[1], [0], [0], [1], [0, 0, 1, 1], [], []>} : vector<8x32xbf16>, vector<32x256xbf16>, vector<8x256xf32> -> vector<8x256xf32>
    %152 = arith.truncf %151 : vector<8x256xf32> to vector<8x256xbf16>
    %c0_157 = arith.constant 0 : index
    %c2048 = arith.constant 2048 : index
    %153 = vector.load %arg16[%c0_157, %c2048] : memref<8x2304xbf16, #tpu.memory_space<vmem>>, vector<8x256xbf16>
    tpu.vector_store %arg16[%c0_157, %c2048], %152 {strides = array<i32>} : memref<8x2304xbf16, #tpu.memory_space<vmem>>, vector<8x256xbf16>,
    %c0_158 = arith.constant 0 : index
    %c0_159 = arith.constant 0 : index
    %154 = vector.load %arg16[%c0_158, %c0_159] : memref<8x2304xbf16, #tpu.memory_space<vmem>>, vector<8x2304xbf16>
    %c0_160 = arith.constant 0 : index
    %c0_161 = arith.constant 0 : index
    %155 = vector.load %arg8[%c0_160, %c0_161] : memref<2304x512xbf16, #tpu.memory_space<vmem>>, vector<2304x512xbf16>
    %cst_162 = arith.constant dense<0.000000e+00> : vector<8x512xf32>
    %156 = tpu.matmul %154, %155, %cst_162 {dimension_numbers = #tpu.dot_dimension_numbers<[1], [0], [0], [1], [0, 0, 1, 1], [], []>} : vector<8x2304xbf16>, vector<2304x512xbf16>, vector<8x512xf32> -> vector<8x512xf32>
    %c0_163 = arith.constant 0 : index
    %c0_164 = arith.constant 0 : index
    %157 = vector.load %arg9[%c0_163, %c0_164] : memref<1x512xf32, #tpu.memory_space<vmem>>, vector<1x512xf32>
    %158 = vector.broadcast %157 : vector<1x512xf32> to vector<8x512xf32>
    %159 = arith.addf %156, %158 : vector<8x512xf32>
    %cst_165 = arith.constant 0.000000e+00 : f32
    %160 = vector.broadcast %cst_165 : f32 to vector<8x512xf32>
    %161 = arith.maximumf %159, %160 : vector<8x512xf32>
    %162 = arith.truncf %161 : vector<8x512xf32> to vector<8x512xbf16>
    %c0_166 = arith.constant 0 : index
    %c0_167 = arith.constant 0 : index
    %163 = vector.load %arg10[%c0_166, %c0_167] : memref<8x8xbf16, #tpu.memory_space<vmem>>, vector<8x8xbf16>
    %cst_168 = arith.constant dense<0.000000e+00> : vector<8x512xf32>
    %164 = tpu.matmul %163, %162, %cst_168 {dimension_numbers = #tpu.dot_dimension_numbers<[1], [0], [0], [1], [0, 0, 1, 1], [], []>} : vector<8x8xbf16>, vector<8x512xbf16>, vector<8x512xf32> -> vector<8x512xf32>
    %165 = arith.truncf %164 : vector<8x512xf32> to vector<8x512xbf16>
    %c0_169 = arith.constant 0 : index
    %c0_170 = arith.constant 0 : index
    %166 = vector.load %arg11[%c0_169, %c0_170] : memref<512x128xbf16, #tpu.memory_space<vmem>>, vector<512x128xbf16>
    %cst_171 = arith.constant dense<0.000000e+00> : vector<8x128xf32>
    %167 = tpu.matmul %165, %166, %cst_171 {dimension_numbers = #tpu.dot_dimension_numbers<[1], [0], [0], [1], [0, 0, 1, 1], [], []>} : vector<8x512xbf16>, vector<512x128xbf16>, vector<8x128xf32> -> vector<8x128xf32>
    %c0_172 = arith.constant 0 : index
    %c0_173 = arith.constant 0 : index
    %168 = vector.load %arg12[%c0_172, %c0_173] : memref<1x128xf32, #tpu.memory_space<vmem>>, vector<1x128xf32>
    %169 = vector.broadcast %168 : vector<1x128xf32> to vector<8x128xf32>
    %170 = arith.addf %167, %169 : vector<8x128xf32>
    %c0_174 = arith.constant 0 : index
    %c0_175 = arith.constant 0 : index
    %171 = vector.load %arg13[%c0_174, %c0_175] : memref<8x128xf32, #tpu.memory_space<vmem>>, vector<8x128xf32>
    tpu.vector_store %arg13[%c0_174, %c0_175], %170 {strides = array<i32>} : memref<8x128xf32, #tpu.memory_space<vmem>>, vector<8x128xf32>,
    return
  }
}

</mosaic_0001>

<bundles_post_ra>
// kernel: eyebone_forward.1
= control target key start
LH: loop header
LB: loop body
LE: loop exit
PB: predicated region body
PF: predicated region fallthrough
CT: control target
= control target key end

     0   :  { %18 = vsyncpa [#allocation6], 0  ;;  %s16309_s0 = inlined_call_operand.vmem [shape: bf16[128,128], index: 0, kind: input, shape index: {}]   ;;  %s16310_s1 = inlined_call_operand.hbm [shape: bf16[9,128,128], index: 1, kind: input, shape index: {}]   ;;  %s16311_s2 = inlined_call_operand.hbm [shape: bf16[1152,128], index: 2, kind: input, shape index: {}]   ;;  %s16312_s3 = inlined_call_operand.hbm [shape: f32[1,128], index: 3, kind: input, shape index: {}]   ;;  %s16313_s4 = inlined_call_operand.hbm [shape: bf16[9,32,128], index: 4, kind: input, shape index: {}]   ;;  %s16314_s5 = inlined_call_operand.hbm [shape: bf16[1152,256], index: 5, kind: input, shape index: {}]   ;;  %s16315_s6 = inlined_call_operand.hbm [shape: f32[1,256], index: 6, kind: input, shape index: {}]   ;;  %s16316_s7 = inlined_call_operand.hbm [shape: bf16[9,8,32], index: 7, kind: input, shape index: {}]   ;;  %s16317_s8 = inlined_call_operand.hbm [shape: bf16[2304,512], index: 8, kind: input, shape index: {}]   ;;  %s16318_s9 = inlined_call_operand.hbm [shape: f32[1,512], index: 9, kind: input, shape index: {}]   ;;  %s16319_s10 = inlined_call_operand.hbm [shape: bf16[8,8], index: 10, kind: input, shape index: {}]   ;;  %s16320_s11 = inlined_call_operand.hbm [shape: bf16[512,128], index: 11, kind: input, shape index: {}]   ;;  %s16321_s12 = inlined_call_operand.hbm [shape: f32[1,128], index: 12, kind: input, shape index: {}]   ;;  %s16322_s13 = inlined_call_operand.vmem [shape: f32[8,128], index: 13, kind: output, shape index: {}]  }
   0x1   :  { %19 = vsyncpa [#allocation8], 0 }
   0x2   :  { %20 = vsyncpa [#allocation11], 0 }
   0x3   :  { %21 = vsyncpa [#allocation14], 0 }
   0x4   :  { %22 = vsyncpa [#allocation17], 0 }
   0x5   :  { %23 = vsyncpa [#allocation20], 0 }
   0x6   :  { %24 = vsyncpa [#allocation23], 0  ;;  %s44_s27 = sshll.u32 %s16311_s2, 4  ;;  %s15407_s28 = smov [#allocation7]   ;;  %s45_s27 = int_to_ptr.hbm [resolvable:$true] %s44_s27 }
   0x7   :  { %s46_s29 = sshll.u32 %s15407_s28, 4  ;;  %s68_s15 = sshll.u32 %s16313_s4, 4  ;;  %s47_s29 = int_to_ptr.vmem [resolvable:$true] %s46_s29  ;;  %s69_s15 = int_to_ptr.hbm [resolvable:$true] %s68_s15 }
   0x8   :  { %s15408_s16 = smov 64   ;;  %s15409_s17 = smov 4  }
   0x9   :  { %52 = dma.hbm_to_vmem [thread:$0]  %s45_s27, 9216, %s47_s29, [#allocation8], %s15408_s16, %s15408_s16, %s15409_s17  }
   0xa   :  { %s15410_s18 = smov [#allocation10]   ;;  %s95_s2 = sshll.u32 %s16315_s6, 4  ;;  %s96_s2 = int_to_ptr.hbm [resolvable:$true] %s95_s2 }
   0xb   :  { %s70_s19 = sshll.u32 %s15410_s18, 4  ;;  %s118_s23 = sshll.u32 %s16317_s8, 4  ;;  %s71_s19 = int_to_ptr.vmem [resolvable:$true] %s70_s19  ;;  %s119_s23 = int_to_ptr.hbm [resolvable:$true] %s118_s23 }
   0xc   :  { %76 = dma.hbm_to_vmem [thread:$0]  %s69_s15, 2304, %s71_s19, [#allocation11], %s15408_s16, %s15408_s16, %s15409_s17  }
   0xd   :  { %s15411_s24 = smov [#allocation13]   ;;  %s15412_s26 = smov [#allocation16]  }
   0xe   :  { %s97_s25 = sshll.u32 %s15411_s24, 4  ;;  %s120_s27 = sshll.u32 %s15412_s26, 4  ;;  %s98_s25 = int_to_ptr.vmem [resolvable:$true] %s97_s25  ;;  %s121_s27 = int_to_ptr.vmem [resolvable:$true] %s120_s27 }
   0xf   :  { %100 = dma.hbm_to_vmem [thread:$0]  %s96_s2, 32, %s98_s25, [#allocation14]  }
  0x10   :  { %s15413_s28 = smov 256   ;;  %s15414_s6 = smov 16  }
  0x11   :  { %126 = dma.hbm_to_vmem [thread:$0]  %s119_s23, 73728, %s121_s27, [#allocation17], %s15413_s28, %s15413_s28, %s15414_s6  }
  0x12   :  { %s143_s14 = sshll.u32 %s16319_s10, 4  ;;  %s15415_s15 = smov [#allocation19]   ;;  %s144_s14 = int_to_ptr.hbm [resolvable:$true] %s143_s14 }
  0x13   :  { %s145_s18 = sshll.u32 %s15415_s15, 4  ;;  %s31_s20 = sshll.u32 %s16310_s1, 4  ;;  %s146_s18 = int_to_ptr.vmem [resolvable:$true] %s145_s18  ;;  %s32_s20 = int_to_ptr.hbm [resolvable:$true] %s31_s20 }
  0x14   :  { %148 = dma.hbm_to_vmem [thread:$0]  %s144_s14, 64, %s146_s18, [#allocation20]  }
  0x15   :  { %s15416_s21 = smov [#allocation5]   ;;  %s58_s23 = sshll.u32 %s16312_s3, 4  ;;  %s59_s23 = int_to_ptr.hbm [resolvable:$true] %s58_s23 }
  0x16   :  { %s33_s2 = sshll.u32 %s15416_s21, 4  ;;  %s81_s25 = sshll.u32 %s16314_s5, 4  ;;  %s34_s2 = int_to_ptr.vmem [resolvable:$true] %s33_s2  ;;  %s82_s25 = int_to_ptr.hbm [resolvable:$true] %s81_s25 }
  0x17   :  { %39 = dma.hbm_to_vmem [thread:$0]  %s32_s20, 9216, %s34_s2, [#allocation6], %s15408_s16, %s15408_s16, %s15409_s17  }
  0x18   :  { %s15417_s26 = smov [#allocation9]   ;;  %s15418_s27 = smov [#allocation12]  }
  0x19   :  { %s60_s1 = sshll.u32 %s15417_s26, 4  ;;  %s83_s28 = sshll.u32 %s15418_s27, 4  ;;  %s61_s1 = int_to_ptr.vmem [resolvable:$true] %s60_s1  ;;  %s84_s28 = int_to_ptr.vmem [resolvable:$true] %s83_s28 }
  0x1a   :  { %63 = dma.hbm_to_vmem [thread:$0]  %s59_s23, 16, %s61_s1, [#allocation8]  }
  0x1b   :  { %s15419_s6 = smov 128   ;;  %s15420_s3 = smov 8  }
  0x1c   :  { %89 = dma.hbm_to_vmem [thread:$0]  %s82_s25, 18432, %s84_s28, [#allocation11], %s15419_s6, %s15419_s6, %s15420_s3  }
  0x1d   :  { %s105_s14 = sshll.u32 %s16316_s7, 4  ;;  %s15421_s15 = smov [#allocation15]   ;;  %s106_s14 = int_to_ptr.hbm [resolvable:$true] %s105_s14 }
  0x1e   :  { %s107_s18 = sshll.u32 %s15421_s15, 4  ;;  %s132_s19 = sshll.u32 %s16318_s9, 4  ;;  %s108_s18 = int_to_ptr.vmem [resolvable:$true] %s107_s18  ;;  %s133_s19 = int_to_ptr.hbm [resolvable:$true] %s132_s19 }
  0x1f   :  { %113 = dma.hbm_to_vmem [thread:$0]  %s106_s14, 576, %s108_s18, [#allocation14], %s15408_s16, %s15408_s16, %s15409_s17  }
  0x20   :  { %s15422_s20 = smov [#allocation18]   ;;  %s153_s22 = sshll.u32 %s16320_s11, 4  ;;  %s154_s22 = int_to_ptr.hbm [resolvable:$true] %s153_s22 }
  0x21   :  { %s134_s21 = sshll.u32 %s15422_s20, 4  ;;  %s167_s10 = sshll.u32 %s16321_s12, 4  ;;  %s135_s21 = int_to_ptr.vmem [resolvable:$true] %s134_s21  ;;  %s168_s10 = int_to_ptr.hbm [resolvable:$true] %s167_s10 }
  0x22   :  { %137 = dma.hbm_to_vmem [thread:$0]  %s133_s19, 64, %s135_s21, [#allocation17]  }
  0x23   :  { %s15423_s24 = smov [#allocation21]   ;;  %s15424_s25 = smov [#allocation22]  }
  0x24   :  { %s155_s9 = sshll.u32 %s15423_s24, 4  ;;  %s169_s26 = sshll.u32 %s15424_s25, 4  ;;  %s156_s9 = int_to_ptr.vmem [resolvable:$true] %s155_s9  ;;  %s170_s26 = int_to_ptr.vmem [resolvable:$true] %s169_s26 }
  0x25   :  { %161 = dma.hbm_to_vmem [thread:$0]  %s154_s22, 4096, %s156_s9, [#allocation20], %s15408_s16, %s15408_s16, %s15409_s17  }
  0x26   :  { %172 = dma.hbm_to_vmem [thread:$0]  %s168_s10, 16, %s170_s26, [#allocation23]  }
  0x27   :  { %15393 = dma.done.wait [#allocation6], 9216  }
  0x28   :  { %15394 = vsyncadd [#allocation6], 4294958080 }
  0x29   :  { %15395 = dma.done.wait [#allocation8], 9232  }
  0x2a   :  { %15396 = vsyncadd [#allocation8], 4294958064 }
  0x2b   :  { %15397 = dma.done.wait [#allocation11], 20736  }
  0x2c   :  { %15398 = vsyncadd [#allocation11], 4294946560 }
  0x2d   :  { %15399 = dma.done.wait [#allocation14], 608  }
  0x2e   :  { %15400 = vsyncadd [#allocation14], 4294966688 }
  0x2f   :  { %15401 = dma.done.wait [#allocation17], 73792  }
  0x30   :  { %15402 = vsyncadd [#allocation17], 4294893504 }
  0x31   :  { %15403 = dma.done.wait [#allocation20], 4160  }
  0x32   :  { %15404 = vsyncadd [#allocation20], 4294963136 }
  0x33   :  { %15405 = dma.done.wait [#allocation23], 16  }
  0x34   :  { %15406 = vsyncadd [#allocation23], 4294967280  ;;  %v15549_v0 = vld [vmem:[%s16309_s0 + $0x38] sm:$0xff]  ;;  %v15556_v1 = vld [vmem:[%s16309_s0 + $0x30] sm:$0xff]  ;;  %vm4824_vm0 = vcmask 261120   ;;  %vm9607_vm1 = vcmask 1043456  }
  0x35   :  { %350 = vmatpush.bf16.msra.mxu0 %v15549_v0  ;;  %496 = vmatpush.bf16.msra.mxu1 %v15549_v0  ;;  %v15565_v2 = vld [vmem:[%s16309_s0 + $0x28] sm:$0xff]  ;;  %v15574_v3 = vld [vmem:[%s16309_s0 + $0x20] sm:$0xff]  ;;  %v15583_v4 = vld [vmem:[%s16309_s0 + $0x18] sm:$0xff]  ;;  %vm9603_vm2 = vcmask 64512  }
  0x36   :  { %642 = vmatpush.bf16.msra.mxu2 %v15549_v0  ;;  %788 = vmatpush.bf16.msra.mxu3 %v15549_v0  ;;  %v15592_v5 = vld [vmem:[%s16309_s0 + $0x10] sm:$0xff]  ;;  %v15601_v6 = vld [vmem:[%s16309_s0 + $0x8] sm:$0xff]  ;;  %v15610_v7 = vld [vmem:[%s16309_s0] sm:$0xff] }
  0x37   :  { %v14078_v8 = vld [vmem:[#allocation5] sm:$0xff]  ;;  %v14079_v12 = vld [vmem:[#allocation5 + $0x8] sm:$0xff]  ;;  %v14080_v16 = vld [vmem:[#allocation5 + $0x10] sm:$0xff] }
  0x38   :  { %v14086_v9 = vld [vmem:[#allocation5 + $0x40] sm:$0xff]  ;;  %v14087_v13 = vld [vmem:[#allocation5 + $0x48] sm:$0xff]  ;;  %v14088_v17 = vld [vmem:[#allocation5 + $0x50] sm:$0xff] }
  0x39   :  { %351 = vmatpush.bf16.msra.mxu0 %v15556_v1  ;;  %497 = vmatpush.bf16.msra.mxu1 %v15556_v1  ;;  %v14094_v10 = vld [vmem:[#allocation5 + $0x80] sm:$0xff]  ;;  %v14095_v14 = vld [vmem:[#allocation5 + $0x88] sm:$0xff]  ;;  %v14096_v18 = vld [vmem:[#allocation5 + $0x90] sm:$0xff] }
  0x3a   :  { %643 = vmatpush.bf16.msra.mxu2 %v15556_v1  ;;  %789 = vmatpush.bf16.msra.mxu3 %v15556_v1  ;;  %v14102_v11 = vld [vmem:[#allocation5 + $0xc0] sm:$0xff]  ;;  %v14103_v15 = vld [vmem:[#allocation5 + $0xc8] sm:$0xff]  ;;  %v14104_v19 = vld [vmem:[#allocation5 + $0xd0] sm:$0xff] }
  0x3b   :  { %v14081_v20 = vld [vmem:[#allocation5 + $0x18] sm:$0xff]  ;;  %v14082_v24 = vld [vmem:[#allocation5 + $0x20] sm:$0xff]  ;;  %v14083_v28 = vld [vmem:[#allocation5 + $0x28] sm:$0xff] }
  0x3c   :  { %v14089_v21 = vld [vmem:[#allocation5 + $0x58] sm:$0xff]  ;;  %v14090_v25 = vld [vmem:[#allocation5 + $0x60] sm:$0xff]  ;;  %v14091_v29 = vld [vmem:[#allocation5 + $0x68] sm:$0xff] }
  0x3d   :  { %352 = vmatpush.bf16.msra.mxu0 %v15565_v2  ;;  %498 = vmatpush.bf16.msra.mxu1 %v15565_v2  ;;  %v14097_v22 = vld [vmem:[#allocation5 + $0x98] sm:$0xff]  ;;  %v14098_v26 = vld [vmem:[#allocation5 + $0xa0] sm:$0xff]  ;;  %v14099_v30 = vld [vmem:[#allocation5 + $0xa8] sm:$0xff] }
  0x3e   :  { %644 = vmatpush.bf16.msra.mxu2 %v15565_v2  ;;  %790 = vmatpush.bf16.msra.mxu3 %v15565_v2  ;;  %v14105_v23 = vld [vmem:[#allocation5 + $0xd8] sm:$0xff]  ;;  %v14106_v27 = vld [vmem:[#allocation5 + $0xe0] sm:$0xff]  ;;  %v14107_v31 = vld [vmem:[#allocation5 + $0xe8] sm:$0xff] }
  0x3f   :  { %v14084_v32 = vld [vmem:[#allocation5 + $0x30] sm:$0xff]  ;;  %v14085_v36 = vld [vmem:[#allocation5 + $0x38] sm:$0xff]  ;;  %v14110_v40 = vld [vmem:[#allocation5 + $0x100] sm:$0xff] }
  0x40   :  { %v14092_v33 = vld [vmem:[#allocation5 + $0x70] sm:$0xff]  ;;  %v14093_v37 = vld [vmem:[#allocation5 + $0x78] sm:$0xff]  ;;  %v14118_v41 = vld [vmem:[#allocation5 + $0x140] sm:$0xff] }
  0x41   :  { %353 = vmatpush.bf16.msra.mxu0 %v15574_v3  ;;  %499 = vmatpush.bf16.msra.mxu1 %v15574_v3  ;;  %v14100_v34 = vld [vmem:[#allocation5 + $0xb0] sm:$0xff]  ;;  %v14101_v38 = vld [vmem:[#allocation5 + $0xb8] sm:$0xff]  ;;  %v14126_v44 = vld [vmem:[#allocation5 + $0x180] sm:$0xff] }
  0x42   :  { %645 = vmatpush.bf16.msra.mxu2 %v15574_v3  ;;  %791 = vmatpush.bf16.msra.mxu3 %v15574_v3  ;;  %v14108_v35 = vld [vmem:[#allocation5 + $0xf0] sm:$0xff]  ;;  %v14109_v39 = vld [vmem:[#allocation5 + $0xf8] sm:$0xff]  ;;  %v14134_v45 = vld [vmem:[#allocation5 + $0x1c0] sm:$0xff] }
  0x43   :  { %v14111_v58 = vld [vmem:[#allocation5 + $0x108] sm:$0xff] }
  0x44   :  { %v14119_v59 = vld [vmem:[#allocation5 + $0x148] sm:$0xff] }
  0x45   :  { %354 = vmatpush.bf16.msra.mxu0 %v15583_v4  ;;  %500 = vmatpush.bf16.msra.mxu1 %v15583_v4 }
  0x46   :  { %646 = vmatpush.bf16.msra.mxu2 %v15583_v4  ;;  %792 = vmatpush.bf16.msra.mxu3 %v15583_v4 }
  0x49   :  { %355 = vmatpush.bf16.msra.mxu0 %v15592_v5  ;;  %501 = vmatpush.bf16.msra.mxu1 %v15592_v5 }
  0x4a   :  { %647 = vmatpush.bf16.msra.mxu2 %v15592_v5  ;;  %793 = vmatpush.bf16.msra.mxu3 %v15592_v5 }
  0x4d   :  { %356 = vmatpush.bf16.msra.mxu0 %v15601_v6  ;;  %502 = vmatpush.bf16.msra.mxu1 %v15601_v6 }
  0x4e   :  { %648 = vmatpush.bf16.msra.mxu2 %v15601_v6  ;;  %794 = vmatpush.bf16.msra.mxu3 %v15601_v6 }
  0x51   :  { %357 = vmatpush.bf16.msra.mxu0 %v15610_v7  ;;  %503 = vmatpush.bf16.msra.mxu1 %v15610_v7 }
  0x52   :  { %649 = vmatpush.bf16.msra.mxu2 %v15610_v7  ;;  %795 = vmatpush.bf16.msra.mxu3 %v15610_v7 }
  0x54   :  { %358 = vmatmul.bf16.vlgmr.msra.gmra.mxu0 %v14078_v8  ;;  %504 = vmatmul.bf16.vlgmr.msra.gmra.mxu1 %v14086_v9 }
  0x55   :  { %934 = vmatpush.bf16.msrb.mxu0 %v15549_v0  ;;  %1080 = vmatpush.bf16.msrb.mxu1 %v15549_v0 }
  0x56   :  { %650 = vmatmul.bf16.vlgmr.msra.gmra.mxu2 %v14094_v10  ;;  %796 = vmatmul.bf16.vlgmr.msra.gmra.mxu3 %v14102_v11 }
  0x57   :  { %1226 = vmatpush.bf16.msrb.mxu2 %v15549_v0  ;;  %1372 = vmatpush.bf16.msrb.mxu3 %v15549_v0 }
  0x59   :  { %935 = vmatpush.bf16.msrb.mxu0 %v15556_v1  ;;  %1081 = vmatpush.bf16.msrb.mxu1 %v15556_v1 }
  0x5b   :  { %1227 = vmatpush.bf16.msrb.mxu2 %v15556_v1  ;;  %1373 = vmatpush.bf16.msrb.mxu3 %v15556_v1 }
  0x5d   :  { %936 = vmatpush.bf16.msrb.mxu0 %v15565_v2  ;;  %1082 = vmatpush.bf16.msrb.mxu1 %v15565_v2 }
  0x5f   :  { %1228 = vmatpush.bf16.msrb.mxu2 %v15565_v2  ;;  %1374 = vmatpush.bf16.msrb.mxu3 %v15565_v2 }
  0x61   :  { %937 = vmatpush.bf16.msrb.mxu0 %v15574_v3  ;;  %1083 = vmatpush.bf16.msrb.mxu1 %v15574_v3 }
  0x63   :  { %1229 = vmatpush.bf16.msrb.mxu2 %v15574_v3  ;;  %1375 = vmatpush.bf16.msrb.mxu3 %v15574_v3 }
  0x64   :  { %363 = vmatmul.bf16.gmra.mxu0 %v14079_v12  ;;  %509 = vmatmul.bf16.gmra.mxu1 %v14087_v13 }
  0x65   :  { %938 = vmatpush.bf16.msrb.mxu0 %v15583_v4  ;;  %1084 = vmatpush.bf16.msrb.mxu1 %v15583_v4 }
  0x66   :  { %655 = vmatmul.bf16.gmra.mxu2 %v14095_v14  ;;  %801 = vmatmul.bf16.gmra.mxu3 %v14103_v15  ;;  %v14112_v14 = vld [vmem:[#allocation5 + $0x110] sm:$0xff] }
  0x67   :  { %1230 = vmatpush.bf16.msrb.mxu2 %v15583_v4  ;;  %1376 = vmatpush.bf16.msrb.mxu3 %v15583_v4  ;;  %v14120_v15 = vld [vmem:[#allocation5 + $0x150] sm:$0xff] }
  0x69   :  { %939 = vmatpush.bf16.msrb.mxu0 %v15592_v5  ;;  %1085 = vmatpush.bf16.msrb.mxu1 %v15592_v5 }
  0x6b   :  { %1231 = vmatpush.bf16.msrb.mxu2 %v15592_v5  ;;  %1377 = vmatpush.bf16.msrb.mxu3 %v15592_v5 }
  0x6d   :  { %940 = vmatpush.bf16.msrb.mxu0 %v15601_v6  ;;  %1086 = vmatpush.bf16.msrb.mxu1 %v15601_v6 }
  0x6f   :  { %1232 = vmatpush.bf16.msrb.mxu2 %v15601_v6  ;;  %1378 = vmatpush.bf16.msrb.mxu3 %v15601_v6 }
  0x71   :  { %941 = vmatpush.bf16.msrb.mxu0 %v15610_v7  ;;  %1087 = vmatpush.bf16.msrb.mxu1 %v15610_v7 }
  0x73   :  { %1233 = vmatpush.bf16.msrb.mxu2 %v15610_v7  ;;  %1379 = vmatpush.bf16.msrb.mxu3 %v15610_v7 }
  0x74   :  { %368 = vmatmul.bf16.gmra.mxu0 %v14080_v16  ;;  %514 = vmatmul.bf16.gmra.mxu1 %v14088_v17 }
  0x75   :  { %1518 = vmatpush.bf16.msra.mxu0 %v15549_v0  ;;  %v14127_v0 = vld [vmem:[#allocation5 + $0x188] sm:$0xff] }
  0x76   :  { %660 = vmatmul.bf16.gmra.mxu2 %v14096_v18  ;;  %806 = vmatmul.bf16.gmra.mxu3 %v14104_v19 }
  0x79   :  { %1519 = vmatpush.bf16.msra.mxu0 %v15556_v1  ;;  %v14135_v1 = vld [vmem:[#allocation5 + $0x1c8] sm:$0xff] }
  0x7d   :  { %1520 = vmatpush.bf16.msra.mxu0 %v15565_v2 }
  0x81   :  { %1521 = vmatpush.bf16.msra.mxu0 %v15574_v3 }
  0x84   :  { %373 = vmatmul.bf16.gmra.mxu0 %v14081_v20  ;;  %519 = vmatmul.bf16.gmra.mxu1 %v14089_v21  ;;  %v14128_v20 = vld [vmem:[#allocation5 + $0x190] sm:$0xff] }
  0x85   :  { %1522 = vmatpush.bf16.msra.mxu0 %v15583_v4  ;;  %v14136_v21 = vld [vmem:[#allocation5 + $0x1d0] sm:$0xff] }
  0x86   :  { %665 = vmatmul.bf16.gmra.mxu2 %v14097_v22  ;;  %811 = vmatmul.bf16.gmra.mxu3 %v14105_v23 }
  0x89   :  { %1523 = vmatpush.bf16.msra.mxu0 %v15592_v5 }
  0x8d   :  { %1524 = vmatpush.bf16.msra.mxu0 %v15601_v6 }
  0x91   :  { %1525 = vmatpush.bf16.msra.mxu0 %v15610_v7 }
  0x94   :  { %378 = vmatmul.bf16.gmra.mxu0 %v14082_v24  ;;  %524 = vmatmul.bf16.gmra.mxu1 %v14090_v25 }
  0x96   :  { %670 = vmatmul.bf16.gmra.mxu2 %v14098_v26  ;;  %816 = vmatmul.bf16.gmra.mxu3 %v14106_v27 }
  0xa4   :  { %383 = vmatmul.bf16.gmra.mxu0 %v14083_v28  ;;  %529 = vmatmul.bf16.gmra.mxu1 %v14091_v29 }
  0xa6   :  { %675 = vmatmul.bf16.gmra.mxu2 %v14099_v30  ;;  %821 = vmatmul.bf16.gmra.mxu3 %v14107_v31 }
  0xb4   :  { %388 = vmatmul.bf16.gmra.mxu0 %v14084_v32  ;;  %534 = vmatmul.bf16.gmra.mxu1 %v14092_v33 }
  0xb6   :  { %680 = vmatmul.bf16.gmra.mxu2 %v14100_v34  ;;  %826 = vmatmul.bf16.gmra.mxu3 %v14108_v35  ;;  %v14113_v34 = vld [vmem:[#allocation5 + $0x118] sm:$0xff] }
  0xb7   :  { %v14121_v35 = vld [vmem:[#allocation5 + $0x158] sm:$0xff] }
  0xc4   :  { %393 = vmatmul.bf16.gmra.mxu0 %v14085_v36  ;;  %539 = vmatmul.bf16.gmra.mxu1 %v14093_v37 }
  0xc6   :  { %685 = vmatmul.bf16.gmra.mxu2 %v14101_v38  ;;  %831 = vmatmul.bf16.gmra.mxu3 %v14109_v39 }
  0xd1   :  { %v359_v42 = vpop.f32.mrf.mxu0  ;;  %v505_v43 = vpop.f32.mrf.mxu1 }
  0xd2   :  { %v399_v46 = vpack.c.bf16 %v359_v42, %v359_v42  ;;  %v545_v47 = vpack.c.bf16 %v505_v43, %v505_v43 }
  0xd4   :  { %415 = vst [vmem:[#allocation2] sm:$0xf] %v399_v46  ;;  %942 = vmatmul.bf16.vlgmr.msrb.gmra.mxu0 %v14110_v40  ;;  %1088 = vmatmul.bf16.vlgmr.msrb.gmra.mxu1 %v14118_v41  ;;  %v14129_v40 = vld [vmem:[#allocation5 + $0x198] sm:$0xff] }
  0xd5   :  { %561 = vst [vmem:[#allocation2 + $0x4] sm:$0xf] %v545_v47  ;;  %v14137_v41 = vld [vmem:[#allocation5 + $0x1d8] sm:$0xff] }
  0xd6   :  { %1234 = vmatmul.bf16.vlgmr.msrb.gmra.mxu2 %v14126_v44  ;;  %1380 = vmatmul.bf16.vlgmr.msrb.gmra.mxu3 %v14134_v45 }
  0xd9   :  { %v651_v48 = vpop.f32.mrf.mxu2  ;;  %v797_v49 = vpop.f32.mrf.mxu3 }
  0xda   :  { %v691_v50 = vpack.c.bf16 %v651_v48, %v651_v48  ;;  %v837_v51 = vpack.c.bf16 %v797_v49, %v797_v49  ;;  %v361_v52 = vpop.f32.mrf.mxu0  ;;  %v507_v53 = vpop.f32.mrf.mxu1 }
  0xdb   :  { %v400_v54 = vpack.c.bf16 %v361_v52, %v361_v52  ;;  %v546_v55 = vpack.c.bf16 %v507_v53, %v507_v53 }
  0xdc   :  { %707 = vst [vmem:[#allocation2 + $0x8] sm:$0xf] %v691_v50 }
  0xdd   :  { %853 = vst [vmem:[#allocation2 + $0xc] sm:$0xf] %v837_v51 }
  0xde   :  { %416 = vst [vmem:[#allocation2 + $0x24] sm:$0xf] %v400_v54  ;;  %v14114_v54 = vld [vmem:[#allocation5 + $0x120] sm:$0xff] }
  0xdf   :  { %562 = vst [vmem:[#allocation2 + $0x28] sm:$0xf] %v546_v55  ;;  %v14122_v55 = vld [vmem:[#allocation5 + $0x160] sm:$0xff] }
  0xe1   :  { %v653_v56 = vpop.f32.mrf.mxu2  ;;  %v799_v57 = vpop.f32.mrf.mxu3 }
  0xe2   :  { %v692_v60 = vpack.c.bf16 %v653_v56, %v653_v56  ;;  %v838_v61 = vpack.c.bf16 %v799_v57, %v799_v57  ;;  %v364_v62 = vpop.f32.mrf.mxu0  ;;  %v510_v63 = vpop.f32.mrf.mxu1 }
  0xe3   :  { %v401_v2 = vpack.c.bf16 %v364_v62, %v364_v62  ;;  %v547_v3 = vpack.c.bf16 %v510_v63, %v510_v63 }
  0xe4   :  { %708 = vst [vmem:[#allocation2 + $0x2c] sm:$0xf] %v692_v60  ;;  %947 = vmatmul.bf16.gmra.mxu0 %v14111_v58  ;;  %1093 = vmatmul.bf16.gmra.mxu1 %v14119_v59  ;;  %v14130_v60 = vld [vmem:[#allocation5 + $0x1a0] sm:$0xff] }
  0xe5   :  { %854 = vst [vmem:[#allocation2 + $0x30] sm:$0xf] %v838_v61  ;;  %v14138_v61 = vld [vmem:[#allocation5 + $0x1e0] sm:$0xff] }
  0xe6   :  { %417 = vst [vmem:[#allocation2 + $0x48] sm:$0xf] %v401_v2  ;;  %1239 = vmatmul.bf16.gmra.mxu2 %v14127_v0  ;;  %1385 = vmatmul.bf16.gmra.mxu3 %v14135_v1  ;;  %v14229_v0 = vld [vmem:[#allocation7 + $0x38] sm:$0xff] }
  0xe7   :  { %563 = vst [vmem:[#allocation2 + $0x4c] sm:$0xf] %v547_v3  ;;  %v14237_v1 = vld [vmem:[#allocation7 + $0x78] sm:$0xff]  ;;  %2627 = vmatpush.bf16.msra.mxu1 %v14229_v0 }
  0xe8   :  { %v14245_v2 = vld [vmem:[#allocation7 + $0xb8] sm:$0xff]  ;;  %2676 = vmatpush.bf16.msra.mxu2 %v14237_v1 }
  0xe9   :  { %v656_v4 = vpop.f32.mrf.mxu2  ;;  %v802_v5 = vpop.f32.mrf.mxu3  ;;  %2725 = vmatpush.bf16.msra.mxu3 %v14245_v2 }
  0xea   :  { %v693_v6 = vpack.c.bf16 %v656_v4, %v656_v4  ;;  %v839_v7 = vpack.c.bf16 %v802_v5, %v802_v5  ;;  %v366_v8 = vpop.f32.mrf.mxu0  ;;  %v512_v9 = vpop.f32.mrf.mxu1 }
  0xeb   :  { %v402_v10 = vpack.c.bf16 %v366_v8, %v366_v8  ;;  %v548_v11 = vpack.c.bf16 %v512_v9, %v512_v9  ;;  %v14228_v9 = vld [vmem:[#allocation7 + $0x30] sm:$0xff] }
  0xec   :  { %709 = vst [vmem:[#allocation2 + $0x50] sm:$0xf] %v693_v6  ;;  %2628 = vmatpush.bf16.msra.mxu1 %v14228_v9 }
  0xed   :  { %855 = vst [vmem:[#allocation2 + $0x54] sm:$0xf] %v839_v7 }
  0xee   :  { %418 = vst [vmem:[#allocation2 + $0x6c] sm:$0xf] %v402_v10  ;;  %v14236_v10 = vld [vmem:[#allocation7 + $0x70] sm:$0xff] }
  0xef   :  { %564 = vst [vmem:[#allocation2 + $0x70] sm:$0xf] %v548_v11  ;;  %v14244_v11 = vld [vmem:[#allocation7 + $0xb0] sm:$0xff]  ;;  %2677 = vmatpush.bf16.msra.mxu2 %v14236_v10  ;;  %v14117_v10 = vld [vmem:[#allocation5 + $0x138] sm:$0xff] }
  0xf0   :  { %2726 = vmatpush.bf16.msra.mxu3 %v14244_v11  ;;  %v14125_v11 = vld [vmem:[#allocation5 + $0x178] sm:$0xff] }
  0xf1   :  { %v658_v12 = vpop.f32.mrf.mxu2  ;;  %v804_v13 = vpop.f32.mrf.mxu3 }
  0xf2   :  { %v694_v16 = vpack.c.bf16 %v658_v12, %v658_v12  ;;  %v840_v17 = vpack.c.bf16 %v804_v13, %v804_v13  ;;  %v369_v18 = vpop.f32.mrf.mxu0  ;;  %v515_v19 = vpop.f32.mrf.mxu1 }
  0xf3   :  { %v403_v22 = vpack.c.bf16 %v369_v18, %v369_v18  ;;  %v549_v23 = vpack.c.bf16 %v515_v19, %v515_v19  ;;  %v14115_v19 = vld [vmem:[#allocation5 + $0x128] sm:$0xff] }
  0xf4   :  { %710 = vst [vmem:[#allocation2 + $0x74] sm:$0xf] %v694_v16  ;;  %952 = vmatmul.bf16.gmra.mxu0 %v14112_v14  ;;  %1098 = vmatmul.bf16.gmra.mxu1 %v14120_v15  ;;  %v14227_v14 = vld [vmem:[#allocation7 + $0x28] sm:$0xff] }
  0xf5   :  { %856 = vst [vmem:[#allocation2 + $0x78] sm:$0xf] %v840_v17  ;;  %v14235_v15 = vld [vmem:[#allocation7 + $0x68] sm:$0xff]  ;;  %2629 = vmatpush.bf16.msra.mxu1 %v14227_v14 }
  0xf6   :  { %419 = vst [vmem:[#allocation2 + $0x90] sm:$0xf] %v403_v22  ;;  %1244 = vmatmul.bf16.gmra.mxu2 %v14128_v20  ;;  %1390 = vmatmul.bf16.gmra.mxu3 %v14136_v21  ;;  %v14243_v16 = vld [vmem:[#allocation7 + $0xa8] sm:$0xff] }
  0xf7   :  { %565 = vst [vmem:[#allocation2 + $0x94] sm:$0xf] %v549_v23  ;;  %2678 = vmatpush.bf16.msra.mxu2 %v14235_v15  ;;  %v14123_v20 = vld [vmem:[#allocation5 + $0x168] sm:$0xff]  ;;  %2727 = vmatpush.bf16.msra.mxu3 %v14243_v16  ;;  %v14133_v16 = vld [vmem:[#allocation5 + $0x1b8] sm:$0xff] }
  0xf8   :  { %v14131_v21 = vld [vmem:[#allocation5 + $0x1a8] sm:$0xff] }
  0xf9   :  { %v661_v24 = vpop.f32.mrf.mxu2  ;;  %v807_v25 = vpop.f32.mrf.mxu3 }
  0xfa   :  { %v695_v26 = vpack.c.bf16 %v661_v24, %v661_v24  ;;  %v841_v27 = vpack.c.bf16 %v807_v25, %v807_v25  ;;  %v371_v28 = vpop.f32.mrf.mxu0  ;;  %v517_v29 = vpop.f32.mrf.mxu1 }
  0xfb   :  { %v404_v30 = vpack.c.bf16 %v371_v28, %v371_v28  ;;  %v550_v31 = vpack.c.bf16 %v517_v29, %v517_v29  ;;  %v14234_v28 = vld [vmem:[#allocation7 + $0x60] sm:$0xff] }
  0xfc   :  { %711 = vst [vmem:[#allocation2 + $0x98] sm:$0xf] %v695_v26  ;;  %v14139_v26 = vld [vmem:[#allocation5 + $0x1e8] sm:$0xff]  ;;  %2679 = vmatpush.bf16.msra.mxu2 %v14234_v28  ;;  %v10330_v28 = vld [vmem:[#allocation2 + $0x8] sm:$0xf] }
  0xfd   :  { %857 = vst [vmem:[#allocation2 + $0x9c] sm:$0xf] %v841_v27  ;;  %v14226_v27 = vld [vmem:[#allocation7 + $0x20] sm:$0xff] }
  0xfe   :  { %420 = vst [vmem:[#allocation2 + $0xb4] sm:$0xf] %v404_v30  ;;  %2630 = vmatpush.bf16.msra.mxu1 %v14226_v27 }
  0xff   :  { %566 = vst [vmem:[#allocation2 + $0xb8] sm:$0xf] %v550_v31  ;;  %v14242_v31 = vld [vmem:[#allocation7 + $0xa0] sm:$0xff] }
 0x100   :  { %2728 = vmatpush.bf16.msra.mxu3 %v14242_v31 }
 0x101   :  { %v663_v32 = vpop.f32.mrf.mxu2  ;;  %v809_v33 = vpop.f32.mrf.mxu3 }
 0x102   :  { %v696_v36 = vpack.c.bf16 %v663_v32, %v663_v32  ;;  %v842_v37 = vpack.c.bf16 %v809_v33, %v809_v33  ;;  %v374_v38 = vpop.f32.mrf.mxu0  ;;  %v520_v39 = vpop.f32.mrf.mxu1  ;;  %v14225_v32 = vld [vmem:[#allocation7 + $0x18] sm:$0xff] }
 0x103   :  { %v405_v42 = vpack.c.bf16 %v374_v38, %v374_v38  ;;  %v551_v43 = vpack.c.bf16 %v520_v39, %v520_v39  ;;  %v14233_v33 = vld [vmem:[#allocation7 + $0x58] sm:$0xff]  ;;  %2631 = vmatpush.bf16.msra.mxu1 %v14225_v32 }
 0x104   :  { %712 = vst [vmem:[#allocation2 + $0xbc] sm:$0xf] %v696_v36  ;;  %957 = vmatmul.bf16.gmra.mxu0 %v14113_v34  ;;  %1103 = vmatmul.bf16.gmra.mxu1 %v14121_v35  ;;  %v14241_v34 = vld [vmem:[#allocation7 + $0x98] sm:$0xff] }
 0x105   :  { %858 = vst [vmem:[#allocation2 + $0xc0] sm:$0xf] %v842_v37  ;;  %2680 = vmatpush.bf16.msra.mxu2 %v14233_v33  ;;  %2729 = vmatpush.bf16.msra.mxu3 %v14241_v34  ;;  %v14142_v33 = vld [vmem:[#allocation5 + $0x200] sm:$0xff]  ;;  %v10324_v34 = vld [vmem:[#allocation2 + $0x24] sm:$0xf0] }
 0x106   :  { %421 = vst [vmem:[#allocation2 + $0xd8] sm:$0xf] %v405_v42  ;;  %1249 = vmatmul.bf16.gmra.mxu2 %v14129_v40  ;;  %1395 = vmatmul.bf16.gmra.mxu3 %v14137_v41  ;;  %v14224_v41 = vld [vmem:[#allocation7 + $0x10] sm:$0xff] }
 0x107   :  { %567 = vst [vmem:[#allocation2 + $0xdc] sm:$0xf] %v551_v43  ;;  %v14232_v42 = vld [vmem:[#allocation7 + $0x50] sm:$0xff]  ;;  %2632 = vmatpush.bf16.msra.mxu1 %v14224_v41 }
 0x109   :  { %v666_v44 = vpop.f32.mrf.mxu2  ;;  %v812_v45 = vpop.f32.mrf.mxu3  ;;  %2681 = vmatpush.bf16.msra.mxu2 %v14232_v42 }
 0x10a   :  { %v697_v46 = vpack.c.bf16 %v666_v44, %v666_v44  ;;  %v843_v47 = vpack.c.bf16 %v812_v45, %v812_v45  ;;  %v376_v48 = vpop.f32.mrf.mxu0  ;;  %v522_v49 = vpop.f32.mrf.mxu1  ;;  %v14240_v45 = vld [vmem:[#allocation7 + $0x90] sm:$0xff] }
 0x10b   :  { %v406_v50 = vpack.c.bf16 %v376_v48, %v376_v48  ;;  %v552_v51 = vpack.c.bf16 %v522_v49, %v522_v49  ;;  %2730 = vmatpush.bf16.msra.mxu3 %v14240_v45  ;;  %v14239_v48 = vld [vmem:[#allocation7 + $0x88] sm:$0xff] }
 0x10c   :  { %713 = vst [vmem:[#allocation2 + $0xe0] sm:$0xf] %v697_v46  ;;  %v14223_v46 = vld [vmem:[#allocation7 + $0x8] sm:$0xff] }
 0x10d   :  { %859 = vst [vmem:[#allocation2 + $0xe4] sm:$0xf] %v843_v47  ;;  %v14231_v47 = vld [vmem:[#allocation7 + $0x48] sm:$0xff]  ;;  %2633 = vmatpush.bf16.msra.mxu1 %v14223_v46 }
 0x10e   :  { %422 = vst [vmem:[#allocation2 + $0xfc] sm:$0xf] %v406_v50  ;;  %2682 = vmatpush.bf16.msra.mxu2 %v14231_v47 }
 0x10f   :  { %568 = vst [vmem:[#allocation2 + $0x100] sm:$0xf] %v552_v51  ;;  %v14116_v51 = vld [vmem:[#allocation5 + $0x130] sm:$0xff]  ;;  %2731 = vmatpush.bf16.msra.mxu3 %v14239_v48 }
 0x111   :  { %v668_v52 = vpop.f32.mrf.mxu2  ;;  %v814_v53 = vpop.f32.mrf.mxu3 }
 0x112   :  { %v698_v56 = vpack.c.bf16 %v668_v52, %v668_v52  ;;  %v844_v57 = vpack.c.bf16 %v814_v53, %v814_v53  ;;  %v379_v58 = vpop.f32.mrf.mxu0  ;;  %v525_v59 = vpop.f32.mrf.mxu1  ;;  %v14124_v52 = vld [vmem:[#allocation5 + $0x170] sm:$0xff] }
 0x113   :  { %v407_v62 = vpack.c.bf16 %v379_v58, %v379_v58  ;;  %v553_v63 = vpack.c.bf16 %v525_v59, %v525_v59  ;;  %v14132_v53 = vld [vmem:[#allocation5 + $0x1b0] sm:$0xff]  ;;  %v14222_v59 = vld [vmem:[#allocation7] sm:$0xff] }
 0x114   :  { %714 = vst [vmem:[#allocation2 + $0x104] sm:$0xf] %v698_v56  ;;  %962 = vmatmul.bf16.gmra.mxu0 %v14114_v54  ;;  %1108 = vmatmul.bf16.gmra.mxu1 %v14122_v55  ;;  %v14140_v58 = vld [vmem:[#allocation5 + $0x1f0] sm:$0xff] }
 0x115   :  { %860 = vst [vmem:[#allocation2 + $0x108] sm:$0xf] %v844_v57  ;;  %2634 = vmatpush.bf16.msra.mxu1 %v14222_v59  ;;  %v14143_v59 = vld [vmem:[#allocation5 + $0x208] sm:$0xff] }
 0x116   :  { %423 = vst [vmem:[#allocation2 + $0x120] sm:$0xf] %v407_v62  ;;  %1254 = vmatmul.bf16.gmra.mxu2 %v14130_v60  ;;  %1400 = vmatmul.bf16.gmra.mxu3 %v14138_v61  ;;  %v14230_v60 = vld [vmem:[#allocation7 + $0x40] sm:$0xff] }
 0x117   :  { %569 = vst [vmem:[#allocation2 + $0x124] sm:$0xf] %v553_v63  ;;  %v14238_v63 = vld [vmem:[#allocation7 + $0x80] sm:$0xff]  ;;  %2683 = vmatpush.bf16.msra.mxu2 %v14230_v60 }
 0x118   :  { %2732 = vmatpush.bf16.msra.mxu3 %v14238_v63  ;;  %v10360_v60 = vld [vmem:[#allocation2 + $0x6c] sm:$0xf0] }
 0x119   :  { %v671_v3 = vpop.f32.mrf.mxu2  ;;  %v817_v4 = vpop.f32.mrf.mxu3 }
 0x11a   :  { %v699_v5 = vpack.c.bf16 %v671_v3, %v671_v3  ;;  %v845_v6 = vpack.c.bf16 %v817_v4, %v817_v4  ;;  %v381_v7 = vpop.f32.mrf.mxu0  ;;  %v527_v8 = vpop.f32.mrf.mxu1 }
 0x11b   :  { %v408_v12 = vpack.c.bf16 %v381_v7, %v381_v7  ;;  %v554_v13 = vpack.c.bf16 %v527_v8, %v527_v8 }
 0x11c   :  { %715 = vst [vmem:[#allocation2 + $0x128] sm:$0xf] %v699_v5 }
 0x11d   :  { %861 = vst [vmem:[#allocation2 + $0x12c] sm:$0xf] %v845_v6 }
 0x11e   :  { %424 = vst [vmem:[#allocation2 + $0x144] sm:$0xf] %v408_v12 }
 0x11f   :  { %570 = vst [vmem:[#allocation2 + $0x148] sm:$0xf] %v554_v13 }
 0x121   :  { %v673_v17 = vpop.f32.mrf.mxu2  ;;  %v819_v18 = vpop.f32.mrf.mxu3 }
 0x122   :  { %v700_v22 = vpack.c.bf16 %v673_v17, %v673_v17  ;;  %v846_v23 = vpack.c.bf16 %v819_v18, %v819_v18  ;;  %v384_v24 = vpop.f32.mrf.mxu0  ;;  %v530_v25 = vpop.f32.mrf.mxu1  ;;  %v14141_v17 = vld [vmem:[#allocation5 + $0x1f8] sm:$0xff] }
 0x123   :  { %v409_v29 = vpack.c.bf16 %v384_v24, %v384_v24  ;;  %v555_v30 = vpack.c.bf16 %v530_v25, %v530_v25 }
 0x124   :  { %716 = vst [vmem:[#allocation2 + $0x14c] sm:$0xf] %v700_v22  ;;  %967 = vmatmul.bf16.gmra.mxu0 %v14115_v19  ;;  %1113 = vmatmul.bf16.gmra.mxu1 %v14123_v20 }
 0x125   :  { %862 = vst [vmem:[#allocation2 + $0x150] sm:$0xf] %v846_v23 }
 0x126   :  { %425 = vst [vmem:[#allocation2 + $0x168] sm:$0xf] %v409_v29  ;;  %1259 = vmatmul.bf16.gmra.mxu2 %v14131_v21  ;;  %1405 = vmatmul.bf16.gmra.mxu3 %v14139_v26  ;;  %v14155_v29 = vld [vmem:[#allocation2 + $0x28] sm:$0xf0] }
 0x127   :  { %571 = vst [vmem:[#allocation2 + $0x16c] sm:$0xf] %v555_v30  ;;  %v14154_v30 = vld [vmem:[#allocation2 + $0x20] sm:$0xf0] }
 0x129   :  { %v676_v35 = vpop.f32.mrf.mxu2  ;;  %v822_v36 = vpop.f32.mrf.mxu3 }
 0x12a   :  { %v701_v37 = vpack.c.bf16 %v676_v35, %v676_v35  ;;  %v847_v38 = vpack.c.bf16 %v822_v36, %v822_v36  ;;  %v386_v39 = vpop.f32.mrf.mxu0  ;;  %v532_v40 = vpop.f32.mrf.mxu1 }
 0x12b   :  { %v410_v43 = vpack.c.bf16 %v386_v39, %v386_v39  ;;  %v556_v44 = vpack.c.bf16 %v532_v40, %v532_v40  ;;  %v10322_v39 = vld [vmem:[#allocation2] sm:$0xf]  ;;  %v10331_v40 = vor.u32 %v14155_v29, %v10330_v28 }
 0x12c   :  { %717 = vst [vmem:[#allocation2 + $0x170] sm:$0xf] %v701_v37 }
 0x12d   :  { %863 = vst [vmem:[#allocation2 + $0x174] sm:$0xf] %v847_v38 }
 0x12e   :  { %426 = vst [vmem:[#allocation2 + $0x18c] sm:$0xf] %v410_v43  ;;  %v10323_v43 = vor.u32 %v14154_v30, %v10322_v39 }
 0x12f   :  { %572 = vst [vmem:[#allocation2 + $0x190] sm:$0xf] %v556_v44  ;;  %v14150_v44 = vld [vmem:[#allocation2 + $0x4] sm:$0xf] }
 0x130   :  { %v10327_v45 = vor.u32 %v14150_v44, %v10324_v34  ;;  %v14181_v44 = vld [vmem:[#allocation2 + $0xf8] sm:$0xf0] }
 0x131   :  { %v678_v49 = vpop.f32.mrf.mxu2  ;;  %v824_v50 = vpop.f32.mrf.mxu3 }
 0x132   :  { %v702_v54 = vpack.c.bf16 %v678_v49, %v678_v49  ;;  %v848_v55 = vpack.c.bf16 %v824_v50, %v824_v50  ;;  %v389_v56 = vpop.f32.mrf.mxu0  ;;  %v535_v57 = vpop.f32.mrf.mxu1 }
 0x133   :  { %v411_v61 = vpack.c.bf16 %v389_v56, %v389_v56  ;;  %v557_v62 = vpack.c.bf16 %v535_v57, %v535_v57  ;;  %v14163_v56 = vld [vmem:[#allocation2 + $0x68] sm:$0xf0] }
 0x134   :  { %718 = vst [vmem:[#allocation2 + $0x194] sm:$0xf] %v702_v54  ;;  %972 = vmatmul.bf16.gmra.mxu0 %v14116_v51  ;;  %1118 = vmatmul.bf16.gmra.mxu1 %v14124_v52  ;;  %v10366_v54 = vld [vmem:[#allocation2 + $0x50] sm:$0xf] }
 0x135   :  { %864 = vst [vmem:[#allocation2 + $0x198] sm:$0xf] %v848_v55  ;;  %v14164_v55 = vld [vmem:[#allocation2 + $0x70] sm:$0xf0] }
 0x136   :  { %427 = vst [vmem:[#allocation2 + $0x1b0] sm:$0xf] %v411_v61  ;;  %1264 = vmatmul.bf16.gmra.mxu2 %v14132_v53  ;;  %1410 = vmatmul.bf16.gmra.mxu3 %v14140_v58 }
 0x137   :  { %573 = vst [vmem:[#allocation2 + $0x1b4] sm:$0xf] %v557_v62 }
 0x139   :  { %v681_v0 = vpop.f32.mrf.mxu2  ;;  %v827_v1 = vpop.f32.mrf.mxu3 }
 0x13a   :  { %v703_v2 = vpack.c.bf16 %v681_v0, %v681_v0  ;;  %v849_v3 = vpack.c.bf16 %v827_v1, %v827_v1  ;;  %v391_v4 = vpop.f32.mrf.mxu0  ;;  %v537_v5 = vpop.f32.mrf.mxu1  ;;  %v10358_v1 = vld [vmem:[#allocation2 + $0x48] sm:$0xf] }
 0x13b   :  { %v412_v6 = vpack.c.bf16 %v391_v4, %v391_v4  ;;  %v558_v7 = vpack.c.bf16 %v537_v5, %v537_v5  ;;  %v10359_v5 = vor.u32 %v14163_v56, %v10358_v1 }
 0x13c   :  { %719 = vst [vmem:[#allocation2 + $0x1b8] sm:$0xf] %v703_v2  ;;  %v10367_v2 = vor.u32 %v14164_v55, %v10366_v54 }
 0x13d   :  { %865 = vst [vmem:[#allocation2 + $0x1bc] sm:$0xf] %v849_v3 }
 0x13e   :  { %428 = vst [vmem:[#allocation2 + $0x1d4] sm:$0xf] %v412_v6  ;;  %v14159_v6 = vld [vmem:[#allocation2 + $0x4c] sm:$0xf] }
 0x13f   :  { %574 = vst [vmem:[#allocation2 + $0x1d8] sm:$0xf] %v558_v7  ;;  %v10363_v7 = vor.u32 %v14159_v6, %v10360_v60  ;;  %v14190_v6 = vld [vmem:[#allocation2 + $0x140] sm:$0xf0] }
 0x141   :  { %v683_v8 = vpop.f32.mrf.mxu2  ;;  %v829_v9 = vpop.f32.mrf.mxu3 }
 0x142   :  { %v704_v12 = vpack.c.bf16 %v683_v8, %v683_v8  ;;  %v850_v13 = vpack.c.bf16 %v829_v9, %v829_v9  ;;  %v394_v14 = vpop.f32.mrf.mxu0  ;;  %v540_v15 = vpop.f32.mrf.mxu1 }
 0x143   :  { %v413_v18 = vpack.c.bf16 %v394_v14, %v394_v14  ;;  %v559_v19 = vpack.c.bf16 %v540_v15, %v540_v15 }
 0x144   :  { %720 = vst [vmem:[#allocation2 + $0x1dc] sm:$0xf] %v704_v12  ;;  %977 = vmatmul.bf16.gmra.mxu0 %v14117_v10  ;;  %1123 = vmatmul.bf16.gmra.mxu1 %v14125_v11 }
 0x145   :  { %866 = vst [vmem:[#allocation2 + $0x1e0] sm:$0xf] %v850_v13 }
 0x146   :  { %429 = vst [vmem:[#allocation2 + $0x1f8] sm:$0xf] %v413_v18  ;;  %1269 = vmatmul.bf16.gmra.mxu2 %v14133_v16  ;;  %1415 = vmatmul.bf16.gmra.mxu3 %v14141_v17  ;;  %v10402_v16 = vld [vmem:[#allocation2 + $0x98] sm:$0xf]  ;;  %v14173_v17 = vld [vmem:[#allocation2 + $0xb8] sm:$0xf0] }
 0x147   :  { %575 = vst [vmem:[#allocation2 + $0x1fc] sm:$0xf] %v559_v19  ;;  %v14172_v18 = vld [vmem:[#allocation2 + $0xb0] sm:$0xf0]  ;;  %v10403_v28 = vor.u32 %v14173_v17, %v10402_v16 }
 0x149   :  { %v686_v20 = vpop.f32.mrf.mxu2  ;;  %v832_v21 = vpop.f32.mrf.mxu3 }
 0x14a   :  { %v705_v22 = vpack.c.bf16 %v686_v20, %v686_v20  ;;  %v851_v23 = vpack.c.bf16 %v832_v21, %v832_v21  ;;  %v396_v24 = vpop.f32.mrf.mxu0  ;;  %v542_v25 = vpop.f32.mrf.mxu1  ;;  %v14144_v21 = vld [vmem:[#allocation5 + $0x210] sm:$0xff] }
 0x14b   :  { %v414_v26 = vpack.c.bf16 %v396_v24, %v396_v24  ;;  %v560_v27 = vpack.c.bf16 %v542_v25, %v542_v25 }
 0x14c   :  { %721 = vst [vmem:[#allocation2 + $0x200] sm:$0xf] %v705_v22  ;;  %v10396_v22 = vld [vmem:[#allocation2 + $0xb4] sm:$0xf0] }
 0x14d   :  { %867 = vst [vmem:[#allocation2 + $0x204] sm:$0xf] %v851_v23 }
 0x14e   :  { %430 = vst [vmem:[#allocation2 + $0x21c] sm:$0xf] %v414_v26 }
 0x14f   :  { %576 = vst [vmem:[#allocation2 + $0x220] sm:$0xf] %v560_v27  ;;  %v10394_v27 = vld [vmem:[#allocation2 + $0x90] sm:$0xf] }
 0x151   :  { %v688_v31 = vpop.f32.mrf.mxu2  ;;  %v834_v32 = vpop.f32.mrf.mxu3 }
 0x152   :  { %v706_v35 = vpack.c.bf16 %v688_v31, %v688_v31  ;;  %v852_v36 = vpack.c.bf16 %v834_v32, %v834_v32  ;;  %v943_v37 = vpop.f32.mrf.mxu0  ;;  %v1089_v38 = vpop.f32.mrf.mxu1  ;;  %v10395_v31 = vor.u32 %v14172_v18, %v10394_v27  ;;  %v14168_v32 = vld [vmem:[#allocation2 + $0x94] sm:$0xf] }
 0x153   :  { %v983_v41 = vpack.c.bf16 %v943_v37, %v943_v37  ;;  %v1129_v42 = vpack.c.bf16 %v1089_v38, %v1089_v38 }
 0x154   :  { %722 = vst [vmem:[#allocation2 + $0x224] sm:$0xf] %v706_v35  ;;  %1526 = vmatmul.bf16.vlgmr.msra.gmra.mxu0 %v14142_v33  ;;  %2635 = vmatmul.bf16.vlgmr.msra.gmra.mxu1 %v10323_v43  ;;  %v10399_v33 = vor.u32 %v14168_v32, %v10396_v22  ;;  %v14182_v43 = vld [vmem:[#allocation2 + $0x100] sm:$0xf0]  ;;  %v14253_v22 = vld [vmem:[#allocation7 + $0xf8] sm:$0xff] }
 0x155   :  { %868 = vst [vmem:[#allocation2 + $0x228] sm:$0xf] %v852_v36  ;;  %2774 = vmatpush.bf16.msrb.mxu0 %v14253_v22  ;;  %v14271_v22 = vld [vmem:[#allocation7 + $0x188] sm:$0xff] }
 0x156   :  { %999 = vst [vmem:[#allocation2 + $0x10] sm:$0xf] %v983_v41  ;;  %2684 = vmatmul.bf16.vlgmr.msra.gmra.mxu2 %v10327_v45  ;;  %2733 = vmatmul.bf16.vlgmr.msra.gmra.mxu3 %v10331_v40 }
 0x157   :  { %1145 = vst [vmem:[#allocation2 + $0x14] sm:$0xf] %v1129_v42  ;;  %v10438_v42 = vld [vmem:[#allocation2 + $0xe0] sm:$0xf] }
 0x158   :  { %v10439_v54 = vor.u32 %v14182_v43, %v10438_v42  ;;  %v14267_v42 = vld [vmem:[#allocation7 + $0x168] sm:$0xff]  ;;  %v14199_v43 = vld [vmem:[#allocation2 + $0x188] sm:$0xf0] }
 0x159   :  { %v1235_v46 = vpop.f32.mrf.mxu2  ;;  %v1381_v47 = vpop.f32.mrf.mxu3 }
 0x15a   :  { %v1275_v48 = vpack.c.bf16 %v1235_v46, %v1235_v46  ;;  %v1421_v49 = vpack.c.bf16 %v1381_v47, %v1381_v47  ;;  %v945_v50 = vpop.f32.mrf.mxu0  ;;  %v1091_v51 = vpop.f32.mrf.mxu1  ;;  %v14145_v47 = vld [vmem:[#allocation5 + $0x218] sm:$0xff] }
 0x15b   :  { %v984_v52 = vpack.c.bf16 %v945_v50, %v945_v50  ;;  %v1130_v53 = vpack.c.bf16 %v1091_v51, %v1091_v51 }
 0x15c   :  { %1291 = vst [vmem:[#allocation2 + $0x18] sm:$0xf] %v1275_v48  ;;  %v10432_v48 = vld [vmem:[#allocation2 + $0xfc] sm:$0xf0] }
 0x15d   :  { %1437 = vst [vmem:[#allocation2 + $0x1c] sm:$0xf] %v1421_v49 }
 0x15e   :  { %1000 = vst [vmem:[#allocation2 + $0x34] sm:$0xf] %v984_v52 }
 0x15f   :  { %1146 = vst [vmem:[#allocation2 + $0x38] sm:$0xf] %v1130_v53  ;;  %v10430_v53 = vld [vmem:[#allocation2 + $0xd8] sm:$0xf] }
 0x161   :  { %v1237_v57 = vpop.f32.mrf.mxu2  ;;  %v1383_v58 = vpop.f32.mrf.mxu3 }
 0x162   :  { %v1276_v61 = vpack.c.bf16 %v1237_v57, %v1237_v57  ;;  %v1422_v62 = vpack.c.bf16 %v1383_v58, %v1383_v58  ;;  %v948_v63 = vpop.f32.mrf.mxu0  ;;  %v1094_v0 = vpop.f32.mrf.mxu1  ;;  %v10431_v57 = vor.u32 %v14181_v44, %v10430_v53  ;;  %v14177_v58 = vld [vmem:[#allocation2 + $0xdc] sm:$0xf]  ;;  %v10502_v53 = vld [vmem:[#allocation2 + $0x168] sm:$0xf] }
 0x163   :  { %v985_v3 = vpack.c.bf16 %v948_v63, %v948_v63  ;;  %v1131_v4 = vpack.c.bf16 %v1094_v0, %v1094_v0  ;;  %v14275_v44 = vld [vmem:[#allocation7 + $0x1a8] sm:$0xff] }
 0x164   :  { %1292 = vst [vmem:[#allocation2 + $0x3c] sm:$0xf] %v1276_v61  ;;  %1531 = vmatmul.bf16.gmra.mxu0 %v14143_v59  ;;  %2640 = vmatmul.bf16.gmra.mxu1 %v10359_v5  ;;  %v10435_v59 = vor.u32 %v14177_v58, %v10432_v48  ;;  %v14191_v5 = vld [vmem:[#allocation2 + $0x148] sm:$0xf0]  ;;  %v10504_v48 = vld [vmem:[#allocation2 + $0x18c] sm:$0xf0] }
 0x165   :  { %1438 = vst [vmem:[#allocation2 + $0x40] sm:$0xf] %v1422_v62  ;;  %v14195_v58 = vld [vmem:[#allocation2 + $0x16c] sm:$0xf] }
 0x166   :  { %1001 = vst [vmem:[#allocation2 + $0x58] sm:$0xf] %v985_v3  ;;  %2689 = vmatmul.bf16.gmra.mxu2 %v10363_v7  ;;  %2738 = vmatmul.bf16.gmra.mxu3 %v10367_v2 }
 0x167   :  { %1147 = vst [vmem:[#allocation2 + $0x5c] sm:$0xf] %v1131_v4  ;;  %v10474_v4 = vld [vmem:[#allocation2 + $0x128] sm:$0xf] }
 0x168   :  { %v10475_v16 = vor.u32 %v14191_v5, %v10474_v4 }
 0x169   :  { %v1240_v8 = vpop.f32.mrf.mxu2  ;;  %v1386_v9 = vpop.f32.mrf.mxu3 }
 0x16a   :  { %v1277_v10 = vpack.c.bf16 %v1240_v8, %v1240_v8  ;;  %v1423_v11 = vpack.c.bf16 %v1386_v9, %v1386_v9  ;;  %v950_v12 = vpop.f32.mrf.mxu0  ;;  %v1096_v13 = vpop.f32.mrf.mxu1  ;;  %v14146_v9 = vld [vmem:[#allocation5 + $0x220] sm:$0xff] }
 0x16b   :  { %v986_v14 = vpack.c.bf16 %v950_v12, %v950_v12  ;;  %v1132_v15 = vpack.c.bf16 %v1096_v13, %v1096_v13 }
 0x16c   :  { %1293 = vst [vmem:[#allocation2 + $0x60] sm:$0xf] %v1277_v10  ;;  %v10468_v10 = vld [vmem:[#allocation2 + $0x144] sm:$0xf0] }
 0x16d   :  { %1439 = vst [vmem:[#allocation2 + $0x64] sm:$0xf] %v1423_v11 }
 0x16e   :  { %1002 = vst [vmem:[#allocation2 + $0x7c] sm:$0xf] %v986_v14 }
 0x16f   :  { %1148 = vst [vmem:[#allocation2 + $0x80] sm:$0xf] %v1132_v15  ;;  %v10466_v15 = vld [vmem:[#allocation2 + $0x120] sm:$0xf] }
 0x171   :  { %v1242_v19 = vpop.f32.mrf.mxu2  ;;  %v1388_v20 = vpop.f32.mrf.mxu3 }
 0x172   :  { %v1278_v23 = vpack.c.bf16 %v1242_v19, %v1242_v19  ;;  %v1424_v24 = vpack.c.bf16 %v1388_v20, %v1388_v20  ;;  %v953_v25 = vpop.f32.mrf.mxu0  ;;  %v1099_v26 = vpop.f32.mrf.mxu1  ;;  %v10467_v19 = vor.u32 %v14190_v6, %v10466_v15  ;;  %v14186_v20 = vld [vmem:[#allocation2 + $0x124] sm:$0xf] }
 0x173   :  { %v987_v29 = vpack.c.bf16 %v953_v25, %v953_v25  ;;  %v1133_v30 = vpack.c.bf16 %v1099_v26, %v1099_v26  ;;  %v14277_v25 = vld [vmem:[#allocation7 + $0x1b8] sm:$0xff]  ;;  %v14272_v15 = vld [vmem:[#allocation7 + $0x190] sm:$0xff] }
 0x174   :  { %1294 = vst [vmem:[#allocation2 + $0x84] sm:$0xf] %v1278_v23  ;;  %1536 = vmatmul.bf16.gmra.mxu0 %v14144_v21  ;;  %2645 = vmatmul.bf16.gmra.mxu1 %v10395_v31  ;;  %v10471_v21 = vor.u32 %v14186_v20, %v10468_v10  ;;  %v14261_v23 = vld [vmem:[#allocation7 + $0x138] sm:$0xff]  ;;  %v14208_v20 = vld [vmem:[#allocation2 + $0x1d0] sm:$0xf0] }
 0x175   :  { %1440 = vst [vmem:[#allocation2 + $0x88] sm:$0xf] %v1424_v24  ;;  %v14269_v24 = vld [vmem:[#allocation7 + $0x178] sm:$0xff]  ;;  %2823 = vmatpush.bf16.msrb.mxu1 %v14261_v23  ;;  %2921 = vmatpush.bf16.msrb.mxu3 %v14277_v25  ;;  %v14148_v25 = vld [vmem:[#allocation5 + $0x230] sm:$0xff] }
 0x176   :  { %1003 = vst [vmem:[#allocation2 + $0xa0] sm:$0xf] %v987_v29  ;;  %2694 = vmatmul.bf16.gmra.mxu2 %v10399_v33  ;;  %2743 = vmatmul.bf16.gmra.mxu3 %v10403_v28 }
 0x177   :  { %1149 = vst [vmem:[#allocation2 + $0xa4] sm:$0xf] %v1133_v30  ;;  %2872 = vmatpush.bf16.msrb.mxu2 %v14269_v24 }
 0x179   :  { %v1245_v34 = vpop.f32.mrf.mxu2  ;;  %v1391_v35 = vpop.f32.mrf.mxu3 }
 0x17a   :  { %v1279_v36 = vpack.c.bf16 %v1245_v34, %v1245_v34  ;;  %v1425_v37 = vpack.c.bf16 %v1391_v35, %v1391_v35  ;;  %v955_v38 = vpop.f32.mrf.mxu0  ;;  %v1101_v39 = vpop.f32.mrf.mxu1  ;;  %v14252_v34 = vld [vmem:[#allocation7 + $0xf0] sm:$0xff] }
 0x17b   :  { %v988_v40 = vpack.c.bf16 %v955_v38, %v955_v38  ;;  %v1134_v41 = vpack.c.bf16 %v1101_v39, %v1101_v39  ;;  %v14260_v35 = vld [vmem:[#allocation7 + $0x130] sm:$0xff]  ;;  %v10510_v38 = vld [vmem:[#allocation2 + $0x170] sm:$0xf]  ;;  %v14200_v39 = vld [vmem:[#allocation2 + $0x190] sm:$0xf0]  ;;  %2775 = vmatpush.bf16.msrb.mxu0 %v14252_v34 }
 0x17c   :  { %1295 = vst [vmem:[#allocation2 + $0xa8] sm:$0xf] %v1279_v36  ;;  %v14268_v36 = vld [vmem:[#allocation7 + $0x170] sm:$0xff]  ;;  %2824 = vmatpush.bf16.msrb.mxu1 %v14260_v35 }
 0x17d   :  { %1441 = vst [vmem:[#allocation2 + $0xac] sm:$0xf] %v1425_v37  ;;  %v14276_v37 = vld [vmem:[#allocation7 + $0x1b0] sm:$0xff]  ;;  %2873 = vmatpush.bf16.msrb.mxu2 %v14268_v36  ;;  %v14204_v36 = vld [vmem:[#allocation2 + $0x1b4] sm:$0xf] }
 0x17e   :  { %1004 = vst [vmem:[#allocation2 + $0xc4] sm:$0xf] %v988_v40  ;;  %2922 = vmatpush.bf16.msrb.mxu3 %v14276_v37  ;;  %v14251_v40 = vld [vmem:[#allocation7 + $0xe8] sm:$0xff] }
 0x17f   :  { %1150 = vst [vmem:[#allocation2 + $0xc8] sm:$0xf] %v1134_v41  ;;  %v14259_v41 = vld [vmem:[#allocation7 + $0x128] sm:$0xff]  ;;  %2776 = vmatpush.bf16.msrb.mxu0 %v14251_v40  ;;  %v14262_v40 = vld [vmem:[#allocation7 + $0x140] sm:$0xff] }
 0x180   :  { %2825 = vmatpush.bf16.msrb.mxu1 %v14259_v41  ;;  %v14270_v41 = vld [vmem:[#allocation7 + $0x180] sm:$0xff] }
 0x181   :  { %v1247_v45 = vpop.f32.mrf.mxu2  ;;  %v1393_v46 = vpop.f32.mrf.mxu3  ;;  %2874 = vmatpush.bf16.msrb.mxu2 %v14267_v42 }
 0x182   :  { %v1280_v49 = vpack.c.bf16 %v1247_v45, %v1247_v45  ;;  %v1426_v50 = vpack.c.bf16 %v1393_v46, %v1393_v46  ;;  %v958_v51 = vpop.f32.mrf.mxu0  ;;  %v1104_v52 = vpop.f32.mrf.mxu1  ;;  %2923 = vmatpush.bf16.msrb.mxu3 %v14275_v44 }
 0x183   :  { %v989_v55 = vpack.c.bf16 %v958_v51, %v958_v51  ;;  %v1135_v56 = vpack.c.bf16 %v1104_v52, %v1104_v52 }
 0x184   :  { %1296 = vst [vmem:[#allocation2 + $0xcc] sm:$0xf] %v1280_v49  ;;  %1541 = vmatmul.bf16.gmra.mxu0 %v14145_v47  ;;  %2650 = vmatmul.bf16.gmra.mxu1 %v10431_v57  ;;  %v14147_v47 = vld [vmem:[#allocation5 + $0x228] sm:$0xff]  ;;  %v10503_v57 = vor.u32 %v14199_v43, %v10502_v53 }
 0x185   :  { %1442 = vst [vmem:[#allocation2 + $0xd0] sm:$0xf] %v1426_v50 }
 0x186   :  { %1005 = vst [vmem:[#allocation2 + $0xe8] sm:$0xf] %v989_v55  ;;  %2699 = vmatmul.bf16.gmra.mxu2 %v10435_v59  ;;  %2748 = vmatmul.bf16.gmra.mxu3 %v10439_v54  ;;  %v10511_v54 = vor.u32 %v14200_v39, %v10510_v38  ;;  %v10507_v59 = vor.u32 %v14195_v58, %v10504_v48  ;;  %v14246_v38 = vld [vmem:[#allocation7 + $0xc0] sm:$0xff] }
 0x187   :  { %1151 = vst [vmem:[#allocation2 + $0xec] sm:$0xf] %v1135_v56  ;;  %v14254_v39 = vld [vmem:[#allocation7 + $0x100] sm:$0xff] }
 0x189   :  { %v1250_v60 = vpop.f32.mrf.mxu2  ;;  %v1396_v61 = vpop.f32.mrf.mxu3 }
 0x18a   :  { %v1281_v62 = vpack.c.bf16 %v1250_v60, %v1250_v60  ;;  %v1427_v63 = vpack.c.bf16 %v1396_v61, %v1396_v61  ;;  %v960_v0 = vpop.f32.mrf.mxu0  ;;  %v1106_v1 = vpop.f32.mrf.mxu1  ;;  %v14250_v60 = vld [vmem:[#allocation7 + $0xe0] sm:$0xff] }
 0x18b   :  { %v990_v2 = vpack.c.bf16 %v960_v0, %v960_v0  ;;  %v1136_v3 = vpack.c.bf16 %v1106_v1, %v1106_v1  ;;  %v14258_v61 = vld [vmem:[#allocation7 + $0x120] sm:$0xff]  ;;  %2777 = vmatpush.bf16.msrb.mxu0 %v14250_v60  ;;  %v14249_v0 = vld [vmem:[#allocation7 + $0xd8] sm:$0xff] }
 0x18c   :  { %1297 = vst [vmem:[#allocation2 + $0xf0] sm:$0xf] %v1281_v62  ;;  %v14266_v62 = vld [vmem:[#allocation7 + $0x160] sm:$0xff]  ;;  %2826 = vmatpush.bf16.msrb.mxu1 %v14258_v61  ;;  %v14257_v1 = vld [vmem:[#allocation7 + $0x118] sm:$0xff]  ;;  %v10574_v61 = vld [vmem:[#allocation2 + $0x1f8] sm:$0xf] }
 0x18d   :  { %1443 = vst [vmem:[#allocation2 + $0xf4] sm:$0xf] %v1427_v63  ;;  %v14274_v63 = vld [vmem:[#allocation7 + $0x1a0] sm:$0xff]  ;;  %2875 = vmatpush.bf16.msrb.mxu2 %v14266_v62 }
 0x18e   :  { %1006 = vst [vmem:[#allocation2 + $0x10c] sm:$0xf] %v990_v2  ;;  %2924 = vmatpush.bf16.msrb.mxu3 %v14274_v63  ;;  %v14265_v2 = vld [vmem:[#allocation7 + $0x158] sm:$0xff] }
 0x18f   :  { %1152 = vst [vmem:[#allocation2 + $0x110] sm:$0xf] %v1136_v3  ;;  %v14273_v3 = vld [vmem:[#allocation7 + $0x198] sm:$0xff]  ;;  %2778 = vmatpush.bf16.msrb.mxu0 %v14249_v0 }
 0x190   :  { %2827 = vmatpush.bf16.msrb.mxu1 %v14257_v1 }
 0x191   :  { %v1252_v7 = vpop.f32.mrf.mxu2  ;;  %v1398_v8 = vpop.f32.mrf.mxu3  ;;  %2876 = vmatpush.bf16.msrb.mxu2 %v14265_v2  ;;  %v14213_v2 = vld [vmem:[#allocation2 + $0x1fc] sm:$0xf] }
 0x192   :  { %v1282_v11 = vpack.c.bf16 %v1252_v7, %v1252_v7  ;;  %v1428_v12 = vpack.c.bf16 %v1398_v8, %v1398_v8  ;;  %v963_v13 = vpop.f32.mrf.mxu0  ;;  %v1109_v14 = vpop.f32.mrf.mxu1  ;;  %2925 = vmatpush.bf16.msrb.mxu3 %v14273_v3 }
 0x193   :  { %v991_v17 = vpack.c.bf16 %v963_v13, %v963_v13  ;;  %v1137_v18 = vpack.c.bf16 %v1109_v14, %v1109_v14  ;;  %v14256_v13 = vld [vmem:[#allocation7 + $0x110] sm:$0xff] }
 0x194   :  { %1298 = vst [vmem:[#allocation2 + $0x114] sm:$0xf] %v1282_v11  ;;  %1546 = vmatmul.bf16.gmra.mxu0 %v14146_v9  ;;  %2655 = vmatmul.bf16.gmra.mxu1 %v10467_v19  ;;  %v14264_v14 = vld [vmem:[#allocation7 + $0x150] sm:$0xff]  ;;  %v14255_v19 = vld [vmem:[#allocation7 + $0x108] sm:$0xff] }
 0x195   :  { %1444 = vst [vmem:[#allocation2 + $0x118] sm:$0xf] %v1428_v12  ;;  %v14248_v12 = vld [vmem:[#allocation7 + $0xd0] sm:$0xff]  ;;  %2828 = vmatpush.bf16.msrb.mxu1 %v14256_v13  ;;  %2877 = vmatpush.bf16.msrb.mxu2 %v14264_v14  ;;  %v14157_v13 = vld [vmem:[#allocation2 + $0x38] sm:$0xf0] }
 0x196   :  { %1007 = vst [vmem:[#allocation2 + $0x130] sm:$0xf] %v991_v17  ;;  %2704 = vmatmul.bf16.gmra.mxu2 %v10471_v21  ;;  %2753 = vmatmul.bf16.gmra.mxu3 %v10475_v16  ;;  %v10546_v16 = vld [vmem:[#allocation2 + $0x1b8] sm:$0xf]  ;;  %v14209_v17 = vld [vmem:[#allocation2 + $0x1d8] sm:$0xf0] }
 0x197   :  { %1153 = vst [vmem:[#allocation2 + $0x134] sm:$0xf] %v1137_v18  ;;  %2779 = vmatpush.bf16.msrb.mxu0 %v14248_v12  ;;  %v14247_v18 = vld [vmem:[#allocation7 + $0xc8] sm:$0xff]  ;;  %2926 = vmatpush.bf16.msrb.mxu3 %v14272_v15  ;;  %v14151_v14 = vld [vmem:[#allocation2 + $0xc] sm:$0xf] }
 0x198   :  { %v14263_v21 = vld [vmem:[#allocation7 + $0x148] sm:$0xff]  ;;  %v10332_v15 = vld [vmem:[#allocation2 + $0x2c] sm:$0xf0] }
 0x199   :  { %v1255_v26 = vpop.f32.mrf.mxu2  ;;  %v1401_v27 = vpop.f32.mrf.mxu3  ;;  %2829 = vmatpush.bf16.msrb.mxu1 %v14255_v19  ;;  %2878 = vmatpush.bf16.msrb.mxu2 %v14263_v21  ;;  %v10346_v12 = vld [vmem:[#allocation2 + $0x18] sm:$0xf] }
 0x19a   :  { %v1283_v28 = vpack.c.bf16 %v1255_v26, %v1255_v26  ;;  %v1429_v29 = vpack.c.bf16 %v1401_v27, %v1401_v27  ;;  %v965_v30 = vpop.f32.mrf.mxu0  ;;  %v1111_v31 = vpop.f32.mrf.mxu1  ;;  %v10540_v26 = vld [vmem:[#allocation2 + $0x1d4] sm:$0xf0] }
 0x19b   :  { %v992_v32 = vpack.c.bf16 %v965_v30, %v965_v30  ;;  %v1138_v33 = vpack.c.bf16 %v1111_v31, %v1111_v31  ;;  %v10538_v31 = vld [vmem:[#allocation2 + $0x1b0] sm:$0xf]  ;;  %2780 = vmatpush.bf16.msrb.mxu0 %v14247_v18  ;;  %v10543_v37 = vor.u32 %v14204_v36, %v10540_v26  ;;  %2927 = vmatpush.bf16.msrb.mxu3 %v14271_v22  ;;  %v10340_v19 = vld [vmem:[#allocation2 + $0x34] sm:$0xf0] }
 0x19c   :  { %1299 = vst [vmem:[#allocation2 + $0x138] sm:$0xf] %v1283_v28  ;;  %v10539_v35 = vor.u32 %v14208_v20, %v10538_v31 }
 0x19d   :  { %1445 = vst [vmem:[#allocation2 + $0x13c] sm:$0xf] %v1429_v29  ;;  %2830 = vmatpush.bf16.msrb.mxu1 %v14254_v39  ;;  %2879 = vmatpush.bf16.msrb.mxu2 %v14262_v40  ;;  %v10382_v40 = vld [vmem:[#allocation2 + $0x60] sm:$0xf] }
 0x19e   :  { %1008 = vst [vmem:[#allocation2 + $0x154] sm:$0xf] %v992_v32  ;;  %v10547_v32 = vor.u32 %v14209_v17, %v10546_v16  ;;  %v14156_v16 = vld [vmem:[#allocation2 + $0x30] sm:$0xf0] }
 0x19f   :  { %1154 = vst [vmem:[#allocation2 + $0x158] sm:$0xf] %v1138_v33  ;;  %2781 = vmatpush.bf16.msrb.mxu0 %v14246_v38  ;;  %2928 = vmatpush.bf16.msrb.mxu3 %v14270_v41  ;;  %v14166_v41 = vld [vmem:[#allocation2 + $0x80] sm:$0xf0] }
 0x1a1   :  { %v1257_v45 = vpop.f32.mrf.mxu2  ;;  %v1403_v46 = vpop.f32.mrf.mxu3 }
 0x1a2   :  { %v1284_v49 = vpack.c.bf16 %v1257_v45, %v1257_v45  ;;  %v1430_v50 = vpack.c.bf16 %v1403_v46, %v1403_v46  ;;  %v968_v51 = vpop.f32.mrf.mxu0  ;;  %v1114_v52 = vpop.f32.mrf.mxu1 }
 0x1a3   :  { %v993_v55 = vpack.c.bf16 %v968_v51, %v968_v51  ;;  %v1139_v56 = vpack.c.bf16 %v1114_v52, %v1114_v52  ;;  %v14218_v51 = vld [vmem:[#allocation2 + $0x220] sm:$0xf0]  ;;  %v14217_v52 = vld [vmem:[#allocation2 + $0x218] sm:$0xf0] }
 0x1a4   :  { %1300 = vst [vmem:[#allocation2 + $0x15c] sm:$0xf] %v1284_v49  ;;  %1551 = vmatmul.bf16.gmra.mxu0 %v14147_v47  ;;  %2660 = vmatmul.bf16.gmra.mxu1 %v10503_v57  ;;  %v10575_v1 = vor.u32 %v14217_v52, %v10574_v61  ;;  %v10374_v52 = vld [vmem:[#allocation2 + $0x58] sm:$0xf] }
 0x1a5   :  { %1446 = vst [vmem:[#allocation2 + $0x160] sm:$0xf] %v1430_v50  ;;  %v10582_v50 = vld [vmem:[#allocation2 + $0x200] sm:$0xf] }
 0x1a6   :  { %1009 = vst [vmem:[#allocation2 + $0x178] sm:$0xf] %v993_v55  ;;  %2709 = vmatmul.bf16.gmra.mxu2 %v10507_v59  ;;  %2758 = vmatmul.bf16.gmra.mxu3 %v10511_v54  ;;  %v14149_v55 = vld [vmem:[#allocation5 + $0x238] sm:$0xff]  ;;  %v10583_v62 = vor.u32 %v14218_v51, %v10582_v50 }
 0x1a7   :  { %1155 = vst [vmem:[#allocation2 + $0x17c] sm:$0xf] %v1139_v56  ;;  %v10576_v56 = vld [vmem:[#allocation2 + $0x21c] sm:$0xf0] }
 0x1a8   :  { %v10579_v3 = vor.u32 %v14213_v2, %v10576_v56 }
 0x1a9   :  { %v1260_v4 = vpop.f32.mrf.mxu2  ;;  %v1406_v5 = vpop.f32.mrf.mxu3 }
 0x1aa   :  { %v1285_v6 = vpack.c.bf16 %v1260_v4, %v1260_v4  ;;  %v1431_v7 = vpack.c.bf16 %v1406_v5, %v1406_v5  ;;  %v970_v8 = vpop.f32.mrf.mxu0  ;;  %v1116_v9 = vpop.f32.mrf.mxu1 }
 0x1ab   :  { %v994_v10 = vpack.c.bf16 %v970_v8, %v970_v8  ;;  %v1140_v11 = vpack.c.bf16 %v1116_v9, %v1116_v9 }
 0x1ac   :  { %1301 = vst [vmem:[#allocation2 + $0x180] sm:$0xf] %v1285_v6 }
 0x1ad   :  { %1447 = vst [vmem:[#allocation2 + $0x184] sm:$0xf] %v1431_v7 }
 0x1ae   :  { %1010 = vst [vmem:[#allocation2 + $0x19c] sm:$0xf] %v994_v10 }
 0x1af   :  { %1156 = vst [vmem:[#allocation2 + $0x1a0] sm:$0xf] %v1140_v11 }
 0x1b1   :  { %v1262_v23 = vpop.f32.mrf.mxu2  ;;  %v1408_v24 = vpop.f32.mrf.mxu3 }
 0x1b2   :  { %v1286_v27 = vpack.c.bf16 %v1262_v23, %v1262_v23  ;;  %v1432_v28 = vpack.c.bf16 %v1408_v24, %v1408_v24  ;;  %v973_v29 = vpop.f32.mrf.mxu0  ;;  %v1119_v30 = vpop.f32.mrf.mxu1  ;;  %v10338_v24 = vld [vmem:[#allocation2 + $0x10] sm:$0xf] }
 0x1b3   :  { %v995_v33 = vpack.c.bf16 %v973_v29, %v973_v29  ;;  %v1141_v34 = vpack.c.bf16 %v1119_v30, %v1119_v30  ;;  %v14152_v29 = vld [vmem:[#allocation2 + $0x14] sm:$0xf]  ;;  %v15658_v30 = vld [vmem:[#allocation9] ss:$0 sm:$0xff] }
 0x1b4   :  { %1302 = vst [vmem:[#allocation2 + $0x1a4] sm:$0xf] %v1286_v27  ;;  %1556 = vmatmul.bf16.gmra.mxu0 %v14148_v25  ;;  %2665 = vmatmul.bf16.gmra.mxu1 %v10539_v35  ;;  %v10347_v25 = vor.u32 %v14157_v13, %v10346_v12  ;;  %v10335_v27 = vor.u32 %v14151_v14, %v10332_v15  ;;  %v10412_v12 = vld [vmem:[#allocation2 + $0xc4] sm:$0xf0] }
 0x1b5   :  { %1448 = vst [vmem:[#allocation2 + $0x1a8] sm:$0xf] %v1432_v28  ;;  %v10339_v28 = vor.u32 %v14156_v16, %v10338_v24  ;;  %v10343_v31 = vor.u32 %v14152_v29, %v10340_v19  ;;  %v10410_v16 = vld [vmem:[#allocation2 + $0xa0] sm:$0xf] }
 0x1b6   :  { %1011 = vst [vmem:[#allocation2 + $0x1c0] sm:$0xf] %v995_v33  ;;  %2714 = vmatmul.bf16.gmra.mxu2 %v10543_v37  ;;  %2763 = vmatmul.bf16.gmra.mxu3 %v10547_v32 }
 0x1b7   :  { %1157 = vst [vmem:[#allocation2 + $0x1c4] sm:$0xf] %v1141_v34 }
 0x1b9   :  { %v1265_v42 = vpop.f32.mrf.mxu2  ;;  %v1411_v43 = vpop.f32.mrf.mxu3 }
 0x1ba   :  { %v1287_v44 = vpack.c.bf16 %v1265_v42, %v1265_v42  ;;  %v1433_v45 = vpack.c.bf16 %v1411_v43, %v1411_v43  ;;  %v975_v46 = vpop.f32.mrf.mxu0  ;;  %v1121_v47 = vpop.f32.mrf.mxu1  ;;  %v14160_v43 = vld [vmem:[#allocation2 + $0x54] sm:$0xf] }
 0x1bb   :  { %v996_v48 = vpack.c.bf16 %v975_v46, %v975_v46  ;;  %v1142_v49 = vpack.c.bf16 %v1121_v47, %v1121_v47 }
 0x1bc   :  { %1303 = vst [vmem:[#allocation2 + $0x1c8] sm:$0xf] %v1287_v44  ;;  %v10368_v44 = vld [vmem:[#allocation2 + $0x74] sm:$0xf0] }
 0x1bd   :  { %1449 = vst [vmem:[#allocation2 + $0x1cc] sm:$0xf] %v1433_v45  ;;  %v14165_v45 = vld [vmem:[#allocation2 + $0x78] sm:$0xf0] }
 0x1be   :  { %1012 = vst [vmem:[#allocation2 + $0x1e4] sm:$0xf] %v996_v48  ;;  %v10376_v48 = vld [vmem:[#allocation2 + $0x7c] sm:$0xf0]  ;;  %v10375_v56 = vor.u32 %v14165_v45, %v10374_v52 }
 0x1bf   :  { %1158 = vst [vmem:[#allocation2 + $0x1e8] sm:$0xf] %v1142_v49 }
 0x1c1   :  { %v1267_v53 = vpop.f32.mrf.mxu2  ;;  %v1413_v54 = vpop.f32.mrf.mxu3 }
 0x1c2   :  { %v1288_v57 = vpack.c.bf16 %v1267_v53, %v1267_v53  ;;  %v1434_v58 = vpack.c.bf16 %v1413_v54, %v1413_v54  ;;  %v978_v59 = vpop.f32.mrf.mxu0  ;;  %v1124_v60 = vpop.f32.mrf.mxu1  ;;  %v10383_v53 = vor.u32 %v14166_v41, %v10382_v40 }
 0x1c3   :  { %v997_v63 = vpack.c.bf16 %v978_v59, %v978_v59  ;;  %v1143_v0 = vpack.c.bf16 %v1124_v60, %v1124_v60 }
 0x1c4   :  { %1304 = vst [vmem:[#allocation2 + $0x1ec] sm:$0xf] %v1288_v57  ;;  %1561 = vmatmul.bf16.gmra.mxu0 %v14149_v55  ;;  %2670 = vmatmul.bf16.gmra.mxu1 %v10575_v1  ;;  %v10371_v55 = vor.u32 %v14160_v43, %v10368_v44  ;;  %v14161_v57 = vld [vmem:[#allocation2 + $0x5c] sm:$0xf] }
 0x1c5   :  { %1450 = vst [vmem:[#allocation2 + $0x1f0] sm:$0xf] %v1434_v58  ;;  %v10379_v59 = vor.u32 %v14161_v57, %v10376_v48 }
 0x1c6   :  { %1013 = vst [vmem:[#allocation2 + $0x208] sm:$0xf] %v997_v63  ;;  %2719 = vmatmul.bf16.gmra.mxu2 %v10579_v3  ;;  %2768 = vmatmul.bf16.gmra.mxu3 %v10583_v62 }
 0x1c7   :  { %1159 = vst [vmem:[#allocation2 + $0x20c] sm:$0xf] %v1143_v0 }
 0x1c9   :  { %v1270_v4 = vpop.f32.mrf.mxu2  ;;  %v1416_v5 = vpop.f32.mrf.mxu3 }
 0x1ca   :  { %v1289_v6 = vpack.c.bf16 %v1270_v4, %v1270_v4  ;;  %v1435_v7 = vpack.c.bf16 %v1416_v5, %v1416_v5  ;;  %v980_v8 = vpop.f32.mrf.mxu0  ;;  %v1126_v9 = vpop.f32.mrf.mxu1  ;;  %v10418_v4 = vld [vmem:[#allocation2 + $0xa8] sm:$0xf]  ;;  %v14175_v5 = vld [vmem:[#allocation2 + $0xc8] sm:$0xf0] }
 0x1cb   :  { %v998_v10 = vpack.c.bf16 %v980_v8, %v980_v8  ;;  %v1144_v11 = vpack.c.bf16 %v1126_v9, %v1126_v9  ;;  %v10404_v8 = vld [vmem:[#allocation2 + $0xbc] sm:$0xf0]  ;;  %v14174_v9 = vld [vmem:[#allocation2 + $0xc0] sm:$0xf0] }
 0x1cc   :  { %1305 = vst [vmem:[#allocation2 + $0x210] sm:$0xf] %v1289_v6 }
 0x1cd   :  { %1451 = vst [vmem:[#allocation2 + $0x214] sm:$0xf] %v1435_v7  ;;  %v14169_v7 = vld [vmem:[#allocation2 + $0x9c] sm:$0xf] }
 0x1ce   :  { %1014 = vst [vmem:[#allocation2 + $0x22c] sm:$0xf] %v998_v10  ;;  %v10407_v19 = vor.u32 %v14169_v7, %v10404_v8  ;;  %v10484_v8 = vld [vmem:[#allocation2 + $0x154] sm:$0xf0] }
 0x1cf   :  { %1160 = vst [vmem:[#allocation2 + $0x230] sm:$0xf] %v1144_v11 }
 0x1d1   :  { %v1272_v17 = vpop.f32.mrf.mxu2  ;;  %v1418_v18 = vpop.f32.mrf.mxu3 }
 0x1d2   :  { %v1290_v20 = vpack.c.bf16 %v1272_v17, %v1272_v17  ;;  %v1436_v21 = vpack.c.bf16 %v1418_v18, %v1418_v18  ;;  %v1527_v22 = vpop.f32.mrf.mxu0  ;;  %v2636_v23 = vpop.f32.mrf.mxu1  ;;  %v10419_v17 = vor.u32 %v14175_v5, %v10418_v4  ;;  %v10476_v4 = vld [vmem:[#allocation2 + $0x14c] sm:$0xf0]  ;;  %v14192_v5 = vld [vmem:[#allocation2 + $0x150] sm:$0xf0] }
 0x1d3   :  { %v1567_v26 = vpack.c.bf16 %v1527_v22, %v1527_v22  ;;  %v2637_v32 = vadd.f32 %v15658_v30, %v2636_v23 }
 0x1d4   :  { %1306 = vst [vmem:[#allocation2 + $0x234] sm:$0xf] %v1290_v20  ;;  %2782 = vmatmul.bf16.vlgmr.msrb.gmra.mxu0 %v10335_v27  ;;  %2831 = vmatmul.bf16.vlgmr.msrb.gmra.mxu1 %v10339_v28  ;;  %v10411_v20 = vor.u32 %v14174_v9, %v10410_v16 }
 0x1d5   :  { %1452 = vst [vmem:[#allocation2 + $0x238] sm:$0xf] %v1436_v21  ;;  %v14170_v21 = vld [vmem:[#allocation2 + $0xa4] sm:$0xf] }
 0x1d6   :  { %1583 = vst [vmem:[#allocation2 + $0x20] sm:$0xf] %v1567_v26  ;;  %2880 = vmatmul.bf16.vlgmr.msrb.gmra.mxu2 %v10343_v31  ;;  %2929 = vmatmul.bf16.vlgmr.msrb.gmra.mxu3 %v10347_v25  ;;  %v10415_v23 = vor.u32 %v14170_v21, %v10412_v12  ;;  %v10482_v12 = vld [vmem:[#allocation2 + $0x130] sm:$0xf]  ;;  %v14293_v21 = vld [vmem:[#allocation7 + $0x238] sm:$0xff] }
 0x1d7   :  { %v10483_v16 = vor.u32 %v14192_v5, %v10482_v12  ;;  %3019 = vmatpush.bf16.msra.mxu1 %v14293_v21  ;;  %v14287_v12 = vld [vmem:[#allocation7 + $0x208] sm:$0xff] }
 0x1d9   :  { %v2685_v33 = vpop.f32.mrf.mxu2  ;;  %v2734_v34 = vpop.f32.mrf.mxu3 }
 0x1da   :  { %v2686_v35 = vadd.f32 %v2685_v33, %v2637_v32  ;;  %v1529_v36 = vpop.f32.mrf.mxu0  ;;  %v2638_v37 = vpop.f32.mrf.mxu1  ;;  %v10454_v33 = vld [vmem:[#allocation2 + $0xf0] sm:$0xf] }
 0x1db   :  { %v1568_v38 = vpack.c.bf16 %v1529_v36, %v1529_v36  ;;  %v2639_v42 = vadd.f32 %v15658_v30, %v2638_v37  ;;  %v14178_v36 = vld [vmem:[#allocation2 + $0xe4] sm:$0xf]  ;;  %v10440_v37 = vld [vmem:[#allocation2 + $0x104] sm:$0xf0] }
 0x1dc   :  { %v15661_v39 = vadd.f32 %v2734_v34, %v2686_v35  ;;  %v14184_v34 = vld [vmem:[#allocation2 + $0x110] sm:$0xf0] }
 0x1dd   :  { %1584 = vst [vmem:[#allocation2 + $0x44] sm:$0xf] %v1568_v38  ;;  %v14183_v38 = vld [vmem:[#allocation2 + $0x108] sm:$0xf0] }
 0x1e1   :  { %v2687_v46 = vpop.f32.mrf.mxu2  ;;  %v2736_v47 = vpop.f32.mrf.mxu3 }
 0x1e2   :  { %v2688_v49 = vadd.f32 %v2687_v46, %v2639_v42  ;;  %v1532_v50 = vpop.f32.mrf.mxu0  ;;  %v2641_v51 = vpop.f32.mrf.mxu1  ;;  %v10448_v42 = vld [vmem:[#allocation2 + $0x10c] sm:$0xf0]  ;;  %v10446_v46 = vld [vmem:[#allocation2 + $0xe8] sm:$0xf] }
 0x1e3   :  { %v1569_v54 = vpack.c.bf16 %v1532_v50, %v1532_v50  ;;  %v2642_v60 = vadd.f32 %v15658_v30, %v2641_v51  ;;  %v10447_v50 = vor.u32 %v14183_v38, %v10446_v46  ;;  %v14179_v51 = vld [vmem:[#allocation2 + $0xec] sm:$0xf]  ;;  %v14202_v38 = vld [vmem:[#allocation2 + $0x1a0] sm:$0xf0] }
 0x1e4   :  { %v15664_v58 = vadd.f32 %v2736_v47, %v2688_v49  ;;  %2787 = vmatmul.bf16.gmra.mxu0 %v10371_v55  ;;  %2836 = vmatmul.bf16.gmra.mxu1 %v10375_v56  ;;  %v10455_v47 = vor.u32 %v14184_v34, %v10454_v33  ;;  %v10443_v49 = vor.u32 %v14178_v36, %v10440_v37  ;;  %v14284_v33 = vld [vmem:[#allocation7 + $0x1f0] sm:$0xff]  ;;  %v14291_v36 = vld [vmem:[#allocation7 + $0x228] sm:$0xff] }
 0x1e5   :  { %1585 = vst [vmem:[#allocation2 + $0x68] sm:$0xf] %v1569_v54  ;;  %v14292_v34 = vld [vmem:[#allocation7 + $0x230] sm:$0xff] }
 0x1e6   :  { %2885 = vmatmul.bf16.gmra.mxu2 %v10379_v59  ;;  %2934 = vmatmul.bf16.gmra.mxu3 %v10383_v53  ;;  %v10451_v53 = vor.u32 %v14179_v51, %v10448_v42  ;;  %v10526_v37 = vld [vmem:[#allocation2 + $0x180] sm:$0xf]  ;;  %v14201_v42 = vld [vmem:[#allocation2 + $0x198] sm:$0xf0] }
 0x1e7   :  { %3020 = vmatpush.bf16.msra.mxu1 %v14292_v34  ;;  %v14278_v34 = vld [vmem:[#allocation7 + $0x1c0] sm:$0xff] }
 0x1e9   :  { %v2690_v61 = vpop.f32.mrf.mxu2  ;;  %v2739_v62 = vpop.f32.mrf.mxu3 }
 0x1ea   :  { %v2691_v63 = vadd.f32 %v2690_v61, %v2642_v60  ;;  %v1534_v0 = vpop.f32.mrf.mxu0  ;;  %v2643_v1 = vpop.f32.mrf.mxu1 }
 0x1eb   :  { %v1570_v2 = vpack.c.bf16 %v1534_v0, %v1534_v0  ;;  %v2644_v6 = vadd.f32 %v15658_v30, %v2643_v1  ;;  %v14193_v0 = vld [vmem:[#allocation2 + $0x158] sm:$0xf0]  ;;  %3021 = vmatpush.bf16.msra.mxu1 %v14291_v36 }
 0x1ec   :  { %v15667_v3 = vadd.f32 %v2739_v62, %v2691_v63  ;;  %v10490_v63 = vld [vmem:[#allocation2 + $0x138] sm:$0xf] }
 0x1ed   :  { %1586 = vst [vmem:[#allocation2 + $0x8c] sm:$0xf] %v1570_v2  ;;  %v14187_v2 = vld [vmem:[#allocation2 + $0x12c] sm:$0xf] }
 0x1f1   :  { %v2692_v10 = vpop.f32.mrf.mxu2  ;;  %v2741_v11 = vpop.f32.mrf.mxu3 }
 0x1f2   :  { %v2693_v13 = vadd.f32 %v2692_v10, %v2644_v6  ;;  %v1537_v14 = vpop.f32.mrf.mxu0  ;;  %v2646_v15 = vpop.f32.mrf.mxu1 }
 0x1f3   :  { %v1571_v18 = vpack.c.bf16 %v1537_v14, %v1537_v14  ;;  %v2647_v24 = vadd.f32 %v15658_v30, %v2646_v15  ;;  %v10479_v15 = vor.u32 %v14187_v2, %v10476_v4 }
 0x1f4   :  { %v15670_v22 = vadd.f32 %v2741_v11, %v2693_v13  ;;  %2792 = vmatmul.bf16.gmra.mxu0 %v10407_v19  ;;  %2841 = vmatmul.bf16.gmra.mxu1 %v10411_v20  ;;  %v10491_v13 = vor.u32 %v14193_v0, %v10490_v63  ;;  %v14285_v20 = vld [vmem:[#allocation7 + $0x1f8] sm:$0xff] }
 0x1f5   :  { %1587 = vst [vmem:[#allocation2 + $0xb0] sm:$0xf] %v1571_v18  ;;  %2970 = vmatpush.bf16.msra.mxu0 %v14285_v20 }
 0x1f6   :  { %2890 = vmatmul.bf16.gmra.mxu2 %v10415_v23  ;;  %2939 = vmatmul.bf16.gmra.mxu3 %v10419_v17  ;;  %v14188_v17 = vld [vmem:[#allocation2 + $0x134] sm:$0xf] }
 0x1f7   :  { %v10487_v19 = vor.u32 %v14188_v17, %v10484_v8  ;;  %v14288_v8 = vld [vmem:[#allocation7 + $0x210] sm:$0xff] }
 0x1f9   :  { %v2695_v25 = vpop.f32.mrf.mxu2  ;;  %v2744_v26 = vpop.f32.mrf.mxu3  ;;  %2971 = vmatpush.bf16.msra.mxu0 %v14284_v33 }
 0x1fa   :  { %v2696_v27 = vadd.f32 %v2695_v25, %v2647_v24  ;;  %v1539_v28 = vpop.f32.mrf.mxu0  ;;  %v2648_v29 = vpop.f32.mrf.mxu1 }
 0x1fb   :  { %v1572_v31 = vpack.c.bf16 %v1539_v28, %v1539_v28  ;;  %v2649_v35 = vadd.f32 %v15658_v30, %v2648_v29 }
 0x1fc   :  { %v15673_v32 = vadd.f32 %v2744_v26, %v2696_v27 }
 0x1fd   :  { %1588 = vst [vmem:[#allocation2 + $0xd4] sm:$0xf] %v1572_v31 }
 0x201   :  { %v2697_v40 = vpop.f32.mrf.mxu2  ;;  %v2746_v41 = vpop.f32.mrf.mxu3 }
 0x202   :  { %v2698_v43 = vadd.f32 %v2697_v40, %v2649_v35  ;;  %v1542_v44 = vpop.f32.mrf.mxu0  ;;  %v2651_v45 = vpop.f32.mrf.mxu1  ;;  %v14283_v35 = vld [vmem:[#allocation7 + $0x1e8] sm:$0xff]  ;;  %v14196_v40 = vld [vmem:[#allocation2 + $0x174] sm:$0xf] }
 0x203   :  { %v1573_v48 = vpack.c.bf16 %v1542_v44, %v1542_v44  ;;  %v2652_v54 = vadd.f32 %v15658_v30, %v2651_v45  ;;  %v10520_v45 = vld [vmem:[#allocation2 + $0x19c] sm:$0xf0]  ;;  %2972 = vmatpush.bf16.msra.mxu0 %v14283_v35  ;;  %v14286_v35 = vld [vmem:[#allocation7 + $0x200] sm:$0xff] }
 0x204   :  { %v15676_v52 = vadd.f32 %v2746_v41, %v2698_v43  ;;  %2797 = vmatmul.bf16.gmra.mxu0 %v10443_v49  ;;  %2846 = vmatmul.bf16.gmra.mxu1 %v10447_v50  ;;  %v10512_v41 = vld [vmem:[#allocation2 + $0x194] sm:$0xf0]  ;;  %v10527_v49 = vor.u32 %v14202_v38, %v10526_v37 }
 0x205   :  { %1589 = vst [vmem:[#allocation2 + $0xf8] sm:$0xf] %v1573_v48  ;;  %v10518_v48 = vld [vmem:[#allocation2 + $0x178] sm:$0xf]  ;;  %v10515_v51 = vor.u32 %v14196_v40, %v10512_v41 }
 0x206   :  { %2895 = vmatmul.bf16.gmra.mxu2 %v10451_v53  ;;  %2944 = vmatmul.bf16.gmra.mxu3 %v10455_v47  ;;  %v10519_v53 = vor.u32 %v14201_v42, %v10518_v48  ;;  %v14220_v48 = vld [vmem:[#allocation2 + $0x230] sm:$0xf0] }
 0x209   :  { %v2700_v55 = vpop.f32.mrf.mxu2  ;;  %v2749_v56 = vpop.f32.mrf.mxu3 }
 0x20a   :  { %v2701_v57 = vadd.f32 %v2700_v55, %v2652_v54  ;;  %v1544_v59 = vpop.f32.mrf.mxu0  ;;  %v2653_v60 = vpop.f32.mrf.mxu1  ;;  %v14197_v54 = vld [vmem:[#allocation2 + $0x17c] sm:$0xf] }
 0x20b   :  { %v1574_v61 = vpack.c.bf16 %v1544_v59, %v1544_v59  ;;  %v2654_v1 = vadd.f32 %v15658_v30, %v2653_v60  ;;  %v10523_v55 = vor.u32 %v14197_v54, %v10520_v45  ;;  %v14281_v59 = vld [vmem:[#allocation7 + $0x1d8] sm:$0xff] }
 0x20c   :  { %v15679_v62 = vadd.f32 %v2749_v56, %v2701_v57  ;;  %v14282_v56 = vld [vmem:[#allocation7 + $0x1e0] sm:$0xff]  ;;  %v14289_v60 = vld [vmem:[#allocation7 + $0x218] sm:$0xff] }
 0x20d   :  { %1590 = vst [vmem:[#allocation2 + $0x11c] sm:$0xf] %v1574_v61  ;;  %v14290_v57 = vld [vmem:[#allocation7 + $0x220] sm:$0xff]  ;;  %2973 = vmatpush.bf16.msra.mxu0 %v14282_v56 }
 0x20e   :  { %3022 = vmatpush.bf16.msra.mxu1 %v14290_v57 }
 0x211   :  { %v2702_v6 = vpop.f32.mrf.mxu2  ;;  %v2751_v7 = vpop.f32.mrf.mxu3  ;;  %2974 = vmatpush.bf16.msra.mxu0 %v14281_v59  ;;  %v10590_v59 = vld [vmem:[#allocation2 + $0x208] sm:$0xf] }
 0x212   :  { %v2703_v9 = vadd.f32 %v2702_v6, %v2654_v1  ;;  %v1547_v10 = vpop.f32.mrf.mxu0  ;;  %v2656_v11 = vpop.f32.mrf.mxu1  ;;  %3023 = vmatpush.bf16.msra.mxu1 %v14289_v60 }
 0x213   :  { %v1575_v14 = vpack.c.bf16 %v1547_v10, %v1547_v10  ;;  %v2657_v23 = vadd.f32 %v15658_v30, %v2656_v11  ;;  %v14211_v10 = vld [vmem:[#allocation2 + $0x1e8] sm:$0xf0]  ;;  %v14279_v11 = vld [vmem:[#allocation7 + $0x1c8] sm:$0xff] }
 0x214   :  { %v15682_v18 = vadd.f32 %v2751_v7, %v2703_v9  ;;  %2802 = vmatmul.bf16.gmra.mxu0 %v10479_v15  ;;  %2851 = vmatmul.bf16.gmra.mxu1 %v10483_v16  ;;  %v14280_v7 = vld [vmem:[#allocation7 + $0x1d0] sm:$0xff]  ;;  %v10562_v9 = vld [vmem:[#allocation2 + $0x1c8] sm:$0xf] }
 0x215   :  { %1591 = vst [vmem:[#allocation2 + $0x140] sm:$0xf] %v1575_v14  ;;  %2975 = vmatpush.bf16.msra.mxu0 %v14280_v7  ;;  %v10548_v14 = vld [vmem:[#allocation2 + $0x1dc] sm:$0xf0]  ;;  %v14210_v15 = vld [vmem:[#allocation2 + $0x1e0] sm:$0xf0] }
 0x216   :  { %2900 = vmatmul.bf16.gmra.mxu2 %v10487_v19  ;;  %2949 = vmatmul.bf16.gmra.mxu3 %v10491_v13  ;;  %v14205_v13 = vld [vmem:[#allocation2 + $0x1bc] sm:$0xf]  ;;  %v10556_v19 = vld [vmem:[#allocation2 + $0x1e4] sm:$0xf0] }
 0x217   :  { %3024 = vmatpush.bf16.msra.mxu1 %v14288_v8 }
 0x219   :  { %v2705_v24 = vpop.f32.mrf.mxu2  ;;  %v2754_v25 = vpop.f32.mrf.mxu3  ;;  %2976 = vmatpush.bf16.msra.mxu0 %v14279_v11 }
 0x21a   :  { %v2706_v26 = vadd.f32 %v2705_v24, %v2657_v23  ;;  %v1549_v27 = vpop.f32.mrf.mxu0  ;;  %v15685_v28 = vpop.f32.mrf.mxu1  ;;  %v10554_v23 = vld [vmem:[#allocation2 + $0x1c0] sm:$0xf]  ;;  %v10563_v24 = vor.u32 %v14211_v10, %v10562_v9 }
 0x21b   :  { %v1576_v29 = vpack.c.bf16 %v1549_v27, %v1549_v27  ;;  %v10555_v27 = vor.u32 %v14210_v15, %v10554_v23  ;;  %3025 = vmatpush.bf16.msra.mxu1 %v14287_v12  ;;  %v10348_v15 = vld [vmem:[#allocation2 + $0x3c] sm:$0xf0] }
 0x21c   :  { %v15687_v31 = vadd.f32 %v2754_v25, %v2706_v26  ;;  %v10551_v26 = vor.u32 %v14205_v13, %v10548_v14  ;;  %v14153_v14 = vld [vmem:[#allocation2 + $0x1c] sm:$0xf] }
 0x21d   :  { %1592 = vst [vmem:[#allocation2 + $0x164] sm:$0xf] %v1576_v29  ;;  %v14206_v29 = vld [vmem:[#allocation2 + $0x1c4] sm:$0xf]  ;;  %2977 = vmatpush.bf16.msra.mxu0 %v14278_v34 }
 0x21e   :  { %v10559_v33 = vor.u32 %v14206_v29, %v10556_v19  ;;  %v14158_v19 = vld [vmem:[#allocation2 + $0x40] sm:$0xf0] }
 0x21f   :  { %3026 = vmatpush.bf16.msra.mxu1 %v14286_v35 }
 0x221   :  { %v15689_v43 = vpop.f32.mrf.mxu2  ;;  %v15691_v44 = vpop.f32.mrf.mxu3 }
 0x222   :  { %v1552_v46 = vpop.f32.mrf.mxu0  ;;  %v2661_v47 = vpop.f32.mrf.mxu1 }
 0x223   :  { %v1577_v50 = vpack.c.bf16 %v1552_v46, %v1552_v46  ;;  %v2662_v61 = vadd.f32 %v15658_v30, %v2661_v47  ;;  %v10598_v47 = vld [vmem:[#allocation2 + $0x210] sm:$0xf] }
 0x224   :  { %2807 = vmatmul.bf16.gmra.mxu0 %v10515_v51  ;;  %2856 = vmatmul.bf16.gmra.mxu1 %v10519_v53  ;;  %v14219_v51 = vld [vmem:[#allocation2 + $0x228] sm:$0xf0]  ;;  %v10599_v60 = vor.u32 %v14220_v48, %v10598_v47  ;;  %v14162_v47 = vld [vmem:[#allocation2 + $0x64] sm:$0xf]  ;;  %v10384_v48 = vld [vmem:[#allocation2 + $0x84] sm:$0xf0] }
 0x225   :  { %1593 = vst [vmem:[#allocation2 + $0x188] sm:$0xf] %v1577_v50  ;;  %v10584_v50 = vld [vmem:[#allocation2 + $0x224] sm:$0xf0] }
 0x226   :  { %2905 = vmatmul.bf16.gmra.mxu2 %v10523_v55  ;;  %2954 = vmatmul.bf16.gmra.mxu3 %v10527_v49  ;;  %v14214_v49 = vld [vmem:[#allocation2 + $0x204] sm:$0xf]  ;;  %v10592_v55 = vld [vmem:[#allocation2 + $0x22c] sm:$0xf0] }
 0x229   :  { %v2710_v63 = vpop.f32.mrf.mxu2  ;;  %v2759_v0 = vpop.f32.mrf.mxu3 }
 0x22a   :  { %v2711_v1 = vadd.f32 %v2710_v63, %v2662_v61  ;;  %v1554_v2 = vpop.f32.mrf.mxu0  ;;  %v15694_v4 = vpop.f32.mrf.mxu1  ;;  %v10587_v63 = vor.u32 %v14214_v49, %v10584_v50  ;;  %v14167_v49 = vld [vmem:[#allocation2 + $0x88] sm:$0xf0] }
 0x22b   :  { %v1578_v5 = vpack.c.bf16 %v1554_v2, %v1554_v2 }
 0x22c   :  { %v15696_v6 = vadd.f32 %v2759_v0, %v2711_v1  ;;  %v10591_v0 = vor.u32 %v14219_v51, %v10590_v59  ;;  %v14215_v1 = vld [vmem:[#allocation2 + $0x20c] sm:$0xf]  ;;  %v10387_v59 = vor.u32 %v14162_v47, %v10384_v48  ;;  %v10456_v47 = vld [vmem:[#allocation2 + $0x114] sm:$0xf0]  ;;  %v14185_v48 = vld [vmem:[#allocation2 + $0x118] sm:$0xf0] }
 0x22d   :  { %1594 = vst [vmem:[#allocation2 + $0x1ac] sm:$0xf] %v1578_v5  ;;  %v10595_v2 = vor.u32 %v14215_v1, %v10592_v55 }
 0x231   :  { %v15698_v16 = vpop.f32.mrf.mxu2  ;;  %v15700_v17 = vpop.f32.mrf.mxu3 }
 0x232   :  { %v1557_v20 = vpop.f32.mrf.mxu0  ;;  %v2666_v21 = vpop.f32.mrf.mxu1 }
 0x233   :  { %v1579_v25 = vpack.c.bf16 %v1557_v20, %v1557_v20  ;;  %v2667_v36 = vadd.f32 %v15658_v30, %v2666_v21 }
 0x234   :  { %2812 = vmatmul.bf16.gmra.mxu0 %v10551_v26  ;;  %2861 = vmatmul.bf16.gmra.mxu1 %v10555_v27  ;;  %v10351_v27 = vor.u32 %v14153_v14, %v10348_v15 }
 0x235   :  { %1595 = vst [vmem:[#allocation2 + $0x1d0] sm:$0xf] %v1579_v25  ;;  %v10354_v25 = vld [vmem:[#allocation2 + $0x20] sm:$0xf] }
 0x236   :  { %2910 = vmatmul.bf16.gmra.mxu2 %v10559_v33  ;;  %2959 = vmatmul.bf16.gmra.mxu3 %v10563_v24  ;;  %v10355_v29 = vor.u32 %v14158_v19, %v10354_v25 }
 0x239   :  { %v2715_v37 = vpop.f32.mrf.mxu2  ;;  %v2764_v38 = vpop.f32.mrf.mxu3 }
 0x23a   :  { %v2716_v40 = vadd.f32 %v2715_v37, %v2667_v36  ;;  %v1559_v41 = vpop.f32.mrf.mxu0  ;;  %v15703_v42 = vpop.f32.mrf.mxu1 }
 0x23b   :  { %v1580_v45 = vpack.c.bf16 %v1559_v41, %v1559_v41 }
 0x23c   :  { %v15705_v46 = vadd.f32 %v2764_v38, %v2716_v40 }
 0x23d   :  { %1596 = vst [vmem:[#allocation2 + $0x1f4] sm:$0xf] %v1580_v45 }
 0x241   :  { %v15707_v53 = vpop.f32.mrf.mxu2  ;;  %v15709_v54 = vpop.f32.mrf.mxu3 }
 0x242   :  { %v1562_v56 = vpop.f32.mrf.mxu0  ;;  %v2671_v57 = vpop.f32.mrf.mxu1 }
 0x243   :  { %v1581_v61 = vpack.c.bf16 %v1562_v56, %v1562_v56  ;;  %v2672_v5 = vadd.f32 %v15658_v30, %v2671_v57  ;;  %v10390_v56 = vld [vmem:[#allocation2 + $0x68] sm:$0xf] }
 0x244   :  { %2817 = vmatmul.bf16.gmra.mxu0 %v10587_v63  ;;  %2866 = vmatmul.bf16.gmra.mxu1 %v10591_v0 }
 0x245   :  { %1597 = vst [vmem:[#allocation2 + $0x218] sm:$0xf] %v1581_v61 }
 0x246   :  { %2915 = vmatmul.bf16.gmra.mxu2 %v10595_v2  ;;  %2964 = vmatmul.bf16.gmra.mxu3 %v10599_v60  ;;  %v10391_v60 = vor.u32 %v14167_v49, %v10390_v56  ;;  %v10462_v56 = vld [vmem:[#allocation2 + $0xf8] sm:$0xf] }
 0x249   :  { %v2720_v7 = vpop.f32.mrf.mxu2  ;;  %v2769_v8 = vpop.f32.mrf.mxu3 }
 0x24a   :  { %v2721_v9 = vadd.f32 %v2720_v7, %v2672_v5  ;;  %v1564_v10 = vpop.f32.mrf.mxu0  ;;  %v15712_v11 = vpop.f32.mrf.mxu1 }
 0x24b   :  { %v1582_v12 = vpack.c.bf16 %v1564_v10, %v1564_v10  ;;  %v10420_v10 = vld [vmem:[#allocation2 + $0xcc] sm:$0xf0] }
 0x24c   :  { %v15714_v13 = vadd.f32 %v2769_v8, %v2721_v9  ;;  %v14171_v9 = vld [vmem:[#allocation2 + $0xac] sm:$0xf] }
 0x24d   :  { %1598 = vst [vmem:[#allocation2 + $0x23c] sm:$0xf] %v1582_v12  ;;  %v14176_v12 = vld [vmem:[#allocation2 + $0xd0] sm:$0xf0]  ;;  %v10423_v25 = vor.u32 %v14171_v9, %v10420_v10  ;;  %v14189_v10 = vld [vmem:[#allocation2 + $0x13c] sm:$0xf] }
 0x251   :  { %v15716_v20 = vpop.f32.mrf.mxu2  ;;  %v15718_v21 = vpop.f32.mrf.mxu3 }
 0x252   :  { %v2783_v23 = vpop.f32.mrf.mxu0  ;;  %v2832_v24 = vpop.f32.mrf.mxu1 }
 0x253   :  { %v2784_v26 = vadd.f32 %v2783_v23, %v15661_v39  ;;  %v10426_v23 = vld [vmem:[#allocation2 + $0xb0] sm:$0xf] }
 0x254   :  { %2978 = vmatmul.bf16.vlgmr.msra.gmra.mxu0 %v10351_v27  ;;  %3027 = vmatmul.bf16.vlgmr.msra.gmra.mxu1 %v10355_v29 }
 0x255   :  { %v2833_v33 = vadd.f32 %v2832_v24, %v2784_v26  ;;  %v10427_v26 = vor.u32 %v14176_v12, %v10426_v23  ;;  %v10492_v12 = vld [vmem:[#allocation2 + $0x15c] sm:$0xf0] }
 0x259   :  { %v2881_v34 = vpop.f32.mrf.mxu2  ;;  %v2930_v35 = vpop.f32.mrf.mxu3 }
 0x25a   :  { %v2882_v36 = vadd.f32 %v2881_v34, %v2833_v33  ;;  %v2785_v37 = vpop.f32.mrf.mxu0  ;;  %v2834_v38 = vpop.f32.mrf.mxu1 }
 0x25b   :  { %v2786_v40 = vadd.f32 %v2785_v37, %v15664_v58 }
 0x25c   :  { %v15722_v41 = vadd.f32 %v2930_v35, %v2882_v36 }
 0x25d   :  { %v15724_v45 = vadd.f32 %v2834_v38, %v2786_v40  ;;  %v14180_v40 = vld [vmem:[#allocation2 + $0xf4] sm:$0xf] }
 0x261   :  { %v15726_v39 = vpop.f32.mrf.mxu2  ;;  %v15728_v50 = vpop.f32.mrf.mxu3 }
 0x262   :  { %v2788_v51 = vpop.f32.mrf.mxu0  ;;  %v2837_v55 = vpop.f32.mrf.mxu1 }
 0x263   :  { %v2789_v57 = vadd.f32 %v2788_v51, %v15667_v3 }
 0x264   :  { %2983 = vmatmul.bf16.gmra.mxu0 %v10387_v59  ;;  %3032 = vmatmul.bf16.gmra.mxu1 %v10391_v60  ;;  %v10459_v59 = vor.u32 %v14180_v40, %v10456_v47  ;;  %v10463_v60 = vor.u32 %v14185_v48, %v10462_v56  ;;  %v14198_v47 = vld [vmem:[#allocation2 + $0x184] sm:$0xf]  ;;  %v10528_v48 = vld [vmem:[#allocation2 + $0x1a4] sm:$0xf0] }
 0x265   :  { %v2838_v61 = vadd.f32 %v2837_v55, %v2789_v57 }
 0x269   :  { %v2886_v58 = vpop.f32.mrf.mxu2  ;;  %v2935_v63 = vpop.f32.mrf.mxu3 }
 0x26a   :  { %v2887_v0 = vadd.f32 %v2886_v58, %v2838_v61  ;;  %v2790_v1 = vpop.f32.mrf.mxu0  ;;  %v2839_v2 = vpop.f32.mrf.mxu1 }
 0x26b   :  { %v2791_v5 = vadd.f32 %v2790_v1, %v15670_v22 }
 0x26c   :  { %v15732_v7 = vadd.f32 %v2935_v63, %v2887_v0 }
 0x26d   :  { %v15734_v8 = vadd.f32 %v2839_v2, %v2791_v5 }
 0x271   :  { %v15736_v3 = vpop.f32.mrf.mxu2  ;;  %v15738_v14 = vpop.f32.mrf.mxu3 }
 0x272   :  { %v2793_v15 = vpop.f32.mrf.mxu0  ;;  %v2842_v19 = vpop.f32.mrf.mxu1 }
 0x273   :  { %v2794_v24 = vadd.f32 %v2793_v15, %v15673_v32  ;;  %v14194_v15 = vld [vmem:[#allocation2 + $0x160] sm:$0xf0] }
 0x274   :  { %2988 = vmatmul.bf16.gmra.mxu0 %v10423_v25  ;;  %3037 = vmatmul.bf16.gmra.mxu1 %v10427_v26  ;;  %v10498_v25 = vld [vmem:[#allocation2 + $0x140] sm:$0xf] }
 0x275   :  { %v2843_v27 = vadd.f32 %v2842_v19, %v2794_v24 }
 0x279   :  { %v2891_v22 = vpop.f32.mrf.mxu2  ;;  %v2940_v29 = vpop.f32.mrf.mxu3 }
 0x27a   :  { %v2892_v33 = vadd.f32 %v2891_v22, %v2843_v27  ;;  %v2795_v34 = vpop.f32.mrf.mxu0  ;;  %v2844_v35 = vpop.f32.mrf.mxu1  ;;  %v10495_v27 = vor.u32 %v14189_v10, %v10492_v12  ;;  %v10499_v22 = vor.u32 %v14194_v15, %v10498_v25  ;;  %v10570_v12 = vld [vmem:[#allocation2 + $0x1d0] sm:$0xf] }
 0x27b   :  { %v2796_v36 = vadd.f32 %v2795_v34, %v15676_v52 }
 0x27c   :  { %v15742_v37 = vadd.f32 %v2940_v29, %v2892_v33 }
 0x27d   :  { %v15744_v38 = vadd.f32 %v2844_v35, %v2796_v36 }
 0x281   :  { %v15746_v32 = vpop.f32.mrf.mxu2  ;;  %v15748_v49 = vpop.f32.mrf.mxu3 }
 0x282   :  { %v2798_v51 = vpop.f32.mrf.mxu0  ;;  %v2847_v55 = vpop.f32.mrf.mxu1 }
 0x283   :  { %v2799_v57 = vadd.f32 %v2798_v51, %v15679_v62  ;;  %v14203_v51 = vld [vmem:[#allocation2 + $0x1a8] sm:$0xf0] }
 0x284   :  { %2993 = vmatmul.bf16.gmra.mxu0 %v10459_v59  ;;  %3042 = vmatmul.bf16.gmra.mxu1 %v10463_v60  ;;  %v10531_v59 = vor.u32 %v14198_v47, %v10528_v48 }
 0x285   :  { %v2848_v61 = vadd.f32 %v2847_v55, %v2799_v57 }
 0x289   :  { %v2896_v52 = vpop.f32.mrf.mxu2  ;;  %v2945_v58 = vpop.f32.mrf.mxu3 }
 0x28a   :  { %v2897_v63 = vadd.f32 %v2896_v52, %v2848_v61  ;;  %v2800_v0 = vpop.f32.mrf.mxu0  ;;  %v2849_v1 = vpop.f32.mrf.mxu1 }
 0x28b   :  { %v2801_v2 = vadd.f32 %v2800_v0, %v15682_v18  ;;  %v10564_v0 = vld [vmem:[#allocation2 + $0x1ec] sm:$0xf0] }
 0x28c   :  { %v15752_v5 = vadd.f32 %v2945_v58, %v2897_v63  ;;  %v14207_v63 = vld [vmem:[#allocation2 + $0x1cc] sm:$0xf] }
 0x28d   :  { %v15754_v9 = vadd.f32 %v2849_v1, %v2801_v2  ;;  %v14212_v1 = vld [vmem:[#allocation2 + $0x1f0] sm:$0xf0] }
 0x291   :  { %v15756_v62 = vpop.f32.mrf.mxu2  ;;  %v15758_v19 = vpop.f32.mrf.mxu3 }
 0x292   :  { %v2803_v23 = vpop.f32.mrf.mxu0  ;;  %v2852_v24 = vpop.f32.mrf.mxu1 }
 0x293   :  { %v2804_v26 = vadd.f32 %v2803_v23, %v15687_v31  ;;  %v10534_v31 = vld [vmem:[#allocation2 + $0x188] sm:$0xf]  ;;  %v10567_v23 = vor.u32 %v14207_v63, %v10564_v0 }
 0x294   :  { %2998 = vmatmul.bf16.gmra.mxu0 %v10495_v27  ;;  %3047 = vmatmul.bf16.gmra.mxu1 %v10499_v22  ;;  %v10535_v60 = vor.u32 %v14203_v51, %v10534_v31  ;;  %v14216_v27 = vld [vmem:[#allocation2 + $0x214] sm:$0xf]  ;;  %v10600_v22 = vld [vmem:[#allocation2 + $0x234] sm:$0xf0] }
 0x295   :  { %v2853_v29 = vadd.f32 %v2852_v24, %v2804_v26  ;;  %v10603_v48 = vor.u32 %v14216_v27, %v10600_v22 }
 0x299   :  { %v2901_v18 = vpop.f32.mrf.mxu2  ;;  %v2950_v36 = vpop.f32.mrf.mxu3 }
 0x29a   :  { %v2902_v33 = vadd.f32 %v2901_v18, %v2853_v29  ;;  %v15761_v34 = vpop.f32.mrf.mxu0  ;;  %v15763_v35 = vpop.f32.mrf.mxu1  ;;  %v14221_v29 = vld [vmem:[#allocation2 + $0x238] sm:$0xf0] }
 0x29c   :  { %v15765_v40 = vadd.f32 %v2950_v36, %v2902_v33  ;;  %v10606_v36 = vld [vmem:[#allocation2 + $0x218] sm:$0xf] }
 0x2a2   :  { %v2808_v55 = vpop.f32.mrf.mxu0  ;;  %v2857_v56 = vpop.f32.mrf.mxu1 }
 0x2a3   :  { %v2809_v57 = vadd.f32 %v2808_v55, %v15696_v6  ;;  %v10571_v6 = vor.u32 %v14212_v1, %v10570_v12 }
 0x2a4   :  { %3003 = vmatmul.bf16.gmra.mxu0 %v10531_v59  ;;  %3052 = vmatmul.bf16.gmra.mxu1 %v10535_v60  ;;  %v2884_v60 = vadd.f32 %v15726_v39, %v15724_v45 }
 0x2a5   :  { %v15768_v61 = vadd.f32 %v2857_v56, %v2809_v57 }
 0x2aa   :  { %v15770_v52 = vpop.f32.mrf.mxu0  ;;  %v15772_v58 = vpop.f32.mrf.mxu1 }
 0x2b2   :  { %v2813_v2 = vpop.f32.mrf.mxu0  ;;  %v2862_v10 = vpop.f32.mrf.mxu1 }
 0x2b3   :  { %v2814_v15 = vadd.f32 %v2813_v2, %v15705_v46  ;;  %v10607_v46 = vor.u32 %v14221_v29, %v10606_v36 }
 0x2b4   :  { %3008 = vmatmul.bf16.gmra.mxu0 %v10567_v23  ;;  %3057 = vmatmul.bf16.gmra.mxu1 %v10571_v6 }
 0x2b5   :  { %v15775_v24 = vadd.f32 %v2862_v10, %v2814_v15 }
 0x2ba   :  { %v15777_v25 = vpop.f32.mrf.mxu0  ;;  %v15779_v26 = vpop.f32.mrf.mxu1 }
 0x2c2   :  { %v2818_v18 = vpop.f32.mrf.mxu0  ;;  %v2867_v33 = vpop.f32.mrf.mxu1 }
 0x2c3   :  { %v2819_v47 = vadd.f32 %v2818_v18, %v15714_v13  ;;  %v2933_v13 = vadd.f32 %v15728_v50, %v2884_v60 }
 0x2c4   :  { %3013 = vmatmul.bf16.gmra.mxu0 %v10603_v48  ;;  %3062 = vmatmul.bf16.gmra.mxu1 %v10607_v46 }
 0x2c5   :  { %v15782_v51 = vadd.f32 %v2867_v33, %v2819_v47 }
 0x2ca   :  { %v15784_v55 = vpop.f32.mrf.mxu0  ;;  %v15786_v56 = vpop.f32.mrf.mxu1 }
 0x2d2   :  { %v2979_v31 = vpop.f32.mrf.mxu0  ;;  %v3028_v57 = vpop.f32.mrf.mxu1 }
 0x2d3   :  { %v2980_v59 = vadd.f32 %v2979_v31, %v15722_v41  ;;  %v2889_v41 = vadd.f32 %v15736_v3, %v15734_v8 }
 0x2d5   :  { %v3029_v63 = vadd.f32 %v3028_v57, %v2980_v59  ;;  %v2938_v45 = vadd.f32 %v15738_v14, %v2889_v41  ;;  %v2952_v41 = vpop.f32.mrf.mxu3 }
 0x2d7   :  { %v3068_v12 = vmax.f32 %v3029_v63, 0.0 }
 0x2da   :  { %v2981_v0 = vpop.f32.mrf.mxu0  ;;  %v3030_v1 = vpop.f32.mrf.mxu1 }
 0x2db   :  { %v2982_v2 = vadd.f32 %v2981_v0, %v2933_v13 }
 0x2dd   :  { %v3031_v10 = vadd.f32 %v3030_v1, %v2982_v2 }
 0x2df   :  { %v3069_v15 = vmax.f32 %v3031_v10, 0.0 }
 0x2e1   :  { %v15792_v23 = vpack.c.bf16 %v3069_v15, %v3068_v12  ;;  %v2903_v15 = vpop.f32.mrf.mxu2 }
 0x2e2   :  { %v2984_v6 = vpop.f32.mrf.mxu0  ;;  %v3033_v27 = vpop.f32.mrf.mxu1 }
 0x2e3   :  { %v2985_v22 = vadd.f32 %v2984_v6, %v15732_v7  ;;  %v2894_v7 = vadd.f32 %v15746_v32, %v15744_v38  ;;  %v2659_v32 = vadd.f32 %v15658_v30, %v15685_v28 }
 0x2e5   :  { %v3034_v29 = vadd.f32 %v3033_v27, %v2985_v22  ;;  %v2943_v8 = vadd.f32 %v15748_v49, %v2894_v7  ;;  %v2708_v49 = vadd.f32 %v15689_v43, %v2659_v32 }
 0x2e7   :  { %v3070_v36 = vmax.f32 %v3034_v29, 0.0 }
 0x2ea   :  { %v2986_v39 = vpop.f32.mrf.mxu0  ;;  %v3035_v50 = vpop.f32.mrf.mxu1 }
 0x2eb   :  { %v2987_v18 = vadd.f32 %v2986_v39, %v2938_v45  ;;  %v2757_v45 = vadd.f32 %v15691_v44, %v2708_v49  ;;  %v2664_v44 = vadd.f32 %v15658_v30, %v15694_v4 }
 0x2ed   :  { %v3036_v33 = vadd.f32 %v3035_v50, %v2987_v18  ;;  %v2906_v50 = vpop.f32.mrf.mxu2 }
 0x2ef   :  { %v3071_v47 = vmax.f32 %v3036_v33, 0.0 }
 0x2f1   :  { %v15798_v48 = vpack.c.bf16 %v3071_v47, %v3070_v36  ;;  %v2955_v47 = vpop.f32.mrf.mxu3 }
 0x2f2   :  { %v2989_v46 = vpop.f32.mrf.mxu0  ;;  %v3038_v31 = vpop.f32.mrf.mxu1 }
 0x2f3   :  { %v2990_v57 = vadd.f32 %v2989_v46, %v15742_v37  ;;  %v2899_v37 = vadd.f32 %v15756_v62, %v15754_v9 }
 0x2f5   :  { %v3039_v59 = vadd.f32 %v3038_v31, %v2990_v57  ;;  %v2948_v6 = vadd.f32 %v15758_v19, %v2899_v37  ;;  %v2713_v31 = vadd.f32 %v15698_v16, %v2664_v44  ;;  %v2908_v57 = vpop.f32.mrf.mxu2  ;;  %v15102_v37 = vld [vmem:[#allocation9] ss:$0 sm:$0xff] }
 0x2f7   :  { %v3072_v13 = vmax.f32 %v3039_v59, 0.0 }
 0x2fa   :  { %v2991_v3 = vpop.f32.mrf.mxu0  ;;  %v3040_v14 = vpop.f32.mrf.mxu1 }
 0x2fb   :  { %v2992_v60 = vadd.f32 %v2991_v3, %v2943_v8  ;;  %v2762_v3 = vadd.f32 %v15700_v17, %v2713_v31  ;;  %v2669_v17 = vadd.f32 %v15102_v37, %v15703_v42 }
 0x2fd   :  { %v3041_v63 = vadd.f32 %v3040_v14, %v2992_v60  ;;  %v2957_v60 = vpop.f32.mrf.mxu3 }
 0x2ff   :  { %v3073_v0 = vmax.f32 %v3041_v63, 0.0 }
 0x301   :  { %v15804_v1 = vpack.c.bf16 %v3073_v0, %v3072_v13  ;;  %v2907_v13 = vadd.f32 %v2906_v50, %v15768_v61 }
 0x302   :  { %v2994_v2 = vpop.f32.mrf.mxu0  ;;  %v3043_v10 = vpop.f32.mrf.mxu1 }
 0x303   :  { %v2995_v12 = vadd.f32 %v2994_v2, %v15752_v5  ;;  %v2806_v5 = vadd.f32 %v15761_v34, %v2757_v45  ;;  %v2911_v2 = vpop.f32.mrf.mxu2 }
 0x305   :  { %v3044_v38 = vadd.f32 %v3043_v10, %v2995_v12  ;;  %v2855_v43 = vadd.f32 %v15763_v35, %v2806_v5  ;;  %v2811_v35 = vadd.f32 %v15770_v52, %v2762_v3  ;;  %v2956_v10 = vadd.f32 %v2955_v47, %v2907_v13  ;;  %v2960_v32 = vpop.f32.mrf.mxu3 }
 0x306   :  { %v2718_v52 = vadd.f32 %v15707_v53, %v2669_v17  ;;  %v2912_v5 = vadd.f32 %v2911_v2, %v15775_v24  ;;  %v14295_v17 = vld [vmem:[#allocation10 + $0x8] sm:$0xff] }
 0x307   :  { %v3074_v9 = vmax.f32 %v3044_v38, 0.0  ;;  %v2904_v36 = vadd.f32 %v2903_v15, %v2855_v43  ;;  %v2860_v16 = vadd.f32 %v15772_v58, %v2811_v35  ;;  %v2674_v43 = vadd.f32 %v15102_v37, %v15712_v11  ;;  %v14296_v37 = vld [vmem:[#allocation10 + $0x10] sm:$0xff] }
 0x309   :  { %v2953_v34 = vadd.f32 %v2952_v41, %v2904_v36  ;;  %v2909_v12 = vadd.f32 %v2908_v57, %v2860_v16  ;;  %v2723_v36 = vadd.f32 %v15716_v20, %v2674_v43  ;;  %v14357_v43 = vld [vmem:[#allocation12 + $0xd4] sm:$0xf0] }
 0x30a   :  { %v2996_v27 = vpop.f32.mrf.mxu0  ;;  %v3045_v22 = vpop.f32.mrf.mxu1 }
 0x30b   :  { %v2997_v29 = vadd.f32 %v2996_v27, %v2948_v6  ;;  %v2958_v38 = vadd.f32 %v2957_v60, %v2909_v12  ;;  %v2913_v41 = vpop.f32.mrf.mxu2  ;;  %v2772_v31 = vadd.f32 %v15718_v21, %v2723_v36  ;;  %v14306_v36 = vld [vmem:[#allocation10 + $0x60] sm:$0xff] }
 0x30d   :  { %v3046_v39 = vadd.f32 %v3045_v22, %v2997_v29  ;;  %v2767_v22 = vadd.f32 %v15709_v54, %v2718_v52  ;;  %v14298_v52 = vld [vmem:[#allocation10 + $0x20] sm:$0xff] }
 0x30f   :  { %v3075_v62 = vmax.f32 %v3046_v39, 0.0  ;;  %v2816_v58 = vadd.f32 %v15777_v25, %v2767_v22  ;;  %v14303_v22 = vld [vmem:[#allocation10 + $0x48] sm:$0xff] }
 0x311   :  { %v15815_v18 = vpack.c.bf16 %v3075_v62, %v3074_v9  ;;  %v2865_v9 = vadd.f32 %v15779_v26, %v2816_v58  ;;  %v2962_v62 = vpop.f32.mrf.mxu3  ;;  %v2821_v26 = vadd.f32 %v15784_v55, %v2772_v31  ;;  %v11098_v58 = vld [vmem:[#allocation12 + $0x70] sm:$0xf]  ;;  %v14355_v31 = vld [vmem:[#allocation12 + $0xc4] sm:$0xf0] }
 0x312   :  { %v2999_v33 = vpop.f32.mrf.mxu0  ;;  %v3048_v28 = vpop.f32.mrf.mxu1 }
 0x313   :  { %v3000_v19 = vadd.f32 %v2999_v33, %v15765_v40  ;;  %v2961_v33 = vadd.f32 %v2960_v32, %v2912_v5  ;;  %v2916_v54 = vpop.f32.mrf.mxu2  ;;  %v2870_v35 = vadd.f32 %v15786_v56, %v2821_v26  ;;  %v14294_v56 = vld [vmem:[#allocation10] sm:$0xff]  ;;  %v14299_v32 = vld [vmem:[#allocation10 + $0x28] sm:$0xff] }
 0x314   :  { %v14361_v5 = vld [vmem:[#allocation12 + $0xf4] sm:$0xf0]  ;;  %v11130_v26 = vld [vmem:[#allocation12 + $0xb0] sm:$0xf] }
 0x315   :  { %v3049_v46 = vadd.f32 %v3048_v28, %v3000_v19  ;;  %v2914_v28 = vadd.f32 %v2913_v41, %v2865_v9  ;;  %v14305_v41 = vld [vmem:[#allocation10 + $0x58] sm:$0xff] }
 0x316   :  { %v14359_v9 = vld [vmem:[#allocation12 + $0xe4] sm:$0xf0] }
 0x317   :  { %v3076_v40 = vmax.f32 %v3049_v46, 0.0  ;;  %v2963_v25 = vadd.f32 %v2962_v62, %v2914_v28  ;;  %v11082_v62 = vld [vmem:[#allocation12 + $0x50] sm:$0xf] }
 0x319   :  { %v2965_v57 = vpop.f32.mrf.mxu3 }
 0x31a   :  { %v3001_v7 = vpop.f32.mrf.mxu0  ;;  %v3050_v59 = vpop.f32.mrf.mxu1 }
 0x31b   :  { %v3002_v8 = vadd.f32 %v3001_v7, %v2953_v34  ;;  %v2918_v11 = vpop.f32.mrf.mxu2 }
 0x31d   :  { %v3051_v14 = vadd.f32 %v3050_v59, %v3002_v8  ;;  %v2917_v8 = vadd.f32 %v2916_v54, %v15782_v51 }
 0x31f   :  { %v3077_v63 = vmax.f32 %v3051_v14, 0.0  ;;  %v2966_v60 = vadd.f32 %v2965_v57, %v2917_v8 }
 0x321   :  { %v15825_v0 = vpack.c.bf16 %v3077_v63, %v3076_v40  ;;  %v2919_v40 = vadd.f32 %v2918_v11, %v2870_v35  ;;  %v2967_v13 = vpop.f32.mrf.mxu3  ;;  %v14307_v11 = vld [vmem:[#allocation10 + $0x68] sm:$0xff]  ;;  %v11122_v35 = vld [vmem:[#allocation12 + $0xa0] sm:$0xf] }
 0x322   :  { %v3004_v30 = vpop.f32.mrf.mxu0  ;;  %v3053_v4 = vpop.f32.mrf.mxu1 }
 0x323   :  { %v3005_v15 = vadd.f32 %v3004_v30, %v2956_v10  ;;  %v2968_v21 = vadd.f32 %v2967_v13, %v2919_v40  ;;  %v14351_v40 = vld [vmem:[#allocation12 + $0xa4] sm:$0xf0]  ;;  %v14333_v13 = vld [vmem:[#allocation12 + $0x14] sm:$0xf0] }
 0x325   :  { %v3054_v61 = vadd.f32 %v3053_v4, %v3005_v15  ;;  %v14297_v15 = vld [vmem:[#allocation10 + $0x18] sm:$0xff] }
 0x327   :  { %v3078_v45 = vmax.f32 %v3054_v61, 0.0  ;;  %v14304_v61 = vld [vmem:[#allocation10 + $0x50] sm:$0xff] }
 0x32a   :  { %v3006_v49 = vpop.f32.mrf.mxu0  ;;  %v3055_v6 = vpop.f32.mrf.mxu1 }
 0x32b   :  { %v3007_v27 = vadd.f32 %v3006_v49, %v2958_v38  ;;  %v14300_v38 = vld [vmem:[#allocation10 + $0x30] sm:$0xff]  ;;  %v14301_v49 = vld [vmem:[#allocation10 + $0x38] sm:$0xff] }
 0x32d   :  { %v3056_v29 = vadd.f32 %v3055_v6, %v3007_v27  ;;  %v14302_v6 = vld [vmem:[#allocation10 + $0x40] sm:$0xff] }
 0x32e   :  { %v14310_v27 = vld [vmem:[#allocation10 + $0x80] sm:$0xff] }
 0x32f   :  { %v3079_v39 = vmax.f32 %v3056_v29, 0.0  ;;  %v14311_v29 = vld [vmem:[#allocation10 + $0x88] sm:$0xff] }
 0x331   :  { %v15833_v42 = vpack.c.bf16 %v3079_v39, %v3078_v45  ;;  %v14345_v45 = vld [vmem:[#allocation12 + $0x74] sm:$0xf0]  ;;  %v11162_v39 = vld [vmem:[#allocation12 + $0xf0] sm:$0xf] }
 0x332   :  { %v3009_v50 = vpop.f32.mrf.mxu0  ;;  %v3058_v53 = vpop.f32.mrf.mxu1 }
 0x333   :  { %v3010_v19 = vadd.f32 %v3009_v50, %v2961_v33  ;;  %v14343_v50 = vld [vmem:[#allocation12 + $0x64] sm:$0xf0]  ;;  %v14341_v33 = vld [vmem:[#allocation12 + $0x54] sm:$0xf0] }
 0x334   :  { %v11083_v54 = vor.u32 %v14341_v33, %v11082_v62  ;;  %v14371_v62 = vld [vmem:[#allocation12 + $0x144] sm:$0xf0] }
 0x335   :  { %v3059_v44 = vadd.f32 %v3058_v53, %v3010_v19  ;;  %v11154_v53 = vld [vmem:[#allocation12 + $0xe0] sm:$0xf] }
 0x336   :  { %v11155_v28 = vor.u32 %v14359_v9, %v11154_v53 }
 0x337   :  { %v3080_v7 = vmax.f32 %v3059_v44, 0.0  ;;  %v11138_v44 = vld [vmem:[#allocation12 + $0xc0] sm:$0xf] }
 0x338   :  { %v11139_v57 = vor.u32 %v14355_v31, %v11138_v44 }
 0x33a   :  { %v3011_v47 = vpop.f32.mrf.mxu0  ;;  %v3060_v46 = vpop.f32.mrf.mxu1 }
 0x33b   :  { %v3012_v24 = vadd.f32 %v3011_v47, %v2963_v25  ;;  %v14308_v25 = vld [vmem:[#allocation10 + $0x70] sm:$0xff] }
 0x33c   :  { %v11074_v47 = vld [vmem:[#allocation12 + $0x40] sm:$0xf] }
 0x33d   :  { %v3061_v34 = vadd.f32 %v3060_v46, %v3012_v24  ;;  %v14339_v46 = vld [vmem:[#allocation12 + $0x44] sm:$0xf0] }
 0x33e   :  { %v11075_v24 = vor.u32 %v14339_v46, %v11074_v47  ;;  %v14385_v47 = vld [vmem:[#allocation12 + $0x1b4] sm:$0xf0] }
 0x33f   :  { %v3081_v59 = vmax.f32 %v3061_v34, 0.0  ;;  %v14337_v34 = vld [vmem:[#allocation12 + $0x34] sm:$0xf0] }
 0x341   :  { %v15841_v3 = vpack.c.bf16 %v3081_v59, %v3080_v7  ;;  %v14353_v7 = vld [vmem:[#allocation12 + $0xb4] sm:$0xf0] }
 0x342   :  { %v3014_v14 = vpop.f32.mrf.mxu0  ;;  %v3063_v20 = vpop.f32.mrf.mxu1  ;;  %v11131_v8 = vor.u32 %v14353_v7, %v11130_v26  ;;  %v11250_v26 = vld [vmem:[#allocation12 + $0x1a0] sm:$0xf] }
 0x343   :  { %v3015_v63 = vadd.f32 %v3014_v14, %v2966_v60  ;;  %v11058_v14 = vld [vmem:[#allocation12 + $0x20] sm:$0xf] }
 0x345   :  { %v3064_v4 = vadd.f32 %v3063_v20, %v3015_v63  ;;  %v14335_v20 = vld [vmem:[#allocation12 + $0x24] sm:$0xf0]  ;;  %v11050_v63 = vld [vmem:[#allocation12 + $0x10] sm:$0xf] }
 0x346   :  { %v11059_v60 = vor.u32 %v14335_v20, %v11058_v14  ;;  %v11242_v14 = vld [vmem:[#allocation12 + $0x190] sm:$0xf]  ;;  %v14381_v20 = vld [vmem:[#allocation12 + $0x194] sm:$0xf0] }
 0x347   :  { %v3082_v10 = vmax.f32 %v3064_v4, 0.0  ;;  %v14349_v4 = vld [vmem:[#allocation12 + $0x94] sm:$0xf0] }
 0x34a   :  { %v3016_v30 = vpop.f32.mrf.mxu0  ;;  %v3065_v55 = vpop.f32.mrf.mxu1 }
 0x34b   :  { %v3017_v16 = vadd.f32 %v3016_v30, %v2968_v21  ;;  %v11123_v21 = vor.u32 %v14351_v40, %v11122_v35  ;;  %v11114_v30 = vld [vmem:[#allocation12 + $0x90] sm:$0xf] }
 0x34d   :  { %v3066_v2 = vadd.f32 %v3065_v55, %v3017_v16  ;;  %v11051_v16 = vor.u32 %v14333_v13, %v11050_v63  ;;  %v11115_v55 = vor.u32 %v14349_v4, %v11114_v30  ;;  %v11243_v63 = vor.u32 %v14381_v20, %v11242_v14 }
 0x34f   :  { %v3083_v12 = vmax.f32 %v3066_v2, 0.0  ;;  %v11042_v2 = vld [vmem:[#allocation12] sm:$0xf] }
 0x351   :  { %v15844_v51 = vpack.c.bf16 %v3083_v12, %v3082_v10  ;;  %v14331_v10 = vld [vmem:[#allocation12 + $0x4] sm:$0xf0]  ;;  %v11106_v12 = vld [vmem:[#allocation12 + $0x80] sm:$0xf] }
 0x353   :  { %3108 = vmatpush.bf16.msra.mxu2 %v15844_v51  ;;  %3152 = vmatpush.bf16.msra.mxu3 %v15844_v51 }
 0x354   :  { %3460 = vmatpush.bf16.msrb.mxu0 %v15844_v51 }
 0x357   :  { %3109 = vmatpush.bf16.msra.mxu2 %v15841_v3  ;;  %3153 = vmatpush.bf16.msra.mxu3 %v15841_v3 }
 0x358   :  { %3461 = vmatpush.bf16.msrb.mxu0 %v15841_v3 }
 0x35b   :  { %3110 = vmatpush.bf16.msra.mxu2 %v15833_v42  ;;  %3154 = vmatpush.bf16.msra.mxu3 %v15833_v42 }
 0x35c   :  { %3462 = vmatpush.bf16.msrb.mxu0 %v15833_v42 }
 0x35f   :  { %3111 = vmatpush.bf16.msra.mxu2 %v15825_v0  ;;  %3155 = vmatpush.bf16.msra.mxu3 %v15825_v0 }
 0x360   :  { %3463 = vmatpush.bf16.msrb.mxu0 %v15825_v0 }
 0x363   :  { %3112 = vmatpush.bf16.msra.mxu2 %v15815_v18  ;;  %3156 = vmatpush.bf16.msra.mxu3 %v15815_v18 }
 0x364   :  { %3464 = vmatpush.bf16.msrb.mxu0 %v15815_v18 }
 0x367   :  { %3113 = vmatpush.bf16.msra.mxu2 %v15804_v1  ;;  %3157 = vmatpush.bf16.msra.mxu3 %v15804_v1 }
 0x368   :  { %3465 = vmatpush.bf16.msrb.mxu0 %v15804_v1 }
 0x36b   :  { %3114 = vmatpush.bf16.msra.mxu2 %v15798_v48  ;;  %3158 = vmatpush.bf16.msra.mxu3 %v15798_v48 }
 0x36c   :  { %3466 = vmatpush.bf16.msrb.mxu0 %v15798_v48 }
 0x36f   :  { %3115 = vmatpush.bf16.msra.mxu2 %v15792_v23  ;;  %3159 = vmatpush.bf16.msra.mxu3 %v15792_v23 }
 0x370   :  { %3467 = vmatpush.bf16.msrb.mxu0 %v15792_v23 }
 0x372   :  { %3116 = vmatmul.bf16.vlgmr.msra.gmra.mxu2 %v14294_v56  ;;  %3160 = vmatmul.bf16.vlgmr.msra.gmra.mxu3 %v14296_v37  ;;  %v14347_v56 = vld [vmem:[#allocation12 + $0x84] sm:$0xf0] }
 0x373   :  { %3196 = vmatpush.bf16.msrb.mxu2 %v15844_v51  ;;  %3240 = vmatpush.bf16.msrb.mxu3 %v15844_v51  ;;  %v11107_v37 = vor.u32 %v14347_v56, %v11106_v12  ;;  %v11234_v56 = vld [vmem:[#allocation12 + $0x180] sm:$0xf] }
 0x374   :  { %3468 = vmatmul.bf16.vlgmr.msrb.gmra.mxu0 %v14310_v27  ;;  %v11282_v27 = vld [vmem:[#allocation12 + $0x1e0] sm:$0xf] }
 0x377   :  { %3197 = vmatpush.bf16.msrb.mxu2 %v15841_v3  ;;  %3241 = vmatpush.bf16.msrb.mxu3 %v15841_v3 }
 0x37b   :  { %3198 = vmatpush.bf16.msrb.mxu2 %v15833_v42  ;;  %3242 = vmatpush.bf16.msrb.mxu3 %v15833_v42 }
 0x37f   :  { %3199 = vmatpush.bf16.msrb.mxu2 %v15825_v0  ;;  %3243 = vmatpush.bf16.msrb.mxu3 %v15825_v0 }
 0x382   :  { %3121 = vmatmul.bf16.gmra.mxu2 %v14295_v17  ;;  %3165 = vmatmul.bf16.gmra.mxu3 %v14297_v15  ;;  %v11226_v17 = vld [vmem:[#allocation12 + $0x170] sm:$0xf]  ;;  %v14377_v15 = vld [vmem:[#allocation12 + $0x174] sm:$0xf0] }
 0x383   :  { %3200 = vmatpush.bf16.msrb.mxu2 %v15815_v18  ;;  %3244 = vmatpush.bf16.msrb.mxu3 %v15815_v18 }
 0x384   :  { %3473 = vmatmul.bf16.gmra.mxu0 %v14311_v29  ;;  %v11210_v29 = vld [vmem:[#allocation12 + $0x150] sm:$0xf] }
 0x387   :  { %3201 = vmatpush.bf16.msrb.mxu2 %v15804_v1  ;;  %3245 = vmatpush.bf16.msrb.mxu3 %v15804_v1 }
 0x38b   :  { %3202 = vmatpush.bf16.msrb.mxu2 %v15798_v48  ;;  %3246 = vmatpush.bf16.msrb.mxu3 %v15798_v48 }
 0x38f   :  { %3203 = vmatpush.bf16.msrb.mxu2 %v15792_v23  ;;  %3247 = vmatpush.bf16.msrb.mxu3 %v15792_v23 }
 0x392   :  { %3204 = vmatmul.bf16.vlgmr.msrb.gmra.mxu2 %v14298_v52  ;;  %3248 = vmatmul.bf16.vlgmr.msrb.gmra.mxu3 %v14300_v38  ;;  %v11290_v52 = vld [vmem:[#allocation12 + $0x1f0] sm:$0xf]  ;;  %v11227_v38 = vor.u32 %v14377_v15, %v11226_v17  ;;  %v14379_v17 = vld [vmem:[#allocation12 + $0x184] sm:$0xf0] }
 0x393   :  { %3284 = vmatpush.bf16.msra.mxu2 %v15844_v51  ;;  %3328 = vmatpush.bf16.msra.mxu3 %v15844_v51  ;;  %v11235_v15 = vor.u32 %v14379_v17, %v11234_v56 }
 0x397   :  { %3285 = vmatpush.bf16.msra.mxu2 %v15841_v3  ;;  %3329 = vmatpush.bf16.msra.mxu3 %v15841_v3 }
 0x39b   :  { %3286 = vmatpush.bf16.msra.mxu2 %v15833_v42  ;;  %3330 = vmatpush.bf16.msra.mxu3 %v15833_v42 }
 0x39f   :  { %3287 = vmatpush.bf16.msra.mxu2 %v15825_v0  ;;  %3331 = vmatpush.bf16.msra.mxu3 %v15825_v0 }
 0x3a2   :  { %3209 = vmatmul.bf16.gmra.mxu2 %v14299_v32  ;;  %3253 = vmatmul.bf16.gmra.mxu3 %v14301_v49  ;;  %v14393_v32 = vld [vmem:[#allocation12 + $0x1f4] sm:$0xf0] }
 0x3a3   :  { %3288 = vmatpush.bf16.msra.mxu2 %v15815_v18  ;;  %3332 = vmatpush.bf16.msra.mxu3 %v15815_v18  ;;  %v11291_v49 = vor.u32 %v14393_v32, %v11290_v52  ;;  %v11354_v52 = vld [vmem:[#allocation12 + $0x270] sm:$0xf] }
 0x3a4   :  { %v11418_v32 = vld [vmem:[#allocation12 + $0x2f0] sm:$0xf] }
 0x3a5   :  { %4526 = vmatpush.bf16.msra.mxu0 %v11291_v49 }
 0x3a7   :  { %3289 = vmatpush.bf16.msra.mxu2 %v15804_v1  ;;  %3333 = vmatpush.bf16.msra.mxu3 %v15804_v1 }
 0x3ab   :  { %3290 = vmatpush.bf16.msra.mxu2 %v15798_v48  ;;  %3334 = vmatpush.bf16.msra.mxu3 %v15798_v48 }
 0x3af   :  { %3291 = vmatpush.bf16.msra.mxu2 %v15792_v23  ;;  %3335 = vmatpush.bf16.msra.mxu3 %v15792_v23 }
 0x3b2   :  { %3292 = vmatmul.bf16.vlgmr.msra.gmra.mxu2 %v14302_v6  ;;  %3336 = vmatmul.bf16.vlgmr.msra.gmra.mxu3 %v14304_v61  ;;  %v11218_v6 = vld [vmem:[#allocation12 + $0x160] sm:$0xf]  ;;  %v14375_v61 = vld [vmem:[#allocation12 + $0x164] sm:$0xf0] }
 0x3b3   :  { %3372 = vmatpush.bf16.msrb.mxu2 %v15844_v51  ;;  %3416 = vmatpush.bf16.msrb.mxu3 %v15844_v51  ;;  %v11043_v51 = vor.u32 %v14331_v10, %v11042_v2  ;;  %v11170_v10 = vld [vmem:[#allocation12 + $0x100] sm:$0xf] }
 0x3b7   :  { %3373 = vmatpush.bf16.msrb.mxu2 %v15841_v3  ;;  %3417 = vmatpush.bf16.msrb.mxu3 %v15841_v3  ;;  %v14309_v3 = vld [vmem:[#allocation10 + $0x78] sm:$0xff] }
 0x3bb   :  { %3374 = vmatpush.bf16.msrb.mxu2 %v15833_v42  ;;  %3418 = vmatpush.bf16.msrb.mxu3 %v15833_v42  ;;  %v11090_v42 = vld [vmem:[#allocation12 + $0x60] sm:$0xf] }
 0x3bf   :  { %3375 = vmatpush.bf16.msrb.mxu2 %v15825_v0  ;;  %3419 = vmatpush.bf16.msrb.mxu3 %v15825_v0  ;;  %v11099_v0 = vor.u32 %v14345_v45, %v11098_v58  ;;  %v14373_v58 = vld [vmem:[#allocation12 + $0x154] sm:$0xf0] }
 0x3c1   :  { %4469 = vmatpush.bf16.msrb.mxu1 %v11099_v0  ;;  %v11274_v0 = vld [vmem:[#allocation12 + $0x1d0] sm:$0xf] }
 0x3c2   :  { %3297 = vmatmul.bf16.gmra.mxu2 %v14303_v22  ;;  %3341 = vmatmul.bf16.gmra.mxu3 %v14305_v41  ;;  %v11219_v22 = vor.u32 %v14375_v61, %v11218_v6  ;;  %v14391_v41 = vld [vmem:[#allocation12 + $0x1e4] sm:$0xf0]  ;;  %v14425_v6 = vld [vmem:[#allocation12 + $0x2f4] sm:$0xf0] }
 0x3c3   :  { %3376 = vmatpush.bf16.msrb.mxu2 %v15815_v18  ;;  %3420 = vmatpush.bf16.msrb.mxu3 %v15815_v18  ;;  %v11163_v18 = vor.u32 %v14361_v5, %v11162_v39  ;;  %v11283_v45 = vor.u32 %v14391_v41, %v11282_v27  ;;  %v14389_v39 = vld [vmem:[#allocation12 + $0x1d4] sm:$0xf0]  ;;  %v11211_v5 = vor.u32 %v14373_v58, %v11210_v29  ;;  %v11346_v58 = vld [vmem:[#allocation12 + $0x260] sm:$0xf] }
 0x3c5   :  { %4527 = vmatpush.bf16.msra.mxu0 %v11283_v45  ;;  %v14407_v45 = vld [vmem:[#allocation12 + $0x264] sm:$0xf0] }
 0x3c7   :  { %3377 = vmatpush.bf16.msrb.mxu2 %v15804_v1  ;;  %3421 = vmatpush.bf16.msrb.mxu3 %v15804_v1  ;;  %v11091_v1 = vor.u32 %v14343_v50, %v11090_v42  ;;  %v11275_v42 = vor.u32 %v14389_v39, %v11274_v0  ;;  %v11410_v0 = vld [vmem:[#allocation12 + $0x2e0] sm:$0xf]  ;;  %v11347_v39 = vor.u32 %v14407_v45, %v11346_v58 }
 0x3c8   :  { %v11362_v58 = vld [vmem:[#allocation12 + $0x280] sm:$0xf] }
 0x3c9   :  { %4470 = vmatpush.bf16.msrb.mxu1 %v11091_v1  ;;  %4528 = vmatpush.bf16.msra.mxu0 %v11275_v42  ;;  %v11202_v1 = vld [vmem:[#allocation12 + $0x140] sm:$0xf]  ;;  %v11338_v42 = vld [vmem:[#allocation12 + $0x250] sm:$0xf] }
 0x3ca   :  { %v11203_v33 = vor.u32 %v14371_v62, %v11202_v1 }
 0x3cb   :  { %3378 = vmatpush.bf16.msrb.mxu2 %v15798_v48  ;;  %3422 = vmatpush.bf16.msrb.mxu3 %v15798_v48  ;;  %v11146_v48 = vld [vmem:[#allocation12 + $0xd0] sm:$0xf] }
 0x3cc   :  { %v11147_v19 = vor.u32 %v14357_v43, %v11146_v48  ;;  %v14387_v48 = vld [vmem:[#allocation12 + $0x1c4] sm:$0xf0] }
 0x3cd   :  { %4471 = vmatpush.bf16.msrb.mxu1 %v11083_v54  ;;  %v11194_v54 = vld [vmem:[#allocation12 + $0x130] sm:$0xf] }
 0x3cf   :  { %3379 = vmatpush.bf16.msrb.mxu2 %v15792_v23  ;;  %3423 = vmatpush.bf16.msrb.mxu3 %v15792_v23  ;;  %v11066_v23 = vld [vmem:[#allocation12 + $0x30] sm:$0xf] }
 0x3d0   :  { %v11067_v59 = vor.u32 %v14337_v34, %v11066_v23  ;;  %v11186_v34 = vld [vmem:[#allocation12 + $0x120] sm:$0xf] }
 0x3d1   :  { %4472 = vmatpush.bf16.msrb.mxu1 %v11075_v24 }
 0x3d2   :  { %3380 = vmatmul.bf16.vlgmr.msrb.gmra.mxu2 %v14306_v36  ;;  %3424 = vmatmul.bf16.vlgmr.msrb.gmra.mxu3 %v14308_v25  ;;  %v11258_v36 = vld [vmem:[#allocation12 + $0x1b0] sm:$0xf] }
 0x3d3   :  { %4488 = vmatpush.bf16.msra.mxu2 %v11163_v18  ;;  %4507 = vmatpush.bf16.msra.mxu3 %v11227_v38  ;;  %v11259_v24 = vor.u32 %v14385_v47, %v11258_v36  ;;  %v14409_v38 = vld [vmem:[#allocation12 + $0x274] sm:$0xf0] }
 0x3d4   :  { %v11355_v49 = vor.u32 %v14409_v38, %v11354_v52 }
 0x3d5   :  { %4473 = vmatpush.bf16.msrb.mxu1 %v11067_v59  ;;  %v14383_v59 = vld [vmem:[#allocation12 + $0x1a4] sm:$0xf0] }
 0x3d7   :  { %4489 = vmatpush.bf16.msra.mxu2 %v11155_v28  ;;  %4508 = vmatpush.bf16.msra.mxu3 %v11219_v22  ;;  %v11266_v28 = vld [vmem:[#allocation12 + $0x1c0] sm:$0xf]  ;;  %v11419_v22 = vor.u32 %v14425_v6, %v11418_v32 }
 0x3d8   :  { %v11267_v43 = vor.u32 %v14387_v48, %v11266_v28 }
 0x3d9   :  { %4474 = vmatpush.bf16.msrb.mxu1 %v11059_v60 }
 0x3da   :  { %4529 = vmatpush.bf16.msra.mxu0 %v11267_v43 }
 0x3db   :  { %4490 = vmatpush.bf16.msra.mxu2 %v11147_v19  ;;  %4509 = vmatpush.bf16.msra.mxu3 %v11211_v5  ;;  %v14369_v19 = vld [vmem:[#allocation12 + $0x134] sm:$0xf0]  ;;  %v14423_v5 = vld [vmem:[#allocation12 + $0x2e4] sm:$0xf0] }
 0x3dc   :  { %v11195_v25 = vor.u32 %v14369_v19, %v11194_v54 }
 0x3dd   :  { %4475 = vmatpush.bf16.msrb.mxu1 %v11051_v16 }
 0x3de   :  { %4530 = vmatpush.bf16.msra.mxu0 %v11259_v24  ;;  %v14403_v24 = vld [vmem:[#allocation12 + $0x244] sm:$0xf0] }
 0x3df   :  { %4491 = vmatpush.bf16.msra.mxu2 %v11139_v57  ;;  %4510 = vmatpush.bf16.msra.mxu3 %v11203_v33  ;;  %v14367_v57 = vld [vmem:[#allocation12 + $0x124] sm:$0xf0] }
 0x3e0   :  { %v11187_v7 = vor.u32 %v14367_v57, %v11186_v34  ;;  %v14419_v34 = vld [vmem:[#allocation12 + $0x2c4] sm:$0xf0] }
 0x3e1   :  { %4476 = vmatpush.bf16.msrb.mxu1 %v11043_v51  ;;  %v14363_v51 = vld [vmem:[#allocation12 + $0x104] sm:$0xf0] }
 0x3e2   :  { %3385 = vmatmul.bf16.gmra.mxu2 %v14307_v11  ;;  %3429 = vmatmul.bf16.gmra.mxu3 %v14309_v3  ;;  %v14365_v11 = vld [vmem:[#allocation12 + $0x114] sm:$0xf0]  ;;  %v11251_v3 = vor.u32 %v14383_v59, %v11250_v26  ;;  %v11322_v26 = vld [vmem:[#allocation12 + $0x230] sm:$0xf] }
 0x3e3   :  { %4492 = vmatpush.bf16.msra.mxu2 %v11131_v8  ;;  %4511 = vmatpush.bf16.msra.mxu3 %v11195_v25  ;;  %v11178_v8 = vld [vmem:[#allocation12 + $0x110] sm:$0xf] }
 0x3e4   :  { %v11179_v35 = vor.u32 %v14365_v11, %v11178_v8  ;;  %4531 = vmatpush.bf16.msra.mxu0 %v11251_v3  ;;  %v11386_v59 = vld [vmem:[#allocation12 + $0x2b0] sm:$0xf]  ;;  %v14417_v11 = vld [vmem:[#allocation12 + $0x2b4] sm:$0xf0] }
 0x3e5   :  { %4545 = vmatpush.bf16.msra.mxu1 %v11355_v49  ;;  %v11387_v14 = vor.u32 %v14417_v11, %v11386_v59  ;;  %v11092_v11 = vld [vmem:[#allocation12 + $0x68] sm:$0xf0] }
 0x3e7   :  { %4493 = vmatpush.bf16.msra.mxu2 %v11123_v21  ;;  %4512 = vmatpush.bf16.msra.mxu3 %v11187_v7  ;;  %v14401_v7 = vld [vmem:[#allocation12 + $0x234] sm:$0xf0] }
 0x3e8   :  { %4532 = vmatpush.bf16.msra.mxu0 %v11243_v63  ;;  %v11323_v8 = vor.u32 %v14401_v7, %v11322_v26  ;;  %v14399_v63 = vld [vmem:[#allocation12 + $0x224] sm:$0xf0] }
 0x3e9   :  { %4546 = vmatpush.bf16.msra.mxu1 %v11347_v39  ;;  %v14471_v26 = vld [vmem:[#allocation12 + $0x464] sm:$0xf0] }
 0x3eb   :  { %4494 = vmatpush.bf16.msra.mxu2 %v11115_v55  ;;  %4513 = vmatpush.bf16.msra.mxu3 %v11179_v35 }
 0x3ec   :  { %4533 = vmatpush.bf16.msra.mxu0 %v11235_v15 }
 0x3ef   :  { %4495 = vmatpush.bf16.msra.mxu2 %v11107_v37  ;;  %v11171_v37 = vor.u32 %v14363_v51, %v11170_v10  ;;  %v11370_v10 = vld [vmem:[#allocation12 + $0x290] sm:$0xf]  ;;  %v14413_v51 = vld [vmem:[#allocation12 + $0x294] sm:$0xf0] }
 0x3f0   :  { %v11371_v17 = vor.u32 %v14413_v51, %v11370_v10  ;;  %v11084_v51 = vld [vmem:[#allocation12 + $0x58] sm:$0xf0] }
 0x3f1   :  { %4514 = vmatpush.bf16.msra.mxu3 %v11171_v37 }
 0x3f3   :  { %4564 = vmatpush.bf16.msrb.mxu2 %v11419_v22  ;;  %v11298_v22 = vld [vmem:[#allocation12 + $0x200] sm:$0xf] }
 0x3f5   :  { %v3117_v18 = vpop.f32.mrf.mxu2  ;;  %v3161_v50 = vpop.f32.mrf.mxu3 }
 0x3f6   :  { %v3127_v53 = vpack.c.bf16 %v3117_v18, %v3117_v18  ;;  %v3171_v9 = vpack.c.bf16 %v3161_v50, %v3161_v50  ;;  %v14405_v18 = vld [vmem:[#allocation12 + $0x254] sm:$0xf0]  ;;  %v11411_v50 = vor.u32 %v14423_v5, %v11410_v0  ;;  %v14411_v0 = vld [vmem:[#allocation12 + $0x284] sm:$0xf0]  ;;  %v11482_v5 = vld [vmem:[#allocation12 + $0x370] sm:$0xf] }
 0x3f7   :  { %v11339_v1 = vor.u32 %v14405_v18, %v11338_v42  ;;  %v11363_v39 = vor.u32 %v14411_v0, %v11362_v58  ;;  %v14441_v42 = vld [vmem:[#allocation12 + $0x374] sm:$0xf0]  ;;  %v11546_v18 = vld [vmem:[#allocation12 + $0x3f0] sm:$0xf]  ;;  %v14451_v0 = vld [vmem:[#allocation12 + $0x3c4] sm:$0xf0] }
 0x3f8   :  { %3131 = vst [vmem:[#allocation3] sm:$0xf] %v3127_v53  ;;  %v11402_v53 = vld [vmem:[#allocation12 + $0x2d0] sm:$0xf]  ;;  %4565 = vmatpush.bf16.msrb.mxu2 %v11411_v50  ;;  %v11483_v50 = vor.u32 %v14441_v42, %v11482_v5  ;;  %v14467_v5 = vld [vmem:[#allocation12 + $0x444] sm:$0xf0] }
 0x3f9   :  { %3175 = vst [vmem:[#allocation3 + $0x4] sm:$0xf] %v3171_v9  ;;  %v14421_v9 = vld [vmem:[#allocation12 + $0x2d4] sm:$0xf0]  ;;  %4547 = vmatpush.bf16.msra.mxu1 %v11339_v1 }
 0x3fa   :  { %v11403_v33 = vor.u32 %v14421_v9, %v11402_v53  ;;  %v14457_v53 = vld [vmem:[#allocation12 + $0x3f4] sm:$0xf0]  ;;  %v11610_v9 = vld [vmem:[#allocation12 + $0x470] sm:$0xf]  ;;  %4583 = vmatpush.bf16.msrb.mxu3 %v11483_v50  ;;  %v14338_v50 = vld [vmem:[#allocation12 + $0x44] sm:$0xf] }
 0x3fb   :  { %v14473_v1 = vld [vmem:[#allocation12 + $0x474] sm:$0xf0] }
 0x3fc   :  { %4566 = vmatpush.bf16.msrb.mxu2 %v11403_v33  ;;  %v11547_v33 = vor.u32 %v14457_v53, %v11546_v18  ;;  %v11076_v53 = vld [vmem:[#allocation12 + $0x48] sm:$0xf0] }
 0x3fd   :  { %v3119_v46 = vpop.f32.mrf.mxu2  ;;  %v3163_v44 = vpop.f32.mrf.mxu3 }
 0x3fe   :  { %v3128_v31 = vpack.c.bf16 %v3119_v46, %v3119_v46  ;;  %v3172_v23 = vpack.c.bf16 %v3163_v44, %v3163_v44  ;;  %v11330_v46 = vld [vmem:[#allocation12 + $0x240] sm:$0xf]  ;;  %4602 = vmatpush.bf16.msrb.mxu0 %v11547_v33  ;;  %v11514_v33 = vld [vmem:[#allocation12 + $0x3b0] sm:$0xf] }
 0x3ff   :  { %v10970_v30 = vld [vmem:[#allocation3] sm:$0xf] }
 0x400   :  { %3132 = vst [vmem:[#allocation3 + $0x24] sm:$0xf] %v3128_v31  ;;  %v14312_v16 = vld [vmem:[#allocation3 + $0x4] sm:$0xf] }
 0x401   :  { %3176 = vst [vmem:[#allocation3 + $0x28] sm:$0xf] %v3172_v23  ;;  %v11394_v31 = vld [vmem:[#allocation12 + $0x2c0] sm:$0xf]  ;;  %v11331_v23 = vor.u32 %v14403_v24, %v11330_v46  ;;  %v14439_v24 = vld [vmem:[#allocation12 + $0x364] sm:$0xf0] }
 0x402   :  { %v11395_v57 = vor.u32 %v14419_v34, %v11394_v31  ;;  %v11474_v46 = vld [vmem:[#allocation12 + $0x360] sm:$0xf]  ;;  %v14455_v34 = vld [vmem:[#allocation12 + $0x3e4] sm:$0xf0] }
 0x403   :  { %4548 = vmatpush.bf16.msra.mxu1 %v11331_v23  ;;  %v11538_v31 = vld [vmem:[#allocation12 + $0x3e0] sm:$0xf]  ;;  %v11475_v23 = vor.u32 %v14439_v24, %v11474_v46 }
 0x404   :  { %4567 = vmatpush.bf16.msrb.mxu2 %v11395_v57  ;;  %v11602_v57 = vld [vmem:[#allocation12 + $0x460] sm:$0xf]  ;;  %v11539_v7 = vor.u32 %v14455_v34, %v11538_v31  ;;  %v14336_v31 = vld [vmem:[#allocation12 + $0x34] sm:$0xf] }
 0x405   :  { %v3122_v60 = vpop.f32.mrf.mxu2  ;;  %v3166_v40 = vpop.f32.mrf.mxu3  ;;  %v11603_v59 = vor.u32 %v14471_v26, %v11602_v57  ;;  %4584 = vmatpush.bf16.msrb.mxu3 %v11475_v23  ;;  %v11068_v23 = vld [vmem:[#allocation12 + $0x38] sm:$0xf0]  ;;  %v11442_v26 = vld [vmem:[#allocation12 + $0x320] sm:$0xf] }
 0x406   :  { %v3129_v13 = vpack.c.bf16 %v3122_v60, %v3122_v60  ;;  %v3173_v21 = vpack.c.bf16 %v3166_v40, %v3166_v40  ;;  %v11314_v40 = vld [vmem:[#allocation12 + $0x220] sm:$0xf]  ;;  %4603 = vmatpush.bf16.msrb.mxu0 %v11539_v7  ;;  %v11071_v57 = vor.u32 %v14336_v31, %v11068_v23  ;;  %v11164_v31 = vld [vmem:[#allocation12 + $0xf8] sm:$0xf0]  ;;  %v14376_v23 = vld [vmem:[#allocation12 + $0x174] sm:$0xf] }
 0x407   :  { %v14316_v4 = vld [vmem:[#allocation3 + $0x20] sm:$0xf0]  ;;  %4549 = vmatpush.bf16.msra.mxu1 %v11323_v8 }
 0x408   :  { %3133 = vst [vmem:[#allocation3 + $0x48] sm:$0xf] %v3129_v13  ;;  %v15918_v55 = vor.u32 %v14316_v4, %v10970_v30  ;;  %v10972_v2 = vld [vmem:[#allocation3 + $0x24] sm:$0xf0]  ;;  %4568 = vmatpush.bf16.msrb.mxu2 %v11387_v14  ;;  %v11378_v13 = vld [vmem:[#allocation12 + $0x2a0] sm:$0xf] }
 0x409   :  { %3177 = vst [vmem:[#allocation3 + $0x4c] sm:$0xf] %v3173_v21  ;;  %v15920_v12 = vor.u32 %v14312_v16, %v10972_v2  ;;  %v11315_v21 = vor.u32 %v14399_v63, %v11314_v40  ;;  %v14415_v30 = vld [vmem:[#allocation12 + $0x2a4] sm:$0xf0]  ;;  %v11306_v4 = vld [vmem:[#allocation12 + $0x210] sm:$0xf] }
 0x40a   :  { %4477 = vmatmul.bf16.vlgmr.msrb.gmra.mxu1 %v15918_v55  ;;  %v14397_v16 = vld [vmem:[#allocation12 + $0x214] sm:$0xf0]  ;;  %v11379_v2 = vor.u32 %v14415_v30, %v11378_v13  ;;  %v14342_v8 = vld [vmem:[#allocation12 + $0x64] sm:$0xf] }
 0x40b   :  { %4496 = vmatmul.bf16.vlgmr.msra.gmra.mxu2 %v15920_v12  ;;  %4550 = vmatpush.bf16.msra.mxu1 %v11315_v21  ;;  %v11307_v56 = vor.u32 %v14397_v16, %v11306_v4  ;;  %v11095_v14 = vor.u32 %v14342_v8, %v11092_v11  ;;  %v11594_v21 = vld [vmem:[#allocation12 + $0x450] sm:$0xf]  ;;  %v14469_v30 = vld [vmem:[#allocation12 + $0x454] sm:$0xf0]  ;;  %v14340_v4 = vld [vmem:[#allocation12 + $0x54] sm:$0xf] }
 0x40c   :  { %4569 = vmatpush.bf16.msrb.mxu2 %v11379_v2  ;;  %v11595_v10 = vor.u32 %v14469_v30, %v11594_v21  ;;  %v11506_v8 = vld [vmem:[#allocation12 + $0x3a0] sm:$0xf]  ;;  %v11434_v21 = vld [vmem:[#allocation12 + $0x310] sm:$0xf] }
 0x40d   :  { %v3124_v61 = vpop.f32.mrf.mxu2  ;;  %v3168_v27 = vpop.f32.mrf.mxu3 }
 0x40e   :  { %v3130_v41 = vpack.c.bf16 %v3124_v61, %v3124_v61  ;;  %v3174_v29 = vpack.c.bf16 %v3168_v27, %v3168_v27 }
 0x40f   :  { %v11006_v54 = vld [vmem:[#allocation3 + $0x48] sm:$0xf]  ;;  %4551 = vmatpush.bf16.msra.mxu1 %v11307_v56 }
 0x410   :  { %3134 = vst [vmem:[#allocation3 + $0x6c] sm:$0xf] %v3130_v41  ;;  %v14321_v36 = vld [vmem:[#allocation3 + $0x4c] sm:$0xf]  ;;  %4570 = vmatpush.bf16.msrb.mxu2 %v11371_v17 }
 0x411   :  { %3178 = vst [vmem:[#allocation3 + $0x70] sm:$0xf] %v3174_v29  ;;  %v14395_v29 = vld [vmem:[#allocation12 + $0x204] sm:$0xf0] }
 0x412   :  { %v11299_v45 = vor.u32 %v14395_v29, %v11298_v22  ;;  %v14435_v22 = vld [vmem:[#allocation12 + $0x344] sm:$0xf0]  ;;  %v11522_v29 = vld [vmem:[#allocation12 + $0x3c0] sm:$0xf] }
 0x413   :  { %v11523_v42 = vor.u32 %v14451_v0, %v11522_v29 }
 0x414   :  { %4552 = vmatpush.bf16.msra.mxu1 %v11299_v45  ;;  %4571 = vmatpush.bf16.msrb.mxu2 %v11363_v39  ;;  %v11586_v39 = vld [vmem:[#allocation12 + $0x440] sm:$0xf] }
 0x415   :  { %v3205_v62 = vpop.f32.mrf.mxu2  ;;  %v3249_v48 = vpop.f32.mrf.mxu3  ;;  %v11587_v18 = vor.u32 %v14467_v5, %v11586_v39 }
 0x416   :  { %v3215_v28 = vpack.c.bf16 %v3205_v62, %v3205_v62  ;;  %v3259_v43 = vpack.c.bf16 %v3249_v48, %v3249_v48  ;;  %v14344_v48 = vld [vmem:[#allocation12 + $0x74] sm:$0xf] }
 0x417   :  { %v14325_v19 = vld [vmem:[#allocation3 + $0x68] sm:$0xf0] }
 0x418   :  { %3219 = vst [vmem:[#allocation3 + $0x8] sm:$0xf] %v3215_v28  ;;  %v15924_v25 = vor.u32 %v14325_v19, %v11006_v54  ;;  %v11008_v47 = vld [vmem:[#allocation3 + $0x6c] sm:$0xf0]  ;;  %v11611_v28 = vor.u32 %v14473_v1, %v11610_v9  ;;  %v11079_v1 = vor.u32 %v14338_v50, %v11076_v53  ;;  %v14427_v53 = vld [vmem:[#allocation12 + $0x304] sm:$0xf0] }
 0x419   :  { %3263 = vst [vmem:[#allocation3 + $0xc] sm:$0xf] %v3259_v43  ;;  %v15926_v44 = vor.u32 %v14321_v36, %v11008_v47  ;;  %v11100_v43 = vld [vmem:[#allocation12 + $0x78] sm:$0xf0]  ;;  %v11450_v9 = vld [vmem:[#allocation12 + $0x330] sm:$0xf] }
 0x41a   :  { %4482 = vmatmul.bf16.gmra.mxu1 %v15924_v25  ;;  %v11103_v36 = vor.u32 %v14344_v48, %v11100_v43  ;;  %v14449_v43 = vld [vmem:[#allocation12 + $0x3b4] sm:$0xf0] }
 0x41b   :  { %4501 = vmatmul.bf16.gmra.mxu2 %v15926_v44  ;;  %4621 = vmatpush.bf16.msrb.mxu1 %v11611_v28  ;;  %v11515_v46 = vor.u32 %v14449_v43, %v11514_v33  ;;  %v14443_v33 = vld [vmem:[#allocation12 + $0x384] sm:$0xf0] }
 0x41c   :  { %4640 = vmatpush.bf16.msra.mxu2 %v11103_v36 }
 0x41d   :  { %v3207_v3 = vpop.f32.mrf.mxu2  ;;  %v3251_v35 = vpop.f32.mrf.mxu3 }
 0x41e   :  { %v3216_v20 = vpack.c.bf16 %v3207_v3, %v3207_v3  ;;  %v3260_v60 = vpack.c.bf16 %v3251_v35, %v3251_v35  ;;  %v11466_v3 = vld [vmem:[#allocation12 + $0x350] sm:$0xf] }
 0x41f   :  { %v10978_v32 = vld [vmem:[#allocation3 + $0x8] sm:$0xf]  ;;  %v11530_v35 = vld [vmem:[#allocation12 + $0x3d0] sm:$0xf]  ;;  %4622 = vmatpush.bf16.msrb.mxu1 %v11603_v59 }
 0x420   :  { %3220 = vst [vmem:[#allocation3 + $0x2c] sm:$0xf] %v3216_v20  ;;  %v14313_v6 = vld [vmem:[#allocation3 + $0xc] sm:$0xf]  ;;  %v14437_v20 = vld [vmem:[#allocation12 + $0x354] sm:$0xf0]  ;;  %4641 = vmatpush.bf16.msra.mxu2 %v11095_v14 }
 0x421   :  { %3264 = vst [vmem:[#allocation3 + $0x30] sm:$0xf] %v3260_v60  ;;  %v14453_v60 = vld [vmem:[#allocation12 + $0x3d4] sm:$0xf0]  ;;  %v11467_v63 = vor.u32 %v14437_v20, %v11466_v3  ;;  %v14431_v59 = vld [vmem:[#allocation12 + $0x324] sm:$0xf0] }
 0x422   :  { %v11531_v13 = vor.u32 %v14453_v60, %v11530_v35  ;;  %v11443_v3 = vor.u32 %v14431_v59, %v11442_v26  ;;  %v14447_v14 = vld [vmem:[#allocation12 + $0x3a4] sm:$0xf0]  ;;  %v11570_v20 = vld [vmem:[#allocation12 + $0x420] sm:$0xf] }
 0x423   :  { %4585 = vmatpush.bf16.msrb.mxu3 %v11467_v63  ;;  %4623 = vmatpush.bf16.msrb.mxu1 %v11595_v10  ;;  %v14463_v35 = vld [vmem:[#allocation12 + $0x424] sm:$0xf0]  ;;  %v11507_v60 = vor.u32 %v14447_v14, %v11506_v8  ;;  %v14334_v63 = vld [vmem:[#allocation12 + $0x24] sm:$0xf]  ;;  %v14392_v8 = vld [vmem:[#allocation12 + $0x1f4] sm:$0xf] }
 0x424   :  { %4604 = vmatpush.bf16.msrb.mxu0 %v11531_v13  ;;  %v11060_v13 = vld [vmem:[#allocation12 + $0x28] sm:$0xf0] }
 0x425   :  { %v3210_v37 = vpop.f32.mrf.mxu2  ;;  %v3254_v52 = vpop.f32.mrf.mxu3  ;;  %v11063_v30 = vor.u32 %v14334_v63, %v11060_v13  ;;  %v11156_v13 = vld [vmem:[#allocation12 + $0xe8] sm:$0xf0] }
 0x426   :  { %v3217_v15 = vpack.c.bf16 %v3210_v37, %v3210_v37  ;;  %v3261_v38 = vpack.c.bf16 %v3254_v52, %v3254_v52  ;;  %v11087_v52 = vor.u32 %v14340_v4, %v11084_v51  ;;  %v14429_v4 = vld [vmem:[#allocation12 + $0x314] sm:$0xf0] }
 0x427   :  { %v14317_v49 = vld [vmem:[#allocation3 + $0x28] sm:$0xf0]  ;;  %4624 = vmatpush.bf16.msrb.mxu1 %v11587_v18  ;;  %v11435_v10 = vor.u32 %v14429_v4, %v11434_v21  ;;  %v14445_v51 = vld [vmem:[#allocation12 + $0x394] sm:$0xf0]  ;;  %v14374_v21 = vld [vmem:[#allocation12 + $0x164] sm:$0xf] }
 0x428   :  { %3221 = vst [vmem:[#allocation3 + $0x50] sm:$0xf] %v3217_v15  ;;  %v15930_v61 = vor.u32 %v14317_v49, %v10978_v32  ;;  %v10980_v27 = vld [vmem:[#allocation3 + $0x2c] sm:$0xf0]  ;;  %v11458_v49 = vld [vmem:[#allocation12 + $0x340] sm:$0xf]  ;;  %4642 = vmatpush.bf16.msra.mxu2 %v11087_v52  ;;  %4605 = vmatpush.bf16.msrb.mxu0 %v11523_v42 }
 0x429   :  { %3265 = vst [vmem:[#allocation3 + $0x54] sm:$0xf] %v3261_v38  ;;  %v15932_v41 = vor.u32 %v14313_v6, %v10980_v27  ;;  %v3469_v27 = vpop.f32.mrf.mxu0  ;;  %v11459_v45 = vor.u32 %v14435_v22, %v11458_v49  ;;  %v14332_v49 = vld [vmem:[#allocation12 + $0x14] sm:$0xf]  ;;  %v11426_v42 = vld [vmem:[#allocation12 + $0x300] sm:$0xf] }
 0x42a   :  { %4515 = vmatmul.bf16.vlgmr.msra.gmra.mxu3 %v15930_v61  ;;  %v3479_v58 = vpack.c.bf16 %v3469_v27, %v3469_v27  ;;  %v11052_v27 = vld [vmem:[#allocation12 + $0x18] sm:$0xf0] }
 0x42b   :  { %4534 = vmatmul.bf16.vlgmr.msra.gmra.mxu0 %v15932_v41  ;;  %4586 = vmatpush.bf16.msrb.mxu3 %v11459_v45  ;;  %v11055_v0 = vor.u32 %v14332_v49, %v11052_v27  ;;  %v14372_v49 = vld [vmem:[#allocation12 + $0x154] sm:$0xf] }
 0x42c   :  { %3483 = vst [vmem:[#allocation3 + $0x20] sm:$0xf] %v3479_v58  ;;  %4643 = vmatpush.bf16.msra.mxu2 %v11079_v1  ;;  %4606 = vmatpush.bf16.msrb.mxu0 %v11515_v46  ;;  %v14360_v46 = vld [vmem:[#allocation12 + $0xf4] sm:$0xf] }
 0x42d   :  { %v3212_v62 = vpop.f32.mrf.mxu2  ;;  %v3256_v19 = vpop.f32.mrf.mxu3 }
 0x42e   :  { %v3218_v54 = vpack.c.bf16 %v3212_v62, %v3212_v62  ;;  %v3262_v47 = vpack.c.bf16 %v3256_v19, %v3256_v19  ;;  %v14433_v62 = vld [vmem:[#allocation12 + $0x334] sm:$0xf0] }
 0x42f   :  { %v11014_v37 = vld [vmem:[#allocation3 + $0x50] sm:$0xf]  ;;  %v11451_v48 = vor.u32 %v14433_v62, %v11450_v9  ;;  %v14465_v19 = vld [vmem:[#allocation12 + $0x434] sm:$0xf0]  ;;  %v11490_v9 = vld [vmem:[#allocation12 + $0x380] sm:$0xf]  ;;  %v11427_v62 = vor.u32 %v14427_v53, %v11426_v42 }
 0x430   :  { %3222 = vst [vmem:[#allocation3 + $0x74] sm:$0xf] %v3218_v54  ;;  %v14322_v15 = vld [vmem:[#allocation3 + $0x54] sm:$0xf]  ;;  %4644 = vmatpush.bf16.msra.mxu2 %v11071_v57  ;;  %4607 = vmatpush.bf16.msrb.mxu0 %v11507_v60  ;;  %v11491_v43 = vor.u32 %v14443_v33, %v11490_v9  ;;  %v14354_v33 = vld [vmem:[#allocation12 + $0xc4] sm:$0xf] }
 0x431   :  { %3266 = vst [vmem:[#allocation3 + $0x78] sm:$0xf] %v3262_v47  ;;  %v11578_v54 = vld [vmem:[#allocation12 + $0x430] sm:$0xf]  ;;  %4587 = vmatpush.bf16.msrb.mxu3 %v11451_v48  ;;  %v3471_v7 = vpop.f32.mrf.mxu0  ;;  %v14459_v48 = vld [vmem:[#allocation12 + $0x404] sm:$0xf0] }
 0x432   :  { %v11579_v24 = vor.u32 %v14465_v19, %v11578_v54  ;;  %v3480_v11 = vpack.c.bf16 %v3471_v7, %v3471_v7  ;;  %v14330_v19 = vld [vmem:[#allocation12 + $0x4] sm:$0xf]  ;;  %v11167_v7 = vor.u32 %v14360_v46, %v11164_v31 }
 0x434   :  { %4625 = vmatpush.bf16.msrb.mxu1 %v11579_v24  ;;  %3484 = vst [vmem:[#allocation3 + $0x44] sm:$0xf] %v3480_v11  ;;  %4645 = vmatpush.bf16.msra.mxu2 %v11063_v30  ;;  %v11292_v11 = vld [vmem:[#allocation12 + $0x1f8] sm:$0xf0] }
 0x435   :  { %v3293_v40 = vpop.f32.mrf.mxu2  ;;  %v3337_v2 = vpop.f32.mrf.mxu3  ;;  %4588 = vmatpush.bf16.msrb.mxu3 %v11443_v3  ;;  %v14408_v3 = vld [vmem:[#allocation12 + $0x274] sm:$0xf] }
 0x436   :  { %v3303_v16 = vpack.c.bf16 %v3293_v40, %v3293_v40  ;;  %v3347_v56 = vpack.c.bf16 %v3337_v2, %v3337_v2  ;;  %v11571_v40 = vor.u32 %v14463_v35, %v11570_v20  ;;  %v11295_v20 = vor.u32 %v14392_v8, %v11292_v11  ;;  %v11356_v35 = vld [vmem:[#allocation12 + $0x278] sm:$0xf0]  ;;  %v14352_v11 = vld [vmem:[#allocation12 + $0xb4] sm:$0xf] }
 0x437   :  { %v14326_v17 = vld [vmem:[#allocation3 + $0x70] sm:$0xf0]  ;;  %v11359_v60 = vor.u32 %v14408_v3, %v11356_v35  ;;  %v11132_v3 = vld [vmem:[#allocation12 + $0xb8] sm:$0xf0] }
 0x438   :  { %3307 = vst [vmem:[#allocation3 + $0x10] sm:$0xf] %v3303_v16  ;;  %v15936_v38 = vor.u32 %v14326_v17, %v11014_v37  ;;  %v11016_v32 = vld [vmem:[#allocation3 + $0x74] sm:$0xf0]  ;;  %v11498_v16 = vld [vmem:[#allocation12 + $0x390] sm:$0xf]  ;;  %4626 = vmatpush.bf16.msrb.mxu1 %v11571_v40  ;;  %4646 = vmatpush.bf16.msra.mxu2 %v11055_v0 }
 0x439   :  { %3351 = vst [vmem:[#allocation3 + $0x14] sm:$0xf] %v3347_v56  ;;  %v15938_v6 = vor.u32 %v14322_v15, %v11016_v32  ;;  %v11562_v56 = vld [vmem:[#allocation12 + $0x410] sm:$0xf]  ;;  %v14461_v37 = vld [vmem:[#allocation12 + $0x414] sm:$0xf0]  ;;  %v11499_v52 = vor.u32 %v14445_v51, %v11498_v16  ;;  %4589 = vmatpush.bf16.msrb.mxu3 %v11435_v10  ;;  %v3474_v50 = vpop.f32.mrf.mxu0 }
 0x43a   :  { %4520 = vmatmul.bf16.gmra.mxu3 %v15936_v38  ;;  %v11563_v32 = vor.u32 %v14461_v37, %v11562_v56  ;;  %v3481_v1 = vpack.c.bf16 %v3474_v50, %v3474_v50  ;;  %v14358_v40 = vld [vmem:[#allocation12 + $0xe4] sm:$0xf]  ;;  %v11220_v16 = vld [vmem:[#allocation12 + $0x168] sm:$0xf0]  ;;  %v11276_v0 = vld [vmem:[#allocation12 + $0x1d8] sm:$0xf0] }
 0x43b   :  { %4539 = vmatmul.bf16.gmra.mxu0 %v15938_v6  ;;  %v11159_v4 = vor.u32 %v14358_v40, %v11156_v13  ;;  %v11284_v10 = vld [vmem:[#allocation12 + $0x1e8] sm:$0xf0]  ;;  %v11223_v51 = vor.u32 %v14374_v21, %v11220_v16  ;;  %v14406_v37 = vld [vmem:[#allocation12 + $0x264] sm:$0xf]  ;;  %v11260_v13 = vld [vmem:[#allocation12 + $0x1b8] sm:$0xf0] }
 0x43c   :  { %4608 = vmatpush.bf16.msrb.mxu0 %v11499_v52  ;;  %4627 = vmatpush.bf16.msrb.mxu1 %v11563_v32  ;;  %3485 = vst [vmem:[#allocation3 + $0x68] sm:$0xf] %v3481_v1  ;;  %v11148_v32 = vld [vmem:[#allocation12 + $0xd8] sm:$0xf0]  ;;  %v14404_v1 = vld [vmem:[#allocation12 + $0x254] sm:$0xf] }
 0x43d   :  { %v3295_v28 = vpop.f32.mrf.mxu2  ;;  %v3339_v47 = vpop.f32.mrf.mxu3  ;;  %4590 = vmatpush.bf16.msrb.mxu3 %v11427_v62  ;;  %v11340_v62 = vld [vmem:[#allocation12 + $0x258] sm:$0xf0]  ;;  %v14400_v21 = vld [vmem:[#allocation12 + $0x234] sm:$0xf] }
 0x43e   :  { %v3304_v36 = vpack.c.bf16 %v3295_v28, %v3295_v28  ;;  %v3348_v34 = vpack.c.bf16 %v3339_v47, %v3339_v47  ;;  %v11554_v28 = vld [vmem:[#allocation12 + $0x400] sm:$0xf] }
 0x43f   :  { %v10986_v29 = vld [vmem:[#allocation3 + $0x10] sm:$0xf]  ;;  %v11555_v54 = vor.u32 %v14459_v48, %v11554_v28 }
 0x440   :  { %3308 = vst [vmem:[#allocation3 + $0x34] sm:$0xf] %v3304_v36  ;;  %v14314_v45 = vld [vmem:[#allocation3 + $0x14] sm:$0xf]  ;;  %v11044_v36 = vld [vmem:[#allocation12 + $0x8] sm:$0xf0]  ;;  %4609 = vmatpush.bf16.msrb.mxu0 %v11491_v43  ;;  %v11343_v43 = vor.u32 %v14404_v1, %v11340_v62 }
 0x441   :  { %3352 = vst [vmem:[#allocation3 + $0x38] sm:$0xf] %v3348_v34  ;;  %v11047_v47 = vor.u32 %v14330_v19, %v11044_v36  ;;  %4628 = vmatpush.bf16.msrb.mxu1 %v11555_v54  ;;  %v11228_v34 = vld [vmem:[#allocation12 + $0x178] sm:$0xf0]  ;;  %4659 = vmatpush.bf16.msra.mxu3 %v11167_v7  ;;  %v3476_v63 = vpop.f32.mrf.mxu0  ;;  %v11140_v54 = vld [vmem:[#allocation12 + $0xc8] sm:$0xf0] }
 0x442   :  { %v11231_v59 = vor.u32 %v14376_v23, %v11228_v34  ;;  %v3482_v30 = vpack.c.bf16 %v3476_v63, %v3476_v63  ;;  %v14370_v19 = vld [vmem:[#allocation12 + $0x144] sm:$0xf]  ;;  %v11143_v46 = vor.u32 %v14354_v33, %v11140_v54  ;;  %v14384_v63 = vld [vmem:[#allocation12 + $0x1b4] sm:$0xf]  ;;  %v11244_v33 = vld [vmem:[#allocation12 + $0x198] sm:$0xf0] }
 0x443   :  { %4647 = vmatpush.bf16.msra.mxu2 %v11047_v47  ;;  %v14386_v34 = vld [vmem:[#allocation12 + $0x1c4] sm:$0xf]  ;;  %v11263_v16 = vor.u32 %v14384_v63, %v11260_v13  ;;  %v14380_v1 = vld [vmem:[#allocation12 + $0x194] sm:$0xf]  ;;  %v11236_v63 = vld [vmem:[#allocation12 + $0x188] sm:$0xf0] }
 0x444   :  { %4678 = vmatpush.bf16.msra.mxu0 %v11231_v59  ;;  %3486 = vst [vmem:[#allocation3 + $0x8c] sm:$0xf] %v3482_v30  ;;  %v14402_v7 = vld [vmem:[#allocation12 + $0x244] sm:$0xf]  ;;  %v11332_v59 = vld [vmem:[#allocation12 + $0x248] sm:$0xf0] }
 0x445   :  { %v3298_v2 = vpop.f32.mrf.mxu2  ;;  %v3342_v15 = vpop.f32.mrf.mxu3  ;;  %4660 = vmatpush.bf16.msra.mxu3 %v11159_v4  ;;  %v11335_v8 = vor.u32 %v14402_v7, %v11332_v59  ;;  %v14396_v54 = vld [vmem:[#allocation12 + $0x214] sm:$0xf] }
 0x446   :  { %v3305_v17 = vpack.c.bf16 %v3298_v2, %v3298_v2  ;;  %v3349_v22 = vpack.c.bf16 %v3342_v15, %v3342_v15  ;;  %v14390_v2 = vld [vmem:[#allocation12 + $0x1e4] sm:$0xf]  ;;  %v14356_v15 = vld [vmem:[#allocation12 + $0xd4] sm:$0xf] }
 0x447   :  { %v14318_v58 = vld [vmem:[#allocation3 + $0x30] sm:$0xf0]  ;;  %v11287_v56 = vor.u32 %v14390_v2, %v11284_v10  ;;  %v11324_v2 = vld [vmem:[#allocation12 + $0x238] sm:$0xf0]  ;;  %v14350_v10 = vld [vmem:[#allocation12 + $0xa4] sm:$0xf] }
 0x448   :  { %3309 = vst [vmem:[#allocation3 + $0x58] sm:$0xf] %v3305_v17  ;;  %v15942_v39 = vor.u32 %v14318_v58, %v10986_v29  ;;  %v10988_v5 = vld [vmem:[#allocation3 + $0x34] sm:$0xf0]  ;;  %v11348_v17 = vld [vmem:[#allocation12 + $0x268] sm:$0xf0]  ;;  %4679 = vmatpush.bf16.msra.mxu0 %v11223_v51  ;;  %v11151_v29 = vor.u32 %v14356_v15, %v11148_v32 }
 0x449   :  { %3353 = vst [vmem:[#allocation3 + $0x5c] sm:$0xf] %v3349_v22  ;;  %v15944_v18 = vor.u32 %v14314_v45, %v10988_v5  ;;  %v11351_v52 = vor.u32 %v14406_v37, %v11348_v17  ;;  %v11212_v58 = vld [vmem:[#allocation12 + $0x158] sm:$0xf0]  ;;  %v14388_v45 = vld [vmem:[#allocation12 + $0x1d4] sm:$0xf]  ;;  %v11327_v37 = vor.u32 %v14400_v21, %v11324_v2 }
 0x44a   :  { %4553 = vmatmul.bf16.vlgmr.msra.gmra.mxu1 %v15942_v39  ;;  %v11215_v53 = vor.u32 %v14372_v49, %v11212_v58  ;;  %v11279_v9 = vor.u32 %v14388_v45, %v11276_v0  ;;  %4661 = vmatpush.bf16.msra.mxu3 %v11151_v29  ;;  %v11124_v51 = vld [vmem:[#allocation12 + $0xa8] sm:$0xf0]  ;;  %v14366_v17 = vld [vmem:[#allocation12 + $0x124] sm:$0xf]  ;;  %v11002_v49 = vld [vmem:[#allocation3 + $0x20] sm:$0xf] }
 0x44b   :  { %4572 = vmatmul.bf16.vlgmr.msrb.gmra.mxu2 %v15944_v18  ;;  %4697 = vmatpush.bf16.msra.mxu1 %v11295_v20  ;;  %v11196_v20 = vld [vmem:[#allocation12 + $0x138] sm:$0xf0]  ;;  %v11188_v15 = vld [vmem:[#allocation12 + $0x128] sm:$0xf0]  ;;  %v14382_v32 = vld [vmem:[#allocation12 + $0x1a4] sm:$0xf] }
 0x44c   :  { %4716 = vmatpush.bf16.msrb.mxu2 %v11359_v60  ;;  %4680 = vmatpush.bf16.msra.mxu0 %v11215_v53  ;;  %v11135_v60 = vor.u32 %v14352_v11, %v11132_v3  ;;  %v11252_v29 = vld [vmem:[#allocation12 + $0x1a8] sm:$0xf0]  ;;  %v14398_v58 = vld [vmem:[#allocation12 + $0x224] sm:$0xf]  ;;  %v14364_v53 = vld [vmem:[#allocation12 + $0x114] sm:$0xf] }
 0x44d   :  { %v3300_v24 = vpop.f32.mrf.mxu2  ;;  %v3344_v26 = vpop.f32.mrf.mxu3  ;;  %v11255_v45 = vor.u32 %v14382_v32, %v11252_v29  ;;  %v11316_v0 = vld [vmem:[#allocation12 + $0x228] sm:$0xf0]  ;;  %v14346_v11 = vld [vmem:[#allocation12 + $0x84] sm:$0xf]  ;;  %v11548_v32 = vld [vmem:[#allocation12 + $0x3f8] sm:$0xf0] }
 0x44e   :  { %v3306_v57 = vpack.c.bf16 %v3300_v24, %v3300_v24  ;;  %v3350_v14 = vpack.c.bf16 %v3344_v26, %v3344_v26  ;;  %v11204_v24 = vld [vmem:[#allocation12 + $0x148] sm:$0xf0]  ;;  %4662 = vmatpush.bf16.msra.mxu3 %v11143_v46  ;;  %v11612_v29 = vld [vmem:[#allocation12 + $0x478] sm:$0xf0] }
 0x44f   :  { %v11022_v22 = vld [vmem:[#allocation3 + $0x58] sm:$0xf]  ;;  %4698 = vmatpush.bf16.msra.mxu1 %v11287_v56  ;;  %v11207_v23 = vor.u32 %v14370_v19, %v11204_v24  ;;  %v11308_v19 = vld [vmem:[#allocation12 + $0x218] sm:$0xf0] }
 0x450   :  { %3310 = vst [vmem:[#allocation3 + $0x7c] sm:$0xf] %v3306_v57  ;;  %v14323_v50 = vld [vmem:[#allocation3 + $0x5c] sm:$0xf]  ;;  %4717 = vmatpush.bf16.msrb.mxu2 %v11351_v52  ;;  %v11268_v57 = vld [vmem:[#allocation12 + $0x1c8] sm:$0xf0]  ;;  %v11127_v52 = vor.u32 %v14350_v10, %v11124_v51 }
 0x451   :  { %3354 = vst [vmem:[#allocation3 + $0x80] sm:$0xf] %v3350_v14  ;;  %v11271_v26 = vor.u32 %v14386_v34, %v11268_v57  ;;  %v14368_v14 = vld [vmem:[#allocation12 + $0x134] sm:$0xf]  ;;  %4681 = vmatpush.bf16.msra.mxu0 %v11207_v23  ;;  %v11420_v10 = vld [vmem:[#allocation12 + $0x2f8] sm:$0xf0] }
 0x452   :  { %v11199_v40 = vor.u32 %v14368_v14, %v11196_v20  ;;  %4663 = vmatpush.bf16.msra.mxu3 %v11135_v60  ;;  %v11108_v14 = vld [vmem:[#allocation12 + $0x88] sm:$0xf0]  ;;  %v14362_v20 = vld [vmem:[#allocation12 + $0x104] sm:$0xf]  ;;  %v14440_v51 = vld [vmem:[#allocation12 + $0x374] sm:$0xf] }
 0x453   :  { %4699 = vmatpush.bf16.msra.mxu1 %v11279_v9  ;;  %v11180_v9 = vld [vmem:[#allocation12 + $0x118] sm:$0xf0]  ;;  %v11172_v60 = vld [vmem:[#allocation12 + $0x108] sm:$0xf0] }
 0x454   :  { %4718 = vmatpush.bf16.msrb.mxu2 %v11343_v43  ;;  %v11247_v43 = vor.u32 %v14380_v1, %v11244_v33  ;;  %v11175_v13 = vor.u32 %v14362_v20, %v11172_v60  ;;  %v11476_v1 = vld [vmem:[#allocation12 + $0x368] sm:$0xf0]  ;;  %v11596_v60 = vld [vmem:[#allocation12 + $0x458] sm:$0xf0] }
 0x455   :  { %v3381_v27 = vpop.f32.mrf.mxu2  ;;  %v3425_v42 = vpop.f32.mrf.mxu3  ;;  %4682 = vmatpush.bf16.msra.mxu0 %v11199_v40  ;;  %v14378_v40 = vld [vmem:[#allocation12 + $0x184] sm:$0xf]  ;;  %v11540_v33 = vld [vmem:[#allocation12 + $0x3e8] sm:$0xf0] }
 0x456   :  { %v3391_v5 = vpack.c.bf16 %v3381_v27, %v3381_v27  ;;  %v3435_v28 = vpack.c.bf16 %v3425_v42, %v3425_v42  ;;  %v14320_v27 = vld [vmem:[#allocation3 + $0x40] sm:$0xf0]  ;;  %v11116_v42 = vld [vmem:[#allocation12 + $0x98] sm:$0xf0]  ;;  %4664 = vmatpush.bf16.msra.mxu3 %v11127_v52  ;;  %v11239_v21 = vor.u32 %v14378_v40, %v11236_v63  ;;  %v14456_v52 = vld [vmem:[#allocation12 + $0x3f4] sm:$0xf] }
 0x457   :  { %v14327_v48 = vld [vmem:[#allocation3 + $0x78] sm:$0xf0]  ;;  %4700 = vmatpush.bf16.msra.mxu1 %v11271_v26  ;;  %v15954_v23 = vor.u32 %v14320_v27, %v11002_v49  ;;  %v14472_v49 = vld [vmem:[#allocation12 + $0x474] sm:$0xf] }
 0x458   :  { %3395 = vst [vmem:[#allocation3 + $0x18] sm:$0xf] %v3391_v5  ;;  %v15948_v36 = vor.u32 %v14327_v48, %v11022_v22  ;;  %v11024_v47 = vld [vmem:[#allocation3 + $0x7c] sm:$0xf0]  ;;  %4719 = vmatpush.bf16.msrb.mxu2 %v11335_v8  ;;  %v11191_v22 = vor.u32 %v14366_v17, %v11188_v15  ;;  %v14348_v5 = vld [vmem:[#allocation12 + $0x94] sm:$0xf]  ;;  %v11183_v48 = vor.u32 %v14364_v53, %v11180_v9 }
 0x459   :  { %3439 = vst [vmem:[#allocation3 + $0x1c] sm:$0xf] %v3435_v28  ;;  %v15950_v31 = vor.u32 %v14323_v50, %v11024_v47  ;;  %v11319_v50 = vor.u32 %v14398_v58, %v11316_v0  ;;  %v11119_v62 = vor.u32 %v14348_v5, %v11116_v42  ;;  %v11311_v8 = vor.u32 %v14396_v54, %v11308_v19  ;;  %v14422_v0 = vld [vmem:[#allocation12 + $0x2e4] sm:$0xf]  ;;  %v14329_v42 = vld [vmem:[#allocation3 + $0x88] sm:$0xf0] }
 0x45a   :  { %4558 = vmatmul.bf16.gmra.mxu1 %v15948_v36  ;;  %4683 = vmatpush.bf16.msra.mxu0 %v11191_v22  ;;  %v11551_v22 = vor.u32 %v14456_v52, %v11548_v32  ;;  %v11038_v5 = vld [vmem:[#allocation3 + $0x68] sm:$0xf]  ;;  %v11604_v54 = vld [vmem:[#allocation12 + $0x468] sm:$0xf0]  ;;  %v14420_v19 = vld [vmem:[#allocation12 + $0x2d4] sm:$0xf] }
 0x45b   :  { %4577 = vmatmul.bf16.gmra.mxu2 %v15950_v31  ;;  %4701 = vmatpush.bf16.msra.mxu1 %v11263_v16  ;;  %v14424_v16 = vld [vmem:[#allocation12 + $0x2f4] sm:$0xf]  ;;  %v14438_v53 = vld [vmem:[#allocation12 + $0x364] sm:$0xf]  ;;  %v15964_v20 = vor.u32 %v14329_v42, %v11038_v5  ;;  %v11588_v32 = vld [vmem:[#allocation12 + $0x448] sm:$0xf0] }
 0x45c   :  { %4720 = vmatpush.bf16.msrb.mxu2 %v11327_v37  ;;  %4665 = vmatpush.bf16.msra.mxu3 %v11119_v62  ;;  %v11423_v17 = vor.u32 %v14424_v16, %v11420_v10  ;;  %v14454_v62 = vld [vmem:[#allocation12 + $0x3e4] sm:$0xf]  ;;  %v11396_v16 = vld [vmem:[#allocation12 + $0x2c8] sm:$0xf0]  ;;  %v11516_v5 = vld [vmem:[#allocation12 + $0x3b8] sm:$0xf0] }
 0x45d   :  { %v3383_v35 = vpop.f32.mrf.mxu2  ;;  %v3427_v4 = vpop.f32.mrf.mxu3  ;;  %v14466_v52 = vld [vmem:[#allocation12 + $0x444] sm:$0xf] }
 0x45e   :  { %v3392_v30 = vpack.c.bf16 %v3383_v35, %v3383_v35  ;;  %v3436_v56 = vpack.c.bf16 %v3427_v4, %v3427_v4  ;;  %4684 = vmatpush.bf16.msra.mxu0 %v11183_v48  ;;  %v11111_v35 = vor.u32 %v14346_v11, %v11108_v14  ;;  %v11300_v4 = vld [vmem:[#allocation12 + $0x208] sm:$0xf0]  ;;  %v11543_v48 = vor.u32 %v14454_v62, %v11540_v33  ;;  %v14468_v11 = vld [vmem:[#allocation12 + $0x454] sm:$0xf]  ;;  %v14430_v33 = vld [vmem:[#allocation12 + $0x324] sm:$0xf] }
 0x45f   :  { %4702 = vmatpush.bf16.msra.mxu1 %v11255_v45  ;;  %v10994_v57 = vld [vmem:[#allocation3 + $0x18] sm:$0xf]  ;;  %v11615_v45 = vor.u32 %v14472_v49, %v11612_v29  ;;  %v11591_v29 = vor.u32 %v14466_v52, %v11588_v32  ;;  %v11380_v62 = vld [vmem:[#allocation12 + $0x2a8] sm:$0xf0] }
 0x460   :  { %3396 = vst [vmem:[#allocation3 + $0x3c] sm:$0xf] %v3392_v30  ;;  %v14315_v24 = vld [vmem:[#allocation3 + $0x1c] sm:$0xf]  ;;  %4721 = vmatpush.bf16.msrb.mxu2 %v11319_v50  ;;  %v14394_v30 = vld [vmem:[#allocation12 + $0x204] sm:$0xf]  ;;  %4666 = vmatpush.bf16.msra.mxu3 %v11111_v35 }
 0x461   :  { %3440 = vst [vmem:[#allocation3 + $0x40] sm:$0xf] %v3436_v56  ;;  %v11303_v2 = vor.u32 %v14394_v30, %v11300_v4  ;;  %v11484_v56 = vld [vmem:[#allocation12 + $0x378] sm:$0xf0]  ;;  %v11412_v50 = vld [vmem:[#allocation12 + $0x2e8] sm:$0xf0]  ;;  %v11599_v30 = vor.u32 %v14468_v11, %v11596_v60 }
 0x462   :  { %4685 = vmatpush.bf16.msra.mxu0 %v11175_v13  ;;  %v11487_v15 = vor.u32 %v14440_v51, %v11484_v56  ;;  %v11415_v9 = vor.u32 %v14422_v0, %v11412_v50  ;;  %v14418_v4 = vld [vmem:[#allocation12 + $0x2c4] sm:$0xf]  ;;  %v11460_v56 = vld [vmem:[#allocation12 + $0x348] sm:$0xf0]  ;;  %v14448_v0 = vld [vmem:[#allocation12 + $0x3b4] sm:$0xf] }
 0x463   :  { %4703 = vmatpush.bf16.msra.mxu1 %v11247_v43  ;;  %v14470_v43 = vld [vmem:[#allocation12 + $0x464] sm:$0xf]  ;;  %v11399_v10 = vor.u32 %v14418_v4, %v11396_v16  ;;  %v11519_v50 = vor.u32 %v14448_v0, %v11516_v5  ;;  %v11500_v60 = vld [vmem:[#allocation12 + $0x398] sm:$0xf0]  ;;  %v11492_v52 = vld [vmem:[#allocation12 + $0x388] sm:$0xf0] }
 0x464   :  { %4722 = vmatpush.bf16.msrb.mxu2 %v11311_v8  ;;  %v11532_v8 = vld [vmem:[#allocation12 + $0x3d8] sm:$0xf0]  ;;  %v14434_v51 = vld [vmem:[#allocation12 + $0x344] sm:$0xf] }
 0x465   :  { %v3386_v28 = vpop.f32.mrf.mxu2  ;;  %v3430_v46 = vpop.f32.mrf.mxu3 }
 0x466   :  { %v3393_v47 = vpack.c.bf16 %v3386_v28, %v3386_v28  ;;  %v3437_v34 = vpack.c.bf16 %v3430_v46, %v3430_v46  ;;  %v11479_v28 = vor.u32 %v14438_v53, %v11476_v1  ;;  %v11404_v46 = vld [vmem:[#allocation12 + $0x2d8] sm:$0xf0]  ;;  %v14464_v53 = vld [vmem:[#allocation12 + $0x434] sm:$0xf]  ;;  %v14414_v1 = vld [vmem:[#allocation12 + $0x2a4] sm:$0xf] }
 0x467   :  { %v14319_v26 = vld [vmem:[#allocation3 + $0x38] sm:$0xf0]  ;;  %4704 = vmatpush.bf16.msra.mxu1 %v11239_v21 }
 0x468   :  { %3397 = vst [vmem:[#allocation3 + $0x60] sm:$0xf] %v3393_v47  ;;  %v15956_v7 = vor.u32 %v14319_v26, %v10994_v57  ;;  %v10996_v59 = vld [vmem:[#allocation3 + $0x3c] sm:$0xf0]  ;;  %4723 = vmatpush.bf16.msrb.mxu2 %v11303_v2  ;;  %v11607_v47 = vor.u32 %v14470_v43, %v11604_v54  ;;  %v11407_v57 = vor.u32 %v14420_v19, %v11404_v46  ;;  %v14446_v43 = vld [vmem:[#allocation12 + $0x3a4] sm:$0xf] }
 0x469   :  { %3441 = vst [vmem:[#allocation3 + $0x64] sm:$0xf] %v3437_v34  ;;  %v15958_v3 = vor.u32 %v14315_v24, %v10996_v59  ;;  %v14436_v24 = vld [vmem:[#allocation12 + $0x354] sm:$0xf]  ;;  %v11468_v34 = vld [vmem:[#allocation12 + $0x358] sm:$0xf0] }
 0x46a   :  { %4591 = vmatmul.bf16.vlgmr.msrb.gmra.mxu3 %v15956_v7  ;;  %4629 = vmatmul.bf16.vlgmr.msrb.gmra.mxu1 %v15954_v23  ;;  %v11471_v26 = vor.u32 %v14436_v24, %v11468_v34  ;;  %v14452_v59 = vld [vmem:[#allocation12 + $0x3d4] sm:$0xf]  ;;  %v11508_v54 = vld [vmem:[#allocation12 + $0x3a8] sm:$0xf0]  ;;  %v14462_v46 = vld [vmem:[#allocation12 + $0x424] sm:$0xf] }
 0x46b   :  { %4610 = vmatmul.bf16.vlgmr.msrb.gmra.mxu0 %v15958_v3  ;;  %4648 = vmatmul.bf16.vlgmr.msra.gmra.mxu2 %v15918_v55  ;;  %v11535_v35 = vor.u32 %v14452_v59, %v11532_v8  ;;  %v11572_v24 = vld [vmem:[#allocation12 + $0x428] sm:$0xf0]  ;;  %v14412_v34 = vld [vmem:[#allocation12 + $0x294] sm:$0xf]  ;;  %v11436_v59 = vld [vmem:[#allocation12 + $0x318] sm:$0xf0] }
 0x46c   :  { %4735 = vmatpush.bf16.msrb.mxu3 %v11423_v17  ;;  %4754 = vmatpush.bf16.msrb.mxu0 %v11487_v15  ;;  %v11463_v17 = vor.u32 %v14434_v51, %v11460_v56  ;;  %v11524_v15 = vld [vmem:[#allocation12 + $0x3c8] sm:$0xf0]  ;;  %v15974_v8 = vld [vmem:[#allocation13] sm:$0x3]  ;;  %v11575_v11 = vor.u32 %v14462_v46, %v11572_v24  ;;  %v14426_v56 = vld [vmem:[#allocation12 + $0x304] sm:$0xf] }
 0x46d   :  { %v3388_v37 = vpop.f32.mrf.mxu2  ;;  %v3432_v27 = vpop.f32.mrf.mxu3  ;;  %4773 = vmatpush.bf16.msrb.mxu1 %v11551_v22  ;;  %4792 = vmatpush.bf16.msra.mxu2 %v11615_v45  ;;  %v14432_v22 = vld [vmem:[#allocation12 + $0x334] sm:$0xf]  ;;  %v11452_v45 = vld [vmem:[#allocation12 + $0x338] sm:$0xf0]  ;;  %v15977_v4 = vperm.slane %v15974_v8, 0 }
 0x46e   :  { %v3394_v55 = vpack.c.bf16 %v3388_v37, %v3388_v37  ;;  %v3438_v58 = vpack.c.bf16 %v3432_v27, %v3432_v27  ;;  %v14450_v37 = vld [vmem:[#allocation12 + $0x3c4] sm:$0xf]  ;;  %v11388_v27 = vld [vmem:[#allocation12 + $0x2b8] sm:$0xf0]  ;;  %v11455_v42 = vor.u32 %v14432_v22, %v11452_v45  ;;  %v11364_v51 = vld [vmem:[#allocation12 + $0x288] sm:$0xf0] }
 0x46f   :  { %v11030_v40 = vld [vmem:[#allocation3 + $0x60] sm:$0xf]  ;;  %v11527_v49 = vor.u32 %v14450_v37, %v11524_v15  ;;  %v14442_v15 = vld [vmem:[#allocation12 + $0x384] sm:$0xf]  ;;  %v11556_v22 = vld [vmem:[#allocation12 + $0x408] sm:$0xf0] }
 0x470   :  { %3398 = vst [vmem:[#allocation3 + $0x84] sm:$0xf] %v3394_v55  ;;  %4736 = vmatpush.bf16.msrb.mxu3 %v11415_v9  ;;  %4755 = vmatpush.bf16.msrb.mxu0 %v11479_v28  ;;  %v14324_v14 = vld [vmem:[#allocation3 + $0x64] sm:$0xf]  ;;  %v14416_v55 = vld [vmem:[#allocation12 + $0x2b4] sm:$0xf]  ;;  %v11383_v28 = vor.u32 %v14414_v1, %v11380_v62 }
 0x471   :  { %3442 = vst [vmem:[#allocation3 + $0x88] sm:$0xf] %v3438_v58  ;;  %4774 = vmatpush.bf16.msrb.mxu1 %v11543_v48  ;;  %4793 = vmatpush.bf16.msra.mxu2 %v11607_v47  ;;  %v11391_v58 = vor.u32 %v14416_v55, %v11388_v27  ;;  %v11580_v9 = vld [vmem:[#allocation12 + $0x438] sm:$0xf0]  ;;  %v11444_v48 = vld [vmem:[#allocation12 + $0x328] sm:$0xf0]  ;;  %v11511_v47 = vor.u32 %v14446_v43, %v11508_v54 }
 0x472   :  { %v11447_v19 = vor.u32 %v14430_v33, %v11444_v48  ;;  %v11495_v55 = vor.u32 %v14442_v15, %v11492_v52  ;;  %v14458_v27 = vld [vmem:[#allocation12 + $0x404] sm:$0xf] }
 0x474   :  { %4737 = vmatpush.bf16.msrb.mxu3 %v11407_v57  ;;  %4756 = vmatpush.bf16.msrb.mxu0 %v11471_v26  ;;  %v11372_v57 = vld [vmem:[#allocation12 + $0x298] sm:$0xf0]  ;;  %v14428_v26 = vld [vmem:[#allocation12 + $0x314] sm:$0xf] }
 0x475   :  { %4775 = vmatpush.bf16.msrb.mxu1 %v11535_v35  ;;  %4794 = vmatpush.bf16.msra.mxu2 %v11599_v30  ;;  %v14444_v35 = vld [vmem:[#allocation12 + $0x394] sm:$0xf]  ;;  %v11564_v30 = vld [vmem:[#allocation12 + $0x418] sm:$0xf0] }
 0x477   :  { %v14328_v63 = vld [vmem:[#allocation3 + $0x80] sm:$0xf0] }
 0x478   :  { %v15966_v13 = vor.u32 %v14328_v63, %v11030_v40  ;;  %v11032_v21 = vld [vmem:[#allocation3 + $0x84] sm:$0xf0]  ;;  %4738 = vmatpush.bf16.msrb.mxu3 %v11399_v10  ;;  %4757 = vmatpush.bf16.msrb.mxu0 %v11463_v17  ;;  %v11439_v40 = vor.u32 %v14428_v26, %v11436_v59  ;;  %v11503_v63 = vor.u32 %v14444_v35, %v11500_v60  ;;  %v11428_v17 = vld [vmem:[#allocation12 + $0x308] sm:$0xf0] }
 0x479   :  { %v15968_v2 = vor.u32 %v14324_v14, %v11032_v21  ;;  %4776 = vmatpush.bf16.msrb.mxu1 %v11527_v49  ;;  %4795 = vmatpush.bf16.msra.mxu2 %v11591_v29  ;;  %v11375_v14 = vor.u32 %v14412_v34, %v11372_v57  ;;  %v14460_v21 = vld [vmem:[#allocation12 + $0x414] sm:$0xf]  ;;  %v14410_v10 = vld [vmem:[#allocation12 + $0x284] sm:$0xf]  ;;  %v11431_v49 = vor.u32 %v14426_v56, %v11428_v17 }
 0x47a   :  { %4596 = vmatmul.bf16.gmra.mxu3 %v15966_v13  ;;  %4634 = vmatmul.bf16.gmra.mxu1 %v15964_v20  ;;  %v11567_v16 = vor.u32 %v14460_v21, %v11564_v30  ;;  %v11367_v37 = vor.u32 %v14410_v10, %v11364_v51  ;;  %v11559_v29 = vor.u32 %v14458_v27, %v11556_v22 }
 0x47b   :  { %4615 = vmatmul.bf16.gmra.mxu0 %v15968_v2  ;;  %4653 = vmatmul.bf16.gmra.mxu2 %v15924_v25  ;;  %v11583_v25 = vor.u32 %v14464_v53, %v11580_v9 }
 0x47c   :  { %4739 = vmatpush.bf16.msrb.mxu3 %v11391_v58  ;;  %4758 = vmatpush.bf16.msrb.mxu0 %v11455_v42 }
 0x47d   :  { %4777 = vmatpush.bf16.msrb.mxu1 %v11519_v50  ;;  %4796 = vmatpush.bf16.msra.mxu2 %v11583_v25 }
 0x480   :  { %4740 = vmatpush.bf16.msrb.mxu3 %v11383_v28  ;;  %4759 = vmatpush.bf16.msrb.mxu0 %v11447_v19 }
 0x481   :  { %4778 = vmatpush.bf16.msrb.mxu1 %v11511_v47  ;;  %4797 = vmatpush.bf16.msra.mxu2 %v11575_v11 }
 0x484   :  { %4741 = vmatpush.bf16.msrb.mxu3 %v11375_v14  ;;  %4760 = vmatpush.bf16.msrb.mxu0 %v11439_v40 }
 0x485   :  { %4779 = vmatpush.bf16.msrb.mxu1 %v11503_v63  ;;  %4798 = vmatpush.bf16.msra.mxu2 %v11567_v16 }
 0x487   :  { %v4478_v32 = vpop.f32.mrf.mxu1 }
 0x488   :  { %4742 = vmatpush.bf16.msrb.mxu3 %v11367_v37  ;;  %v4479_v58 = vadd.f32 %v4478_v32, %v15977_v4  ;;  %4761 = vmatpush.bf16.msrb.mxu0 %v11431_v49 }
 0x489   :  { %4780 = vmatpush.bf16.msrb.mxu1 %v11495_v55  ;;  %4799 = vmatpush.bf16.msra.mxu2 %v11559_v29 }
 0x48a   :  { %4667 = vmatmul.bf16.vlgmr.msra.gmra.mxu3 %v15920_v12  ;;  %4705 = vmatmul.bf16.vlgmr.msra.gmra.mxu1 %v15932_v41 }
 0x48b   :  { %4686 = vmatmul.bf16.vlgmr.msra.gmra.mxu0 %v15930_v61  ;;  %4724 = vmatmul.bf16.vlgmr.msrb.gmra.mxu2 %v15942_v39 }
 0x48e   :  { %v4497_v45 = vpop.f32.mrf.mxu2 }
 0x48f   :  { %v4498_v0 = vadd.f32 %v4497_v45, %v4479_v58  ;;  %v4480_v12 = vpop.f32.mrf.mxu1 }
 0x490   :  { %v4481_v19 = vadd.f32 %v4480_v12, %v15977_v4 }
 0x496   :  { %v4499_v61 = vpop.f32.mrf.mxu2 }
 0x497   :  { %v4483_v41 = vpop.f32.mrf.mxu1  ;;  %v4500_v24 = vadd.f32 %v4499_v61, %v4481_v19 }
 0x498   :  { %v4484_v54 = vadd.f32 %v4483_v41, %v15977_v4 }
 0x49a   :  { %4672 = vmatmul.bf16.gmra.mxu3 %v15926_v44  ;;  %4710 = vmatmul.bf16.gmra.mxu1 %v15938_v6 }
 0x49b   :  { %4691 = vmatmul.bf16.gmra.mxu0 %v15936_v38  ;;  %4729 = vmatmul.bf16.gmra.mxu2 %v15948_v36 }
 0x49e   :  { %v4502_v44 = vpop.f32.mrf.mxu2 }
 0x49f   :  { %v4485_v38 = vpop.f32.mrf.mxu1  ;;  %v4503_v47 = vadd.f32 %v4502_v44, %v4484_v54 }
 0x4a0   :  { %v4486_v59 = vadd.f32 %v4485_v38, %v15977_v4 }
 0x4a6   :  { %v4504_v39 = vpop.f32.mrf.mxu2 }
 0x4a7   :  { %v4505_v35 = vadd.f32 %v4504_v39, %v4486_v59  ;;  %v16027_v59 = vld [vmem:[#allocation15 + $0x10] sm:$0xf] }
 0x4a8   :  { %v4535_v6 = vpop.f32.mrf.mxu0 }
 0x4aa   :  { %4743 = vmatmul.bf16.vlgmr.msrb.gmra.mxu3 %v15944_v18  ;;  %4781 = vmatmul.bf16.vlgmr.msrb.gmra.mxu1 %v15958_v3 }
 0x4ab   :  { %4762 = vmatmul.bf16.vlgmr.msrb.gmra.mxu0 %v15956_v7  ;;  %4800 = vmatmul.bf16.vlgmr.msra.gmra.mxu2 %v15954_v23 }
 0x4ad   :  { %v4516_v18 = vpop.f32.mrf.mxu3 }
 0x4ae   :  { %v4517_v60 = vadd.f32 %v4516_v18, %v4498_v0 }
 0x4b0   :  { %v4537_v3 = vpop.f32.mrf.mxu0  ;;  %v4536_v10 = vadd.f32 %v4535_v6, %v4517_v60  ;;  %v3654_v60 = vperm.slane %v15974_v8, 1 }
 0x4b5   :  { %v4518_v23 = vpop.f32.mrf.mxu3 }
 0x4b6   :  { %v4519_v11 = vadd.f32 %v4518_v23, %v4500_v24  ;;  %v16023_v24 = vld [vmem:[#allocation15 + $0xc] sm:$0xf] }
 0x4b8   :  { %v4540_v42 = vpop.f32.mrf.mxu0  ;;  %v4538_v21 = vadd.f32 %v4537_v3, %v4519_v11 }
 0x4ba   :  { %4748 = vmatmul.bf16.gmra.mxu3 %v15950_v31  ;;  %4786 = vmatmul.bf16.gmra.mxu1 %v15968_v2 }
 0x4bb   :  { %4767 = vmatmul.bf16.gmra.mxu0 %v15966_v13  ;;  %4805 = vmatmul.bf16.gmra.mxu2 %v15964_v20 }
 0x4bd   :  { %v4521_v31 = vpop.f32.mrf.mxu3 }
 0x4be   :  { %v4522_v34 = vadd.f32 %v4521_v31, %v4503_v47 }
 0x4c0   :  { %v4542_v25 = vpop.f32.mrf.mxu0  ;;  %v4541_v40 = vadd.f32 %v4540_v42, %v4522_v34  ;;  %v16025_v34 = vld [vmem:[#allocation15] sm:$0xf] }
 0x4c5   :  { %v4523_v13 = vpop.f32.mrf.mxu3 }
 0x4c6   :  { %v4524_v63 = vadd.f32 %v4523_v13, %v4505_v35 }
 0x4c7   :  { %v4554_v36 = vpop.f32.mrf.mxu1 }
 0x4c8   :  { %v4555_v15 = vadd.f32 %v4554_v36, %v4536_v10  ;;  %v4543_v32 = vadd.f32 %v4542_v25, %v4524_v63 }
 0x4ce   :  { %v4573_v7 = vpop.f32.mrf.mxu2 }
 0x4cf   :  { %v4556_v5 = vpop.f32.mrf.mxu1  ;;  %v4574_v55 = vadd.f32 %v4573_v7, %v4555_v15 }
 0x4d0   :  { %v4557_v51 = vadd.f32 %v4556_v5, %v4538_v21 }
 0x4d6   :  { %v4575_v50 = vpop.f32.mrf.mxu2 }
 0x4d7   :  { %v4559_v53 = vpop.f32.mrf.mxu1  ;;  %v4576_v52 = vadd.f32 %v4575_v50, %v4557_v51 }
 0x4d8   :  { %v4560_v30 = vadd.f32 %v4559_v53, %v4541_v40 }
 0x4de   :  { %v4578_v9 = vpop.f32.mrf.mxu2 }
 0x4df   :  { %v4561_v2 = vpop.f32.mrf.mxu1  ;;  %v4579_v56 = vadd.f32 %v4578_v9, %v4560_v30 }
 0x4e0   :  { %v4562_v27 = vadd.f32 %v4561_v2, %v4543_v32 }
 0x4e6   :  { %v4580_v1 = vpop.f32.mrf.mxu2 }
 0x4e7   :  { %v4630_v20 = vpop.f32.mrf.mxu1  ;;  %v4581_v29 = vadd.f32 %v4580_v1, %v4562_v27  ;;  %v16015_v1 = vld [vmem:[#allocation15 + $0x4] sm:$0xf] }
 0x4e8   :  { %v4611_v62 = vpop.f32.mrf.mxu0 }
 0x4ed   :  { %v4592_v33 = vpop.f32.mrf.mxu3 }
 0x4ee   :  { %v15996_v28 = vpop.f32.mrf.mxu2  ;;  %v4593_v58 = vadd.f32 %v4592_v33, %v4574_v55 }
 0x4ef   :  { %v4632_v48 = vpop.f32.mrf.mxu1  ;;  %v4650_v10 = vadd.f32 %v15996_v28, %v3654_v60 }
 0x4f0   :  { %v4613_v43 = vpop.f32.mrf.mxu0  ;;  %v4612_v38 = vadd.f32 %v4611_v62, %v4593_v58  ;;  %v16017_v62 = vld [vmem:[#allocation15 + $0x8] sm:$0xf] }
 0x4f2   :  { %v4631_v7 = vadd.f32 %v4630_v20, %v4612_v38 }
 0x4f4   :  { %v4811_v2 = vmax.f32 %v4631_v7, 0.0 }
 0x4f5   :  { %v4594_v46 = vpop.f32.mrf.mxu3 }
 0x4f6   :  { %v16000_v57 = vpop.f32.mrf.mxu2  ;;  %v4595_v22 = vadd.f32 %v4594_v46, %v4576_v52 }
 0x4f7   :  { %v4635_v26 = vpop.f32.mrf.mxu1  ;;  %v4652_v30 = vadd.f32 %v16000_v57, %v3654_v60 }
 0x4f8   :  { %v4616_v14 = vpop.f32.mrf.mxu0  ;;  %v4614_v12 = vadd.f32 %v4613_v43, %v4595_v22 }
 0x4fa   :  { %v4633_v36 = vadd.f32 %v4632_v48, %v4614_v12 }
 0x4fc   :  { %v4813_v50 = vmax.f32 %v4633_v36, 0.0 }
 0x4fd   :  { %v4597_v16 = vpop.f32.mrf.mxu3 }
 0x4fe   :  { %v16003_v37 = vpop.f32.mrf.mxu2  ;;  %v4598_v49 = vadd.f32 %v4597_v16, %v4579_v56  ;;  %v4819_v13 = vpack.c.bf16 %v4813_v50, %v4811_v2 }
 0x4ff   :  { %v4637_v17 = vpop.f32.mrf.mxu1  ;;  %v4655_v63 = vadd.f32 %v16003_v37, %v3654_v60 }
 0x500   :  { %v4618_v4 = vpop.f32.mrf.mxu0  ;;  %v4617_v45 = vadd.f32 %v4616_v14, %v4598_v49 }
 0x502   :  { %v4636_v6 = vadd.f32 %v4635_v26, %v4617_v45 }
 0x504   :  { %v4815_v5 = vmax.f32 %v4636_v6, 0.0 }
 0x505   :  { %v4599_v0 = vpop.f32.mrf.mxu3 }
 0x506   :  { %v4600_v61 = vadd.f32 %v4599_v0, %v4581_v29  ;;  %v16005_v41 = vpop.f32.mrf.mxu2 }
 0x507   :  { %v16007_v44 = vpop.f32.mrf.mxu1  ;;  %v4657_v49 = vadd.f32 %v16005_v41, %v3654_v60  ;;  %v16075_v60 = vld [vmem:[#allocation15 + $0x1c] sm:$0xf] }
 0x508   :  { %v4619_v39 = vadd.f32 %v4618_v4, %v4600_v61  ;;  %v16009_v18 = vpop.f32.mrf.mxu0 }
 0x50a   :  { %v4638_v3 = vadd.f32 %v4637_v17, %v4619_v39 }
 0x50c   :  { %v4817_v23 = vmax.f32 %v4638_v3, 0.0 }
 0x50d   :  { %v4668_v42 = vpop.f32.mrf.mxu3 }
 0x50e   :  { %v4821_v53 = vpack.c.bf16 %v4817_v23, %v4815_v5  ;;  %v16011_v31 = vpop.f32.mrf.mxu2  ;;  %v4669_v17 = vadd.f32 %v4668_v42, %v4650_v10  ;;  %v11972_v10 = vld [vmem:[#allocation16 + $0x2a0] sm:$0xf] }
 0x50f   :  { %v16013_v9 = vpop.f32.mrf.mxu1 }
 0x510   :  { %v4689_v25 = vpop.f32.mrf.mxu0  ;;  %4834 = vmatpush.bf16.msra.mxu3 %v4821_v53  ;;  %4867 = vmatpush.bf16.msra.mxu0 %v4821_v53  ;;  %v4688_v55 = vadd.f32 %v16009_v18, %v4669_v17  ;;  %v11876_v17 = vld [vmem:[#allocation16 + $0x1e0] sm:$0xf] }
 0x511   :  { %4900 = vmatpush.bf16.msrb.mxu2 %v4821_v53 }
 0x512   :  { %v4707_v57 = vadd.f32 %v16007_v44, %v4688_v55 }
 0x514   :  { %4835 = vmatpush.bf16.msra.mxu3 %v4819_v13  ;;  %4868 = vmatpush.bf16.msra.mxu0 %v4819_v13  ;;  %v4726_v38 = vadd.f32 %v16011_v31, %v4707_v57  ;;  %v11860_v57 = vld [vmem:[#allocation16 + $0x1c0] sm:$0xf] }
 0x515   :  { %4901 = vmatpush.bf16.msrb.mxu2 %v4819_v13  ;;  %v4670_v20 = vpop.f32.mrf.mxu3 }
 0x516   :  { %v4727_v33 = vpop.f32.mrf.mxu2  ;;  %v4671_v51 = vadd.f32 %v4670_v20, %v4652_v30 }
 0x517   :  { %v4711_v48 = vpop.f32.mrf.mxu1  ;;  %11618 = vmatmul.msk.bf16.vlgmr.msra.gmra.mxu0 %vm4824_vm0, %v16015_v1  ;;  %11616 = vmatmul.msk.bf16.vlgmr.msra.gmra.mxu3 %vm4824_vm0, %v16025_v34 }
 0x518   :  { %4933 = vmatpush.bf16.msrb.mxu0 %v4821_v53  ;;  %v4692_v43 = vpop.f32.mrf.mxu0  ;;  %11620 = vmatmul.msk.bf16.vlgmr.msrb.gmra.mxu2 %vm4824_vm0, %v16017_v62  ;;  %v4690_v8 = vadd.f32 %v4689_v25, %v4671_v51  ;;  %v14560_v51 = vld [vmem:[#allocation16 + $0x2ac] sm:$0xf0] }
 0x519   :  { %4966 = vmatpush.bf16.msra.mxu2 %v4821_v53 }
 0x51a   :  { %v4709_v22 = vadd.f32 %v16013_v9, %v4690_v8  ;;  %v11956_v8 = vld [vmem:[#allocation16 + $0x280] sm:$0xf] }
 0x51c   :  { %4934 = vmatpush.bf16.msrb.mxu0 %v4819_v13  ;;  %v4728_v0 = vadd.f32 %v4727_v33, %v4709_v22  ;;  %v14496_v22 = vld [vmem:[#allocation16 + $0xac] sm:$0xf0] }
 0x51d   :  { %4967 = vmatpush.bf16.msra.mxu2 %v4819_v13  ;;  %v4673_v54 = vpop.f32.mrf.mxu3 }
 0x51e   :  { %v4730_v19 = vpop.f32.mrf.mxu2  ;;  %v4674_v16 = vadd.f32 %v4673_v54, %v4655_v63  ;;  %v11988_v63 = vld [vmem:[#allocation16 + $0x2c0] sm:$0xf] }
 0x51f   :  { %v4713_v46 = vpop.f32.mrf.mxu1 }
 0x520   :  { %4999 = vmatpush.bf16.msra.mxu0 %v4821_v53  ;;  %v4694_v47 = vpop.f32.mrf.mxu0  ;;  %v4693_v15 = vadd.f32 %v4692_v43, %v4674_v16 }
 0x521   :  { %5032 = vmatpush.bf16.msrb.mxu2 %v4821_v53 }
 0x522   :  { %v4712_v27 = vadd.f32 %v4711_v48, %v4693_v15  ;;  %v11732_v15 = vld [vmem:[#allocation16 + $0xc0] sm:$0xf] }
 0x524   :  { %5000 = vmatpush.bf16.msra.mxu0 %v4819_v13  ;;  %v4731_v29 = vadd.f32 %v4730_v19, %v4712_v27 }
 0x525   :  { %5033 = vmatpush.bf16.msrb.mxu2 %v4819_v13  ;;  %v4675_v26 = vpop.f32.mrf.mxu3 }
 0x526   :  { %v4732_v11 = vpop.f32.mrf.mxu2  ;;  %v4676_v37 = vadd.f32 %v4675_v26, %v4657_v49 }
 0x527   :  { %11622 = vmatmul.msk.bf16.vlgmr.msrb.gmra.mxu0 %vm4824_vm0, %v16023_v24  ;;  %v4782_v35 = vpop.f32.mrf.mxu1 }
 0x528   :  { %11624 = vmatmul.msk.bf16.vlgmr.msra.gmra.mxu2 %vm4824_vm0, %v16027_v59  ;;  %5065 = vmatpush.bf16.msrb.mxu0 %v4821_v53  ;;  %v4763_v14 = vpop.f32.mrf.mxu0  ;;  %v4695_v28 = vadd.f32 %v4694_v47, %v4676_v37  ;;  %v11716_v37 = vld [vmem:[#allocation16 + $0xa0] sm:$0xf] }
 0x529   :  { %5098 = vmatpush.bf16.msra.mxu2 %v4821_v53 }
 0x52a   :  { %v4714_v41 = vadd.f32 %v4713_v46, %v4695_v28  ;;  %v11717_v28 = vor.u32 %v14496_v22, %v11716_v37  ;;  %v12260_v37 = vld [vmem:[#allocation16 + $0x4e0] sm:$0xf] }
 0x52b   :  { %v12084_v22 = vld [vmem:[#allocation16 + $0x380] sm:$0xf] }
 0x52c   :  { %5066 = vmatpush.bf16.msrb.mxu0 %v4819_v13  ;;  %v4733_v3 = vadd.f32 %v4732_v11, %v4714_v41  ;;  %v14492_v41 = vld [vmem:[#allocation16 + $0x8c] sm:$0xf0] }
 0x52d   :  { %5099 = vmatpush.bf16.msra.mxu2 %v4819_v13  ;;  %v4744_v40 = vpop.f32.mrf.mxu3 }
 0x52e   :  { %v4801_v21 = vpop.f32.mrf.mxu2  ;;  %v4745_v36 = vadd.f32 %v4744_v40, %v4726_v38  ;;  %v11700_v38 = vld [vmem:[#allocation16 + $0x80] sm:$0xf] }
 0x52f   :  { %v4784_v52 = vpop.f32.mrf.mxu1 }
 0x530   :  { %v4765_v56 = vpop.f32.mrf.mxu0  ;;  %v4764_v23 = vadd.f32 %v4763_v14, %v4745_v36  ;;  %v4989_v14 = vld [vmem:[#allocation15 + $0x14] sm:$0xf]  ;;  %v11701_v36 = vor.u32 %v14492_v41, %v11700_v38  ;;  %v12388_v38 = vld [vmem:[#allocation16 + $0x5e0] sm:$0xf] }
 0x532   :  { %v4783_v25 = vadd.f32 %v4782_v35, %v4764_v23  ;;  %v16063_v35 = vld [vmem:[#allocation15 + $0x18] sm:$0xf]  ;;  %v11684_v23 = vld [vmem:[#allocation16 + $0x60] sm:$0xf] }
 0x534   :  { %v4802_v43 = vadd.f32 %v4801_v21, %v4783_v25  ;;  %v14564_v21 = vld [vmem:[#allocation16 + $0x2cc] sm:$0xf0]  ;;  %v12132_v25 = vld [vmem:[#allocation16 + $0x3e0] sm:$0xf] }
 0x535   :  { %v4746_v32 = vpop.f32.mrf.mxu3  ;;  %v11989_v30 = vor.u32 %v14564_v21, %v11988_v63  ;;  %v14696_v63 = vld [vmem:[#allocation16 + $0x6ec] sm:$0xf0] }
 0x536   :  { %v4803_v4 = vpop.f32.mrf.mxu2  ;;  %v4747_v6 = vadd.f32 %v4746_v32, %v4728_v0  ;;  %v4812_v26 = vmax.f32 %v4802_v43, 0.0  ;;  %v14536_v32 = vld [vmem:[#allocation16 + $0x1ec] sm:$0xf0] }
 0x537   :  { %v4787_v61 = vpop.f32.mrf.mxu1  ;;  %11626 = vmatmul.msk.bf16.vlgmr.msra.gmra.mxu0 %vm4824_vm0, %v4989_v14  ;;  %v11877_v27 = vor.u32 %v14536_v32, %v11876_v17  ;;  %v14552_v0 = vld [vmem:[#allocation16 + $0x26c] sm:$0xf0]  ;;  %v12100_v17 = vld [vmem:[#allocation16 + $0x3a0] sm:$0xf] }
 0x538   :  { %v4768_v58 = vpop.f32.mrf.mxu0  ;;  %v4766_v7 = vadd.f32 %v4765_v56, %v4747_v6  ;;  %11628 = vmatmul.msk.bf16.vlgmr.msrb.gmra.mxu2 %vm4824_vm0, %v16063_v35  ;;  %v11973_v56 = vor.u32 %v14560_v51, %v11972_v10  ;;  %v11844_v6 = vld [vmem:[#allocation16 + $0x1a0] sm:$0xf]  ;;  %v14520_v43 = vld [vmem:[#allocation16 + $0x16c] sm:$0xf0] }
 0x539   :  { %v14516_v21 = vld [vmem:[#allocation16 + $0x14c] sm:$0xf0]  ;;  %v12500_v10 = vld [vmem:[#allocation16 + $0x6c0] sm:$0xf] }
 0x53a   :  { %v4785_v53 = vadd.f32 %v4784_v52, %v4766_v7  ;;  %v14500_v52 = vld [vmem:[#allocation16 + $0xcc] sm:$0xf0]  ;;  %v11780_v32 = vld [vmem:[#allocation16 + $0x120] sm:$0xf] }
 0x53b   :  { %v11733_v49 = vor.u32 %v14500_v52, %v11732_v15  ;;  %v14692_v51 = vld [vmem:[#allocation16 + $0x6cc] sm:$0xf0] }
 0x53c   :  { %v4804_v31 = vadd.f32 %v4803_v4, %v4785_v53  ;;  %v14556_v4 = vld [vmem:[#allocation16 + $0x28c] sm:$0xf0]  ;;  %v11908_v53 = vld [vmem:[#allocation16 + $0x220] sm:$0xf] }
 0x53d   :  { %v4749_v45 = vpop.f32.mrf.mxu3  ;;  %v11957_v55 = vor.u32 %v14556_v4, %v11956_v8  ;;  %v14592_v15 = vld [vmem:[#allocation16 + $0x3ac] sm:$0xf0]  ;;  %v12501_v8 = vor.u32 %v14692_v51, %v12500_v10  ;;  %v11636_v4 = vld [vmem:[#allocation16] sm:$0xf] }
 0x53e   :  { %v4750_v12 = vadd.f32 %v4749_v45, %v4731_v29  ;;  %v4806_v39 = vpop.f32.mrf.mxu2  ;;  %v4814_v47 = vmax.f32 %v4804_v31, 0.0  ;;  %v14532_v29 = vld [vmem:[#allocation16 + $0x1cc] sm:$0xf0]  ;;  %v11940_v45 = vld [vmem:[#allocation16 + $0x260] sm:$0xf] }
 0x53f   :  { %v4789_v2 = vpop.f32.mrf.mxu1  ;;  %v11668_v31 = vld [vmem:[#allocation16 + $0x40] sm:$0xf]  ;;  %v14652_v10 = vld [vmem:[#allocation16 + $0x58c] sm:$0xf0] }
 0x540   :  { %v4769_v18 = vadd.f32 %v4768_v58, %v4750_v12  ;;  %v4770_v50 = vpop.f32.mrf.mxu0  ;;  %v16048_v11 = vpack.c.bf16 %v4814_v47, %v4812_v26  ;;  %v16081_v58 = vld [vmem:[#allocation15 + $0x20] sm:$0xf]  ;;  %v11861_v12 = vor.u32 %v14532_v29, %v11860_v57  ;;  %v14540_v47 = vld [vmem:[#allocation16 + $0x20c] sm:$0xf0]  ;;  %v12116_v26 = vld [vmem:[#allocation16 + $0x3c0] sm:$0xf] }
 0x541   :  { %v14588_v57 = vld [vmem:[#allocation16 + $0x38c] sm:$0xf0]  ;;  %v12484_v29 = vld [vmem:[#allocation16 + $0x6a0] sm:$0xf] }
 0x542   :  { %v4788_v42 = vadd.f32 %v4787_v61, %v4769_v18  ;;  %v11941_v61 = vor.u32 %v14552_v0, %v11940_v45  ;;  %v11924_v18 = vld [vmem:[#allocation16 + $0x240] sm:$0xf] }
 0x543   :  { %v11764_v0 = vld [vmem:[#allocation16 + $0x100] sm:$0xf] }
 0x544   :  { %v4807_v13 = vadd.f32 %v4806_v39, %v4788_v42  ;;  %v14528_v39 = vld [vmem:[#allocation16 + $0x1ac] sm:$0xf0] }
 0x545   :  { %v4751_v5 = vpop.f32.mrf.mxu3  ;;  %v11845_v7 = vor.u32 %v14528_v39, %v11844_v6  ;;  %v14488_v42 = vld [vmem:[#allocation16 + $0x6c] sm:$0xf0]  ;;  %v12244_v6 = vld [vmem:[#allocation16 + $0x4c0] sm:$0xf] }
 0x546   :  { %v4752_v44 = vadd.f32 %v4751_v5, %v4733_v3  ;;  %v4808_v33 = vpop.f32.mrf.mxu2  ;;  %v4816_v54 = vmax.f32 %v4807_v13, 0.0  ;;  %v11828_v5 = vld [vmem:[#allocation16 + $0x180] sm:$0xf]  ;;  %v14600_v13 = vld [vmem:[#allocation16 + $0x3ec] sm:$0xf0] }
 0x547   :  { %11630 = vmatmul.msk.bf16.vlgmr.msrb.gmra.mxu0 %vm4824_vm0, %v16075_v60  ;;  %v14628_v39 = vld [vmem:[#allocation16 + $0x4cc] sm:$0xf0] }
 0x548   :  { %v4771_v9 = vadd.f32 %v4770_v50, %v4752_v44  ;;  %11632 = vmatmul.msk.bf16.vlgmr.msra.gmra.mxu2 %vm4824_vm0, %v16081_v58  ;;  %v14524_v44 = vld [vmem:[#allocation16 + $0x18c] sm:$0xf0]  ;;  %v11685_v50 = vor.u32 %v14488_v42, %v11684_v23 }
 0x549   :  { %v14584_v23 = vld [vmem:[#allocation16 + $0x36c] sm:$0xf0] }
 0x54a   :  { %v4790_v20 = vadd.f32 %v4789_v2, %v4771_v9  ;;  %v14544_v9 = vld [vmem:[#allocation16 + $0x22c] sm:$0xf0] }
 0x54b   :  { %v11909_v2 = vor.u32 %v14544_v9, %v11908_v53  ;;  %v12228_v9 = vld [vmem:[#allocation16 + $0x4a0] sm:$0xf] }
 0x54c   :  { %v4809_v48 = vadd.f32 %v4808_v33, %v4790_v20  ;;  %v11829_v20 = vor.u32 %v14524_v44, %v11828_v5  ;;  %v11812_v33 = vld [vmem:[#allocation16 + $0x160] sm:$0xf] }
 0x54d   :  { %v12068_v5 = vld [vmem:[#allocation16 + $0x360] sm:$0xf] }
 0x54e   :  { %v4818_v19 = vmax.f32 %v4809_v48, 0.0  ;;  %v14484_v48 = vld [vmem:[#allocation16 + $0x4c] sm:$0xf0] }
 0x550   :  { %v16044_v46 = vpack.c.bf16 %v4818_v19, %v4816_v54  ;;  %v11669_v54 = vor.u32 %v14484_v48, %v11668_v31  ;;  %v11892_v19 = vld [vmem:[#allocation16 + $0x200] sm:$0xf]  ;;  %v12069_v31 = vor.u32 %v14584_v23, %v12068_v5  ;;  %v14672_v23 = vld [vmem:[#allocation16 + $0x62c] sm:$0xf0] }
 0x551   :  { %v12052_v48 = vld [vmem:[#allocation16 + $0x340] sm:$0xf] }
 0x552   :  { %4847 = vmatpush.bf16.msrb.mxu3 %v16044_v46  ;;  %4880 = vmatpush.bf16.msra.mxu1 %v16044_v46  ;;  %v12420_v5 = vld [vmem:[#allocation16 + $0x620] sm:$0xf] }
 0x556   :  { %4848 = vmatpush.bf16.msrb.mxu3 %v16048_v11  ;;  %4881 = vmatpush.bf16.msra.mxu1 %v16048_v11 }
 0x559   :  { %11617 = vmatmul.msk.bf16.vlgmr.msrb.gmra.mxu3 %vm4824_vm0, %v16025_v34  ;;  %11619 = vmatmul.msk.bf16.vlgmr.msra.gmra.mxu1 %vm4824_vm0, %v16015_v1  ;;  %v12004_v1 = vld [vmem:[#allocation16 + $0x2e0] sm:$0xf]  ;;  %v14568_v34 = vld [vmem:[#allocation16 + $0x2ec] sm:$0xf0] }
 0x55a   :  { %4913 = vmatpush.bf16.msra.mxu3 %v16044_v46  ;;  %4946 = vmatpush.bf16.msrb.mxu1 %v16044_v46  ;;  %v12005_v40 = vor.u32 %v14568_v34, %v12004_v1  ;;  %v11813_v1 = vor.u32 %v14520_v43, %v11812_v33  ;;  %v11796_v34 = vld [vmem:[#allocation16 + $0x140] sm:$0xf]  ;;  %v14680_v33 = vld [vmem:[#allocation16 + $0x66c] sm:$0xf0] }
 0x55b   :  { %v11797_v52 = vor.u32 %v14516_v21, %v11796_v34  ;;  %v14580_v43 = vld [vmem:[#allocation16 + $0x34c] sm:$0xf0]  ;;  %v12436_v34 = vld [vmem:[#allocation16 + $0x640] sm:$0xf] }
 0x55c   :  { %8684 = vmatpush.bf16.msrb.mxu2 %v12005_v40  ;;  %v12516_v40 = vld [vmem:[#allocation16 + $0x6e0] sm:$0xf] }
 0x55d   :  { %v12036_v21 = vld [vmem:[#allocation16 + $0x320] sm:$0xf] }
 0x55e   :  { %4914 = vmatpush.bf16.msra.mxu3 %v16048_v11  ;;  %4947 = vmatpush.bf16.msrb.mxu1 %v16048_v11 }
 0x560   :  { %8685 = vmatpush.bf16.msrb.mxu2 %v11989_v30  ;;  %v12517_v30 = vor.u32 %v14696_v63, %v12516_v40  ;;  %v14676_v40 = vld [vmem:[#allocation16 + $0x64c] sm:$0xf0]  ;;  %v12053_v63 = vor.u32 %v14580_v43, %v12052_v48  ;;  %v12532_v43 = vld [vmem:[#allocation16 + $0x700] sm:$0xf] }
 0x561   :  { %v14668_v48 = vld [vmem:[#allocation16 + $0x60c] sm:$0xf0] }
 0x562   :  { %4979 = vmatpush.bf16.msrb.mxu3 %v16044_v46  ;;  %5012 = vmatpush.bf16.msra.mxu1 %v16044_v46 }
 0x564   :  { %8686 = vmatpush.bf16.msrb.mxu2 %v11973_v56 }
 0x566   :  { %4980 = vmatpush.bf16.msrb.mxu3 %v16048_v11  ;;  %5013 = vmatpush.bf16.msra.mxu1 %v16048_v11 }
 0x568   :  { %8687 = vmatpush.bf16.msrb.mxu2 %v11957_v55  ;;  %v14476_v55 = vld [vmem:[#allocation16 + $0xc] sm:$0xf0] }
 0x569   :  { %11621 = vmatmul.msk.bf16.vlgmr.msra.gmra.mxu3 %vm4824_vm0, %v16017_v62  ;;  %11623 = vmatmul.msk.bf16.vlgmr.msrb.gmra.mxu1 %vm4824_vm0, %v16023_v24  ;;  %v11748_v62 = vld [vmem:[#allocation16 + $0xe0] sm:$0xf]  ;;  %v14504_v24 = vld [vmem:[#allocation16 + $0xec] sm:$0xf0] }
 0x56a   :  { %5045 = vmatpush.bf16.msra.mxu3 %v16044_v46  ;;  %5078 = vmatpush.bf16.msrb.mxu1 %v16044_v46  ;;  %v11749_v16 = vor.u32 %v14504_v24, %v11748_v62  ;;  %v11652_v62 = vld [vmem:[#allocation16 + $0x20] sm:$0xf]  ;;  %v14480_v24 = vld [vmem:[#allocation16 + $0x2c] sm:$0xf0] }
 0x56c   :  { %8658 = vmatpush.bf16.msra.mxu0 %v11749_v16  ;;  %8688 = vmatpush.bf16.msrb.mxu2 %v11941_v61  ;;  %v11653_v16 = vor.u32 %v14480_v24, %v11652_v62  ;;  %v14688_v61 = vld [vmem:[#allocation16 + $0x6ac] sm:$0xf0]  ;;  %v12437_v24 = vor.u32 %v14676_v40, %v12436_v34 }
 0x56d   :  { %v12485_v41 = vor.u32 %v14688_v61, %v12484_v29  ;;  %v14716_v29 = vld [vmem:[#allocation16 + $0x78c] sm:$0xf0] }
 0x56e   :  { %5046 = vmatpush.bf16.msra.mxu3 %v16048_v11  ;;  %5079 = vmatpush.bf16.msrb.mxu1 %v16048_v11 }
 0x570   :  { %8659 = vmatpush.bf16.msra.mxu0 %v11733_v49  ;;  %v14512_v49 = vld [vmem:[#allocation16 + $0x12c] sm:$0xf0] }
 0x571   :  { %v11781_v45 = vor.u32 %v14512_v49, %v11780_v32  ;;  %v14728_v32 = vld [vmem:[#allocation16 + $0x7ec] sm:$0xf0] }
 0x574   :  { %8660 = vmatpush.bf16.msra.mxu0 %v11717_v28  ;;  %v12101_v28 = vor.u32 %v14592_v15, %v12100_v17  ;;  %v14572_v17 = vld [vmem:[#allocation16 + $0x30c] sm:$0xf0] }
 0x578   :  { %8661 = vmatpush.bf16.msra.mxu0 %v11701_v36  ;;  %v14664_v36 = vld [vmem:[#allocation16 + $0x5ec] sm:$0xf0] }
 0x579   :  { %11625 = vmatmul.msk.bf16.vlgmr.msrb.gmra.mxu3 %vm4824_vm0, %v16027_v59  ;;  %11627 = vmatmul.msk.bf16.vlgmr.msra.gmra.mxu1 %vm4824_vm0, %v4989_v14  ;;  %v14548_v59 = vld [vmem:[#allocation16 + $0x24c] sm:$0xf0]  ;;  %v12133_v14 = vor.u32 %v14600_v13, %v12132_v25  ;;  %v12389_v44 = vor.u32 %v14664_v36, %v12388_v38  ;;  %v12564_v38 = vld [vmem:[#allocation16 + $0x740] sm:$0xf] }
 0x57a   :  { %5111 = vmatpush.bf16.msrb.mxu3 %v16044_v46  ;;  %8671 = vmatpush.bf16.msra.mxu1 %v11877_v27  ;;  %v11925_v3 = vor.u32 %v14548_v59, %v11924_v18  ;;  %v11893_v46 = vor.u32 %v14540_v47, %v11892_v19  ;;  %v11637_v27 = vor.u32 %v14476_v55, %v11636_v4  ;;  %v12468_v59 = vld [vmem:[#allocation16 + $0x680] sm:$0xf]  ;;  %v14660_v25 = vld [vmem:[#allocation16 + $0x5cc] sm:$0xf0] }
 0x57b   :  { %v12245_v18 = vor.u32 %v14628_v39, %v12244_v6  ;;  %v12356_v19 = vld [vmem:[#allocation16 + $0x5a0] sm:$0xf]  ;;  %v14724_v55 = vld [vmem:[#allocation16 + $0x7cc] sm:$0xf0] }
 0x57c   :  { %8689 = vmatpush.bf16.msrb.mxu2 %v11925_v3  ;;  %8662 = vmatpush.bf16.msra.mxu0 %v11685_v50  ;;  %v14684_v3 = vld [vmem:[#allocation16 + $0x68c] sm:$0xf0]  ;;  %v12372_v50 = vld [vmem:[#allocation16 + $0x5c0] sm:$0xf] }
 0x57d   :  { %v12469_v53 = vor.u32 %v14684_v3, %v12468_v59  ;;  %v12628_v4 = vld [vmem:[#allocation16 + $0x7c0] sm:$0xf]  ;;  %v14616_v36 = vld [vmem:[#allocation16 + $0x46c] sm:$0xf0] }
 0x57e   :  { %5112 = vmatpush.bf16.msrb.mxu3 %v16048_v11  ;;  %8672 = vmatpush.bf16.msra.mxu1 %v11861_v12  ;;  %v14596_v11 = vld [vmem:[#allocation16 + $0x3cc] sm:$0xf0]  ;;  %v12196_v39 = vld [vmem:[#allocation16 + $0x460] sm:$0xf] }
 0x57f   :  { %v12117_v56 = vor.u32 %v14596_v11, %v12116_v26  ;;  %v14508_v12 = vld [vmem:[#allocation16 + $0x10c] sm:$0xf0]  ;;  %v12212_v26 = vld [vmem:[#allocation16 + $0x480] sm:$0xf]  ;;  %v12197_v59 = vor.u32 %v14616_v36, %v12196_v39 }
 0x580   :  { %8690 = vmatpush.bf16.msrb.mxu2 %v11909_v2  ;;  %8663 = vmatpush.bf16.msra.mxu0 %v11669_v54  ;;  %v11765_v42 = vor.u32 %v14508_v12, %v11764_v0  ;;  %v14624_v2 = vld [vmem:[#allocation16 + $0x4ac] sm:$0xf0]  ;;  %v12373_v54 = vor.u32 %v14660_v25, %v12372_v50  ;;  %v12580_v0 = vld [vmem:[#allocation16 + $0x760] sm:$0xf] }
 0x581   :  { %v12229_v13 = vor.u32 %v14624_v2, %v12228_v9  ;;  %v14620_v11 = vld [vmem:[#allocation16 + $0x48c] sm:$0xf0]  ;;  %v12180_v9 = vld [vmem:[#allocation16 + $0x440] sm:$0xf] }
 0x582   :  { %8673 = vmatpush.bf16.msra.mxu1 %v11845_v7  ;;  %v12085_v7 = vor.u32 %v14588_v57, %v12084_v22  ;;  %v14720_v22 = vld [vmem:[#allocation16 + $0x7ac] sm:$0xf0]  ;;  %v12308_v25 = vld [vmem:[#allocation16 + $0x540] sm:$0xf] }
 0x583   :  { %v14712_v12 = vld [vmem:[#allocation16 + $0x76c] sm:$0xf0] }
 0x584   :  { %8691 = vmatpush.bf16.msrb.mxu2 %v11893_v46  ;;  %8664 = vmatpush.bf16.msra.mxu0 %v11653_v16  ;;  %v12340_v16 = vld [vmem:[#allocation16 + $0x580] sm:$0xf]  ;;  %v12581_v61 = vor.u32 %v14712_v12, %v12580_v0  ;;  %v14648_v3 = vld [vmem:[#allocation16 + $0x56c] sm:$0xf0] }
 0x585   :  { %v12341_v15 = vor.u32 %v14652_v10, %v12340_v16  ;;  %v14704_v50 = vld [vmem:[#allocation16 + $0x72c] sm:$0xf0] }
 0x586   :  { %8674 = vmatpush.bf16.msra.mxu1 %v11829_v20  ;;  %v12452_v20 = vld [vmem:[#allocation16 + $0x660] sm:$0xf]  ;;  %v14612_v2 = vld [vmem:[#allocation16 + $0x44c] sm:$0xf0] }
 0x587   :  { %v12453_v47 = vor.u32 %v14680_v33, %v12452_v20  ;;  %v14644_v20 = vld [vmem:[#allocation16 + $0x54c] sm:$0xf0] }
 0x588   :  { %8736 = vmatpush.bf16.msra.mxu2 %v12517_v30  ;;  %8665 = vmatpush.bf16.msra.mxu0 %v11637_v27  ;;  %v14576_v30 = vld [vmem:[#allocation16 + $0x32c] sm:$0xf0]  ;;  %v12629_v27 = vor.u32 %v14724_v55, %v12628_v4  ;;  %v12309_v33 = vor.u32 %v14644_v20, %v12308_v25 }
 0x589   :  { %11629 = vmatmul.msk.bf16.vlgmr.msra.gmra.mxu3 %vm4824_vm0, %v16063_v35  ;;  %11631 = vmatmul.msk.bf16.vlgmr.msrb.gmra.mxu1 %vm4824_vm0, %v16075_v60  ;;  %v14632_v35 = vld [vmem:[#allocation16 + $0x4ec] sm:$0xf0]  ;;  %v12037_v51 = vor.u32 %v14576_v30, %v12036_v21  ;;  %v12276_v30 = vld [vmem:[#allocation16 + $0x500] sm:$0xf] }
 0x58a   :  { %8697 = vmatpush.bf16.msra.mxu3 %v12133_v14  ;;  %8675 = vmatpush.bf16.msra.mxu1 %v11813_v1  ;;  %v12261_v60 = vor.u32 %v14632_v35, %v12260_v37  ;;  %v14656_v14 = vld [vmem:[#allocation16 + $0x5ac] sm:$0xf0]  ;;  %v12213_v1 = vor.u32 %v14620_v11, %v12212_v26  ;;  %v12612_v35 = vld [vmem:[#allocation16 + $0x7a0] sm:$0xf] }
 0x58b   :  { %v12357_v62 = vor.u32 %v14656_v14, %v12356_v19  ;;  %v12613_v57 = vor.u32 %v14720_v22, %v12612_v35  ;;  %v14700_v19 = vld [vmem:[#allocation16 + $0x70c] sm:$0xf0]  ;;  %v12164_v26 = vld [vmem:[#allocation16 + $0x420] sm:$0xf] }
 0x58c   :  { %8737 = vmatpush.bf16.msra.mxu2 %v12501_v8  ;;  %8710 = vmatpush.bf16.msrb.mxu0 %v12261_v60  ;;  %v12596_v60 = vld [vmem:[#allocation16 + $0x780] sm:$0xf]  ;;  %v14608_v11 = vld [vmem:[#allocation16 + $0x42c] sm:$0xf0] }
 0x58d   :  { %v12292_v14 = vld [vmem:[#allocation16 + $0x520] sm:$0xf]  ;;  %v12165_v34 = vor.u32 %v14608_v11, %v12164_v26  ;;  %v14604_v21 = vld [vmem:[#allocation16 + $0x40c] sm:$0xf0] }
 0x58e   :  { %8698 = vmatpush.bf16.msra.mxu3 %v12117_v56  ;;  %8676 = vmatpush.bf16.msra.mxu1 %v11797_v52  ;;  %v12020_v56 = vld [vmem:[#allocation16 + $0x300] sm:$0xf]  ;;  %v14852_v0 = vld [vmem:[#allocation16 + $0xbcc] sm:$0xf0] }
 0x58f   :  { %v12021_v49 = vor.u32 %v14572_v17, %v12020_v56  ;;  %v13012_v22 = vld [vmem:[#allocation16 + $0xac0] sm:$0xf]  ;;  %v14792_v39 = vld [vmem:[#allocation16 + $0x9ec] sm:$0xf0] }
 0x590   :  { %8738 = vmatpush.bf16.msra.mxu2 %v12485_v41  ;;  %8711 = vmatpush.bf16.msrb.mxu0 %v12245_v18  ;;  %v14708_v41 = vld [vmem:[#allocation16 + $0x74c] sm:$0xf0]  ;;  %v12324_v18 = vld [vmem:[#allocation16 + $0x560] sm:$0xf] }
 0x591   :  { %v12565_v6 = vor.u32 %v14708_v41, %v12564_v38  ;;  %v14760_v41 = vld [vmem:[#allocation16 + $0x8ec] sm:$0xf0] }
 0x592   :  { %8699 = vmatpush.bf16.msra.mxu3 %v12101_v28  ;;  %8677 = vmatpush.bf16.msra.mxu1 %v11781_v45  ;;  %v12597_v28 = vor.u32 %v14716_v29, %v12596_v60  ;;  %v14756_v25 = vld [vmem:[#allocation16 + $0x8cc] sm:$0xf0] }
 0x593   :  { %v14788_v20 = vld [vmem:[#allocation16 + $0x9cc] sm:$0xf0] }
 0x594   :  { %8739 = vmatpush.bf16.msra.mxu2 %v12469_v53  ;;  %v16094_v46 = vpop.f32.mrf.mxu0  ;;  %8712 = vmatpush.bf16.msrb.mxu0 %v12229_v13  ;;  %v12181_v13 = vor.u32 %v14612_v2, %v12180_v9 }
 0x596   :  { %8700 = vmatpush.bf16.msra.mxu3 %v12085_v7  ;;  %8678 = vmatpush.bf16.msra.mxu1 %v11765_v42  ;;  %v12325_v7 = vor.u32 %v14648_v3, %v12324_v18  ;;  %v12548_v42 = vld [vmem:[#allocation16 + $0x720] sm:$0xf] }
 0x597   :  { %v12549_v53 = vor.u32 %v14704_v50, %v12548_v42  ;;  %v12996_v3 = vld [vmem:[#allocation16 + $0xaa0] sm:$0xf] }
 0x598   :  { %8740 = vmatpush.bf16.msra.mxu2 %v12453_v47  ;;  %8713 = vmatpush.bf16.msrb.mxu0 %v12213_v1  ;;  %v12533_v47 = vor.u32 %v14700_v19, %v12532_v43  ;;  %v14640_v1 = vld [vmem:[#allocation16 + $0x52c] sm:$0xf0]  ;;  %v13124_v42 = vld [vmem:[#allocation16 + $0xba0] sm:$0xf] }
 0x599   :  { %11633 = vmatmul.msk.bf16.vlgmr.msrb.gmra.mxu3 %vm4824_vm0, %v16081_v58  ;;  %v12644_v58 = vld [vmem:[#allocation16 + $0x7e0] sm:$0xf]  ;;  %v12293_v40 = vor.u32 %v14640_v1, %v12292_v14 }
 0x59a   :  { %8723 = vmatpush.bf16.msrb.mxu1 %v12389_v44  ;;  %8701 = vmatpush.bf16.msra.mxu3 %v12069_v31  ;;  %v12645_v8 = vor.u32 %v14728_v32, %v12644_v58  ;;  %v16098_v37 = vpop.f32.mrf.mxu3  ;;  %v12421_v44 = vor.u32 %v14672_v23, %v12420_v5  ;;  %v12404_v31 = vld [vmem:[#allocation16 + $0x600] sm:$0xf]  ;;  %v14824_v32 = vld [vmem:[#allocation16 + $0xaec] sm:$0xf0] }
 0x59b   :  { %v14816_v23 = vld [vmem:[#allocation16 + $0xaac] sm:$0xf0]  ;;  %v13108_v19 = vld [vmem:[#allocation16 + $0xb80] sm:$0xf] }
 0x59c   :  { %8741 = vmatpush.bf16.msra.mxu2 %v12437_v24  ;;  %v4872_v52 = vpop.f32.mrf.mxu0  ;;  %8714 = vmatpush.bf16.msrb.mxu0 %v12197_v59  ;;  %v12740_v1 = vld [vmem:[#allocation16 + $0x8a0] sm:$0xf] }
 0x59d   :  { %v13028_v52 = vld [vmem:[#allocation16 + $0xae0] sm:$0xf] }
 0x59e   :  { %8724 = vmatpush.bf16.msrb.mxu1 %v12373_v54  ;;  %8702 = vmatpush.bf16.msra.mxu3 %v12053_v63  ;;  %v12405_v54 = vor.u32 %v14668_v48, %v12404_v31  ;;  %v12148_v63 = vld [vmem:[#allocation16 + $0x400] sm:$0xf] }
 0x59f   :  { %v12149_v24 = vor.u32 %v14604_v21, %v12148_v63  ;;  %v12980_v48 = vld [vmem:[#allocation16 + $0xa80] sm:$0xf]  ;;  %v14784_v21 = vld [vmem:[#allocation16 + $0x9ac] sm:$0xf0] }
 0x5a0   :  { %8742 = vmatpush.bf16.msra.mxu2 %v12421_v44  ;;  %8715 = vmatpush.bf16.msrb.mxu0 %v12181_v13  ;;  %v14848_v44 = vld [vmem:[#allocation16 + $0xbac] sm:$0xf0]  ;;  %v12884_v13 = vld [vmem:[#allocation16 + $0x9c0] sm:$0xf] }
 0x5a1   :  { %v13125_v31 = vor.u32 %v14848_v44, %v13124_v42  ;;  %v12885_v14 = vor.u32 %v14788_v20, %v12884_v13  ;;  %v12868_v63 = vld [vmem:[#allocation16 + $0x9a0] sm:$0xf]  ;;  %v14832_v13 = vld [vmem:[#allocation16 + $0xb2c] sm:$0xf0] }
 0x5a2   :  { %8725 = vmatpush.bf16.msrb.mxu1 %v12357_v62  ;;  %8703 = vmatpush.bf16.msra.mxu3 %v12037_v51  ;;  %v4839_v45 = vpop.f32.mrf.mxu3  ;;  %v14636_v62 = vld [vmem:[#allocation16 + $0x50c] sm:$0xf0]  ;;  %v16102_v51 = vpop.f32.mrf.mxu2  ;;  %v12932_v44 = vld [vmem:[#allocation16 + $0xa20] sm:$0xf] }
 0x5a3   :  { %v12277_v16 = vor.u32 %v14636_v62, %v12276_v30  ;;  %v13140_v45 = vld [vmem:[#allocation16 + $0xbc0] sm:$0xf] }
 0x5a4   :  { %8743 = vmatpush.bf16.msra.mxu2 %v12405_v54  ;;  %8716 = vmatpush.bf16.msrb.mxu0 %v12165_v34  ;;  %v16100_v10 = vpop.f32.mrf.mxu0  ;;  %v13141_v59 = vor.u32 %v14852_v0, %v13140_v45  ;;  %v14812_v54 = vld [vmem:[#allocation16 + $0xa8c] sm:$0xf0]  ;;  %v12948_v45 = vld [vmem:[#allocation16 + $0xa40] sm:$0xf] }
 0x5a5   :  { %v12981_v30 = vor.u32 %v14812_v54, %v12980_v48  ;;  %v12820_v54 = vld [vmem:[#allocation16 + $0x940] sm:$0xf] }
 0x5a6   :  { %8726 = vmatpush.bf16.msrb.mxu1 %v12341_v15  ;;  %8704 = vmatpush.bf16.msra.mxu3 %v12021_v49  ;;  %v13156_v49 = vld [vmem:[#allocation16 + $0xbe0] sm:$0xf] }
 0x5a8   :  { %8717 = vmatpush.bf16.msrb.mxu0 %v12149_v24 }
 0x5aa   :  { %8749 = vmatpush.bf16.msrb.mxu3 %v12645_v8  ;;  %8727 = vmatpush.bf16.msrb.mxu1 %v12325_v7  ;;  %v4905_v17 = vpop.f32.mrf.mxu2  ;;  %v14856_v8 = vld [vmem:[#allocation16 + $0xbec] sm:$0xf0] }
 0x5ab   :  { %v13157_v35 = vor.u32 %v14856_v8, %v13156_v49  ;;  %v14808_v17 = vld [vmem:[#allocation16 + $0xa6c] sm:$0xf0]  ;;  %v12724_v49 = vld [vmem:[#allocation16 + $0x880] sm:$0xf] }
 0x5ac   :  { %v4938_v56 = vpop.f32.mrf.mxu0 }
 0x5ae   :  { %8750 = vmatpush.bf16.msrb.mxu3 %v12629_v27  ;;  %8728 = vmatpush.bf16.msrb.mxu1 %v12309_v33  ;;  %v13029_v27 = vor.u32 %v14824_v32, %v13028_v52  ;;  %v12997_v33 = vor.u32 %v14816_v23, %v12996_v3  ;;  %v14840_v52 = vld [vmem:[#allocation16 + $0xb6c] sm:$0xf0]  ;;  %v12869_v32 = vor.u32 %v14784_v21, %v12868_v63  ;;  %v12836_v3 = vld [vmem:[#allocation16 + $0x960] sm:$0xf] }
 0x5af   :  { %v14952_v63 = vld [vmem:[#allocation16 + $0xeec] sm:$0xf0] }
 0x5b2   :  { %8751 = vmatpush.bf16.msrb.mxu3 %v12613_v57  ;;  %8729 = vmatpush.bf16.msrb.mxu1 %v12293_v40  ;;  %v14752_v40 = vld [vmem:[#allocation16 + $0x8ac] sm:$0xf0] }
 0x5b4   :  { %v16105_v57 = vpop.f32.mrf.mxu0 }
 0x5b6   :  { %8752 = vmatpush.bf16.msrb.mxu3 %v12597_v28  ;;  %8730 = vmatpush.bf16.msrb.mxu1 %v12277_v16  ;;  %v14820_v28 = vld [vmem:[#allocation16 + $0xacc] sm:$0xf0]  ;;  %v12964_v16 = vld [vmem:[#allocation16 + $0xa60] sm:$0xf] }
 0x5b7   :  { %v13013_v18 = vor.u32 %v14820_v28, %v13012_v22  ;;  %v12965_v22 = vor.u32 %v14808_v17, %v12964_v16  ;;  %v14984_v16 = vld [vmem:[#allocation16 + $0xfec] sm:$0xf0] }
 0x5b8   :  { %v14736_v17 = vld [vmem:[#allocation16 + $0x82c] sm:$0xf0] }
 0x5ba   :  { %8753 = vmatpush.bf16.msrb.mxu3 %v12581_v61  ;;  %v12772_v61 = vld [vmem:[#allocation16 + $0x8e0] sm:$0xf] }
 0x5bb   :  { %v12773_v50 = vor.u32 %v14760_v41, %v12772_v61  ;;  %v13076_v61 = vld [vmem:[#allocation16 + $0xb40] sm:$0xf] }
 0x5bc   :  { %v5004_v43 = vpop.f32.mrf.mxu0 }
 0x5bd   :  { %v14740_v43 = vld [vmem:[#allocation16 + $0x84c] sm:$0xf0] }
 0x5be   :  { %8754 = vmatpush.bf16.msrb.mxu3 %v12565_v6  ;;  %v12900_v6 = vld [vmem:[#allocation16 + $0x9e0] sm:$0xf] }
 0x5c2   :  { %8755 = vmatpush.bf16.msrb.mxu3 %v12549_v53  ;;  %v12756_v53 = vld [vmem:[#allocation16 + $0x8c0] sm:$0xf] }
 0x5c3   :  { %v12757_v11 = vor.u32 %v14756_v25, %v12756_v53  ;;  %v14800_v53 = vld [vmem:[#allocation16 + $0xa2c] sm:$0xf0]  ;;  %v13060_v25 = vld [vmem:[#allocation16 + $0xb20] sm:$0xf] }
 0x5c6   :  { %8756 = vmatpush.bf16.msrb.mxu3 %v12533_v47  ;;  %v14844_v47 = vld [vmem:[#allocation16 + $0xb8c] sm:$0xf0] }
 0x5c7   :  { %v13109_v62 = vor.u32 %v14844_v47, %v13108_v19  ;;  %v14772_v19 = vld [vmem:[#allocation16 + $0x94c] sm:$0xf0]  ;;  %v12933_v47 = vor.u32 %v14800_v53, %v12932_v44 }
 0x5d6   :  { %v4883_v15 = vpop.f32.mrf.mxu1 }
 0x5d7   :  { %v4887_v58 = vpack.c.bf16 %v4883_v15, %v16094_v46  ;;  %v16111_v46 = vpop.f32.mrf.mxu2  ;;  %v13092_v15 = vld [vmem:[#allocation16 + $0xb60] sm:$0xf] }
 0x5d8   :  { %v13093_v28 = vor.u32 %v14840_v52, %v13092_v15  ;;  %v12804_v15 = vld [vmem:[#allocation16 + $0x920] sm:$0xf]  ;;  %v14768_v52 = vld [vmem:[#allocation16 + $0x92c] sm:$0xf0] }
 0x5d9   :  { %v5726_v4 = vunpack.c.l.b16 %v4887_v58  ;;  %v5727_v55 = vunpack.c.h.b16 %v4887_v58  ;;  %v12741_v58 = vor.u32 %v14752_v40, %v12740_v1  ;;  %v13044_v1 = vld [vmem:[#allocation16 + $0xb00] sm:$0xf] }
 0x5da   :  { %v13540_v40 = vld [vmem:[#allocation16 + $0xee0] sm:$0xf] }
 0x5db   :  { %v16107_v60 = vpack.c.b16 %v5726_v4, %v5726_v4  ;;  %v16109_v29 = vpack.c.b16 %v5727_v55, %v5727_v55  ;;  %v14748_v55 = vld [vmem:[#allocation16 + $0x88c] sm:$0xf0] }
 0x5dc   :  { %v4850_v12 = vpop.f32.mrf.mxu3 }
 0x5dd   :  { %v4854_v38 = vpack.c.bf16 %v4850_v12, %v16098_v37  ;;  %8692 = vmatmul.bf16.vlgmr.msrb.gmra.mxu2 %v16107_v60  ;;  %8705 = vmatmul.bf16.vlgmr.msra.gmra.mxu3 %v16109_v29  ;;  %v12901_v37 = vor.u32 %v14792_v39, %v12900_v6  ;;  %v14804_v12 = vld [vmem:[#allocation16 + $0xa4c] sm:$0xf0]  ;;  %v12725_v6 = vor.u32 %v14748_v55, %v12724_v49 }
 0x5de   :  { %8788 = vmatpush.bf16.msrb.mxu2 %v13029_v27  ;;  %8801 = vmatpush.bf16.msra.mxu3 %v13157_v35  ;;  %v4885_v36 = vpop.f32.mrf.mxu1  ;;  %v12852_v27 = vld [vmem:[#allocation16 + $0x980] sm:$0xf]  ;;  %v14780_v35 = vld [vmem:[#allocation16 + $0x98c] sm:$0xf0]  ;;  %v13541_v55 = vor.u32 %v14952_v63, %v13540_v40 }
 0x5df   :  { %v5724_v7 = vunpack.c.l.b16 %v4854_v38  ;;  %v5725_v5 = vunpack.c.h.b16 %v4854_v38  ;;  %v4971_v34 = vpop.f32.mrf.mxu2  ;;  %v14836_v38 = vld [vmem:[#allocation16 + $0xb4c] sm:$0xf0]  ;;  %v12853_v39 = vor.u32 %v14780_v35, %v12852_v27  ;;  %v12708_v36 = vld [vmem:[#allocation16 + $0x860] sm:$0xf] }
 0x5e0   :  { %v13077_v23 = vor.u32 %v14836_v38, %v13076_v61  ;;  %v14828_v34 = vld [vmem:[#allocation16 + $0xb0c] sm:$0xf0]  ;;  %v13524_v35 = vld [vmem:[#allocation16 + $0xec0] sm:$0xf] }
 0x5e1   :  { %v16116_v9 = vpack.c.b16 %v5724_v7, %v5724_v7  ;;  %v16118_v2 = vpack.c.b16 %v5725_v5, %v5725_v5  ;;  %v14776_v7 = vld [vmem:[#allocation16 + $0x96c] sm:$0xf0]  ;;  %v12949_v5 = vor.u32 %v14804_v12, %v12948_v45  ;;  %v13045_v49 = vor.u32 %v14828_v34, %v13044_v1  ;;  %v12660_v38 = vld [vmem:[#allocation16 + $0x800] sm:$0xf] }
 0x5e2   :  { %8789 = vmatpush.bf16.msrb.mxu2 %v13013_v18  ;;  %8802 = vmatpush.bf16.msra.mxu3 %v13141_v59  ;;  %v14744_v59 = vld [vmem:[#allocation16 + $0x86c] sm:$0xf0]  ;;  %v12837_v20 = vor.u32 %v14776_v7, %v12836_v3  ;;  %v12805_v12 = vor.u32 %v14768_v52, %v12804_v15  ;;  %v13284_v3 = vld [vmem:[#allocation16 + $0xce0] sm:$0xf] }
 0x5e3   :  { %8666 = vmatmul.bf16.vlgmr.msra.gmra.mxu0 %v16116_v9  ;;  %8679 = vmatmul.bf16.vlgmr.msra.gmra.mxu1 %v16118_v2  ;;  %v14980_v61 = vld [vmem:[#allocation16 + $0xfcc] sm:$0xf0] }
 0x5e4   :  { %8762 = vmatpush.bf16.msra.mxu0 %v12773_v50  ;;  %8775 = vmatpush.bf16.msra.mxu1 %v12901_v37  ;;  %v4852_v26 = vpop.f32.mrf.mxu3  ;;  %v14888_v7 = vld [vmem:[#allocation16 + $0xcec] sm:$0xf0] }
 0x5e5   :  { %v13061_v26 = vor.u32 %v14832_v13, %v13060_v25  ;;  %v14916_v1 = vld [vmem:[#allocation16 + $0xdcc] sm:$0xf0] }
 0x5e6   :  { %8790 = vmatpush.bf16.msrb.mxu2 %v12997_v33  ;;  %8803 = vmatpush.bf16.msra.mxu3 %v13125_v31  ;;  %v4949_v24 = vpop.f32.mrf.mxu1  ;;  %v12692_v33 = vld [vmem:[#allocation16 + $0x840] sm:$0xf] }
 0x5e7   :  { %v4953_v56 = vpack.c.bf16 %v4949_v24, %v16100_v10  ;;  %v13668_v24 = vld [vmem:[#allocation16 + $0xfe0] sm:$0xf] }
 0x5e8   :  { %8763 = vmatpush.bf16.msra.mxu0 %v12757_v11  ;;  %8776 = vmatpush.bf16.msra.mxu1 %v12885_v14  ;;  %v12916_v11 = vld [vmem:[#allocation16 + $0xa00] sm:$0xf]  ;;  %v14796_v14 = vld [vmem:[#allocation16 + $0xa0c] sm:$0xf0]  ;;  %v13669_v27 = vor.u32 %v14984_v16, %v13668_v24 }
 0x5e9   :  { %v5730_v8 = vunpack.c.l.b16 %v4953_v56  ;;  %v5731_v4 = vunpack.c.h.b16 %v4953_v56  ;;  %v12676_v56 = vld [vmem:[#allocation16 + $0x820] sm:$0xf]  ;;  %v14940_v24 = vld [vmem:[#allocation16 + $0xe8c] sm:$0xf0] }
 0x5ea   :  { %8791 = vmatpush.bf16.msrb.mxu2 %v12981_v30  ;;  %8804 = vmatpush.bf16.msra.mxu3 %v13109_v62  ;;  %v12693_v30 = vor.u32 %v14740_v43, %v12692_v33  ;;  %v12821_v62 = vor.u32 %v14772_v19, %v12820_v54  ;;  %v12677_v45 = vor.u32 %v14736_v17, %v12676_v56  ;;  %v14976_v33 = vld [vmem:[#allocation16 + $0xfac] sm:$0xf0]  ;;  %v13620_v16 = vld [vmem:[#allocation16 + $0xf80] sm:$0xf] }
 0x5eb   :  { %v16123_v0 = vpack.c.b16 %v5730_v8, %v5730_v8  ;;  %v16125_v10 = vpack.c.b16 %v5731_v4, %v5731_v4  ;;  %v13285_v54 = vor.u32 %v14888_v7, %v13284_v3  ;;  %v14972_v56 = vld [vmem:[#allocation16 + $0xf8c] sm:$0xf0] }
 0x5ec   :  { %8764 = vmatpush.bf16.msra.mxu0 %v12741_v58  ;;  %8777 = vmatpush.bf16.msra.mxu1 %v12869_v32  ;;  %v4916_v41 = vpop.f32.mrf.mxu3  ;;  %v16136_v58 = vpop.f32.mrf.mxu0  ;;  %v12917_v32 = vor.u32 %v14796_v14, %v12916_v11  ;;  %v13396_v14 = vld [vmem:[#allocation16 + $0xdc0] sm:$0xf] }
 0x5ed   :  { %v4920_v18 = vpack.c.bf16 %v4916_v41, %v16102_v51  ;;  %8744 = vmatmul.bf16.vlgmr.msra.gmra.mxu2 %v16123_v0  ;;  %8757 = vmatmul.bf16.vlgmr.msrb.gmra.mxu3 %v16125_v10  ;;  %v12709_v51 = vor.u32 %v14744_v59, %v12708_v36  ;;  %v14732_v41 = vld [vmem:[#allocation16 + $0x80c] sm:$0xf0] }
 0x5ee   :  { %8792 = vmatpush.bf16.msrb.mxu2 %v12965_v22  ;;  %8805 = vmatpush.bf16.msra.mxu3 %v13093_v28  ;;  %v4951_v42 = vpop.f32.mrf.mxu1  ;;  %v14948_v22 = vld [vmem:[#allocation16 + $0xecc] sm:$0xf0]  ;;  %v13652_v28 = vld [vmem:[#allocation16 + $0xfc0] sm:$0xf]  ;;  %v12661_v25 = vor.u32 %v14732_v41, %v12660_v38 }
 0x5ef   :  { %v5728_v50 = vunpack.c.l.b16 %v4920_v18  ;;  %v5729_v37 = vunpack.c.h.b16 %v4920_v18  ;;  %v12788_v18 = vld [vmem:[#allocation16 + $0x900] sm:$0xf]  ;;  %v14764_v59 = vld [vmem:[#allocation16 + $0x90c] sm:$0xf0] }
 0x5f0   :  { %8765 = vmatpush.bf16.msra.mxu0 %v12725_v6  ;;  %8778 = vmatpush.bf16.msra.mxu1 %v12853_v39  ;;  %v16139_v6 = vpop.f32.mrf.mxu2  ;;  %v12789_v13 = vor.u32 %v14764_v59, %v12788_v18  ;;  %v13364_v18 = vld [vmem:[#allocation16 + $0xd80] sm:$0xf]  ;;  %v14908_v59 = vld [vmem:[#allocation16 + $0xd8c] sm:$0xf0] }
 0x5f1   :  { %v16130_v31 = vpack.c.b16 %v5728_v50, %v5728_v50  ;;  %v16132_v48 = vpack.c.b16 %v5729_v37, %v5729_v37  ;;  %v13653_v50 = vor.u32 %v14980_v61, %v13652_v28  ;;  %v13508_v37 = vld [vmem:[#allocation16 + $0xea0] sm:$0xf]  ;;  %v14936_v28 = vld [vmem:[#allocation16 + $0xe6c] sm:$0xf0] }
 0x5f2   :  { %8793 = vmatpush.bf16.msrb.mxu2 %v12949_v5  ;;  %8806 = vmatpush.bf16.msra.mxu3 %v13077_v23  ;;  %v13412_v5 = vld [vmem:[#allocation16 + $0xde0] sm:$0xf]  ;;  %v14920_v23 = vld [vmem:[#allocation16 + $0xdec] sm:$0xf0] }
 0x5f3   :  { %8718 = vmatmul.bf16.vlgmr.msrb.gmra.mxu0 %v16130_v31  ;;  %8731 = vmatmul.bf16.vlgmr.msrb.gmra.mxu1 %v16132_v48  ;;  %v13413_v19 = vor.u32 %v14920_v23, %v13412_v5  ;;  %v13460_v5 = vld [vmem:[#allocation16 + $0xe40] sm:$0xf]  ;;  %v14932_v23 = vld [vmem:[#allocation16 + $0xe4c] sm:$0xf0] }
 0x5f4   :  { %8766 = vmatpush.bf16.msra.mxu0 %v12709_v51  ;;  %8779 = vmatpush.bf16.msra.mxu1 %v12837_v20  ;;  %v4918_v21 = vpop.f32.mrf.mxu3  ;;  %v14944_v51 = vld [vmem:[#allocation16 + $0xeac] sm:$0xf0]  ;;  %v13636_v20 = vld [vmem:[#allocation16 + $0xfa0] sm:$0xf]  ;;  %v5070_v11 = vpop.f32.mrf.mxu0 }
 0x5f5   :  { %v13509_v21 = vor.u32 %v14944_v51, %v13508_v37  ;;  %v14964_v37 = vld [vmem:[#allocation16 + $0xf4c] sm:$0xf0] }
 0x5f6   :  { %8794 = vmatpush.bf16.msrb.mxu2 %v12933_v47  ;;  %8807 = vmatpush.bf16.msra.mxu3 %v13061_v26  ;;  %v5015_v8 = vpop.f32.mrf.mxu1  ;;  %v13268_v47 = vld [vmem:[#allocation16 + $0xcc0] sm:$0xf]  ;;  %v14884_v26 = vld [vmem:[#allocation16 + $0xccc] sm:$0xf0] }
 0x5f7   :  { %v5019_v4 = vpack.c.bf16 %v5015_v8, %v16105_v57  ;;  %v13525_v57 = vor.u32 %v14948_v22, %v13524_v35  ;;  %v14880_v8 = vld [vmem:[#allocation16 + $0xcac] sm:$0xf0]  ;;  %v13621_v35 = vor.u32 %v14972_v56, %v13620_v16  ;;  %v13476_v22 = vld [vmem:[#allocation16 + $0xe60] sm:$0xf] }
 0x5f8   :  { %8767 = vmatpush.bf16.msra.mxu0 %v12693_v30  ;;  %8780 = vmatpush.bf16.msra.mxu1 %v12821_v62  ;;  %v13637_v30 = vor.u32 %v14976_v33, %v13636_v20  ;;  %v13492_v62 = vld [vmem:[#allocation16 + $0xe80] sm:$0xf]  ;;  %v5037_v17 = vpop.f32.mrf.mxu2  ;;  %v14872_v51 = vld [vmem:[#allocation16 + $0xc6c] sm:$0xf0] }
 0x5f9   :  { %v5734_v39 = vunpack.c.l.b16 %v5019_v4  ;;  %v5735_v36 = vunpack.c.h.b16 %v5019_v4  ;;  %v13380_v4 = vld [vmem:[#allocation16 + $0xda0] sm:$0xf]  ;;  %v14904_v33 = vld [vmem:[#allocation16 + $0xd6c] sm:$0xf0] }
 0x5fa   :  { %8795 = vmatpush.bf16.msrb.mxu2 %v12917_v32  ;;  %8808 = vmatpush.bf16.msra.mxu3 %v13045_v49  ;;  %v13397_v32 = vor.u32 %v14916_v1, %v13396_v14  ;;  %v13252_v49 = vld [vmem:[#allocation16 + $0xca0] sm:$0xf]  ;;  %v14960_v11 = vld [vmem:[#allocation16 + $0xf2c] sm:$0xf0] }
 0x5fb   :  { %v16141_v42 = vpack.c.b16 %v5734_v39, %v5734_v39  ;;  %v16143_v44 = vpack.c.b16 %v5735_v36, %v5735_v36  ;;  %v13253_v38 = vor.u32 %v14880_v8, %v13252_v49  ;;  %v13236_v39 = vld [vmem:[#allocation16 + $0xc80] sm:$0xf]  ;;  %v14876_v36 = vld [vmem:[#allocation16 + $0xc8c] sm:$0xf0]  ;;  %v14502_v8 = vld [vmem:[#allocation16 + $0xe4] sm:$0xf] }
 0x5fc   :  { %8768 = vmatpush.bf16.msra.mxu0 %v12677_v45  ;;  %8781 = vmatpush.bf16.msra.mxu1 %v12805_v12  ;;  %v4982_v53 = vpop.f32.mrf.mxu3  ;;  %v13604_v45 = vld [vmem:[#allocation16 + $0xf60] sm:$0xf]  ;;  %v14968_v12 = vld [vmem:[#allocation16 + $0xf6c] sm:$0xf0] }
 0x5fd   :  { %v4986_v43 = vpack.c.bf16 %v4982_v53, %v16111_v46  ;;  %8796 = vmatmul.bf16.vlgmr.msrb.gmra.mxu2 %v16141_v42  ;;  %8809 = vmatmul.bf16.vlgmr.msra.gmra.mxu3 %v16143_v44  ;;  %v13269_v46 = vor.u32 %v14884_v26, %v13268_v47  ;;  %v13605_v7 = vor.u32 %v14968_v12, %v13604_v45  ;;  %v13348_v20 = vld [vmem:[#allocation16 + $0xd60] sm:$0xf]  ;;  %v14928_v47 = vld [vmem:[#allocation16 + $0xe2c] sm:$0xf0] }
 0x5fe   :  { %8840 = vmatpush.bf16.msra.mxu2 %v13541_v55  ;;  %8853 = vmatpush.bf16.msrb.mxu3 %v13669_v27  ;;  %v5017_v34 = vpop.f32.mrf.mxu1  ;;  %v14912_v55 = vld [vmem:[#allocation16 + $0xdac] sm:$0xf0]  ;;  %v13493_v27 = vor.u32 %v14940_v24, %v13492_v62  ;;  %v13237_v53 = vor.u32 %v14876_v36, %v13236_v39  ;;  %v13572_v26 = vld [vmem:[#allocation16 + $0xf20] sm:$0xf] }
 0x5ff   :  { %v5732_v40 = vunpack.c.l.b16 %v4986_v43  ;;  %v5733_v63 = vunpack.c.h.b16 %v4986_v43  ;;  %v13381_v41 = vor.u32 %v14912_v55, %v13380_v4  ;;  %v13461_v43 = vor.u32 %v14932_v23, %v13460_v5  ;;  %v13428_v56 = vld [vmem:[#allocation16 + $0xe00] sm:$0xf]  ;;  %v14924_v17 = vld [vmem:[#allocation16 + $0xe0c] sm:$0xf0]  ;;  %v11750_v4 = vld [vmem:[#allocation16 + $0xf0] sm:$0xf0] }
 0x600   :  { %8769 = vmatpush.bf16.msra.mxu0 %v12661_v25  ;;  %8782 = vmatpush.bf16.msra.mxu1 %v12789_v13  ;;  %v13365_v25 = vor.u32 %v14908_v59, %v13364_v18  ;;  %v13220_v13 = vld [vmem:[#allocation16 + $0xc60] sm:$0xf]  ;;  %v13349_v34 = vor.u32 %v14904_v33, %v13348_v20  ;;  %v13573_v16 = vor.u32 %v14960_v11, %v13572_v26  ;;  %v14956_v49 = vld [vmem:[#allocation16 + $0xf0c] sm:$0xf0] }
 0x601   :  { %v16148_v15 = vpack.c.b16 %v5732_v40, %v5732_v40  ;;  %v16150_v52 = vpack.c.b16 %v5733_v63, %v5733_v63  ;;  %v13221_v1 = vor.u32 %v14872_v51, %v13220_v13  ;;  %v13204_v40 = vld [vmem:[#allocation16 + $0xc40] sm:$0xf]  ;;  %v14868_v63 = vld [vmem:[#allocation16 + $0xc4c] sm:$0xf0]  ;;  %v11753_v36 = vor.u32 %v14502_v8, %v11750_v4 }
 0x602   :  { %8841 = vmatpush.bf16.msra.mxu2 %v13525_v57  ;;  %8854 = vmatpush.bf16.msrb.mxu3 %v13653_v50  ;;  %v13477_v57 = vor.u32 %v14936_v28, %v13476_v22  ;;  %v13588_v50 = vld [vmem:[#allocation16 + $0xf40] sm:$0xf]  ;;  %v13205_v55 = vor.u32 %v14868_v63, %v13204_v40  ;;  %v11878_v22 = vld [vmem:[#allocation16 + $0x1f0] sm:$0xf0]  ;;  %v14864_v12 = vld [vmem:[#allocation16 + $0xc2c] sm:$0xf0] }
 0x603   :  { %8770 = vmatmul.bf16.vlgmr.msra.gmra.mxu0 %v16148_v15  ;;  %8783 = vmatmul.bf16.vlgmr.msra.gmra.mxu1 %v16150_v52  ;;  %v13188_v28 = vld [vmem:[#allocation16 + $0xc20] sm:$0xf]  ;;  %v14892_v33 = vld [vmem:[#allocation16 + $0xd0c] sm:$0xf0]  ;;  %v14494_v63 = vld [vmem:[#allocation16 + $0xa4] sm:$0xf] }
 0x604   :  { %8814 = vmatpush.bf16.msrb.mxu0 %v13285_v54  ;;  %8827 = vmatpush.bf16.msrb.mxu1 %v13413_v19  ;;  %v4984_v61 = vpop.f32.mrf.mxu3  ;;  %v13589_v54 = vor.u32 %v14964_v37, %v13588_v50  ;;  %v13444_v19 = vld [vmem:[#allocation16 + $0xe20] sm:$0xf]  ;;  %v13189_v23 = vor.u32 %v14864_v12, %v13188_v28  ;;  %v11862_v37 = vld [vmem:[#allocation16 + $0x1d0] sm:$0xf0] }
 0x605   :  { %v13445_v24 = vor.u32 %v14928_v47, %v13444_v19  ;;  %v13316_v61 = vld [vmem:[#allocation16 + $0xd20] sm:$0xf]  ;;  %v15048_v47 = vld [vmem:[#allocation16 + $0x11ec] sm:$0xf0]  ;;  %v11830_v12 = vld [vmem:[#allocation16 + $0x190] sm:$0xf0] }
 0x606   :  { %8842 = vmatpush.bf16.msra.mxu2 %v13509_v21  ;;  %8855 = vmatpush.bf16.msrb.mxu3 %v13637_v30  ;;  %v5081_v3 = vpop.f32.mrf.mxu1  ;;  %v13332_v21 = vld [vmem:[#allocation16 + $0xd40] sm:$0xf]  ;;  %v14900_v30 = vld [vmem:[#allocation16 + $0xd4c] sm:$0xf0] }
 0x607   :  { %v5085_v62 = vpack.c.bf16 %v5081_v3, %v16136_v58  ;;  %v14498_v3 = vld [vmem:[#allocation16 + $0xc4] sm:$0xf]  ;;  %v13300_v20 = vld [vmem:[#allocation16 + $0xd00] sm:$0xf] }
 0x608   :  { %8815 = vmatpush.bf16.msrb.mxu0 %v13269_v46  ;;  %8828 = vmatpush.bf16.msrb.mxu1 %v13397_v32  ;;  %v13556_v32 = vld [vmem:[#allocation16 + $0xf00] sm:$0xf]  ;;  %v13301_v40 = vor.u32 %v14892_v33, %v13300_v20  ;;  %v15036_v20 = vld [vmem:[#allocation16 + $0x118c] sm:$0xf0] }
 0x609   :  { %v5738_v45 = vunpack.c.l.b16 %v5085_v62  ;;  %v5739_v58 = vunpack.c.h.b16 %v5085_v62  ;;  %v13557_v39 = vor.u32 %v14956_v49, %v13556_v32  ;;  %v13924_v19 = vld [vmem:[#allocation16 + $0x11e0] sm:$0xf]  ;;  %v15044_v32 = vld [vmem:[#allocation16 + $0x11cc] sm:$0xf0] }
 0x60a   :  { %8843 = vmatpush.bf16.msra.mxu2 %v13493_v27  ;;  %8856 = vmatpush.bf16.msrb.mxu3 %v13621_v35  ;;  %v13333_v27 = vor.u32 %v14900_v30, %v13332_v21  ;;  %v14534_v35 = vld [vmem:[#allocation16 + $0x1e4] sm:$0xf]  ;;  %v11718_v21 = vld [vmem:[#allocation16 + $0xb0] sm:$0xf0]  ;;  %v13925_v62 = vor.u32 %v15048_v47, %v13924_v19 }
 0x60b   :  { %v11881_v18 = vor.u32 %v14534_v35, %v11878_v22  ;;  %v16156_v13 = vpack.c.b16 %v5738_v45, %v5738_v45  ;;  %v16158_v51 = vpack.c.b16 %v5739_v58, %v5739_v58  ;;  %v11721_v8 = vor.u32 %v14494_v63, %v11718_v21  ;;  %v14490_v35 = vld [vmem:[#allocation16 + $0x84] sm:$0xf]  ;;  %v11702_v22 = vld [vmem:[#allocation16 + $0x90] sm:$0xf0]  ;;  %v13860_v63 = vld [vmem:[#allocation16 + $0x1160] sm:$0xf] }
 0x60c   :  { %8816 = vmatpush.bf16.msrb.mxu0 %v13253_v38  ;;  %8829 = vmatpush.bf16.msrb.mxu1 %v13381_v41  ;;  %v5048_v14 = vpop.f32.mrf.mxu3  ;;  %v14896_v38 = vld [vmem:[#allocation16 + $0xd2c] sm:$0xf0]  ;;  %v13429_v41 = vor.u32 %v14924_v17, %v13428_v56  ;;  %v13908_v17 = vld [vmem:[#allocation16 + $0x11c0] sm:$0xf]  ;;  %v14522_v58 = vld [vmem:[#allocation16 + $0x184] sm:$0xf] }
 0x60d   :  { %v5052_v59 = vpack.c.bf16 %v5048_v14, %v16139_v6  ;;  %v13317_v50 = vor.u32 %v14896_v38, %v13316_v61  ;;  %v15016_v6 = vld [vmem:[#allocation16 + $0x10ec] sm:$0xf0]  ;;  %v13909_v45 = vor.u32 %v15044_v32, %v13908_v17  ;;  %v13764_v61 = vld [vmem:[#allocation16 + $0x10a0] sm:$0xf]  ;;  %v14482_v19 = vld [vmem:[#allocation16 + $0x44] sm:$0xf] }
 0x60e   :  { %8844 = vmatpush.bf16.msra.mxu2 %v13477_v57  ;;  %8857 = vmatpush.bf16.msrb.mxu3 %v13605_v7  ;;  %v5083_v46 = vpop.f32.mrf.mxu1  ;;  %v11734_v57 = vld [vmem:[#allocation16 + $0xd0] sm:$0xf0]  ;;  %v14530_v7 = vld [vmem:[#allocation16 + $0x1c4] sm:$0xf]  ;;  %v15012_v56 = vld [vmem:[#allocation16 + $0x10cc] sm:$0xf0] }
 0x60f   :  { %v5736_v26 = vunpack.c.l.b16 %v5052_v59  ;;  %v11737_v11 = vor.u32 %v14498_v3, %v11734_v57  ;;  %v11865_v14 = vor.u32 %v14530_v7, %v11862_v37  ;;  %v14526_v46 = vld [vmem:[#allocation16 + $0x1a4] sm:$0xf]  ;;  %v11686_v57 = vld [vmem:[#allocation16 + $0x70] sm:$0xf0]  ;;  %v13748_v37 = vld [vmem:[#allocation16 + $0x1080] sm:$0xf] }
 0x610   :  { %8817 = vmatpush.bf16.msrb.mxu0 %v13237_v53  ;;  %8830 = vmatpush.bf16.msrb.mxu1 %v13365_v25  ;;  %v13172_v53 = vld [vmem:[#allocation16 + $0xc00] sm:$0xf]  ;;  %v14860_v25 = vld [vmem:[#allocation16 + $0xc0c] sm:$0xf0]  ;;  %v14486_v3 = vld [vmem:[#allocation16 + $0x64] sm:$0xf] }
 0x611   :  { %v16164_v49 = vpack.c.b16 %v5736_v26, %v5736_v26  ;;  %v11689_v33 = vor.u32 %v14486_v3, %v11686_v57  ;;  %v11670_v47 = vld [vmem:[#allocation16 + $0x50] sm:$0xf0]  ;;  %v15032_v21 = vld [vmem:[#allocation16 + $0x116c] sm:$0xf0]  ;;  %v14510_v17 = vld [vmem:[#allocation16 + $0x124] sm:$0xf] }
 0x612   :  { %8845 = vmatpush.bf16.msra.mxu2 %v13461_v43  ;;  %8858 = vmatpush.bf16.msrb.mxu3 %v13589_v54  ;;  %v13796_v43 = vld [vmem:[#allocation16 + $0x10e0] sm:$0xf]  ;;  %v16160_v54 = vpop.f32.mrf.mxu2  ;;  %v11782_v32 = vld [vmem:[#allocation16 + $0x130] sm:$0xf0] }
 0x613   :  { %v13797_v30 = vor.u32 %v15016_v6, %v13796_v43  ;;  %v12390_v3 = vld [vmem:[#allocation16 + $0x5f0] sm:$0xf0]  ;;  %v13700_v57 = vld [vmem:[#allocation16 + $0x1020] sm:$0xf] }
 0x614   :  { %8818 = vmatpush.bf16.msrb.mxu0 %v13221_v1  ;;  %8831 = vmatpush.bf16.msrb.mxu1 %v13349_v34  ;;  %v5050_v5 = vpop.f32.mrf.mxu3  ;;  %v5737_v1 = vunpack.c.h.b16 %v5052_v59  ;;  %v13173_v34 = vor.u32 %v14860_v25, %v13172_v53  ;;  %v11833_v59 = vor.u32 %v14522_v58, %v11830_v12  ;;  %v15004_v53 = vld [vmem:[#allocation16 + $0x108c] sm:$0xf0]  ;;  %v13876_v25 = vld [vmem:[#allocation16 + $0x1180] sm:$0xf]  ;;  %v11785_v58 = vor.u32 %v14510_v17, %v11782_v32  ;;  %v11638_v12 = vld [vmem:[#allocation16 + $0x10] sm:$0xf0] }
 0x615   :  { %v13749_v26 = vor.u32 %v15004_v53, %v13748_v37 }
 0x616   :  { %8846 = vmatpush.bf16.msra.mxu2 %v13445_v24  ;;  %8859 = vmatpush.bf16.msrb.mxu3 %v13573_v16  ;;  %v11846_v24 = vld [vmem:[#allocation16 + $0x1b0] sm:$0xf0]  ;;  %v13780_v16 = vld [vmem:[#allocation16 + $0x10c0] sm:$0xf] }
 0x617   :  { %v13781_v28 = vor.u32 %v15012_v56, %v13780_v16  ;;  %v13861_v56 = vor.u32 %v15032_v21, %v13860_v63  ;;  %v12006_v63 = vld [vmem:[#allocation16 + $0x2f0] sm:$0xf0] }
 0x618   :  { %8819 = vmatpush.bf16.msrb.mxu0 %v13205_v55  ;;  %8832 = vmatpush.bf16.msrb.mxu1 %v13333_v27  ;;  %v16168_v55 = vpack.c.b16 %v5737_v1, %v5737_v1  ;;  %v11849_v27 = vor.u32 %v14526_v46, %v11846_v24  ;;  %v11798_v1 = vld [vmem:[#allocation16 + $0x150] sm:$0xf0]  ;;  %v14478_v46 = vld [vmem:[#allocation16 + $0x24] sm:$0xf] }
 0x619   :  { %v11654_v24 = vld [vmem:[#allocation16 + $0x30] sm:$0xf0] }
 0x61a   :  { %8847 = vmatpush.bf16.msra.mxu2 %v13429_v41  ;;  %8860 = vmatpush.bf16.msrb.mxu3 %v13557_v39  ;;  %v5103_v38 = vpop.f32.mrf.mxu2  ;;  %v15008_v41 = vld [vmem:[#allocation16 + $0x10ac] sm:$0xf0]  ;;  %v13892_v39 = vld [vmem:[#allocation16 + $0x11a0] sm:$0xf] }
 0x61b   :  { %v13765_v7 = vor.u32 %v15008_v41, %v13764_v61  ;;  %v14506_v61 = vld [vmem:[#allocation16 + $0x104] sm:$0xf]  ;;  %v11766_v38 = vld [vmem:[#allocation16 + $0x110] sm:$0xf0] }
 0x61c   :  { %8820 = vmatpush.bf16.msrb.mxu0 %v13189_v23  ;;  %8833 = vmatpush.bf16.msrb.mxu1 %v13317_v50  ;;  %v16166_v4 = vpop.f32.mrf.mxu3  ;;  %v14518_v23 = vld [vmem:[#allocation16 + $0x164] sm:$0xf]  ;;  %v11814_v50 = vld [vmem:[#allocation16 + $0x170] sm:$0xf0]  ;;  %v11769_v37 = vor.u32 %v14506_v61, %v11766_v38 }
 0x61d   :  { %8848 = vmatmul.bf16.vlgmr.msra.gmra.mxu2 %v16156_v13  ;;  %8861 = vmatmul.bf16.vlgmr.msrb.gmra.mxu3 %v16158_v51  ;;  %v11817_v6 = vor.u32 %v14518_v23, %v11814_v50  ;;  %v13828_v23 = vld [vmem:[#allocation16 + $0x1120] sm:$0xf]  ;;  %v15024_v50 = vld [vmem:[#allocation16 + $0x112c] sm:$0xf0]  ;;  %v12118_v61 = vld [vmem:[#allocation16 + $0x3d0] sm:$0xf0] }
 0x61e   :  { %8892 = vmatpush.bf16.msrb.mxu2 %v11753_v36  ;;  %8905 = vmatpush.bf16.msra.mxu3 %v11881_v18  ;;  %v15040_v36 = vld [vmem:[#allocation16 + $0x11ac] sm:$0xf0]  ;;  %v11705_v18 = vor.u32 %v14490_v35, %v11702_v22  ;;  %v13844_v35 = vld [vmem:[#allocation16 + $0x1140] sm:$0xf] }
 0x61f   :  { %v13893_v5 = vor.u32 %v15040_v36, %v13892_v39  ;;  %v15028_v22 = vld [vmem:[#allocation16 + $0x114c] sm:$0xf0]  ;;  %v14630_v36 = vld [vmem:[#allocation16 + $0x4e4] sm:$0xf] }
 0x620   :  { %8821 = vmatpush.bf16.msrb.mxu0 %v13173_v34  ;;  %8834 = vmatpush.bf16.msrb.mxu1 %v13301_v40  ;;  %v13732_v34 = vld [vmem:[#allocation16 + $0x1060] sm:$0xf]  ;;  %v15000_v40 = vld [vmem:[#allocation16 + $0x106c] sm:$0xf0]  ;;  %v13845_v39 = vor.u32 %v15028_v22, %v13844_v35  ;;  %v14562_v22 = vld [vmem:[#allocation16 + $0x2c4] sm:$0xf] }
 0x621   :  { %v13733_v16 = vor.u32 %v15000_v40, %v13732_v34  ;;  %v15020_v34 = vld [vmem:[#allocation16 + $0x110c] sm:$0xf0]  ;;  %v14566_v40 = vld [vmem:[#allocation16 + $0x2e4] sm:$0xf] }
 0x622   :  { %8893 = vmatpush.bf16.msrb.mxu2 %v11737_v11  ;;  %8906 = vmatpush.bf16.msra.mxu3 %v11865_v14  ;;  %v13877_v11 = vor.u32 %v15036_v20, %v13876_v25  ;;  %v14514_v14 = vld [vmem:[#allocation16 + $0x144] sm:$0xf]  ;;  %v5118_v25 = vpack.c.bf16 %v16166_v4, %v16160_v54  ;;  %v12009_v32 = vor.u32 %v14566_v40, %v12006_v63  ;;  %v12182_v63 = vld [vmem:[#allocation16 + $0x450] sm:$0xf0] }
 0x623   :  { %8822 = vmatmul.bf16.vlgmr.msrb.gmra.mxu0 %v16164_v49  ;;  %8835 = vmatmul.bf16.vlgmr.msrb.gmra.mxu1 %v16168_v55  ;;  %v14626_v20 = vld [vmem:[#allocation16 + $0x4c4] sm:$0xf] }
 0x624   :  { %8866 = vmatpush.bf16.msra.mxu0 %v13797_v30  ;;  %8879 = vmatpush.bf16.msra.mxu1 %v13925_v62  ;;  %v5116_v43 = vpop.f32.mrf.mxu3  ;;  %v11673_v30 = vor.u32 %v14482_v19, %v11670_v47  ;;  %v11801_v62 = vor.u32 %v14514_v14, %v11798_v1  ;;  %v14658_v19 = vld [vmem:[#allocation16 + $0x5c4] sm:$0xf]  ;;  %v12374_v47 = vld [vmem:[#allocation16 + $0x5d0] sm:$0xf0]  ;;  %v14988_v14 = vld [vmem:[#allocation16 + $0x100c] sm:$0xf0]  ;;  %v5740_v21 = vunpack.c.l.b16 %v5118_v25 }
 0x625   :  { %v13812_v1 = vld [vmem:[#allocation16 + $0x1100] sm:$0xf]  ;;  %v14598_v4 = vld [vmem:[#allocation16 + $0x3e4] sm:$0xf] }
 0x626   :  { %8894 = vmatpush.bf16.msrb.mxu2 %v11721_v8  ;;  %8907 = vmatpush.bf16.msra.mxu3 %v11849_v27  ;;  %v13716_v8 = vld [vmem:[#allocation16 + $0x1040] sm:$0xf]  ;;  %v14996_v27 = vld [vmem:[#allocation16 + $0x104c] sm:$0xf0]  ;;  %v13813_v17 = vor.u32 %v15020_v34, %v13812_v1  ;;  %v12086_v1 = vld [vmem:[#allocation16 + $0x390] sm:$0xf0] }
 0x627   :  { %v13717_v41 = vor.u32 %v14996_v27, %v13716_v8  ;;  %v14654_v8 = vld [vmem:[#allocation16 + $0x5a4] sm:$0xf]  ;;  %v12358_v27 = vld [vmem:[#allocation16 + $0x5b0] sm:$0xf0] }
 0x628   :  { %8867 = vmatpush.bf16.msra.mxu0 %v13781_v28  ;;  %8880 = vmatpush.bf16.msra.mxu1 %v13909_v45  ;;  %v11657_v28 = vor.u32 %v14478_v46, %v11654_v24  ;;  %v14474_v45 = vld [vmem:[#allocation16 + $0x4] sm:$0xf]  ;;  %v12377_v46 = vor.u32 %v14658_v19, %v12374_v47 }
 0x629   :  { %v14554_v47 = vld [vmem:[#allocation16 + $0x284] sm:$0xf] }
 0x62a   :  { %8895 = vmatpush.bf16.msrb.mxu2 %v11705_v18  ;;  %8908 = vmatpush.bf16.msra.mxu3 %v11833_v59  ;;  %v12262_v18 = vld [vmem:[#allocation16 + $0x4f0] sm:$0xf0]  ;;  %v14662_v59 = vld [vmem:[#allocation16 + $0x5e4] sm:$0xf] }
 0x62b   :  { %v12265_v53 = vor.u32 %v14630_v36, %v12262_v18  ;;  %v12214_v36 = vld [vmem:[#allocation16 + $0x490] sm:$0xf0]  ;;  %v14610_v40 = vld [vmem:[#allocation16 + $0x444] sm:$0xf] }
 0x62c   :  { %8868 = vmatpush.bf16.msra.mxu0 %v13765_v7  ;;  %8881 = vmatpush.bf16.msra.mxu1 %v13893_v5  ;;  %v14992_v7 = vld [vmem:[#allocation16 + $0x102c] sm:$0xf0]  ;;  %v11641_v5 = vor.u32 %v14474_v45, %v11638_v12  ;;  %v16176_v45 = vpack.c.b16 %v5740_v21, %v5740_v21  ;;  %v14594_v12 = vld [vmem:[#allocation16 + $0x3c4] sm:$0xf] }
 0x62d   :  { %v13701_v43 = vor.u32 %v14992_v7, %v13700_v57  ;;  %v12121_v57 = vor.u32 %v14594_v12, %v12118_v61  ;;  %v14558_v7 = vld [vmem:[#allocation16 + $0x2a4] sm:$0xf]  ;;  %v11926_v12 = vld [vmem:[#allocation16 + $0x250] sm:$0xf0] }
 0x62e   :  { %8896 = vmatpush.bf16.msrb.mxu2 %v11689_v33  ;;  %8909 = vmatpush.bf16.msra.mxu3 %v11817_v6  ;;  %v12393_v33 = vor.u32 %v14662_v59, %v12390_v3  ;;  %v12246_v6 = vld [vmem:[#allocation16 + $0x4d0] sm:$0xf0]  ;;  %v14650_v59 = vld [vmem:[#allocation16 + $0x584] sm:$0xf] }
 0x62f   :  { %v12249_v54 = vor.u32 %v14626_v20, %v12246_v6  ;;  %v12342_v3 = vld [vmem:[#allocation16 + $0x590] sm:$0xf0] }
 0x630   :  { %8869 = vmatpush.bf16.msra.mxu0 %v13749_v26  ;;  %8882 = vmatpush.bf16.msra.mxu1 %v13877_v11  ;;  %v13829_v26 = vor.u32 %v15024_v50, %v13828_v23  ;;  %v13684_v11 = vld [vmem:[#allocation16 + $0x1000] sm:$0xf]  ;;  %v14590_v50 = vld [vmem:[#allocation16 + $0x3a4] sm:$0xf]  ;;  %v12198_v20 = vld [vmem:[#allocation16 + $0x470] sm:$0xf0] }
 0x631   :  { %v13685_v24 = vor.u32 %v14988_v14, %v13684_v11  ;;  %v12326_v6 = vld [vmem:[#allocation16 + $0x570] sm:$0xf0]  ;;  %v14586_v14 = vld [vmem:[#allocation16 + $0x384] sm:$0xf] }
 0x632   :  { %8897 = vmatpush.bf16.msrb.mxu2 %v11673_v30  ;;  %8910 = vmatpush.bf16.msra.mxu3 %v11801_v62  ;;  %v12134_v30 = vld [vmem:[#allocation16 + $0x3f0] sm:$0xf0]  ;;  %v5741_v62 = vunpack.c.h.b16 %v5118_v25  ;;  %v14614_v25 = vld [vmem:[#allocation16 + $0x464] sm:$0xf] }
 0x633   :  { %v12137_v35 = vor.u32 %v14598_v4, %v12134_v30  ;;  %v12201_v11 = vor.u32 %v14614_v25, %v12198_v20  ;;  %v12310_v4 = vld [vmem:[#allocation16 + $0x550] sm:$0xf0]  ;;  %v12089_v30 = vor.u32 %v14586_v14, %v12086_v1  ;;  %v14542_v25 = vld [vmem:[#allocation16 + $0x224] sm:$0xf] }
 0x634   :  { %8870 = vmatpush.bf16.msra.mxu0 %v13733_v16  ;;  %8883 = vmatpush.bf16.msra.mxu1 %v13861_v56  ;;  %v14622_v16 = vld [vmem:[#allocation16 + $0x4a4] sm:$0xf]  ;;  %v12230_v56 = vld [vmem:[#allocation16 + $0x4b0] sm:$0xf0]  ;;  %v16178_v38 = vpack.c.b16 %v5741_v62, %v5741_v62 }
 0x635   :  { %v14550_v62 = vld [vmem:[#allocation16 + $0x264] sm:$0xf]  ;;  %v11910_v20 = vld [vmem:[#allocation16 + $0x230] sm:$0xf0] }
 0x636   :  { %8898 = vmatpush.bf16.msrb.mxu2 %v11657_v28  ;;  %8911 = vmatpush.bf16.msra.mxu3 %v11785_v58  ;;  %v11990_v28 = vld [vmem:[#allocation16 + $0x2d0] sm:$0xf0]  ;;  %v12233_v58 = vor.u32 %v14622_v16, %v12230_v56  ;;  %v14582_v16 = vld [vmem:[#allocation16 + $0x364] sm:$0xf]  ;;  %v11913_v14 = vor.u32 %v14542_v25, %v11910_v20 }
 0x637   :  { %v11993_v18 = vor.u32 %v14562_v22, %v11990_v28  ;;  %v12070_v56 = vld [vmem:[#allocation16 + $0x370] sm:$0xf0]  ;;  %v14718_v20 = vld [vmem:[#allocation16 + $0x7a4] sm:$0xf] }
 0x638   :  { %8871 = vmatpush.bf16.msra.mxu0 %v13717_v41  ;;  %8884 = vmatpush.bf16.msra.mxu1 %v13845_v39  ;;  %v12361_v41 = vor.u32 %v14654_v8, %v12358_v27  ;;  %v14618_v39 = vld [vmem:[#allocation16 + $0x484] sm:$0xf]  ;;  %v12166_v8 = vld [vmem:[#allocation16 + $0x430] sm:$0xf0]  ;;  %v12073_v28 = vor.u32 %v14582_v16, %v12070_v56 }
 0x639   :  { %v12217_v23 = vor.u32 %v14618_v39, %v12214_v36  ;;  %v12294_v22 = vld [vmem:[#allocation16 + $0x530] sm:$0xf0]  ;;  %v14602_v36 = vld [vmem:[#allocation16 + $0x404] sm:$0xf] }
 0x63a   :  { %8899 = vmatpush.bf16.msrb.mxu2 %v11641_v5  ;;  %8912 = vmatpush.bf16.msra.mxu3 %v11769_v37  ;;  %v11974_v5 = vld [vmem:[#allocation16 + $0x2b0] sm:$0xf0]  ;;  %v14726_v16 = vld [vmem:[#allocation16 + $0x7e4] sm:$0xf] }
 0x63b   :  { %v12102_v37 = vld [vmem:[#allocation16 + $0x3b0] sm:$0xf0] }
 0x63c   :  { %8872 = vmatpush.bf16.msra.mxu0 %v13701_v43  ;;  %8885 = vmatpush.bf16.msra.mxu1 %v13829_v26  ;;  %v14646_v43 = vld [vmem:[#allocation16 + $0x564] sm:$0xf]  ;;  %v12105_v19 = vor.u32 %v14590_v50, %v12102_v37  ;;  %v11958_v26 = vld [vmem:[#allocation16 + $0x290] sm:$0xf0] }
 0x63d   :  { %8900 = vmatmul.bf16.vlgmr.msrb.gmra.mxu2 %v16116_v9  ;;  %8913 = vmatmul.bf16.vlgmr.msra.gmra.mxu3 %v16118_v2  ;;  %v12329_v34 = vor.u32 %v14646_v43, %v12326_v6  ;;  %v11961_v21 = vor.u32 %v14554_v47, %v11958_v26  ;;  %v12054_v39 = vld [vmem:[#allocation16 + $0x350] sm:$0xf0]  ;;  %v14790_v50 = vld [vmem:[#allocation16 + $0x9e4] sm:$0xf] }
 0x63e   :  { %8944 = vmatpush.bf16.msra.mxu2 %v12265_v53  ;;  %8957 = vmatpush.bf16.msrb.mxu3 %v12393_v33  ;;  %v12345_v53 = vor.u32 %v14650_v59, %v12342_v3  ;;  %v11977_v33 = vor.u32 %v14558_v7, %v11974_v5  ;;  %v12150_v59 = vld [vmem:[#allocation16 + $0x410] sm:$0xf0]  ;;  %v14634_v3 = vld [vmem:[#allocation16 + $0x504] sm:$0xf] }
 0x63f   :  { %v14758_v5 = vld [vmem:[#allocation16 + $0x8e4] sm:$0xf]  ;;  %v12038_v6 = vld [vmem:[#allocation16 + $0x330] sm:$0xf0] }
 0x640   :  { %8873 = vmatpush.bf16.msra.mxu0 %v13685_v24  ;;  %8886 = vmatpush.bf16.msra.mxu1 %v13813_v17  ;;  %v12185_v24 = vor.u32 %v14610_v40, %v12182_v63  ;;  %v14574_v43 = vld [vmem:[#allocation16 + $0x324] sm:$0xf]  ;;  %v12758_v1 = vld [vmem:[#allocation16 + $0x8d0] sm:$0xf0] }
 0x641   :  { %v14754_v26 = vld [vmem:[#allocation16 + $0x8c4] sm:$0xf]  ;;  %v12886_v40 = vld [vmem:[#allocation16 + $0x9d0] sm:$0xf0]  ;;  %v12041_v63 = vor.u32 %v14574_v43, %v12038_v6  ;;  %v16185_v43 = vld [vmem:[#allocation18] sm:$0xf] }
 0x642   :  { %8945 = vmatpush.bf16.msra.mxu2 %v12249_v54  ;;  %8958 = vmatpush.bf16.msrb.mxu3 %v12377_v46  ;;  %v14642_v54 = vld [vmem:[#allocation16 + $0x544] sm:$0xf]  ;;  %v11942_v46 = vld [vmem:[#allocation16 + $0x270] sm:$0xf0] }
 0x643   :  { %8874 = vmatmul.bf16.vlgmr.msra.gmra.mxu0 %v16176_v45  ;;  %8887 = vmatmul.bf16.vlgmr.msra.gmra.mxu1 %v16178_v38  ;;  %v12313_v17 = vor.u32 %v14642_v54, %v12310_v4  ;;  %v11945_v27 = vor.u32 %v14550_v62, %v11942_v46  ;;  %v11894_v54 = vld [vmem:[#allocation16 + $0x210] sm:$0xf0]  ;;  %v14570_v4 = vld [vmem:[#allocation16 + $0x304] sm:$0xf] }
 0x644   :  { %8918 = vmatpush.bf16.msrb.mxu0 %v12009_v32  ;;  %8931 = vmatpush.bf16.msrb.mxu1 %v12137_v35  ;;  %v14606_v32 = vld [vmem:[#allocation16 + $0x424] sm:$0xf]  ;;  %v12518_v46 = vld [vmem:[#allocation16 + $0x6f0] sm:$0xf0] }
 0x645   :  { %v14638_v35 = vld [vmem:[#allocation16 + $0x524] sm:$0xf]  ;;  %v12169_v61 = vor.u32 %v14606_v32, %v12166_v8  ;;  %v12646_v56 = vld [vmem:[#allocation16 + $0x7f0] sm:$0xf0] }
 0x646   :  { %8946 = vmatpush.bf16.msra.mxu2 %v12233_v58  ;;  %8959 = vmatpush.bf16.msrb.mxu3 %v12361_v41  ;;  %v14546_v58 = vld [vmem:[#allocation16 + $0x244] sm:$0xf] }
 0x647   :  { %v14578_v41 = vld [vmem:[#allocation16 + $0x344] sm:$0xf]  ;;  %v11929_v7 = vor.u32 %v14546_v58, %v11926_v12  ;;  %v12870_v58 = vld [vmem:[#allocation16 + $0x9b0] sm:$0xf0]  ;;  %v12649_v12 = vor.u32 %v14726_v16, %v12646_v56 }
 0x648   :  { %8919 = vmatpush.bf16.msrb.mxu0 %v11993_v18  ;;  %8932 = vmatpush.bf16.msrb.mxu1 %v12121_v57  ;;  %v12297_v18 = vor.u32 %v14638_v35, %v12294_v22  ;;  %v12278_v57 = vld [vmem:[#allocation16 + $0x510] sm:$0xf0]  ;;  %v12057_v37 = vor.u32 %v14578_v41, %v12054_v39  ;;  %v14694_v62 = vld [vmem:[#allocation16 + $0x6e4] sm:$0xf] }
 0x649   :  { %v14750_v8 = vld [vmem:[#allocation16 + $0x8a4] sm:$0xf]  ;;  %v12521_v22 = vor.u32 %v14694_v62, %v12518_v46  ;;  %v12502_v41 = vld [vmem:[#allocation16 + $0x6d0] sm:$0xf0] }
 0x64a   :  { %8947 = vmatpush.bf16.msra.mxu2 %v12217_v23  ;;  %8960 = vmatpush.bf16.msrb.mxu3 %v12345_v53  ;;  %v12774_v23 = vld [vmem:[#allocation16 + $0x8f0] sm:$0xf0]  ;;  %v14738_v62 = vld [vmem:[#allocation16 + $0x844] sm:$0xf] }
 0x64b   :  { %v12902_v53 = vld [vmem:[#allocation16 + $0x9f0] sm:$0xf0]  ;;  %v12777_v47 = vor.u32 %v14758_v5, %v12774_v23  ;;  %v14778_v5 = vld [vmem:[#allocation16 + $0x984] sm:$0xf] }
 0x64c   :  { %8920 = vmatpush.bf16.msrb.mxu0 %v11977_v33  ;;  %8933 = vmatpush.bf16.msrb.mxu1 %v12105_v19  ;;  %v12153_v33 = vor.u32 %v14602_v36, %v12150_v59  ;;  %v12281_v19 = vor.u32 %v14634_v3, %v12278_v57  ;;  %v14722_v36 = vld [vmem:[#allocation16 + $0x7c4] sm:$0xf]  ;;  %v12726_v57 = vld [vmem:[#allocation16 + $0x890] sm:$0xf0] }
 0x64d   :  { %v14746_v3 = vld [vmem:[#allocation16 + $0x884] sm:$0xf]  ;;  %v12854_v23 = vld [vmem:[#allocation16 + $0x990] sm:$0xf0] }
 0x64e   :  { %8948 = vmatpush.bf16.msra.mxu2 %v12201_v11  ;;  %8961 = vmatpush.bf16.msrb.mxu3 %v12329_v34  ;;  %v12905_v11 = vor.u32 %v14790_v50, %v12902_v53  ;;  %v14786_v34 = vld [vmem:[#allocation16 + $0x9c4] sm:$0xf]  ;;  %v12486_v53 = vld [vmem:[#allocation16 + $0x6b0] sm:$0xf0]  ;;  %v12729_v25 = vor.u32 %v14746_v3, %v12726_v57  ;;  %v12857_v6 = vor.u32 %v14778_v5, %v12854_v23 }
 0x64f   :  { %v12694_v46 = vld [vmem:[#allocation16 + $0x850] sm:$0xf0]  ;;  %v14766_v57 = vld [vmem:[#allocation16 + $0x924] sm:$0xf] }
 0x650   :  { %8921 = vmatpush.bf16.msrb.mxu0 %v11961_v21  ;;  %8934 = vmatpush.bf16.msrb.mxu1 %v12089_v30  ;;  %v14538_v21 = vld [vmem:[#allocation16 + $0x204] sm:$0xf]  ;;  %v12022_v30 = vld [vmem:[#allocation16 + $0x310] sm:$0xf0] }
 0x651   :  { %v11897_v32 = vor.u32 %v14538_v21, %v11894_v54  ;;  %v12025_v35 = vor.u32 %v14570_v4, %v12022_v30  ;;  %v14714_v54 = vld [vmem:[#allocation16 + $0x784] sm:$0xf]  ;;  %v12598_v4 = vld [vmem:[#allocation16 + $0x790] sm:$0xf0] }
 0x652   :  { %8949 = vmatpush.bf16.msra.mxu2 %v12185_v24  ;;  %8962 = vmatpush.bf16.msrb.mxu3 %v12313_v17  ;;  %v12761_v24 = vor.u32 %v14754_v26, %v12758_v1  ;;  %v12889_v17 = vor.u32 %v14786_v34, %v12886_v40  ;;  %v5707_v34 = vperm.slane %v16185_v43, 0  ;;  %v14682_v40 = vld [vmem:[#allocation16 + $0x684] sm:$0xf] }
 0x654   :  { %8922 = vmatpush.bf16.msrb.mxu0 %v11945_v27  ;;  %8935 = vmatpush.bf16.msrb.mxu1 %v12073_v28  ;;  %v12742_v27 = vld [vmem:[#allocation16 + $0x8b0] sm:$0xf0]  ;;  %v14782_v28 = vld [vmem:[#allocation16 + $0x9a4] sm:$0xf] }
 0x655   :  { %v12745_v39 = vor.u32 %v14750_v8, %v12742_v27  ;;  %v12873_v59 = vor.u32 %v14782_v28, %v12870_v58  ;;  %v14678_v28 = vld [vmem:[#allocation16 + $0x664] sm:$0xf]  ;;  %v12454_v58 = vld [vmem:[#allocation16 + $0x670] sm:$0xf0] }
 0x656   :  { %8950 = vmatpush.bf16.msra.mxu2 %v12169_v61  ;;  %8963 = vmatpush.bf16.msrb.mxu3 %v12297_v18  ;;  %v14690_v61 = vld [vmem:[#allocation16 + $0x6c4] sm:$0xf]  ;;  %v12630_v18 = vld [vmem:[#allocation16 + $0x7d0] sm:$0xf0]  ;;  %v12457_v3 = vor.u32 %v14678_v28, %v12454_v58 }
 0x657   :  { %v12633_v50 = vor.u32 %v14722_v36, %v12630_v18  ;;  %v14734_v18 = vld [vmem:[#allocation16 + $0x824] sm:$0xf]  ;;  %v13270_v28 = vld [vmem:[#allocation16 + $0xcd0] sm:$0xf0] }
 0x658   :  { %8923 = vmatpush.bf16.msrb.mxu0 %v11929_v7  ;;  %8936 = vmatpush.bf16.msrb.mxu1 %v12057_v37  ;;  %v12505_v7 = vor.u32 %v14690_v61, %v12502_v41  ;;  %v14686_v37 = vld [vmem:[#allocation16 + $0x6a4] sm:$0xf]  ;;  %v12582_v41 = vld [vmem:[#allocation16 + $0x770] sm:$0xf0] }
 0x659   :  { %v12489_v26 = vor.u32 %v14686_v37, %v12486_v53  ;;  %v14710_v61 = vld [vmem:[#allocation16 + $0x764] sm:$0xf]  ;;  %v12438_v37 = vld [vmem:[#allocation16 + $0x650] sm:$0xf0] }
 0x65a   :  { %8951 = vmatpush.bf16.msra.mxu2 %v12153_v33  ;;  %8964 = vmatpush.bf16.msrb.mxu3 %v12281_v19  ;;  %v12614_v33 = vld [vmem:[#allocation16 + $0x7b0] sm:$0xf0]  ;;  %v14742_v19 = vld [vmem:[#allocation16 + $0x864] sm:$0xf]  ;;  %v12585_v23 = vor.u32 %v14710_v61, %v12582_v41 }
 0x65b   :  { %v12617_v1 = vor.u32 %v14718_v20, %v12614_v33  ;;  %v12566_v20 = vld [vmem:[#allocation16 + $0x750] sm:$0xf0]  ;;  %v14730_v33 = vld [vmem:[#allocation16 + $0x804] sm:$0xf] }
 0x65c   :  { %8924 = vmatpush.bf16.msrb.mxu0 %v11913_v14  ;;  %8937 = vmatpush.bf16.msrb.mxu1 %v12041_v63  ;;  %v12838_v14 = vld [vmem:[#allocation16 + $0x970] sm:$0xf0]  ;;  %v14914_v58 = vld [vmem:[#allocation16 + $0xdc4] sm:$0xf] }
 0x65d   :  { %8952 = vmatmul.bf16.vlgmr.msra.gmra.mxu2 %v16130_v31  ;;  %8965 = vmatmul.bf16.vlgmr.msrb.gmra.mxu3 %v16132_v48  ;;  %v12470_v63 = vld [vmem:[#allocation16 + $0x690] sm:$0xf0]  ;;  %v14666_v41 = vld [vmem:[#allocation16 + $0x604] sm:$0xf] }
 0x65e   :  { %8996 = vmatpush.bf16.msrb.mxu2 %v12777_v47  ;;  %9009 = vmatpush.bf16.msra.mxu3 %v12905_v11  ;;  %v12710_v47 = vld [vmem:[#allocation16 + $0x870] sm:$0xf0]  ;;  %v14774_v11 = vld [vmem:[#allocation16 + $0x964] sm:$0xf]  ;;  %v12473_v56 = vor.u32 %v14682_v40, %v12470_v63 }
 0x65f   :  { %v12713_v21 = vor.u32 %v14742_v19, %v12710_v47  ;;  %v12841_v30 = vor.u32 %v14774_v11, %v12838_v14  ;;  %v12662_v47 = vld [vmem:[#allocation16 + $0x810] sm:$0xf0]  ;;  %v14886_v40 = vld [vmem:[#allocation16 + $0xce4] sm:$0xf] }
 0x660   :  { %8925 = vmatpush.bf16.msrb.mxu0 %v11897_v32  ;;  %8938 = vmatpush.bf16.msrb.mxu1 %v12025_v35  ;;  %v8680_v16 = vpop.f32.mrf.mxu1  ;;  %v12822_v32 = vld [vmem:[#allocation16 + $0x950] sm:$0xf0]  ;;  %v8693_v27 = vpop.f32.mrf.mxu2 }
 0x661   :  { %v8706_v35 = vpop.f32.mrf.mxu3  ;;  %v12790_v11 = vld [vmem:[#allocation16 + $0x910] sm:$0xf0] }
 0x662   :  { %8997 = vmatpush.bf16.msrb.mxu2 %v12761_v24  ;;  %9010 = vmatpush.bf16.msra.mxu3 %v12889_v17  ;;  %v8667_v24 = vpop.f32.mrf.mxu0  ;;  %v14770_v17 = vld [vmem:[#allocation16 + $0x944] sm:$0xf]  ;;  %v13286_v63 = vld [vmem:[#allocation16 + $0xcf0] sm:$0xf0] }
 0x663   :  { %8926 = vmatmul.bf16.vlgmr.msrb.gmra.mxu0 %v16107_v60  ;;  %8939 = vmatmul.bf16.vlgmr.msrb.gmra.mxu1 %v16109_v29  ;;  %v8668_v8 = vadd.f32 %v8667_v24, %v5707_v34  ;;  %v12825_v36 = vor.u32 %v14770_v17, %v12822_v32  ;;  %v12422_v24 = vld [vmem:[#allocation16 + $0x630] sm:$0xf0] }
 0x664   :  { %8970 = vmatpush.bf16.msra.mxu0 %v12521_v22  ;;  %8983 = vmatpush.bf16.msra.mxu1 %v12649_v12  ;;  %v12601_v22 = vor.u32 %v14714_v54, %v12598_v4  ;;  %v12697_v12 = vor.u32 %v14738_v62, %v12694_v46  ;;  %v13414_v62 = vld [vmem:[#allocation16 + $0xdf0] sm:$0xf0]  ;;  %v14670_v46 = vld [vmem:[#allocation16 + $0x624] sm:$0xf] }
 0x665   :  { %v12550_v17 = vld [vmem:[#allocation16 + $0x730] sm:$0xf0] }
 0x666   :  { %8998 = vmatpush.bf16.msrb.mxu2 %v12745_v39  ;;  %9011 = vmatpush.bf16.msra.mxu3 %v12873_v59  ;;  %v8681_v39 = vadd.f32 %v8680_v16, %v8668_v8  ;;  %v12678_v59 = vld [vmem:[#allocation16 + $0x830] sm:$0xf0]  ;;  %v12665_v16 = vor.u32 %v14730_v33, %v12662_v47  ;;  %v13289_v8 = vor.u32 %v14886_v40, %v13286_v63  ;;  %v14818_v40 = vld [vmem:[#allocation16 + $0xac4] sm:$0xf] }
 0x667   :  { %v12681_v53 = vor.u32 %v14734_v18, %v12678_v59  ;;  %v12534_v18 = vld [vmem:[#allocation16 + $0x710] sm:$0xf0]  ;;  %v14822_v59 = vld [vmem:[#allocation16 + $0xae4] sm:$0xf] }
 0x668   :  { %8971 = vmatpush.bf16.msra.mxu0 %v12505_v7  ;;  %8984 = vmatpush.bf16.msra.mxu1 %v12633_v50  ;;  %v12806_v7 = vld [vmem:[#allocation16 + $0x930] sm:$0xf0]  ;;  %v8694_v5 = vadd.f32 %v8693_v27, %v8681_v39  ;;  %v14674_v50 = vld [vmem:[#allocation16 + $0x644] sm:$0xf]  ;;  %v8695_v54 = vpop.f32.mrf.mxu2 }
 0x669   :  { %v12809_v19 = vor.u32 %v14766_v57, %v12806_v7  ;;  %v12441_v34 = vor.u32 %v14674_v50, %v12438_v37  ;;  %v8708_v4 = vpop.f32.mrf.mxu3  ;;  %v14882_v27 = vld [vmem:[#allocation16 + $0xcc4] sm:$0xf]  ;;  %v12406_v39 = vld [vmem:[#allocation16 + $0x610] sm:$0xf0] }
 0x66a   :  { %8999 = vmatpush.bf16.msrb.mxu2 %v12729_v25  ;;  %9012 = vmatpush.bf16.msra.mxu3 %v12857_v6  ;;  %v14706_v25 = vld [vmem:[#allocation16 + $0x744] sm:$0xf]  ;;  %v8707_v6 = vadd.f32 %v8706_v35, %v8694_v5  ;;  %v8669_v14 = vpop.f32.mrf.mxu0  ;;  %v13273_v57 = vor.u32 %v14882_v27, %v13270_v28  ;;  %v13158_v5 = vld [vmem:[#allocation16 + $0xbf0] sm:$0xf0] }
 0x66b   :  { %v14854_v7 = vld [vmem:[#allocation16 + $0xbe4] sm:$0xf]  ;;  %v13014_v63 = vld [vmem:[#allocation16 + $0xad0] sm:$0xf0] }
 0x66c   :  { %8972 = vmatpush.bf16.msra.mxu0 %v12489_v26  ;;  %8985 = vmatpush.bf16.msra.mxu1 %v12617_v1  ;;  %v14762_v26 = vld [vmem:[#allocation16 + $0x904] sm:$0xf]  ;;  %v8682_v1 = vpop.f32.mrf.mxu1  ;;  %v12998_v27 = vld [vmem:[#allocation16 + $0xab0] sm:$0xf0] }
 0x66d   :  { %v12793_v32 = vor.u32 %v14762_v26, %v12790_v11  ;;  %v14910_v14 = vld [vmem:[#allocation16 + $0xda4] sm:$0xf]  ;;  %v13382_v1 = vld [vmem:[#allocation16 + $0xdb0] sm:$0xf0] }
 0x66e   :  { %9000 = vmatpush.bf16.msrb.mxu2 %v12713_v21  ;;  %9013 = vmatpush.bf16.msra.mxu3 %v12841_v30  ;;  %v14918_v21 = vld [vmem:[#allocation16 + $0xde4] sm:$0xf]  ;;  %v12569_v30 = vor.u32 %v14706_v25, %v12566_v20  ;;  %v13254_v20 = vld [vmem:[#allocation16 + $0xcb0] sm:$0xf0] }
 0x66f   :  { %v13417_v35 = vor.u32 %v14918_v21, %v13414_v62  ;;  %v14878_v25 = vld [vmem:[#allocation16 + $0xca4] sm:$0xf] }
 0x670   :  { %8973 = vmatpush.bf16.msra.mxu0 %v12473_v56  ;;  %8986 = vmatpush.bf16.msra.mxu1 %v12601_v22  ;;  %v14702_v56 = vld [vmem:[#allocation16 + $0x724] sm:$0xf]  ;;  %v12425_v22 = vor.u32 %v14670_v46, %v12422_v24  ;;  %v8745_v47 = vpop.f32.mrf.mxu2  ;;  %v13257_v54 = vor.u32 %v14878_v25, %v13254_v20  ;;  %v13238_v46 = vld [vmem:[#allocation16 + $0xc90] sm:$0xf0] }
 0x671   :  { %v12553_v61 = vor.u32 %v14702_v56, %v12550_v17  ;;  %v8758_v11 = vpop.f32.mrf.mxu3  ;;  %v14850_v4 = vld [vmem:[#allocation16 + $0xbc4] sm:$0xf]  ;;  %v13366_v17 = vld [vmem:[#allocation16 + $0xd90] sm:$0xf0] }
 0x672   :  { %9001 = vmatpush.bf16.msrb.mxu2 %v12697_v12  ;;  %9014 = vmatpush.bf16.msra.mxu3 %v12825_v36  ;;  %v13398_v12 = vld [vmem:[#allocation16 + $0xdd0] sm:$0xf0]  ;;  %v14698_v36 = vld [vmem:[#allocation16 + $0x704] sm:$0xf] }
 0x673   :  { %v13401_v37 = vor.u32 %v14914_v58, %v13398_v12  ;;  %v14874_v62 = vld [vmem:[#allocation16 + $0xc84] sm:$0xf]  ;;  %v13126_v58 = vld [vmem:[#allocation16 + $0xbb0] sm:$0xf0] }
 0x674   :  { %8974 = vmatpush.bf16.msra.mxu0 %v12457_v3  ;;  %8987 = vmatpush.bf16.msra.mxu1 %v12585_v23  ;;  %v13030_v3 = vld [vmem:[#allocation16 + $0xaf0] sm:$0xf0]  ;;  %v8719_v23 = vpop.f32.mrf.mxu0  ;;  %v8732_v50 = vpop.f32.mrf.mxu1  ;;  %v14906_v56 = vld [vmem:[#allocation16 + $0xd84] sm:$0xf] }
 0x675   :  { %v8720_v33 = vadd.f32 %v8719_v23, %v8707_v6  ;;  %v13033_v26 = vor.u32 %v14822_v59, %v13030_v3  ;;  %v13385_v6 = vor.u32 %v14910_v14, %v13382_v1  ;;  %v14846_v28 = vld [vmem:[#allocation16 + $0xba4] sm:$0xf]  ;;  %v13110_v25 = vld [vmem:[#allocation16 + $0xb90] sm:$0xf0] }
 0x676   :  { %9002 = vmatpush.bf16.msrb.mxu2 %v12681_v53  ;;  %9015 = vmatpush.bf16.msra.mxu3 %v12809_v19  ;;  %v12409_v53 = vor.u32 %v14666_v41, %v12406_v39  ;;  %v12537_v19 = vor.u32 %v14698_v36, %v12534_v18  ;;  %v13369_v41 = vor.u32 %v14906_v56, %v13366_v17  ;;  %v14870_v39 = vld [vmem:[#allocation16 + $0xc64] sm:$0xf]  ;;  %v13222_v36 = vld [vmem:[#allocation16 + $0xc70] sm:$0xf0] }
 0x677   :  { %v8733_v21 = vadd.f32 %v8732_v50, %v8720_v33  ;;  %v14810_v23 = vld [vmem:[#allocation16 + $0xa84] sm:$0xf]  ;;  %v12982_v50 = vld [vmem:[#allocation16 + $0xa90] sm:$0xf0] }
 0x678   :  { %8975 = vmatpush.bf16.msra.mxu0 %v12441_v34  ;;  %8988 = vmatpush.bf16.msra.mxu1 %v12569_v30  ;;  %v13161_v34 = vor.u32 %v14854_v7, %v13158_v5  ;;  %v13142_v30 = vld [vmem:[#allocation16 + $0xbd0] sm:$0xf0]  ;;  %v8747_v18 = vpop.f32.mrf.mxu2  ;;  %v13129_v5 = vor.u32 %v14846_v28, %v13126_v58  ;;  %v14866_v33 = vld [vmem:[#allocation16 + $0xc44] sm:$0xf] }
 0x679   :  { %v8746_v24 = vadd.f32 %v8745_v47, %v8733_v21  ;;  %v8760_v3 = vpop.f32.mrf.mxu3  ;;  %v13350_v7 = vld [vmem:[#allocation16 + $0xd70] sm:$0xf0]  ;;  %v12985_v47 = vor.u32 %v14810_v23, %v12982_v50  ;;  %v14806_v1 = vld [vmem:[#allocation16 + $0xa64] sm:$0xf] }
 0x67a   :  { %9003 = vmatpush.bf16.msrb.mxu2 %v12665_v16  ;;  %9016 = vmatpush.bf16.msra.mxu3 %v12793_v32  ;;  %v13017_v16 = vor.u32 %v14818_v40, %v13014_v63  ;;  %v13145_v32 = vor.u32 %v14850_v4, %v13142_v30  ;;  %v14838_v63 = vld [vmem:[#allocation16 + $0xb64] sm:$0xf]  ;;  %v13094_v21 = vld [vmem:[#allocation16 + $0xb70] sm:$0xf0] }
 0x67b   :  { %v14862_v4 = vld [vmem:[#allocation16 + $0xc24] sm:$0xf]  ;;  %v13190_v30 = vld [vmem:[#allocation16 + $0xc30] sm:$0xf0] }
 0x67c   :  { %8976 = vmatpush.bf16.msra.mxu0 %v12425_v22  ;;  %8989 = vmatpush.bf16.msra.mxu1 %v12553_v61  ;;  %v13241_v22 = vor.u32 %v14874_v62, %v13238_v46  ;;  %v8721_v12 = vpop.f32.mrf.mxu0  ;;  %v8734_v61 = vpop.f32.mrf.mxu1  ;;  %v13193_v28 = vor.u32 %v14862_v4, %v13190_v30  ;;  %v14834_v58 = vld [vmem:[#allocation16 + $0xb44] sm:$0xf]  ;;  %v13926_v50 = vld [vmem:[#allocation16 + $0x11f0] sm:$0xf0] }
 0x67d   :  { %9004 = vmatmul.bf16.vlgmr.msrb.gmra.mxu2 %v16148_v15  ;;  %9017 = vmatmul.bf16.vlgmr.msra.gmra.mxu3 %v16150_v52  ;;  %v13078_v12 = vld [vmem:[#allocation16 + $0xb50] sm:$0xf0]  ;;  %v14858_v61 = vld [vmem:[#allocation16 + $0xc04] sm:$0xf] }
 0x67e   :  { %9048 = vmatpush.bf16.msra.mxu2 %v13289_v8  ;;  %9061 = vmatpush.bf16.msrb.mxu3 %v13417_v35  ;;  %v14814_v8 = vld [vmem:[#allocation16 + $0xaa4] sm:$0xf]  ;;  %v8759_v35 = vadd.f32 %v8758_v11, %v8746_v24  ;;  %v13334_v11 = vld [vmem:[#allocation16 + $0xd50] sm:$0xf0]  ;;  %v13081_v23 = vor.u32 %v14834_v58, %v13078_v12 }
 0x67f   :  { %v13001_v59 = vor.u32 %v14814_v8, %v12998_v27  ;;  %v14894_v24 = vld [vmem:[#allocation16 + $0xd24] sm:$0xf]  ;;  %v13766_v12 = vld [vmem:[#allocation16 + $0x10b0] sm:$0xf0] }
 0x680   :  { %8977 = vmatpush.bf16.msra.mxu0 %v12409_v53  ;;  %8990 = vmatpush.bf16.msra.mxu1 %v12537_v19  ;;  %v14842_v53 = vld [vmem:[#allocation16 + $0xb84] sm:$0xf]  ;;  %v13206_v19 = vld [vmem:[#allocation16 + $0xc50] sm:$0xf0]  ;;  %v8797_v17 = vpop.f32.mrf.mxu2 }
 0x681   :  { %v13113_v14 = vor.u32 %v14842_v53, %v13110_v25  ;;  %v13209_v40 = vor.u32 %v14866_v33, %v13206_v19  ;;  %v8810_v8 = vpop.f32.mrf.mxu3  ;;  %v14802_v27 = vld [vmem:[#allocation16 + $0xa44] sm:$0xf]  ;;  %v12934_v53 = vld [vmem:[#allocation16 + $0xa30] sm:$0xf0] }
 0x682   :  { %9049 = vmatpush.bf16.msra.mxu2 %v13273_v57  ;;  %9062 = vmatpush.bf16.msrb.mxu3 %v13401_v37  ;;  %v14902_v57 = vld [vmem:[#allocation16 + $0xd64] sm:$0xf]  ;;  %v13225_v37 = vor.u32 %v14870_v39, %v13222_v36  ;;  %v13174_v36 = vld [vmem:[#allocation16 + $0xc10] sm:$0xf0] }
 0x683   :  { %8978 = vmatmul.bf16.vlgmr.msra.gmra.mxu0 %v16123_v0  ;;  %8991 = vmatmul.bf16.vlgmr.msra.gmra.mxu1 %v16125_v10  ;;  %v13353_v20 = vor.u32 %v14902_v57, %v13350_v7  ;;  %v14890_v18 = vld [vmem:[#allocation16 + $0xd04] sm:$0xf]  ;;  %v13798_v57 = vld [vmem:[#allocation16 + $0x10f0] sm:$0xf0]  ;;  %v13177_v25 = vor.u32 %v14858_v61, %v13174_v36 }
 0x684   :  { %9022 = vmatpush.bf16.msrb.mxu0 %v13033_v26  ;;  %9035 = vmatpush.bf16.msrb.mxu1 %v13161_v34  ;;  %v14898_v26 = vld [vmem:[#allocation16 + $0xd44] sm:$0xf]  ;;  %v12966_v34 = vld [vmem:[#allocation16 + $0xa70] sm:$0xf0]  ;;  %v8784_v62 = vpop.f32.mrf.mxu1 }
 0x685   :  { %v12969_v46 = vor.u32 %v14806_v1, %v12966_v34  ;;  %v15046_v7 = vld [vmem:[#allocation16 + $0x11e4] sm:$0xf]  ;;  %v13062_v33 = vld [vmem:[#allocation16 + $0xb30] sm:$0xf0] }
 0x686   :  { %9050 = vmatpush.bf16.msra.mxu2 %v13257_v54  ;;  %9063 = vmatpush.bf16.msrb.mxu3 %v13385_v6  ;;  %v13337_v54 = vor.u32 %v14898_v26, %v13334_v11  ;;  %v8771_v6 = vpop.f32.mrf.mxu0  ;;  %v15010_v11 = vld [vmem:[#allocation16 + $0x10c4] sm:$0xf]  ;;  %v13782_v34 = vld [vmem:[#allocation16 + $0x10d0] sm:$0xf0] }
 0x687   :  { %v8772_v56 = vadd.f32 %v8771_v6, %v8759_v35  ;;  %v15014_v35 = vld [vmem:[#allocation16 + $0x10e4] sm:$0xf]  ;;  %v12918_v6 = vld [vmem:[#allocation16 + $0xa10] sm:$0xf0] }
 0x688   :  { %9023 = vmatpush.bf16.msrb.mxu0 %v13017_v16  ;;  %9036 = vmatpush.bf16.msrb.mxu1 %v13145_v32  ;;  %v13318_v16 = vld [vmem:[#allocation16 + $0xd30] sm:$0xf0]  ;;  %v13097_v32 = vor.u32 %v14838_v63, %v13094_v21  ;;  %v13801_v26 = vor.u32 %v15014_v35, %v13798_v57  ;;  %v14794_v30 = vld [vmem:[#allocation16 + $0xa04] sm:$0xf] }
 0x689   :  { %v13321_v39 = vor.u32 %v14894_v24, %v13318_v16  ;;  %v13910_v63 = vld [vmem:[#allocation16 + $0x11d0] sm:$0xf0]  ;;  %v8812_v24 = vpop.f32.mrf.mxu3  ;;  %v15006_v58 = vld [vmem:[#allocation16 + $0x10a4] sm:$0xf] }
 0x68a   :  { %9051 = vmatpush.bf16.msra.mxu2 %v13241_v22  ;;  %9064 = vmatpush.bf16.msrb.mxu3 %v13369_v41  ;;  %v12950_v22 = vld [vmem:[#allocation16 + $0xa50] sm:$0xf0]  ;;  %v8785_v41 = vadd.f32 %v8784_v62, %v8772_v56  ;;  %v14826_v62 = vld [vmem:[#allocation16 + $0xb04] sm:$0xf]  ;;  %v13769_v35 = vor.u32 %v15006_v58, %v13766_v12 }
 0x68b   :  { %v12953_v3 = vor.u32 %v14802_v27, %v12950_v22  ;;  %v13046_v16 = vld [vmem:[#allocation16 + $0xb10] sm:$0xf0]  ;;  %v14950_v56 = vld [vmem:[#allocation16 + $0xee4] sm:$0xf] }
 0x68c   :  { %9024 = vmatpush.bf16.msrb.mxu0 %v13001_v59  ;;  %9037 = vmatpush.bf16.msrb.mxu1 %v13129_v5  ;;  %v13302_v59 = vld [vmem:[#allocation16 + $0xd10] sm:$0xf0]  ;;  %v8798_v5 = vadd.f32 %v8797_v17, %v8785_v41  ;;  %v13049_v61 = vor.u32 %v14826_v62, %v13046_v16  ;;  %v14978_v57 = vld [vmem:[#allocation16 + $0xfc4] sm:$0xf] }
 0x68d   :  { %v13542_v17 = vld [vmem:[#allocation16 + $0xef0] sm:$0xf0] }
 0x68e   :  { %9052 = vmatpush.bf16.msra.mxu2 %v13225_v37  ;;  %9065 = vmatpush.bf16.msrb.mxu3 %v13353_v20  ;;  %v14798_v37 = vld [vmem:[#allocation16 + $0xa24] sm:$0xf]  ;;  %v16193_v19 = vadd.f32 %v8810_v8, %v8798_v5  ;;  %v8773_v21 = vpop.f32.mrf.mxu0  ;;  %v13670_v27 = vld [vmem:[#allocation16 + $0xff0] sm:$0xf0]  ;;  %v13545_v41 = vor.u32 %v14950_v56, %v13542_v17 }
 0x68f   :  { %v14830_v20 = vld [vmem:[#allocation16 + $0xb24] sm:$0xf]  ;;  %v12937_v1 = vor.u32 %v14798_v37, %v12934_v53  ;;  %v13894_v36 = vld [vmem:[#allocation16 + $0x11b0] sm:$0xf0] }
 0x690   :  { %9025 = vmatpush.bf16.msrb.mxu0 %v12985_v47  ;;  %9038 = vmatpush.bf16.msrb.mxu1 %v13113_v14  ;;  %v13305_v47 = vor.u32 %v14890_v18, %v13302_v59  ;;  %v13929_v14 = vor.u32 %v15046_v7, %v13926_v50  ;;  %v13065_v4 = vor.u32 %v14830_v20, %v13062_v33  ;;  %v14982_v8 = vld [vmem:[#allocation16 + $0xfe4] sm:$0xf]  ;;  %v13654_v7 = vld [vmem:[#allocation16 + $0xfd0] sm:$0xf0] }
 0x691   :  { %v13673_v18 = vor.u32 %v14982_v8, %v13670_v27  ;;  %v14946_v59 = vld [vmem:[#allocation16 + $0xec4] sm:$0xf]  ;;  %v13750_v50 = vld [vmem:[#allocation16 + $0x1090] sm:$0xf0]  ;;  %v13657_v20 = vor.u32 %v14978_v57, %v13654_v7 }
 0x692   :  { %9053 = vmatpush.bf16.msra.mxu2 %v13209_v40  ;;  %9066 = vmatpush.bf16.msrb.mxu3 %v13337_v54  ;;  %v15042_v40 = vld [vmem:[#allocation16 + $0x11c4] sm:$0xf]  ;;  %v8786_v54 = vpop.f32.mrf.mxu1  ;;  %v13622_v24 = vld [vmem:[#allocation16 + $0xf90] sm:$0xf0] }
 0x693   :  { %v13913_v22 = vor.u32 %v15042_v40, %v13910_v63  ;;  %v15034_v53 = vld [vmem:[#allocation16 + $0x1184] sm:$0xf]  ;;  %v13734_v40 = vld [vmem:[#allocation16 + $0x1070] sm:$0xf0] }
 0x694   :  { %9026 = vmatpush.bf16.msrb.mxu0 %v12969_v46  ;;  %9039 = vmatpush.bf16.msrb.mxu1 %v13097_v32  ;;  %v8799_v46 = vpop.f32.mrf.mxu2  ;;  %v13785_v32 = vor.u32 %v15010_v11, %v13782_v34  ;;  %v14942_v33 = vld [vmem:[#allocation16 + $0xea4] sm:$0xf]  ;;  %v13862_v54 = vld [vmem:[#allocation16 + $0x1170] sm:$0xf0] }
 0x695   :  { %v14974_v11 = vld [vmem:[#allocation16 + $0xfa4] sm:$0xf]  ;;  %v13718_v17 = vld [vmem:[#allocation16 + $0x1050] sm:$0xf0] }
 0x696   :  { %9054 = vmatpush.bf16.msra.mxu2 %v13193_v28  ;;  %9067 = vmatpush.bf16.msrb.mxu3 %v13321_v39  ;;  %v12921_v28 = vor.u32 %v14794_v30, %v12918_v6  ;;  %v15038_v39 = vld [vmem:[#allocation16 + $0x11a4] sm:$0xf]  ;;  %v13494_v6 = vld [vmem:[#allocation16 + $0xe90] sm:$0xf0] }
 0x697   :  { %v13897_v5 = vor.u32 %v15038_v39, %v13894_v36  ;;  %v14998_v34 = vld [vmem:[#allocation16 + $0x1064] sm:$0xf]  ;;  %v13846_v27 = vld [vmem:[#allocation16 + $0x1150] sm:$0xf0] }
 0x698   :  { %9027 = vmatpush.bf16.msrb.mxu0 %v12953_v3  ;;  %9040 = vmatpush.bf16.msrb.mxu1 %v13081_v23  ;;  %v13526_v3 = vld [vmem:[#allocation16 + $0xed0] sm:$0xf0]  ;;  %v15002_v23 = vld [vmem:[#allocation16 + $0x1084] sm:$0xf]  ;;  %v13737_v62 = vor.u32 %v14998_v34, %v13734_v40 }
 0x699   :  { %v13529_v37 = vor.u32 %v14946_v59, %v13526_v3  ;;  %v15030_v21 = vld [vmem:[#allocation16 + $0x1164] sm:$0xf]  ;;  %v13478_v58 = vld [vmem:[#allocation16 + $0xe70] sm:$0xf0] }
 0x69a   :  { %9055 = vmatpush.bf16.msra.mxu2 %v13177_v25  ;;  %9068 = vmatpush.bf16.msrb.mxu3 %v13305_v47  ;;  %v13878_v25 = vld [vmem:[#allocation16 + $0x1190] sm:$0xf0]  ;;  %v14938_v30 = vld [vmem:[#allocation16 + $0xe84] sm:$0xf]  ;;  %v13865_v16 = vor.u32 %v15030_v21, %v13862_v54  ;;  %v12012_v21 = vld [vmem:[#allocation16 + $0x2e8] sm:$0xf] }
 0x69b   :  { %v13510_v47 = vld [vmem:[#allocation16 + $0xeb0] sm:$0xf0]  ;;  %v14970_v46 = vld [vmem:[#allocation16 + $0xf84] sm:$0xf]  ;;  %v14569_v54 = vld [vmem:[#allocation16 + $0x2f4] sm:$0xf0] }
 0x69c   :  { %9028 = vmatpush.bf16.msrb.mxu0 %v12937_v1  ;;  %9041 = vmatpush.bf16.msrb.mxu1 %v13065_v4  ;;  %v13881_v1 = vor.u32 %v15034_v53, %v13878_v25  ;;  %v13513_v63 = vor.u32 %v14942_v33, %v13510_v47  ;;  %v14994_v56 = vld [vmem:[#allocation16 + $0x1044] sm:$0xf]  ;;  %v13702_v3 = vld [vmem:[#allocation16 + $0x1030] sm:$0xf0] }
 0x69d   :  { %9056 = vmatmul.bf16.vlgmr.msra.gmra.mxu2 %v16164_v49  ;;  %9069 = vmatmul.bf16.vlgmr.msrb.gmra.mxu3 %v16168_v55  ;;  %v15026_v8 = vld [vmem:[#allocation16 + $0x1144] sm:$0xf]  ;;  %v13721_v12 = vor.u32 %v14994_v56, %v13718_v17  ;;  %v13462_v25 = vld [vmem:[#allocation16 + $0xe50] sm:$0xf0] }
 0x69e   :  { %9100 = vmatpush.bf16.msrb.mxu2 %v13801_v26  ;;  %9113 = vmatpush.bf16.msra.mxu3 %v13929_v14  ;;  %v13753_v26 = vor.u32 %v15002_v23, %v13750_v50  ;;  %v13638_v14 = vld [vmem:[#allocation16 + $0xfb0] sm:$0xf0]  ;;  %v13849_v36 = vor.u32 %v15026_v8, %v13846_v27  ;;  %v14990_v59 = vld [vmem:[#allocation16 + $0x1024] sm:$0xf]  ;;  %v12013_v8 = vor.u32 %v14569_v54, %v12012_v21  ;;  %v11996_v27 = vld [vmem:[#allocation16 + $0x2c8] sm:$0xf] }
 0x69f   :  { %v13641_v4 = vor.u32 %v14974_v11, %v13638_v14  ;;  %v15022_v23 = vld [vmem:[#allocation16 + $0x1124] sm:$0xf]  ;;  %v13830_v50 = vld [vmem:[#allocation16 + $0x1130] sm:$0xf0]  ;;  %v13705_v33 = vor.u32 %v14990_v59, %v13702_v3  ;;  %v11868_v21 = vld [vmem:[#allocation16 + $0x1c8] sm:$0xf] }
 0x6a0   :  { %9029 = vmatpush.bf16.msrb.mxu0 %v12921_v28  ;;  %9042 = vmatpush.bf16.msrb.mxu1 %v13049_v61  ;;  %v14934_v28 = vld [vmem:[#allocation16 + $0xe64] sm:$0xf]  ;;  %v8823_v39 = vpop.f32.mrf.mxu0  ;;  %v8836_v57 = vpop.f32.mrf.mxu1  ;;  %v13833_v14 = vor.u32 %v15022_v23, %v13830_v50  ;;  %v13814_v34 = vld [vmem:[#allocation16 + $0x1110] sm:$0xf0]  ;;  %v14505_v23 = vld [vmem:[#allocation16 + $0xf4] sm:$0xf0] }
 0x6a1   :  { %v14966_v61 = vld [vmem:[#allocation16 + $0xf64] sm:$0xf]  ;;  %v13481_v7 = vor.u32 %v14934_v28, %v13478_v58  ;;  %v13574_v17 = vld [vmem:[#allocation16 + $0xf30] sm:$0xf0]  ;;  %v14533_v54 = vld [vmem:[#allocation16 + $0x1d4] sm:$0xf0] }
 0x6a2   :  { %9101 = vmatpush.bf16.msrb.mxu2 %v13785_v32  ;;  %9114 = vmatpush.bf16.msra.mxu3 %v13913_v22  ;;  %v13497_v32 = vor.u32 %v14938_v30, %v13494_v6  ;;  %v13625_v22 = vor.u32 %v14970_v46, %v13622_v24  ;;  %v14930_v53 = vld [vmem:[#allocation16 + $0xe44] sm:$0xf]  ;;  %v14601_v6 = vld [vmem:[#allocation16 + $0x3f4] sm:$0xf0]  ;;  %v13446_v46 = vld [vmem:[#allocation16 + $0xe30] sm:$0xf0] }
 0x6a3   :  { %9030 = vmatmul.bf16.vlgmr.msrb.gmra.mxu0 %v16141_v42  ;;  %9043 = vmatmul.bf16.vlgmr.msrb.gmra.mxu1 %v16143_v44  ;;  %v14962_v47 = vld [vmem:[#allocation16 + $0xf44] sm:$0xf] }
 0x6a4   :  { %9074 = vmatpush.bf16.msra.mxu0 %v13545_v41  ;;  %9087 = vmatpush.bf16.msra.mxu1 %v13673_v18  ;;  %v13606_v41 = vld [vmem:[#allocation16 + $0xf70] sm:$0xf0]  ;;  %v8849_v18 = vpop.f32.mrf.mxu2  ;;  %v14986_v11 = vld [vmem:[#allocation16 + $0x1004] sm:$0xf] }
 0x6a5   :  { %v14958_v56 = vld [vmem:[#allocation16 + $0xf24] sm:$0xf] }
 0x6a6   :  { %9102 = vmatpush.bf16.msrb.mxu2 %v13769_v35  ;;  %9115 = vmatpush.bf16.msra.mxu3 %v13897_v5  ;;  %v8824_v35 = vadd.f32 %v8823_v39, %v16193_v19  ;;  %v8862_v5 = vpop.f32.mrf.mxu3  ;;  %v15018_v19 = vld [vmem:[#allocation16 + $0x1104] sm:$0xf]  ;;  %v14597_v39 = vld [vmem:[#allocation16 + $0x3d4] sm:$0xf0]  ;;  %v13577_v59 = vor.u32 %v14958_v56, %v13574_v17  ;;  %v11869_v56 = vor.u32 %v14533_v54, %v11868_v21  ;;  %v11724_v17 = vld [vmem:[#allocation16 + $0xa8] sm:$0xf] }
 0x6a7   :  { %v14922_v3 = vld [vmem:[#allocation16 + $0xe04] sm:$0xf] }
 0x6a8   :  { %9075 = vmatpush.bf16.msra.mxu0 %v13529_v37  ;;  %9088 = vmatpush.bf16.msra.mxu1 %v13657_v20  ;;  %v13609_v37 = vor.u32 %v14966_v61, %v13606_v41  ;;  %v8837_v20 = vadd.f32 %v8836_v57, %v8824_v35  ;;  %v14565_v61 = vld [vmem:[#allocation16 + $0x2d4] sm:$0xf0]  ;;  %v12124_v41 = vld [vmem:[#allocation16 + $0x3c8] sm:$0xf]  ;;  %v13430_v35 = vld [vmem:[#allocation16 + $0xe10] sm:$0xf0] }
 0x6a9   :  { %v14954_v57 = vld [vmem:[#allocation16 + $0xf04] sm:$0xf]  ;;  %v11997_v50 = vor.u32 %v14565_v61, %v11996_v27  ;;  %v11852_v27 = vld [vmem:[#allocation16 + $0x1a8] sm:$0xf] }
 0x6aa   :  { %9103 = vmatpush.bf16.msrb.mxu2 %v13753_v26  ;;  %9116 = vmatpush.bf16.msra.mxu3 %v13881_v1  ;;  %v13590_v26 = vld [vmem:[#allocation16 + $0xf50] sm:$0xf0]  ;;  %v8850_v40 = vadd.f32 %v8849_v18, %v8837_v20  ;;  %v13433_v20 = vor.u32 %v14922_v3, %v13430_v35  ;;  %v11836_v35 = vld [vmem:[#allocation16 + $0x188] sm:$0xf] }
 0x6ab   :  { %v13686_v1 = vld [vmem:[#allocation16 + $0x1010] sm:$0xf0]  ;;  %v13593_v30 = vor.u32 %v14962_v47, %v13590_v26  ;;  %v14561_v47 = vld [vmem:[#allocation16 + $0x2b4] sm:$0xf0] }
 0x6ac   :  { %9076 = vmatpush.bf16.msra.mxu0 %v13513_v63  ;;  %9089 = vmatpush.bf16.msra.mxu1 %v13641_v4  ;;  %v13465_v63 = vor.u32 %v14930_v53, %v13462_v25  ;;  %v12140_v4 = vld [vmem:[#allocation16 + $0x3e8] sm:$0xf]  ;;  %v16200_v24 = vadd.f32 %v8862_v5, %v8850_v40  ;;  %v8851_v28 = vpop.f32.mrf.mxu2  ;;  %v14537_v53 = vld [vmem:[#allocation16 + $0x1f4] sm:$0xf0]  ;;  %v12125_v25 = vor.u32 %v14597_v39, %v12124_v41 }
 0x6ad   :  { %v12141_v58 = vor.u32 %v14601_v6, %v12140_v4  ;;  %v11756_v5 = vld [vmem:[#allocation16 + $0xe8] sm:$0xf]  ;;  %v14501_v40 = vld [vmem:[#allocation16 + $0xd4] sm:$0xf0] }
 0x6ae   :  { %9104 = vmatpush.bf16.msrb.mxu2 %v13737_v62  ;;  %9117 = vmatpush.bf16.msra.mxu3 %v13865_v16  ;;  %v14926_v62 = vld [vmem:[#allocation16 + $0xe24] sm:$0xf]  ;;  %v13689_v16 = vor.u32 %v14986_v11, %v13686_v1  ;;  %v8864_v18 = vpop.f32.mrf.mxu3  ;;  %v11757_v11 = vor.u32 %v14505_v23, %v11756_v5  ;;  %v14593_v1 = vld [vmem:[#allocation16 + $0x3b4] sm:$0xf0]  ;;  %v12076_v41 = vld [vmem:[#allocation16 + $0x368] sm:$0xf] }
 0x6af   :  { %v14557_v6 = vld [vmem:[#allocation16 + $0x294] sm:$0xf0]  ;;  %v11708_v18 = vld [vmem:[#allocation16 + $0x88] sm:$0xf] }
 0x6b0   :  { %9077 = vmatpush.bf16.msra.mxu0 %v13497_v32  ;;  %9090 = vmatpush.bf16.msra.mxu1 %v13625_v22  ;;  %v13817_v32 = vor.u32 %v15018_v19, %v13814_v34  ;;  %v8825_v22 = vpop.f32.mrf.mxu0  ;;  %v11740_v34 = vld [vmem:[#allocation16 + $0xc8] sm:$0xf]  ;;  %v14585_v39 = vld [vmem:[#allocation16 + $0x374] sm:$0xf0] }
 0x6b1   :  { %v14529_v22 = vld [vmem:[#allocation16 + $0x1b4] sm:$0xf0]  ;;  %v11932_v5 = vld [vmem:[#allocation16 + $0x248] sm:$0xf] }
 0x6b2   :  { %9105 = vmatpush.bf16.msrb.mxu2 %v13721_v12  ;;  %9118 = vmatpush.bf16.msra.mxu3 %v13849_v36  ;;  %v13449_v12 = vor.u32 %v14926_v62, %v13446_v46  ;;  %v8838_v36 = vpop.f32.mrf.mxu1  ;;  %v11741_v62 = vor.u32 %v14501_v40, %v11740_v34  ;;  %v12092_v46 = vld [vmem:[#allocation16 + $0x388] sm:$0xf]  ;;  %v14549_v23 = vld [vmem:[#allocation16 + $0x254] sm:$0xf0] }
 0x6b3   :  { %v11853_v36 = vor.u32 %v14529_v22, %v11852_v27  ;;  %v11916_v40 = vld [vmem:[#allocation16 + $0x228] sm:$0xf]  ;;  %v14517_v22 = vld [vmem:[#allocation16 + $0x154] sm:$0xf0] }
 0x6b4   :  { %9078 = vmatpush.bf16.msra.mxu0 %v13481_v7  ;;  %9091 = vmatpush.bf16.msra.mxu1 %v13609_v37  ;;  %v13558_v7 = vld [vmem:[#allocation16 + $0xf10] sm:$0xf0]  ;;  %v11884_v37 = vld [vmem:[#allocation16 + $0x1e8] sm:$0xf] }
 0x6b5   :  { %v13561_v26 = vor.u32 %v14954_v57, %v13558_v7  ;;  %v11885_v19 = vor.u32 %v14537_v53, %v11884_v37  ;;  %v14525_v57 = vld [vmem:[#allocation16 + $0x194] sm:$0xf0]  ;;  %v12077_v7 = vor.u32 %v14585_v39, %v12076_v41  ;;  %v12060_v53 = vld [vmem:[#allocation16 + $0x348] sm:$0xf] }
 0x6b6   :  { %9106 = vmatpush.bf16.msrb.mxu2 %v13705_v33  ;;  %9119 = vmatpush.bf16.msra.mxu3 %v13833_v14  ;;  %v11980_v33 = vld [vmem:[#allocation16 + $0x2a8] sm:$0xf] }
 0x6b7   :  { %v12108_v14 = vld [vmem:[#allocation16 + $0x3a8] sm:$0xf] }
 0x6b8   :  { %9079 = vmatpush.bf16.msra.mxu0 %v13465_v63  ;;  %9092 = vmatpush.bf16.msra.mxu1 %v13593_v30  ;;  %v11981_v63 = vor.u32 %v14561_v47, %v11980_v33  ;;  %v12109_v4 = vor.u32 %v14593_v1, %v12108_v14  ;;  %v11964_v30 = vld [vmem:[#allocation16 + $0x288] sm:$0xf]  ;;  %v14489_v47 = vld [vmem:[#allocation16 + $0x74] sm:$0xf0] }
 0x6b9   :  { %v11692_v33 = vld [vmem:[#allocation16 + $0x68] sm:$0xf]  ;;  %v14521_v14 = vld [vmem:[#allocation16 + $0x174] sm:$0xf0] }
 0x6ba   :  { %9107 = vmatpush.bf16.msrb.mxu2 %v13689_v16  ;;  %9120 = vmatpush.bf16.msra.mxu3 %v13817_v32  ;;  %v14589_v16 = vld [vmem:[#allocation16 + $0x394] sm:$0xf0]  ;;  %v11804_v27 = vld [vmem:[#allocation16 + $0x148] sm:$0xf] }
 0x6bb   :  { %v14497_v32 = vld [vmem:[#allocation16 + $0xb4] sm:$0xf0]  ;;  %v12093_v28 = vor.u32 %v14589_v16, %v12092_v46  ;;  %v11676_v16 = vld [vmem:[#allocation16 + $0x48] sm:$0xf] }
 0x6bc   :  { %9080 = vmatpush.bf16.msra.mxu0 %v13449_v12  ;;  %9093 = vmatpush.bf16.msra.mxu1 %v13577_v59  ;;  %v14553_v12 = vld [vmem:[#allocation16 + $0x274] sm:$0xf0]  ;;  %v11725_v61 = vor.u32 %v14497_v32, %v11724_v17  ;;  %v12524_v39 = vld [vmem:[#allocation16 + $0x6e8] sm:$0xf] }
 0x6bd   :  { %9108 = vmatmul.bf16.vlgmr.msrb.gmra.mxu2 %v16176_v45  ;;  %9121 = vmatmul.bf16.vlgmr.msra.gmra.mxu3 %v16178_v38  ;;  %v14493_v59 = vld [vmem:[#allocation16 + $0x94] sm:$0xf0] }
 0x6be   :  { %9152 = vmatpush.bf16.msra.mxu2 %v12013_v8  ;;  %9165 = vmatpush.bf16.msrb.mxu3 %v12141_v58  ;;  %v11965_v8 = vor.u32 %v14557_v6, %v11964_v30  ;;  %v11948_v58 = vld [vmem:[#allocation16 + $0x268] sm:$0xf]  ;;  %v11709_v37 = vor.u32 %v14493_v59, %v11708_v18  ;;  %v11693_v30 = vor.u32 %v14489_v47, %v11692_v33 }
 0x6bf   :  { %v11949_v3 = vor.u32 %v14553_v12, %v11948_v58  ;;  %v12044_v6 = vld [vmem:[#allocation16 + $0x328] sm:$0xf]  ;;  %v14541_v58 = vld [vmem:[#allocation16 + $0x214] sm:$0xf0]  ;;  %v11805_v59 = vor.u32 %v14517_v22, %v11804_v27 }
 0x6c0   :  { %9081 = vmatpush.bf16.msra.mxu0 %v13433_v20  ;;  %9094 = vmatpush.bf16.msra.mxu1 %v13561_v26  ;;  %v11837_v20 = vor.u32 %v14525_v57, %v11836_v35  ;;  %v11933_v26 = vor.u32 %v14549_v23, %v11932_v5  ;;  %v8875_v1 = vpop.f32.mrf.mxu0  ;;  %v8914_v54 = vpop.f32.mrf.mxu3  ;;  %v12028_v12 = vld [vmem:[#allocation16 + $0x308] sm:$0xf]  ;;  %v14481_v57 = vld [vmem:[#allocation16 + $0x34] sm:$0xf0] }
 0x6c1   :  { %v8876_v21 = vadd.f32 %v8875_v1, %v16200_v24  ;;  %v11900_v24 = vld [vmem:[#allocation16 + $0x208] sm:$0xf]  ;;  %v14513_v23 = vld [vmem:[#allocation16 + $0x134] sm:$0xf0] }
 0x6c2   :  { %9153 = vmatpush.bf16.msra.mxu2 %v11997_v50  ;;  %9166 = vmatpush.bf16.msrb.mxu3 %v12125_v25  ;;  %v5708_v50 = vperm.slane %v16185_v43, 1  ;;  %v14581_v25 = vld [vmem:[#allocation16 + $0x354] sm:$0xf0]  ;;  %v12652_v18 = vld [vmem:[#allocation16 + $0x7e8] sm:$0xf] }
 0x6c3   :  { %9082 = vmatmul.bf16.vlgmr.msra.gmra.mxu0 %v16156_v13  ;;  %9095 = vmatmul.bf16.vlgmr.msra.gmra.mxu1 %v16158_v51  ;;  %v12061_v34 = vor.u32 %v14581_v25, %v12060_v53  ;;  %v11660_v35 = vld [vmem:[#allocation16 + $0x28] sm:$0xf]  ;;  %v14725_v1 = vld [vmem:[#allocation16 + $0x7d4] sm:$0xf0] }
 0x6c4   :  { %9126 = vmatpush.bf16.msrb.mxu0 %v11757_v11  ;;  %9139 = vmatpush.bf16.msrb.mxu1 %v11885_v19  ;;  %v11820_v11 = vld [vmem:[#allocation16 + $0x168] sm:$0xf]  ;;  %v8901_v19 = vpop.f32.mrf.mxu2 }
 0x6c5   :  { %v8902_v43 = vadd.f32 %v8901_v19, %v5708_v50  ;;  %v11821_v46 = vor.u32 %v14521_v14, %v11820_v11  ;;  %v11788_v5 = vld [vmem:[#allocation16 + $0x128] sm:$0xf]  ;;  %v14693_v11 = vld [vmem:[#allocation16 + $0x6d4] sm:$0xf0] }
 0x6c6   :  { %9154 = vmatpush.bf16.msra.mxu2 %v11981_v63  ;;  %9167 = vmatpush.bf16.msrb.mxu3 %v12109_v4  ;;  %v14545_v63 = vld [vmem:[#allocation16 + $0x234] sm:$0xf0]  ;;  %v8888_v4 = vpop.f32.mrf.mxu1  ;;  %v12508_v25 = vld [vmem:[#allocation16 + $0x6c8] sm:$0xf] }
 0x6c7   :  { %v16208_v17 = vadd.f32 %v8914_v54, %v8902_v43  ;;  %v16210_v32 = vadd.f32 %v8888_v4, %v8876_v21  ;;  %v12636_v14 = vld [vmem:[#allocation16 + $0x7c8] sm:$0xf]  ;;  %v14509_v43 = vld [vmem:[#allocation16 + $0x114] sm:$0xf0] }
 0x6c8   :  { %9127 = vmatpush.bf16.msrb.mxu0 %v11741_v62  ;;  %9140 = vmatpush.bf16.msrb.mxu1 %v11869_v56  ;;  %v14577_v62 = vld [vmem:[#allocation16 + $0x334] sm:$0xf0]  ;;  %v8916_v33 = vpop.f32.mrf.mxu3  ;;  %v11772_v21 = vld [vmem:[#allocation16 + $0x108] sm:$0xf] }
 0x6c9   :  { %v14485_v56 = vld [vmem:[#allocation16 + $0x54] sm:$0xf0]  ;;  %v12268_v54 = vld [vmem:[#allocation16 + $0x4e8] sm:$0xf]  ;;  %v11773_v27 = vor.u32 %v14509_v43, %v11772_v21 }
 0x6ca   :  { %9155 = vmatpush.bf16.msra.mxu2 %v11965_v8  ;;  %9168 = vmatpush.bf16.msrb.mxu3 %v12093_v28  ;;  %v11917_v8 = vor.u32 %v14545_v63, %v11916_v40  ;;  %v12045_v28 = vor.u32 %v14577_v62, %v12044_v6  ;;  %v11677_v41 = vor.u32 %v14485_v56, %v11676_v16  ;;  %v11644_v40 = vld [vmem:[#allocation16 + $0x8] sm:$0xf]  ;;  %v14477_v63 = vld [vmem:[#allocation16 + $0x14] sm:$0xf0] }
 0x6cb   :  { %v14633_v4 = vld [vmem:[#allocation16 + $0x4f4] sm:$0xf0]  ;;  %v12396_v6 = vld [vmem:[#allocation16 + $0x5e8] sm:$0xf]  ;;  %v11645_v16 = vor.u32 %v14477_v63, %v11644_v40 }
 0x6cc   :  { %9128 = vmatpush.bf16.msrb.mxu0 %v11725_v61  ;;  %9141 = vmatpush.bf16.msrb.mxu1 %v11853_v36  ;;  %v14573_v61 = vld [vmem:[#allocation16 + $0x314] sm:$0xf0]  ;;  %v8903_v50 = vpop.f32.mrf.mxu2  ;;  %v12492_v56 = vld [vmem:[#allocation16 + $0x6a8] sm:$0xf]  ;;  %v12269_v22 = vor.u32 %v14633_v4, %v12268_v54 }
 0x6cd   :  { %v14697_v36 = vld [vmem:[#allocation16 + $0x6f4] sm:$0xf0]  ;;  %v12460_v33 = vld [vmem:[#allocation16 + $0x668] sm:$0xf] }
 0x6ce   :  { %9156 = vmatpush.bf16.msra.mxu2 %v11949_v3  ;;  %9169 = vmatpush.bf16.msrb.mxu3 %v12077_v7  ;;  %v14729_v3 = vld [vmem:[#allocation16 + $0x7f4] sm:$0xf0]  ;;  %v11901_v7 = vor.u32 %v14541_v58, %v11900_v24  ;;  %v12525_v53 = vor.u32 %v14697_v36, %v12524_v39  ;;  %v8890_v19 = vpop.f32.mrf.mxu1  ;;  %v12620_v24 = vld [vmem:[#allocation16 + $0x7a8] sm:$0xf] }
 0x6cf   :  { %v12653_v47 = vor.u32 %v14729_v3, %v12652_v18  ;;  %v14665_v62 = vld [vmem:[#allocation16 + $0x5f4] sm:$0xf0]  ;;  %v12380_v39 = vld [vmem:[#allocation16 + $0x5c8] sm:$0xf] }
 0x6d0   :  { %9129 = vmatpush.bf16.msrb.mxu0 %v11709_v37  ;;  %9142 = vmatpush.bf16.msrb.mxu1 %v11837_v20  ;;  %v12029_v37 = vor.u32 %v14573_v61, %v12028_v12  ;;  %v8877_v20 = vpop.f32.mrf.mxu0  ;;  %v12397_v58 = vor.u32 %v14665_v62, %v12396_v6  ;;  %v12252_v12 = vld [vmem:[#allocation16 + $0x4c8] sm:$0xf]  ;;  %v14629_v61 = vld [vmem:[#allocation16 + $0x4d4] sm:$0xf0] }
 0x6d1   :  { %v14661_v36 = vld [vmem:[#allocation16 + $0x5d4] sm:$0xf0]  ;;  %v12220_v19 = vld [vmem:[#allocation16 + $0x488] sm:$0xf] }
 0x6d2   :  { %9157 = vmatpush.bf16.msra.mxu2 %v11933_v26  ;;  %9170 = vmatpush.bf16.msrb.mxu3 %v12061_v34  ;;  %v11661_v26 = vor.u32 %v14481_v57, %v11660_v35  ;;  %v11789_v34 = vor.u32 %v14513_v23, %v11788_v5  ;;  %v14685_v3 = vld [vmem:[#allocation16 + $0x694] sm:$0xf0]  ;;  %v12253_v35 = vor.u32 %v14629_v61, %v12252_v12  ;;  %v12604_v57 = vld [vmem:[#allocation16 + $0x788] sm:$0xf] }
 0x6d3   :  { %v12381_v5 = vor.u32 %v14661_v36, %v12380_v39  ;;  %v12236_v23 = vld [vmem:[#allocation16 + $0x4a8] sm:$0xf]  ;;  %v14625_v50 = vld [vmem:[#allocation16 + $0x4b4] sm:$0xf0] }
 0x6d4   :  { %9130 = vmatpush.bf16.msrb.mxu0 %v11693_v30  ;;  %9143 = vmatpush.bf16.msrb.mxu1 %v11821_v46  ;;  %v12509_v30 = vor.u32 %v14693_v11, %v12508_v25  ;;  %v12637_v46 = vor.u32 %v14725_v1, %v12636_v14  ;;  %v14657_v25 = vld [vmem:[#allocation16 + $0x5b4] sm:$0xf0]  ;;  %v12588_v11 = vld [vmem:[#allocation16 + $0x768] sm:$0xf] }
 0x6d5   :  { %v14713_v14 = vld [vmem:[#allocation16 + $0x774] sm:$0xf0]  ;;  %v12348_v63 = vld [vmem:[#allocation16 + $0x588] sm:$0xf] }
 0x6d6   :  { %9158 = vmatpush.bf16.msra.mxu2 %v11917_v8  ;;  %9171 = vmatpush.bf16.msrb.mxu3 %v12045_v28  ;;  %v14689_v8 = vld [vmem:[#allocation16 + $0x6b4] sm:$0xf0]  ;;  %v12589_v43 = vor.u32 %v14713_v14, %v12588_v11  ;;  %v12444_v54 = vld [vmem:[#allocation16 + $0x648] sm:$0xf] }
 0x6d7   :  { %v14721_v28 = vld [vmem:[#allocation16 + $0x7b4] sm:$0xf0]  ;;  %v12572_v6 = vld [vmem:[#allocation16 + $0x748] sm:$0xf] }
 0x6d8   :  { %9131 = vmatpush.bf16.msrb.mxu0 %v11677_v41  ;;  %9144 = vmatpush.bf16.msrb.mxu1 %v11805_v59  ;;  %v12493_v41 = vor.u32 %v14689_v8, %v12492_v56  ;;  %v12621_v18 = vor.u32 %v14721_v28, %v12620_v24  ;;  %v12476_v59 = vld [vmem:[#allocation16 + $0x688] sm:$0xf]  ;;  %v14653_v21 = vld [vmem:[#allocation16 + $0x594] sm:$0xf0] }
 0x6d9   :  { %v14677_v4 = vld [vmem:[#allocation16 + $0x654] sm:$0xf0]  ;;  %v12428_v12 = vld [vmem:[#allocation16 + $0x628] sm:$0xf] }
 0x6da   :  { %9159 = vmatpush.bf16.msra.mxu2 %v11901_v7  ;;  %9172 = vmatpush.bf16.msrb.mxu3 %v12029_v37  ;;  %v14717_v7 = vld [vmem:[#allocation16 + $0x794] sm:$0xf0]  ;;  %v12477_v37 = vor.u32 %v14685_v3, %v12476_v59  ;;  %v12445_v8 = vor.u32 %v14677_v4, %v12444_v54  ;;  %v12556_v59 = vld [vmem:[#allocation16 + $0x728] sm:$0xf] }
 0x6db   :  { %v12605_v20 = vor.u32 %v14717_v7, %v12604_v57  ;;  %v14709_v62 = vld [vmem:[#allocation16 + $0x754] sm:$0xf0]  ;;  %v12188_v57 = vld [vmem:[#allocation16 + $0x448] sm:$0xf] }
 0x6dc   :  { %9132 = vmatpush.bf16.msrb.mxu0 %v11661_v26  ;;  %9145 = vmatpush.bf16.msrb.mxu1 %v11789_v34  ;;  %v12237_v26 = vor.u32 %v14625_v50, %v12236_v23  ;;  %v14621_v34 = vld [vmem:[#allocation16 + $0x494] sm:$0xf0]  ;;  %v12316_v50 = vld [vmem:[#allocation16 + $0x548] sm:$0xf] }
 0x6dd   :  { %9160 = vmatmul.bf16.vlgmr.msra.gmra.mxu2 %v16107_v60  ;;  %9173 = vmatmul.bf16.vlgmr.msrb.gmra.mxu3 %v16109_v29  ;;  %v14617_v56 = vld [vmem:[#allocation16 + $0x474] sm:$0xf0]  ;;  %v13036_v11 = vld [vmem:[#allocation16 + $0xae8] sm:$0xf] }
 0x6de   :  { %9204 = vmatpush.bf16.msrb.mxu2 %v12525_v53  ;;  %9217 = vmatpush.bf16.msra.mxu3 %v12653_v47  ;;  %v12364_v53 = vld [vmem:[#allocation16 + $0x5a8] sm:$0xf]  ;;  %v14681_v47 = vld [vmem:[#allocation16 + $0x674] sm:$0xf0] }
 0x6df   :  { %v12365_v1 = vor.u32 %v14657_v25, %v12364_v53  ;;  %v12461_v40 = vor.u32 %v14681_v47, %v12460_v33  ;;  %v14673_v61 = vld [vmem:[#allocation16 + $0x634] sm:$0xf0]  ;;  %v12412_v53 = vld [vmem:[#allocation16 + $0x608] sm:$0xf] }
 0x6e0   :  { %9133 = vmatpush.bf16.msrb.mxu0 %v11645_v16  ;;  %9146 = vmatpush.bf16.msrb.mxu1 %v11773_v27  ;;  %v12204_v16 = vld [vmem:[#allocation16 + $0x468] sm:$0xf]  ;;  %v8927_v24 = vpop.f32.mrf.mxu0  ;;  %v8953_v28 = vpop.f32.mrf.mxu2  ;;  %v14705_v3 = vld [vmem:[#allocation16 + $0x734] sm:$0xf0]  ;;  %v12429_v23 = vor.u32 %v14673_v61, %v12428_v12 }
 0x6e1   :  { %v12332_v27 = vld [vmem:[#allocation16 + $0x568] sm:$0xf]  ;;  %v8940_v39 = vpop.f32.mrf.mxu1  ;;  %v8966_v36 = vpop.f32.mrf.mxu3  ;;  %v14613_v7 = vld [vmem:[#allocation16 + $0x454] sm:$0xf0]  ;;  %v12557_v25 = vor.u32 %v14705_v3, %v12556_v59 }
 0x6e2   :  { %9205 = vmatpush.bf16.msrb.mxu2 %v12509_v30  ;;  %9218 = vmatpush.bf16.msra.mxu3 %v12637_v46  ;;  %v12221_v30 = vor.u32 %v14621_v34, %v12220_v19  ;;  %v12349_v46 = vor.u32 %v14653_v21, %v12348_v63  ;;  %v14701_v33 = vld [vmem:[#allocation16 + $0x714] sm:$0xf0]  ;;  %v12300_v54 = vld [vmem:[#allocation16 + $0x528] sm:$0xf] }
 0x6e3   :  { %9134 = vmatmul.bf16.vlgmr.msrb.gmra.mxu0 %v16116_v9  ;;  %9147 = vmatmul.bf16.vlgmr.msrb.gmra.mxu1 %v16118_v2  ;;  %v14825_v14 = vld [vmem:[#allocation16 + $0xaf4] sm:$0xf0]  ;;  %v12156_v61 = vld [vmem:[#allocation16 + $0x408] sm:$0xf] }
 0x6e4   :  { %9178 = vmatpush.bf16.msra.mxu0 %v12269_v22  ;;  %9191 = vmatpush.bf16.msra.mxu1 %v12397_v58  ;;  %v14649_v22 = vld [vmem:[#allocation16 + $0x574] sm:$0xf0]  ;;  %v12573_v58 = vor.u32 %v14709_v62, %v12572_v6 }
 0x6e5   :  { %v14857_v34 = vld [vmem:[#allocation16 + $0xbf4] sm:$0xf0] }
 0x6e6   :  { %9206 = vmatpush.bf16.msrb.mxu2 %v12493_v41  ;;  %9219 = vmatpush.bf16.msra.mxu3 %v12621_v18  ;;  %v8928_v41 = vadd.f32 %v8927_v24, %v16208_v17  ;;  %v12205_v18 = vor.u32 %v14617_v56, %v12204_v16  ;;  %v12540_v17 = vld [vmem:[#allocation16 + $0x708] sm:$0xf]  ;;  %v14609_v63 = vld [vmem:[#allocation16 + $0x434] sm:$0xf0] }
 0x6e7   :  { %v14641_v4 = vld [vmem:[#allocation16 + $0x534] sm:$0xf0]  ;;  %v12541_v62 = vor.u32 %v14701_v33, %v12540_v17  ;;  %v13020_v16 = vld [vmem:[#allocation16 + $0xac8] sm:$0xf] }
 0x6e8   :  { %9179 = vmatpush.bf16.msra.mxu0 %v12253_v35  ;;  %9192 = vmatpush.bf16.msra.mxu1 %v12381_v5  ;;  %v12333_v35 = vor.u32 %v14649_v22, %v12332_v27  ;;  %v8941_v5 = vadd.f32 %v8940_v39, %v8928_v41  ;;  %v8955_v6 = vpop.f32.mrf.mxu2  ;;  %v14821_v24 = vld [vmem:[#allocation16 + $0xad4] sm:$0xf0]  ;;  %v12301_v12 = vor.u32 %v14641_v4, %v12300_v54  ;;  %v12284_v39 = vld [vmem:[#allocation16 + $0x508] sm:$0xf] }
 0x6e9   :  { %v8942_v56 = vpop.f32.mrf.mxu1  ;;  %v14605_v41 = vld [vmem:[#allocation16 + $0x414] sm:$0xf0]  ;;  %v13021_v3 = vor.u32 %v14821_v24, %v13020_v16  ;;  %v12764_v33 = vld [vmem:[#allocation16 + $0x8c8] sm:$0xf] }
 0x6ea   :  { %9207 = vmatpush.bf16.msrb.mxu2 %v12477_v37  ;;  %9220 = vmatpush.bf16.msra.mxu3 %v12605_v20  ;;  %v14645_v37 = vld [vmem:[#allocation16 + $0x554] sm:$0xf0]  ;;  %v8954_v47 = vadd.f32 %v8953_v28, %v8941_v5  ;;  %v13148_v28 = vld [vmem:[#allocation16 + $0xbc8] sm:$0xf]  ;;  %v12157_v5 = vor.u32 %v14605_v41, %v12156_v61 }
 0x6eb   :  { %v14669_v20 = vld [vmem:[#allocation16 + $0x614] sm:$0xf0]  ;;  %v12317_v19 = vor.u32 %v14645_v37, %v12316_v50  ;;  %v12748_v4 = vld [vmem:[#allocation16 + $0x8a8] sm:$0xf] }
 0x6ec   :  { %9180 = vmatpush.bf16.msra.mxu0 %v12237_v26  ;;  %9193 = vmatpush.bf16.msra.mxu1 %v12365_v1  ;;  %v12189_v26 = vor.u32 %v14613_v7, %v12188_v57  ;;  %v13164_v1 = vld [vmem:[#allocation16 + $0xbe8] sm:$0xf]  ;;  %v16217_v21 = vadd.f32 %v8966_v36, %v8954_v47  ;;  %v14637_v36 = vld [vmem:[#allocation16 + $0x514] sm:$0xf0] }
 0x6ed   :  { %v13165_v27 = vor.u32 %v14857_v34, %v13164_v1  ;;  %v14761_v59 = vld [vmem:[#allocation16 + $0x8f4] sm:$0xf0]  ;;  %v12285_v37 = vor.u32 %v14637_v36, %v12284_v39  ;;  %v12972_v56 = vld [vmem:[#allocation16 + $0xa68] sm:$0xf] }
 0x6ee   :  { %9208 = vmatpush.bf16.msrb.mxu2 %v12461_v40  ;;  %9221 = vmatpush.bf16.msra.mxu3 %v12589_v43  ;;  %v12172_v40 = vld [vmem:[#allocation16 + $0x428] sm:$0xf]  ;;  %v12413_v43 = vor.u32 %v14669_v20, %v12412_v53  ;;  %v14793_v57 = vld [vmem:[#allocation16 + $0x9f4] sm:$0xf0] }
 0x6ef   :  { %v12173_v22 = vor.u32 %v14609_v63, %v12172_v40  ;;  %v14817_v50 = vld [vmem:[#allocation16 + $0xab4] sm:$0xf0]  ;;  %v13116_v63 = vld [vmem:[#allocation16 + $0xb88] sm:$0xf] }
 0x6f0   :  { %9181 = vmatpush.bf16.msra.mxu0 %v12221_v30  ;;  %9194 = vmatpush.bf16.msra.mxu1 %v12349_v46  ;;  %v8929_v30 = vpop.f32.mrf.mxu0  ;;  %v13037_v46 = vor.u32 %v14825_v14, %v13036_v11  ;;  %v14849_v20 = vld [vmem:[#allocation16 + $0xbb4] sm:$0xf0]  ;;  %v12892_v11 = vld [vmem:[#allocation16 + $0x9c8] sm:$0xf] }
 0x6f1   :  { %v14757_v47 = vld [vmem:[#allocation16 + $0x8d4] sm:$0xf0]  ;;  %v12860_v41 = vld [vmem:[#allocation16 + $0x988] sm:$0xf] }
 0x6f2   :  { %9209 = vmatpush.bf16.msrb.mxu2 %v12445_v8  ;;  %9222 = vmatpush.bf16.msra.mxu3 %v12573_v58  ;;  %v8968_v8 = vpop.f32.mrf.mxu3  ;;  %v14853_v58 = vld [vmem:[#allocation16 + $0xbd4] sm:$0xf0]  ;;  %v12765_v40 = vor.u32 %v14757_v47, %v12764_v33  ;;  %v12940_v33 = vld [vmem:[#allocation16 + $0xa28] sm:$0xf] }
 0x6f3   :  { %v13149_v7 = vor.u32 %v14853_v58, %v13148_v28  ;;  %v14789_v14 = vld [vmem:[#allocation16 + $0x9d4] sm:$0xf0]  ;;  %v12732_v58 = vld [vmem:[#allocation16 + $0x888] sm:$0xf] }
 0x6f4   :  { %9182 = vmatpush.bf16.msra.mxu0 %v12205_v18  ;;  %9195 = vmatpush.bf16.msra.mxu1 %v12333_v35  ;;  %v12780_v18 = vld [vmem:[#allocation16 + $0x8e8] sm:$0xf]  ;;  %v14813_v34 = vld [vmem:[#allocation16 + $0xa94] sm:$0xf0]  ;;  %v12893_v54 = vor.u32 %v14789_v14, %v12892_v11 }
 0x6f5   :  { %v12908_v35 = vld [vmem:[#allocation16 + $0x9e8] sm:$0xf]  ;;  %v12781_v53 = vor.u32 %v14761_v59, %v12780_v18  ;;  %v14753_v30 = vld [vmem:[#allocation16 + $0x8b4] sm:$0xf0] }
 0x6f6   :  { %9210 = vmatpush.bf16.msrb.mxu2 %v12429_v23  ;;  %9223 = vmatpush.bf16.msra.mxu3 %v12557_v25  ;;  %v13004_v23 = vld [vmem:[#allocation16 + $0xaa8] sm:$0xf]  ;;  %v12909_v17 = vor.u32 %v14793_v57, %v12908_v35  ;;  %v14809_v8 = vld [vmem:[#allocation16 + $0xa74] sm:$0xf0] }
 0x6f7   :  { %v13132_v25 = vld [vmem:[#allocation16 + $0xba8] sm:$0xf]  ;;  %v14841_v24 = vld [vmem:[#allocation16 + $0xb74] sm:$0xf0]  ;;  %v12973_v61 = vor.u32 %v14809_v8, %v12972_v56 }
 0x6f8   :  { %9183 = vmatpush.bf16.msra.mxu0 %v12189_v26  ;;  %9196 = vmatpush.bf16.msra.mxu1 %v12317_v19  ;;  %v13005_v26 = vor.u32 %v14817_v50, %v13004_v23  ;;  %v13133_v1 = vor.u32 %v14849_v20, %v13132_v25  ;;  %v12988_v19 = vld [vmem:[#allocation16 + $0xa88] sm:$0xf]  ;;  %v14781_v39 = vld [vmem:[#allocation16 + $0x994] sm:$0xf0] }
 0x6f9   :  { %v12989_v6 = vor.u32 %v14813_v34, %v12988_v19  ;;  %v12956_v18 = vld [vmem:[#allocation16 + $0xa48] sm:$0xf]  ;;  %v14805_v59 = vld [vmem:[#allocation16 + $0xa54] sm:$0xf0] }
 0x6fa   :  { %9211 = vmatpush.bf16.msrb.mxu2 %v12413_v43  ;;  %9224 = vmatpush.bf16.msra.mxu3 %v12541_v62  ;;  %v14845_v43 = vld [vmem:[#allocation16 + $0xb94] sm:$0xf0]  ;;  %v12876_v62 = vld [vmem:[#allocation16 + $0x9a8] sm:$0xf]  ;;  %v12957_v50 = vor.u32 %v14805_v59, %v12956_v18 }
 0x6fb   :  { %v13117_v16 = vor.u32 %v14845_v43, %v13116_v63  ;;  %v13084_v35 = vld [vmem:[#allocation16 + $0xb48] sm:$0xf]  ;;  %v14837_v57 = vld [vmem:[#allocation16 + $0xb54] sm:$0xf0] }
 0x6fc   :  { %9184 = vmatpush.bf16.msra.mxu0 %v12173_v22  ;;  %9197 = vmatpush.bf16.msra.mxu1 %v12301_v12  ;;  %v13100_v22 = vld [vmem:[#allocation16 + $0xb68] sm:$0xf]  ;;  %v14749_v12 = vld [vmem:[#allocation16 + $0x894] sm:$0xf0] }
 0x6fd   :  { %9212 = vmatmul.bf16.vlgmr.msrb.gmra.mxu2 %v16123_v0  ;;  %9225 = vmatmul.bf16.vlgmr.msra.gmra.mxu3 %v16125_v10  ;;  %v13101_v36 = vor.u32 %v14841_v24, %v13100_v22  ;;  %v14745_v23 = vld [vmem:[#allocation16 + $0x874] sm:$0xf0]  ;;  %v13068_v19 = vld [vmem:[#allocation16 + $0xb28] sm:$0xf] }
 0x6fe   :  { %9256 = vmatpush.bf16.msra.mxu2 %v13037_v46  ;;  %9269 = vmatpush.bf16.msrb.mxu3 %v13165_v27  ;;  %v14785_v46 = vld [vmem:[#allocation16 + $0x9b4] sm:$0xf0]  ;;  %v12749_v27 = vor.u32 %v14753_v30, %v12748_v4  ;;  %v12700_v63 = vld [vmem:[#allocation16 + $0x848] sm:$0xf] }
 0x6ff   :  { %v12877_v28 = vor.u32 %v14785_v46, %v12876_v62  ;;  %v14801_v47 = vld [vmem:[#allocation16 + $0xa34] sm:$0xf0]  ;;  %v12828_v30 = vld [vmem:[#allocation16 + $0x948] sm:$0xf] }
 0x700   :  { %9185 = vmatpush.bf16.msra.mxu0 %v12157_v5  ;;  %9198 = vmatpush.bf16.msra.mxu1 %v12285_v37  ;;  %v12716_v5 = vld [vmem:[#allocation16 + $0x868] sm:$0xf]  ;;  %v8979_v25 = vpop.f32.mrf.mxu0  ;;  %v9005_v20 = vpop.f32.mrf.mxu2  ;;  %v14833_v34 = vld [vmem:[#allocation16 + $0xb34] sm:$0xf0]  ;;  %v12941_v4 = vor.u32 %v14801_v47, %v12940_v33 }
 0x701   :  { %v12844_v37 = vld [vmem:[#allocation16 + $0x968] sm:$0xf]  ;;  %v8992_v11 = vpop.f32.mrf.mxu1  ;;  %v9018_v14 = vpop.f32.mrf.mxu3  ;;  %v14741_v43 = vld [vmem:[#allocation16 + $0x854] sm:$0xf0]  ;;  %v13069_v46 = vor.u32 %v14833_v34, %v13068_v19 }
 0x702   :  { %9257 = vmatpush.bf16.msra.mxu2 %v13021_v3  ;;  %9270 = vmatpush.bf16.msrb.mxu3 %v13149_v7  ;;  %v12733_v3 = vor.u32 %v14749_v12, %v12732_v58  ;;  %v12861_v7 = vor.u32 %v14781_v39, %v12860_v41  ;;  %v12924_v62 = vld [vmem:[#allocation16 + $0xa08] sm:$0xf]  ;;  %v14829_v56 = vld [vmem:[#allocation16 + $0xb14] sm:$0xf0] }
 0x703   :  { %9186 = vmatmul.bf16.vlgmr.msra.gmra.mxu0 %v16130_v31  ;;  %9199 = vmatmul.bf16.vlgmr.msra.gmra.mxu1 %v16132_v48  ;;  %v13548_v22 = vld [vmem:[#allocation16 + $0xee8] sm:$0xf]  ;;  %v14953_v24 = vld [vmem:[#allocation16 + $0xef4] sm:$0xf0] }
 0x704   :  { %9230 = vmatpush.bf16.msrb.mxu0 %v12781_v53  ;;  %9243 = vmatpush.bf16.msrb.mxu1 %v12909_v17  ;;  %v14777_v53 = vld [vmem:[#allocation16 + $0x974] sm:$0xf0]  ;;  %v13085_v17 = vor.u32 %v14837_v57, %v13084_v35  ;;  %v12812_v18 = vld [vmem:[#allocation16 + $0x928] sm:$0xf] }
 0x705   :  { %v14985_v12 = vld [vmem:[#allocation16 + $0xff4] sm:$0xf0]  ;;  %v12668_v47 = vld [vmem:[#allocation16 + $0x808] sm:$0xf] }
 0x706   :  { %9258 = vmatpush.bf16.msra.mxu2 %v13005_v26  ;;  %9271 = vmatpush.bf16.msrb.mxu3 %v13133_v1  ;;  %v8980_v26 = vadd.f32 %v8979_v25, %v16217_v21  ;;  %v12717_v1 = vor.u32 %v14745_v23, %v12716_v5  ;;  %v13052_v21 = vld [vmem:[#allocation16 + $0xb08] sm:$0xf]  ;;  %v14737_v41 = vld [vmem:[#allocation16 + $0x834] sm:$0xf0] }
 0x707   :  { %v14769_v59 = vld [vmem:[#allocation16 + $0x934] sm:$0xf0]  ;;  %v13053_v57 = vor.u32 %v14829_v56, %v13052_v21  ;;  %v13532_v5 = vld [vmem:[#allocation16 + $0xec8] sm:$0xf] }
 0x708   :  { %9231 = vmatpush.bf16.msrb.mxu0 %v12765_v40  ;;  %9244 = vmatpush.bf16.msrb.mxu1 %v12893_v54  ;;  %v12845_v40 = vor.u32 %v14777_v53, %v12844_v37  ;;  %v8993_v54 = vadd.f32 %v8992_v11, %v8980_v26  ;;  %v9007_v35 = vpop.f32.mrf.mxu2  ;;  %v14949_v25 = vld [vmem:[#allocation16 + $0xed4] sm:$0xf0]  ;;  %v12813_v33 = vor.u32 %v14769_v59, %v12812_v18  ;;  %v12796_v11 = vld [vmem:[#allocation16 + $0x908] sm:$0xf] }
 0x709   :  { %v8994_v23 = vpop.f32.mrf.mxu1  ;;  %v14733_v26 = vld [vmem:[#allocation16 + $0x814] sm:$0xf0]  ;;  %v13533_v34 = vor.u32 %v14949_v25, %v13532_v5  ;;  %v13276_v56 = vld [vmem:[#allocation16 + $0xcc8] sm:$0xf] }
 0x70a   :  { %9259 = vmatpush.bf16.msra.mxu2 %v12989_v6  ;;  %9272 = vmatpush.bf16.msrb.mxu3 %v13117_v16  ;;  %v14773_v6 = vld [vmem:[#allocation16 + $0x954] sm:$0xf0]  ;;  %v9006_v8 = vadd.f32 %v9005_v20, %v8993_v54  ;;  %v13660_v20 = vld [vmem:[#allocation16 + $0xfc8] sm:$0xf]  ;;  %v12669_v54 = vor.u32 %v14733_v26, %v12668_v47 }
 0x70b   :  { %v14797_v16 = vld [vmem:[#allocation16 + $0xa14] sm:$0xf0]  ;;  %v12829_v58 = vor.u32 %v14773_v6, %v12828_v30  ;;  %v13260_v59 = vld [vmem:[#allocation16 + $0xca8] sm:$0xf] }
 0x70c   :  { %9232 = vmatpush.bf16.msrb.mxu0 %v12749_v27  ;;  %9245 = vmatpush.bf16.msrb.mxu1 %v12877_v28  ;;  %v12701_v27 = vor.u32 %v14741_v43, %v12700_v63  ;;  %v13676_v28 = vld [vmem:[#allocation16 + $0xfe8] sm:$0xf]  ;;  %v16224_v39 = vadd.f32 %v9018_v14, %v9006_v8  ;;  %v14765_v14 = vld [vmem:[#allocation16 + $0x914] sm:$0xf0] }
 0x70d   :  { %v13677_v37 = vor.u32 %v14985_v12, %v13676_v28  ;;  %v14889_v19 = vld [vmem:[#allocation16 + $0xcf4] sm:$0xf0]  ;;  %v12797_v6 = vor.u32 %v14765_v14, %v12796_v11  ;;  %v13484_v23 = vld [vmem:[#allocation16 + $0xe68] sm:$0xf] }
 0x70e   :  { %9260 = vmatpush.bf16.msra.mxu2 %v12973_v61  ;;  %9273 = vmatpush.bf16.msrb.mxu3 %v13101_v36  ;;  %v12684_v61 = vld [vmem:[#allocation16 + $0x828] sm:$0xf]  ;;  %v12925_v36 = vor.u32 %v14797_v16, %v12924_v62  ;;  %v14921_v63 = vld [vmem:[#allocation16 + $0xdf4] sm:$0xf0] }
 0x70f   :  { %v12685_v53 = vor.u32 %v14737_v41, %v12684_v61  ;;  %v14945_v30 = vld [vmem:[#allocation16 + $0xeb4] sm:$0xf0]  ;;  %v13628_v41 = vld [vmem:[#allocation16 + $0xf88] sm:$0xf] }
 0x710   :  { %9233 = vmatpush.bf16.msrb.mxu0 %v12733_v3  ;;  %9246 = vmatpush.bf16.msrb.mxu1 %v12861_v7  ;;  %v8981_v3 = vpop.f32.mrf.mxu0  ;;  %v13549_v7 = vor.u32 %v14953_v24, %v13548_v22  ;;  %v14977_v16 = vld [vmem:[#allocation16 + $0xfb4] sm:$0xf0]  ;;  %v13404_v22 = vld [vmem:[#allocation16 + $0xdc8] sm:$0xf] }
 0x711   :  { %v14885_v8 = vld [vmem:[#allocation16 + $0xcd4] sm:$0xf0]  ;;  %v13372_v26 = vld [vmem:[#allocation16 + $0xd88] sm:$0xf] }
 0x712   :  { %9261 = vmatpush.bf16.msra.mxu2 %v12957_v50  ;;  %9274 = vmatpush.bf16.msrb.mxu3 %v13085_v17  ;;  %v9020_v50 = vpop.f32.mrf.mxu3  ;;  %v14981_v17 = vld [vmem:[#allocation16 + $0xfd4] sm:$0xf0]  ;;  %v13277_v61 = vor.u32 %v14885_v8, %v13276_v56  ;;  %v13452_v56 = vld [vmem:[#allocation16 + $0xe28] sm:$0xf] }
 0x713   :  { %v13661_v43 = vor.u32 %v14981_v17, %v13660_v20  ;;  %v14917_v24 = vld [vmem:[#allocation16 + $0xdd4] sm:$0xf0]  ;;  %v13244_v17 = vld [vmem:[#allocation16 + $0xc88] sm:$0xf] }
 0x714   :  { %9234 = vmatpush.bf16.msrb.mxu0 %v12717_v1  ;;  %9247 = vmatpush.bf16.msrb.mxu1 %v12845_v40  ;;  %v13292_v1 = vld [vmem:[#allocation16 + $0xce8] sm:$0xf]  ;;  %v14941_v12 = vld [vmem:[#allocation16 + $0xe94] sm:$0xf0]  ;;  %v13405_v18 = vor.u32 %v14917_v24, %v13404_v22 }
 0x715   :  { %v13420_v40 = vld [vmem:[#allocation16 + $0xde8] sm:$0xf]  ;;  %v13293_v62 = vor.u32 %v14889_v19, %v13292_v1  ;;  %v14881_v3 = vld [vmem:[#allocation16 + $0xcb4] sm:$0xf0] }
 0x716   :  { %9262 = vmatpush.bf16.msra.mxu2 %v12941_v4  ;;  %9275 = vmatpush.bf16.msrb.mxu3 %v13069_v46  ;;  %v13516_v4 = vld [vmem:[#allocation16 + $0xea8] sm:$0xf]  ;;  %v13421_v21 = vor.u32 %v14921_v63, %v13420_v40  ;;  %v14937_v50 = vld [vmem:[#allocation16 + $0xe74] sm:$0xf0] }
 0x717   :  { %v13644_v46 = vld [vmem:[#allocation16 + $0xfa8] sm:$0xf]  ;;  %v14969_v25 = vld [vmem:[#allocation16 + $0xf74] sm:$0xf0]  ;;  %v13485_v47 = vor.u32 %v14937_v50, %v13484_v23 }
 0x718   :  { %9235 = vmatpush.bf16.msrb.mxu0 %v12701_v27  ;;  %9248 = vmatpush.bf16.msrb.mxu1 %v12829_v58  ;;  %v13517_v27 = vor.u32 %v14945_v30, %v13516_v4  ;;  %v13645_v28 = vor.u32 %v14977_v16, %v13644_v46  ;;  %v13500_v58 = vld [vmem:[#allocation16 + $0xe88] sm:$0xf]  ;;  %v14909_v11 = vld [vmem:[#allocation16 + $0xd94] sm:$0xf0] }
 0x719   :  { %v13501_v35 = vor.u32 %v14941_v12, %v13500_v58  ;;  %v13468_v1 = vld [vmem:[#allocation16 + $0xe48] sm:$0xf]  ;;  %v14933_v19 = vld [vmem:[#allocation16 + $0xe54] sm:$0xf0] }
 0x71a   :  { %9263 = vmatpush.bf16.msra.mxu2 %v12925_v36  ;;  %9276 = vmatpush.bf16.msrb.mxu3 %v13053_v57  ;;  %v14973_v36 = vld [vmem:[#allocation16 + $0xf94] sm:$0xf0]  ;;  %v13388_v57 = vld [vmem:[#allocation16 + $0xda8] sm:$0xf]  ;;  %v13469_v30 = vor.u32 %v14933_v19, %v13468_v1 }
 0x71b   :  { %v13629_v5 = vor.u32 %v14973_v36, %v13628_v41  ;;  %v13596_v40 = vld [vmem:[#allocation16 + $0xf48] sm:$0xf]  ;;  %v14965_v63 = vld [vmem:[#allocation16 + $0xf54] sm:$0xf0] }
 0x71c   :  { %9236 = vmatpush.bf16.msrb.mxu0 %v12685_v53  ;;  %9249 = vmatpush.bf16.msrb.mxu1 %v12813_v33  ;;  %v13612_v53 = vld [vmem:[#allocation16 + $0xf68] sm:$0xf]  ;;  %v14877_v33 = vld [vmem:[#allocation16 + $0xc94] sm:$0xf0] }
 0x71d   :  { %9264 = vmatmul.bf16.vlgmr.msra.gmra.mxu2 %v16141_v42  ;;  %9277 = vmatmul.bf16.vlgmr.msrb.gmra.mxu3 %v16143_v44  ;;  %v13613_v14 = vor.u32 %v14969_v25, %v13612_v53  ;;  %v14873_v4 = vld [vmem:[#allocation16 + $0xc74] sm:$0xf0]  ;;  %v13580_v58 = vld [vmem:[#allocation16 + $0xf28] sm:$0xf]  ;;  %v14503_v53 = vld [vmem:[#allocation16 + $0xec] sm:$0xf] }
 0x71e   :  { %9308 = vmatpush.bf16.msrb.mxu2 %v13549_v7  ;;  %9321 = vmatpush.bf16.msra.mxu3 %v13677_v37  ;;  %v14913_v7 = vld [vmem:[#allocation16 + $0xdb4] sm:$0xf0]  ;;  %v13261_v37 = vor.u32 %v14881_v3, %v13260_v59  ;;  %v13212_v41 = vld [vmem:[#allocation16 + $0xc48] sm:$0xf]  ;;  %v11758_v25 = vld [vmem:[#allocation16 + $0xf8] sm:$0xf0] }
 0x71f   :  { %v13389_v20 = vor.u32 %v14913_v7, %v13388_v57  ;;  %v14929_v8 = vld [vmem:[#allocation16 + $0xe34] sm:$0xf0]  ;;  %v13340_v3 = vld [vmem:[#allocation16 + $0xd48] sm:$0xf] }
 0x720   :  { %9237 = vmatpush.bf16.msrb.mxu0 %v12669_v54  ;;  %9250 = vmatpush.bf16.msrb.mxu1 %v12797_v6  ;;  %v13228_v54 = vld [vmem:[#allocation16 + $0xc68] sm:$0xf]  ;;  %v9031_v46 = vpop.f32.mrf.mxu0  ;;  %v9057_v16 = vpop.f32.mrf.mxu2  ;;  %v14961_v12 = vld [vmem:[#allocation16 + $0xf34] sm:$0xf0]  ;;  %v13453_v59 = vor.u32 %v14929_v8, %v13452_v56 }
 0x721   :  { %v13356_v6 = vld [vmem:[#allocation16 + $0xd68] sm:$0xf]  ;;  %v9044_v22 = vpop.f32.mrf.mxu1  ;;  %v9070_v24 = vpop.f32.mrf.mxu3  ;;  %v14869_v36 = vld [vmem:[#allocation16 + $0xc54] sm:$0xf0]  ;;  %v13581_v7 = vor.u32 %v14961_v12, %v13580_v58 }
 0x722   :  { %9309 = vmatpush.bf16.msrb.mxu2 %v13533_v34  ;;  %9322 = vmatpush.bf16.msra.mxu3 %v13661_v43  ;;  %v13245_v34 = vor.u32 %v14877_v33, %v13244_v17  ;;  %v13373_v43 = vor.u32 %v14909_v11, %v13372_v26  ;;  %v13436_v57 = vld [vmem:[#allocation16 + $0xe08] sm:$0xf]  ;;  %v14957_v23 = vld [vmem:[#allocation16 + $0xf14] sm:$0xf0]  ;;  %v11886_v33 = vld [vmem:[#allocation16 + $0x1f8] sm:$0xf0] }
 0x723   :  { %9238 = vmatmul.bf16.vlgmr.msrb.gmra.mxu0 %v16148_v15  ;;  %9251 = vmatmul.bf16.vlgmr.msrb.gmra.mxu1 %v16150_v52  ;;  %v14865_v26 = vld [vmem:[#allocation16 + $0xc34] sm:$0xf0]  ;;  %v13324_v1 = vld [vmem:[#allocation16 + $0xd28] sm:$0xf] }
 0x724   :  { %9282 = vmatpush.bf16.msra.mxu0 %v13293_v62  ;;  %9295 = vmatpush.bf16.msra.mxu1 %v13421_v21  ;;  %v14905_v62 = vld [vmem:[#allocation16 + $0xd74] sm:$0xf0]  ;;  %v13597_v21 = vor.u32 %v14965_v63, %v13596_v40  ;;  %v13180_v8 = vld [vmem:[#allocation16 + $0xc08] sm:$0xf] }
 0x725   :  { %v14897_v19 = vld [vmem:[#allocation16 + $0xd34] sm:$0xf0] }
 0x726   :  { %9310 = vmatpush.bf16.msrb.mxu2 %v13517_v27  ;;  %9323 = vmatpush.bf16.msra.mxu3 %v13645_v28  ;;  %v9032_v27 = vadd.f32 %v9031_v46, %v16224_v39  ;;  %v13229_v28 = vor.u32 %v14873_v4, %v13228_v54  ;;  %v13564_v39 = vld [vmem:[#allocation16 + $0xf08] sm:$0xf]  ;;  %v14499_v54 = vld [vmem:[#allocation16 + $0xcc] sm:$0xf]  ;;  %v11742_v46 = vld [vmem:[#allocation16 + $0xd8] sm:$0xf0]  ;;  %v13325_v56 = vor.u32 %v14897_v19, %v13324_v1 }
 0x727   :  { %v13565_v63 = vor.u32 %v14957_v23, %v13564_v39  ;;  %v15017_v58 = vld [vmem:[#allocation16 + $0x10f4] sm:$0xf0]  ;;  %v11745_v12 = vor.u32 %v14499_v54, %v11742_v46  ;;  %v13788_v23 = vld [vmem:[#allocation16 + $0x10c8] sm:$0xf]  ;;  %v11822_v46 = vld [vmem:[#allocation16 + $0x178] sm:$0xf0] }
 0x728   :  { %9283 = vmatpush.bf16.msra.mxu0 %v13277_v61  ;;  %9296 = vmatpush.bf16.msra.mxu1 %v13405_v18  ;;  %v13357_v61 = vor.u32 %v14905_v62, %v13356_v6  ;;  %v9045_v18 = vadd.f32 %v9044_v22, %v9032_v27  ;;  %v9059_v40 = vpop.f32.mrf.mxu2  ;;  %v14861_v27 = vld [vmem:[#allocation16 + $0xc14] sm:$0xf0]  ;;  %v13308_v22 = vld [vmem:[#allocation16 + $0xd08] sm:$0xf] }
 0x729   :  { %v9046_v4 = vpop.f32.mrf.mxu1  ;;  %v13772_v19 = vld [vmem:[#allocation16 + $0x10a8] sm:$0xf] }
 0x72a   :  { %9311 = vmatpush.bf16.msrb.mxu2 %v13501_v35  ;;  %9324 = vmatpush.bf16.msra.mxu3 %v13629_v5  ;;  %v14901_v35 = vld [vmem:[#allocation16 + $0xd54] sm:$0xf0]  ;;  %v9058_v50 = vadd.f32 %v9057_v16, %v9045_v18  ;;  %v14531_v16 = vld [vmem:[#allocation16 + $0x1cc] sm:$0xf]  ;;  %v13181_v18 = vor.u32 %v14861_v27, %v13180_v8  ;;  %v13884_v27 = vld [vmem:[#allocation16 + $0x1188] sm:$0xf] }
 0x72b   :  { %v14925_v5 = vld [vmem:[#allocation16 + $0xe14] sm:$0xf0]  ;;  %v13341_v17 = vor.u32 %v14901_v35, %v13340_v3  ;;  %v11726_v3 = vld [vmem:[#allocation16 + $0xb8] sm:$0xf0]  ;;  %v14487_v4 = vld [vmem:[#allocation16 + $0x6c] sm:$0xf] }
 0x72c   :  { %9284 = vmatpush.bf16.msra.mxu0 %v13261_v37  ;;  %9297 = vmatpush.bf16.msra.mxu1 %v13389_v20  ;;  %v13213_v37 = vor.u32 %v14869_v36, %v13212_v41  ;;  %v14535_v20 = vld [vmem:[#allocation16 + $0x1ec] sm:$0xf]  ;;  %v16231_v11 = vadd.f32 %v9070_v24, %v9058_v50  ;;  %v14893_v24 = vld [vmem:[#allocation16 + $0xd14] sm:$0xf0] }
 0x72d   :  { %v11889_v6 = vor.u32 %v14535_v20, %v11886_v33  ;;  %v15049_v41 = vld [vmem:[#allocation16 + $0x11f4] sm:$0xf0]  ;;  %v13309_v35 = vor.u32 %v14893_v24, %v13308_v22  ;;  %v11710_v33 = vld [vmem:[#allocation16 + $0x98] sm:$0xf0] }
 0x72e   :  { %9312 = vmatpush.bf16.msrb.mxu2 %v13485_v47  ;;  %9325 = vmatpush.bf16.msra.mxu3 %v13613_v14  ;;  %v13196_v47 = vld [vmem:[#allocation16 + $0xc28] sm:$0xf]  ;;  %v13437_v14 = vor.u32 %v14925_v5, %v13436_v57  ;;  %v11854_v5 = vld [vmem:[#allocation16 + $0x1b8] sm:$0xf0]  ;;  %v15013_v50 = vld [vmem:[#allocation16 + $0x10d4] sm:$0xf0] }
 0x72f   :  { %v13197_v62 = vor.u32 %v14865_v26, %v13196_v47  ;;  %v13789_v47 = vor.u32 %v15013_v50, %v13788_v23  ;;  %v14523_v26 = vld [vmem:[#allocation16 + $0x18c] sm:$0xf]  ;;  %v15037_v22 = vld [vmem:[#allocation16 + $0x1194] sm:$0xf0]  ;;  %v11662_v50 = vld [vmem:[#allocation16 + $0x38] sm:$0xf0] }
 0x730   :  { %9285 = vmatpush.bf16.msra.mxu0 %v13245_v34  ;;  %9298 = vmatpush.bf16.msra.mxu1 %v13373_v43  ;;  %v9033_v34 = vpop.f32.mrf.mxu0  ;;  %v11761_v43 = vor.u32 %v14503_v53, %v11758_v25  ;;  %v13916_v53 = vld [vmem:[#allocation16 + $0x11c8] sm:$0xf]  ;;  %v15045_v25 = vld [vmem:[#allocation16 + $0x11d4] sm:$0xf0]  ;;  %v14479_v23 = vld [vmem:[#allocation16 + $0x2c] sm:$0xf] }
 0x731   :  { %v13917_v1 = vor.u32 %v15045_v25, %v13916_v53  ;;  %v15009_v34 = vld [vmem:[#allocation16 + $0x10b4] sm:$0xf0] }
 0x732   :  { %9313 = vmatpush.bf16.msrb.mxu2 %v13469_v30  ;;  %9326 = vmatpush.bf16.msra.mxu3 %v13597_v21  ;;  %v9072_v30 = vpop.f32.mrf.mxu3  ;;  %v11870_v21 = vld [vmem:[#allocation16 + $0x1d8] sm:$0xf0] }
 0x733   :  { %v11873_v36 = vor.u32 %v14531_v16, %v11870_v21  ;;  %v11694_v30 = vld [vmem:[#allocation16 + $0x78] sm:$0xf0]  ;;  %v13756_v21 = vld [vmem:[#allocation16 + $0x1088] sm:$0xf] }
 0x734   :  { %9286 = vmatpush.bf16.msra.mxu0 %v13229_v28  ;;  %9299 = vmatpush.bf16.msra.mxu1 %v13357_v61  ;;  %v13804_v28 = vld [vmem:[#allocation16 + $0x10e8] sm:$0xf]  ;;  %v11697_v8 = vor.u32 %v14487_v4, %v11694_v30  ;;  %v11774_v4 = vld [vmem:[#allocation16 + $0x118] sm:$0xf0] }
 0x735   :  { %v13932_v61 = vld [vmem:[#allocation16 + $0x11e8] sm:$0xf]  ;;  %v13805_v57 = vor.u32 %v15017_v58, %v13804_v28  ;;  %v14483_v28 = vld [vmem:[#allocation16 + $0x4c] sm:$0xf]  ;;  %v11678_v58 = vld [vmem:[#allocation16 + $0x58] sm:$0xf0] }
 0x736   :  { %9314 = vmatpush.bf16.msrb.mxu2 %v13453_v59  ;;  %9327 = vmatpush.bf16.msra.mxu3 %v13581_v7  ;;  %v14495_v59 = vld [vmem:[#allocation16 + $0xac] sm:$0xf]  ;;  %v13933_v39 = vor.u32 %v15049_v41, %v13932_v61  ;;  %v11806_v41 = vld [vmem:[#allocation16 + $0x158] sm:$0xf0] }
 0x737   :  { %v14527_v7 = vld [vmem:[#allocation16 + $0x1ac] sm:$0xf] }
 0x738   :  { %9287 = vmatpush.bf16.msra.mxu0 %v13213_v37  ;;  %9300 = vmatpush.bf16.msra.mxu1 %v13341_v17  ;;  %v11729_v37 = vor.u32 %v14495_v59, %v11726_v3  ;;  %v11857_v20 = vor.u32 %v14527_v7, %v11854_v5  ;;  %v14491_v17 = vld [vmem:[#allocation16 + $0x8c] sm:$0xf]  ;;  %v15001_v59 = vld [vmem:[#allocation16 + $0x1074] sm:$0xf0]  ;;  %v11681_v3 = vor.u32 %v14483_v28, %v11678_v58  ;;  %v13836_v28 = vld [vmem:[#allocation16 + $0x1128] sm:$0xf] }
 0x739   :  { %v11713_v40 = vor.u32 %v14491_v17, %v11710_v33  ;;  %v14515_v61 = vld [vmem:[#allocation16 + $0x14c] sm:$0xf]  ;;  %v11790_v33 = vld [vmem:[#allocation16 + $0x138] sm:$0xf0]  ;;  %v15025_v58 = vld [vmem:[#allocation16 + $0x1134] sm:$0xf0] }
 0x73a   :  { %9315 = vmatpush.bf16.msrb.mxu2 %v13437_v14  ;;  %9328 = vmatpush.bf16.msra.mxu3 %v13565_v63  ;;  %v11838_v14 = vld [vmem:[#allocation16 + $0x198] sm:$0xf0]  ;;  %v13900_v63 = vld [vmem:[#allocation16 + $0x11a8] sm:$0xf]  ;;  %v14511_v17 = vld [vmem:[#allocation16 + $0x12c] sm:$0xf] }
 0x73b   :  { %v11841_v54 = vor.u32 %v14523_v26, %v11838_v14  ;;  %v13724_v26 = vld [vmem:[#allocation16 + $0x1048] sm:$0xf]  ;;  %v14997_v14 = vld [vmem:[#allocation16 + $0x1054] sm:$0xf0] }
 0x73c   :  { %9288 = vmatpush.bf16.msra.mxu0 %v13197_v62  ;;  %9301 = vmatpush.bf16.msra.mxu1 %v13325_v56  ;;  %v14519_v62 = vld [vmem:[#allocation16 + $0x16c] sm:$0xf]  ;;  %v15005_v56 = vld [vmem:[#allocation16 + $0x1094] sm:$0xf0] }
 0x73d   :  { %9316 = vmatmul.bf16.vlgmr.msrb.gmra.mxu2 %v16156_v13  ;;  %9329 = vmatmul.bf16.vlgmr.msra.gmra.mxu3 %v16158_v51  ;;  %v11825_v24 = vor.u32 %v14519_v62, %v11822_v46  ;;  %v14631_v62 = vld [vmem:[#allocation16 + $0x4ec] sm:$0xf]  ;;  %v12270_v46 = vld [vmem:[#allocation16 + $0x4f8] sm:$0xf0] }
 0x73e   :  { %9360 = vmatpush.bf16.msra.mxu2 %v11761_v43  ;;  %9373 = vmatpush.bf16.msrb.mxu3 %v11889_v6  ;;  %v15041_v43 = vld [vmem:[#allocation16 + $0x11b4] sm:$0xf0]  ;;  %v13773_v6 = vor.u32 %v15009_v34, %v13772_v19  ;;  %v11665_v19 = vor.u32 %v14479_v23, %v11662_v50  ;;  %v13852_v34 = vld [vmem:[#allocation16 + $0x1148] sm:$0xf]  ;;  %v13837_v23 = vor.u32 %v15025_v58, %v13836_v28  ;;  %v11982_v28 = vld [vmem:[#allocation16 + $0x2b8] sm:$0xf0] }
 0x73f   :  { %v13901_v16 = vor.u32 %v15041_v43, %v13900_v63  ;;  %v14475_v63 = vld [vmem:[#allocation16 + $0xc] sm:$0xf]  ;;  %v11793_v43 = vor.u32 %v14511_v17, %v11790_v33  ;;  %v13692_v50 = vld [vmem:[#allocation16 + $0x1008] sm:$0xf]  ;;  %v12014_v17 = vld [vmem:[#allocation16 + $0x2f8] sm:$0xf0] }
 0x740   :  { %9289 = vmatpush.bf16.msra.mxu0 %v13181_v18  ;;  %9302 = vmatpush.bf16.msra.mxu1 %v13309_v35  ;;  %v13740_v18 = vld [vmem:[#allocation16 + $0x1068] sm:$0xf]  ;;  %v9083_v7 = vpop.f32.mrf.mxu0  ;;  %v9109_v5 = vpop.f32.mrf.mxu2 }
 0x741   :  { %v13868_v35 = vld [vmem:[#allocation16 + $0x1168] sm:$0xf]  ;;  %v9096_v53 = vpop.f32.mrf.mxu1  ;;  %v9122_v25 = vpop.f32.mrf.mxu3 }
 0x742   :  { %9361 = vmatpush.bf16.msra.mxu2 %v11745_v12  ;;  %9374 = vmatpush.bf16.msrb.mxu3 %v11873_v36  ;;  %v13757_v12 = vor.u32 %v15005_v56, %v13756_v21  ;;  %v13885_v36 = vor.u32 %v15037_v22, %v13884_v27  ;;  %v12398_v56 = vld [vmem:[#allocation16 + $0x5f8] sm:$0xf0]  ;;  %v14993_v27 = vld [vmem:[#allocation16 + $0x1034] sm:$0xf0] }
 0x743   :  { %9290 = vmatmul.bf16.vlgmr.msra.gmra.mxu0 %v16164_v49  ;;  %9303 = vmatmul.bf16.vlgmr.msra.gmra.mxu1 %v16168_v55 }
 0x744   :  { %9334 = vmatpush.bf16.msrb.mxu0 %v13805_v57  ;;  %9347 = vmatpush.bf16.msrb.mxu1 %v13933_v39  ;;  %v15033_v57 = vld [vmem:[#allocation16 + $0x1174] sm:$0xf0]  ;;  %v11809_v39 = vor.u32 %v14515_v61, %v11806_v41 }
 0x746   :  { %9362 = vmatpush.bf16.msra.mxu2 %v11729_v37  ;;  %9375 = vmatpush.bf16.msrb.mxu3 %v11857_v20  ;;  %v9084_v37 = vadd.f32 %v9083_v7, %v16231_v11  ;;  %v13741_v20 = vor.u32 %v15001_v59, %v13740_v18  ;;  %v14507_v11 = vld [vmem:[#allocation16 + $0x10c] sm:$0xf]  ;;  %v12254_v7 = vld [vmem:[#allocation16 + $0x4d8] sm:$0xf0] }
 0x747   :  { %v11777_v41 = vor.u32 %v14507_v11, %v11774_v4  ;;  %v14627_v18 = vld [vmem:[#allocation16 + $0x4cc] sm:$0xf] }
 0x748   :  { %9335 = vmatpush.bf16.msrb.mxu0 %v13789_v47  ;;  %9348 = vmatpush.bf16.msrb.mxu1 %v13917_v1  ;;  %v13869_v47 = vor.u32 %v15033_v57, %v13868_v35  ;;  %v9097_v1 = vadd.f32 %v9096_v53, %v9084_v37  ;;  %v9111_v61 = vpop.f32.mrf.mxu2  ;;  %v14989_v37 = vld [vmem:[#allocation16 + $0x1014] sm:$0xf0]  ;;  %v13820_v53 = vld [vmem:[#allocation16 + $0x1108] sm:$0xf]  ;;  %v12257_v33 = vor.u32 %v14627_v18, %v12254_v7  ;;  %v14563_v4 = vld [vmem:[#allocation16 + $0x2cc] sm:$0xf] }
 0x749   :  { %v9098_v59 = vpop.f32.mrf.mxu1  ;;  %v12110_v61 = vld [vmem:[#allocation16 + $0x3b8] sm:$0xf0]  ;;  %v14555_v7 = vld [vmem:[#allocation16 + $0x28c] sm:$0xf] }
 0x74a   :  { %9363 = vmatpush.bf16.msra.mxu2 %v11713_v40  ;;  %9376 = vmatpush.bf16.msrb.mxu3 %v11841_v54  ;;  %v15029_v40 = vld [vmem:[#allocation16 + $0x1154] sm:$0xf0]  ;;  %v11646_v54 = vld [vmem:[#allocation16 + $0x18] sm:$0xf0]  ;;  %v9110_v30 = vadd.f32 %v9109_v5, %v9097_v1  ;;  %v14659_v5 = vld [vmem:[#allocation16 + $0x5cc] sm:$0xf]  ;;  %v13693_v1 = vor.u32 %v14989_v37, %v13692_v50 }
 0x74b   :  { %v13853_v21 = vor.u32 %v15029_v40, %v13852_v34  ;;  %v12238_v34 = vld [vmem:[#allocation16 + $0x4b8] sm:$0xf0] }
 0x74c   :  { %9336 = vmatpush.bf16.msrb.mxu0 %v13773_v6  ;;  %9349 = vmatpush.bf16.msrb.mxu1 %v13901_v16  ;;  %v13725_v6 = vor.u32 %v14997_v14, %v13724_v26  ;;  %v14663_v16 = vld [vmem:[#allocation16 + $0x5ec] sm:$0xf]  ;;  %v16238_v22 = vadd.f32 %v9122_v25, %v9110_v30  ;;  %v15021_v25 = vld [vmem:[#allocation16 + $0x1114] sm:$0xf0]  ;;  %v12142_v26 = vld [vmem:[#allocation16 + $0x3f8] sm:$0xf0] }
 0x74d   :  { %v12401_v35 = vor.u32 %v14663_v16, %v12398_v56  ;;  %v13821_v40 = vor.u32 %v15021_v25, %v13820_v53  ;;  %v11998_v30 = vld [vmem:[#allocation16 + $0x2d8] sm:$0xf0]  ;;  %v14611_v53 = vld [vmem:[#allocation16 + $0x44c] sm:$0xf] }
 0x74e   :  { %9364 = vmatpush.bf16.msra.mxu2 %v11697_v8  ;;  %9377 = vmatpush.bf16.msrb.mxu3 %v11825_v24  ;;  %v13708_v8 = vld [vmem:[#allocation16 + $0x1028] sm:$0xf]  ;;  %v11649_v24 = vor.u32 %v14475_v63, %v11646_v54  ;;  %v12366_v54 = vld [vmem:[#allocation16 + $0x5b8] sm:$0xf0] }
 0x74f   :  { %v13709_v57 = vor.u32 %v14993_v27, %v13708_v8  ;;  %v12222_v56 = vld [vmem:[#allocation16 + $0x498] sm:$0xf0]  ;;  %v14651_v8 = vld [vmem:[#allocation16 + $0x58c] sm:$0xf] }
 0x750   :  { %9337 = vmatpush.bf16.msrb.mxu0 %v13757_v12  ;;  %9350 = vmatpush.bf16.msrb.mxu1 %v13885_v36  ;;  %v9085_v12 = vpop.f32.mrf.mxu0  ;;  %v12273_v36 = vor.u32 %v14631_v62, %v12270_v46  ;;  %v14595_v62 = vld [vmem:[#allocation16 + $0x3cc] sm:$0xf]  ;;  %v12126_v46 = vld [vmem:[#allocation16 + $0x3d8] sm:$0xf0] }
 0x751   :  { %v12350_v27 = vld [vmem:[#allocation16 + $0x598] sm:$0xf0]  ;;  %v14591_v12 = vld [vmem:[#allocation16 + $0x3ac] sm:$0xf] }
 0x752   :  { %9365 = vmatpush.bf16.msra.mxu2 %v11681_v3  ;;  %9378 = vmatpush.bf16.msrb.mxu3 %v11809_v39  ;;  %v9124_v3 = vpop.f32.mrf.mxu3  ;;  %v12382_v39 = vld [vmem:[#allocation16 + $0x5d8] sm:$0xf0] }
 0x753   :  { %v12385_v14 = vor.u32 %v14659_v5, %v12382_v39  ;;  %v12206_v18 = vld [vmem:[#allocation16 + $0x478] sm:$0xf0]  ;;  %v14647_v3 = vld [vmem:[#allocation16 + $0x56c] sm:$0xf] }
 0x754   :  { %9338 = vmatpush.bf16.msrb.mxu0 %v13741_v20  ;;  %9351 = vmatpush.bf16.msrb.mxu1 %v13869_v47  ;;  %v14567_v20 = vld [vmem:[#allocation16 + $0x2ec] sm:$0xf]  ;;  %v11966_v5 = vld [vmem:[#allocation16 + $0x298] sm:$0xf0] }
 0x755   :  { %v14599_v47 = vld [vmem:[#allocation16 + $0x3ec] sm:$0xf]  ;;  %v12017_v63 = vor.u32 %v14567_v20, %v12014_v17  ;;  %v12094_v50 = vld [vmem:[#allocation16 + $0x398] sm:$0xf0]  ;;  %v15103_v20 = vld [vmem:[#allocation18] sm:$0xf] }
 0x756   :  { %9366 = vmatpush.bf16.msra.mxu2 %v11665_v19  ;;  %9379 = vmatpush.bf16.msrb.mxu3 %v11793_v43  ;;  %v14623_v19 = vld [vmem:[#allocation16 + $0x4ac] sm:$0xf]  ;;  %v12145_v11 = vor.u32 %v14599_v47, %v12142_v26  ;;  %v12190_v25 = vld [vmem:[#allocation16 + $0x458] sm:$0xf0]  ;;  %v5709_v17 = vperm.slane %v15103_v20, 2 }
 0x757   :  { %v14655_v43 = vld [vmem:[#allocation16 + $0x5ac] sm:$0xf]  ;;  %v12318_v26 = vld [vmem:[#allocation16 + $0x558] sm:$0xf0] }
 0x758   :  { %9339 = vmatpush.bf16.msrb.mxu0 %v13725_v6  ;;  %9352 = vmatpush.bf16.msrb.mxu1 %v13853_v21  ;;  %v12241_v6 = vor.u32 %v14623_v19, %v12238_v34  ;;  %v12369_v16 = vor.u32 %v14655_v43, %v12366_v54  ;;  %v14619_v21 = vld [vmem:[#allocation16 + $0x48c] sm:$0xf]  ;;  %v11950_v19 = vld [vmem:[#allocation16 + $0x278] sm:$0xf0]  ;;  %v12193_v34 = vor.u32 %v14611_v53, %v12190_v25 }
 0x759   :  { %v12225_v58 = vor.u32 %v14619_v21, %v12222_v56  ;;  %v14643_v47 = vld [vmem:[#allocation16 + $0x54c] sm:$0xf]  ;;  %v12302_v56 = vld [vmem:[#allocation16 + $0x538] sm:$0xf0] }
 0x75a   :  { %9367 = vmatpush.bf16.msra.mxu2 %v11649_v24  ;;  %9380 = vmatpush.bf16.msrb.mxu3 %v11777_v41  ;;  %v12129_v24 = vor.u32 %v14595_v62, %v12126_v46  ;;  %v12353_v41 = vor.u32 %v14651_v8, %v12350_v27  ;;  %v14639_v21 = vld [vmem:[#allocation16 + $0x52c] sm:$0xf]  ;;  %v11934_v27 = vld [vmem:[#allocation16 + $0x258] sm:$0xf0] }
 0x75b   :  { %v14547_v8 = vld [vmem:[#allocation16 + $0x24c] sm:$0xf]  ;;  %v12046_v20 = vld [vmem:[#allocation16 + $0x338] sm:$0xf0] }
 0x75c   :  { %9340 = vmatpush.bf16.msrb.mxu0 %v13709_v57  ;;  %9353 = vmatpush.bf16.msrb.mxu1 %v13837_v23  ;;  %v12113_v57 = vor.u32 %v14591_v12, %v12110_v61  ;;  %v14587_v23 = vld [vmem:[#allocation16 + $0x38c] sm:$0xf]  ;;  %v12305_v61 = vor.u32 %v14639_v21, %v12302_v56 }
 0x75d   :  { %9368 = vmatmul.bf16.vlgmr.msra.gmra.mxu2 %v16116_v9  ;;  %9381 = vmatmul.bf16.vlgmr.msrb.gmra.mxu3 %v16118_v2  ;;  %v12001_v9 = vor.u32 %v14563_v4, %v11998_v30  ;;  %v14559_v2 = vld [vmem:[#allocation16 + $0x2ac] sm:$0xf]  ;;  %v12174_v30 = vld [vmem:[#allocation16 + $0x438] sm:$0xf0] }
 0x75e   :  { %9412 = vmatpush.bf16.msrb.mxu2 %v12273_v36  ;;  %9425 = vmatpush.bf16.msra.mxu3 %v12401_v35  ;;  %v14615_v36 = vld [vmem:[#allocation16 + $0x46c] sm:$0xf]  ;;  %v11985_v59 = vor.u32 %v14559_v2, %v11982_v28  ;;  %v12334_v35 = vld [vmem:[#allocation16 + $0x578] sm:$0xf0] }
 0x75f   :  { %v12209_v39 = vor.u32 %v14615_v36, %v12206_v18  ;;  %v12337_v37 = vor.u32 %v14647_v3, %v12334_v35  ;;  %v14607_v4 = vld [vmem:[#allocation16 + $0x42c] sm:$0xf]  ;;  %v12286_v18 = vld [vmem:[#allocation16 + $0x518] sm:$0xf0]  ;;  %v11937_v3 = vor.u32 %v14547_v8, %v11934_v27 }
 0x760   :  { %9341 = vmatpush.bf16.msrb.mxu0 %v13693_v1  ;;  %9354 = vmatpush.bf16.msrb.mxu1 %v13821_v40  ;;  %v14551_v1 = vld [vmem:[#allocation16 + $0x26c] sm:$0xf]  ;;  %v9135_v43 = vpop.f32.mrf.mxu0  ;;  %v9161_v54 = vpop.f32.mrf.mxu2  ;;  %v12177_v2 = vor.u32 %v14607_v4, %v12174_v30  ;;  %v11902_v30 = vld [vmem:[#allocation16 + $0x218] sm:$0xf0] }
 0x761   :  { %v14583_v40 = vld [vmem:[#allocation16 + $0x36c] sm:$0xf]  ;;  %v9148_v62 = vpop.f32.mrf.mxu1  ;;  %v9174_v46 = vpop.f32.mrf.mxu3 }
 0x762   :  { %9413 = vmatpush.bf16.msrb.mxu2 %v12257_v33  ;;  %9426 = vmatpush.bf16.msra.mxu3 %v12385_v14  ;;  %v11969_v33 = vor.u32 %v14555_v7, %v11966_v5  ;;  %v12097_v14 = vor.u32 %v14587_v23, %v12094_v50  ;;  %v14579_v28 = vld [vmem:[#allocation16 + $0x34c] sm:$0xf]  ;;  %v11918_v50 = vld [vmem:[#allocation16 + $0x238] sm:$0xf0] }
 0x763   :  { %9342 = vmatmul.bf16.vlgmr.msrb.gmra.mxu0 %v16176_v45  ;;  %9355 = vmatmul.bf16.vlgmr.msrb.gmra.mxu1 %v16178_v38  ;;  %v14603_v12 = vld [vmem:[#allocation16 + $0x40c] sm:$0xf] }
 0x764   :  { %9386 = vmatpush.bf16.msra.mxu0 %v12017_v63  ;;  %9399 = vmatpush.bf16.msra.mxu1 %v12145_v11  ;;  %v12078_v63 = vld [vmem:[#allocation16 + $0x378] sm:$0xf0]  ;;  %v12321_v11 = vor.u32 %v14643_v47, %v12318_v26  ;;  %v14635_v36 = vld [vmem:[#allocation16 + $0x50c] sm:$0xf] }
 0x765   :  { %v14759_v35 = vld [vmem:[#allocation16 + $0x8ec] sm:$0xf]  ;;  %v12289_v47 = vor.u32 %v14635_v36, %v12286_v18  ;;  %v12510_v18 = vld [vmem:[#allocation16 + $0x6d8] sm:$0xf0] }
 0x766   :  { %9414 = vmatpush.bf16.msrb.mxu2 %v12241_v6  ;;  %9427 = vmatpush.bf16.msra.mxu3 %v12369_v16  ;;  %v9136_v6 = vadd.f32 %v9135_v43, %v5709_v17  ;;  %v11953_v16 = vor.u32 %v14551_v1, %v11950_v19  ;;  %v14791_v7 = vld [vmem:[#allocation16 + $0x9ec] sm:$0xf] }
 0x767   :  { %v14543_v23 = vld [vmem:[#allocation16 + $0x22c] sm:$0xf] }
 0x768   :  { %9387 = vmatpush.bf16.msra.mxu0 %v12001_v9  ;;  %9400 = vmatpush.bf16.msra.mxu1 %v12129_v24  ;;  %v12081_v9 = vor.u32 %v14583_v40, %v12078_v63  ;;  %v9149_v24 = vadd.f32 %v9148_v62, %v9136_v6  ;;  %v14575_v25 = vld [vmem:[#allocation16 + $0x32c] sm:$0xf]  ;;  %v9137_v17 = vpop.f32.mrf.mxu0  ;;  %v11921_v40 = vor.u32 %v14543_v23, %v11918_v50  ;;  %v12766_v63 = vld [vmem:[#allocation16 + $0x8d8] sm:$0xf0] }
 0x769   :  { %v9150_v1 = vpop.f32.mrf.mxu1  ;;  %v9176_v19 = vpop.f32.mrf.mxu3  ;;  %v14787_v43 = vld [vmem:[#allocation16 + $0x9cc] sm:$0xf]  ;;  %v12030_v62 = vld [vmem:[#allocation16 + $0x318] sm:$0xf0] }
 0x76a   :  { %9415 = vmatpush.bf16.msrb.mxu2 %v12225_v58  ;;  %9428 = vmatpush.bf16.msra.mxu3 %v12353_v41  ;;  %v12062_v58 = vld [vmem:[#allocation16 + $0x358] sm:$0xf0]  ;;  %v14539_v4 = vld [vmem:[#allocation16 + $0x20c] sm:$0xf] }
 0x76b   :  { %v12158_v41 = vld [vmem:[#allocation16 + $0x418] sm:$0xf0]  ;;  %v12065_v5 = vor.u32 %v14579_v28, %v12062_v58  ;;  %v14571_v6 = vld [vmem:[#allocation16 + $0x30c] sm:$0xf]  ;;  %v11905_v27 = vor.u32 %v14539_v4, %v11902_v30 }
 0x76c   :  { %9388 = vmatpush.bf16.msra.mxu0 %v11985_v59  ;;  %9401 = vmatpush.bf16.msra.mxu1 %v12113_v57  ;;  %v9162_v59 = vadd.f32 %v9161_v54, %v9149_v24  ;;  %v12782_v57 = vld [vmem:[#allocation16 + $0x8f8] sm:$0xf0]  ;;  %v12161_v53 = vor.u32 %v14603_v12, %v12158_v41  ;;  %v14727_v56 = vld [vmem:[#allocation16 + $0x7ec] sm:$0xf]  ;;  %v12033_v28 = vor.u32 %v14571_v6, %v12030_v62 }
 0x76d   :  { %v12785_v26 = vor.u32 %v14759_v35, %v12782_v57  ;;  %v12894_v54 = vld [vmem:[#allocation16 + $0x9d8] sm:$0xf0]  ;;  %v14751_v24 = vld [vmem:[#allocation16 + $0x8ac] sm:$0xf] }
 0x76e   :  { %9416 = vmatpush.bf16.msrb.mxu2 %v12209_v39  ;;  %9429 = vmatpush.bf16.msra.mxu3 %v12337_v37  ;;  %v12910_v39 = vld [vmem:[#allocation16 + $0x9f8] sm:$0xf0]  ;;  %v16244_v37 = vadd.f32 %v9174_v46, %v9162_v59  ;;  %v14695_v46 = vld [vmem:[#allocation16 + $0x6ec] sm:$0xf]  ;;  %v12897_v8 = vor.u32 %v14787_v43, %v12894_v54 }
 0x76f   :  { %v14783_v12 = vld [vmem:[#allocation16 + $0x9ac] sm:$0xf]  ;;  %v12638_v35 = vld [vmem:[#allocation16 + $0x7d8] sm:$0xf0] }
 0x770   :  { %9389 = vmatpush.bf16.msra.mxu0 %v11969_v33  ;;  %9402 = vmatpush.bf16.msra.mxu1 %v12097_v14  ;;  %v9163_v33 = vpop.f32.mrf.mxu2  ;;  %v14755_v14 = vld [vmem:[#allocation16 + $0x8cc] sm:$0xf]  ;;  %v12862_v23 = vld [vmem:[#allocation16 + $0x998] sm:$0xf0] }
 0x771   :  { %v12769_v21 = vor.u32 %v14755_v14, %v12766_v63  ;;  %v14691_v36 = vld [vmem:[#allocation16 + $0x6cc] sm:$0xf]  ;;  %v12622_v17 = vld [vmem:[#allocation16 + $0x7b8] sm:$0xf0] }
 0x772   :  { %9417 = vmatpush.bf16.msrb.mxu2 %v12193_v34  ;;  %9430 = vmatpush.bf16.msra.mxu3 %v12321_v11  ;;  %v12913_v34 = vor.u32 %v14791_v7, %v12910_v39  ;;  %v12049_v11 = vor.u32 %v14575_v25, %v12046_v20  ;;  %v14747_v7 = vld [vmem:[#allocation16 + $0x88c] sm:$0xf]  ;;  %v12846_v19 = vld [vmem:[#allocation16 + $0x978] sm:$0xf0] }
 0x773   :  { %v14779_v39 = vld [vmem:[#allocation16 + $0x98c] sm:$0xf]  ;;  %v12478_v63 = vld [vmem:[#allocation16 + $0x698] sm:$0xf0] }
 0x774   :  { %9390 = vmatpush.bf16.msra.mxu0 %v11953_v16  ;;  %9403 = vmatpush.bf16.msra.mxu1 %v12081_v9  ;;  %v12526_v16 = vld [vmem:[#allocation16 + $0x6f8] sm:$0xf0]  ;;  %v14719_v20 = vld [vmem:[#allocation16 + $0x7ac] sm:$0xf]  ;;  %v12865_v33 = vor.u32 %v14779_v39, %v12862_v23 }
 0x775   :  { %v12654_v9 = vld [vmem:[#allocation16 + $0x7f8] sm:$0xf0]  ;;  %v12529_v58 = vor.u32 %v14695_v46, %v12526_v16  ;;  %v14775_v1 = vld [vmem:[#allocation16 + $0x96c] sm:$0xf] }
 0x776   :  { %9418 = vmatpush.bf16.msrb.mxu2 %v12177_v2  ;;  %9431 = vmatpush.bf16.msra.mxu3 %v12305_v61  ;;  %v12750_v2 = vld [vmem:[#allocation16 + $0x8b8] sm:$0xf0]  ;;  %v12657_v41 = vor.u32 %v14727_v56, %v12654_v9  ;;  %v14715_v43 = vld [vmem:[#allocation16 + $0x78c] sm:$0xf] }
 0x777   :  { %v12878_v61 = vld [vmem:[#allocation16 + $0x9b8] sm:$0xf0]  ;;  %v12753_v59 = vor.u32 %v14751_v24, %v12750_v2  ;;  %v14739_v4 = vld [vmem:[#allocation16 + $0x84c] sm:$0xf] }
 0x778   :  { %9391 = vmatpush.bf16.msra.mxu0 %v11937_v3  ;;  %9404 = vmatpush.bf16.msra.mxu1 %v12065_v5  ;;  %v14723_v3 = vld [vmem:[#allocation16 + $0x7cc] sm:$0xf]  ;;  %v12881_v57 = vor.u32 %v14783_v12, %v12878_v61  ;;  %v12734_v5 = vld [vmem:[#allocation16 + $0x898] sm:$0xf0] }
 0x779   :  { %v12641_v50 = vor.u32 %v14723_v3, %v12638_v35  ;;  %v12737_v25 = vor.u32 %v14747_v7, %v12734_v5  ;;  %v12606_v54 = vld [vmem:[#allocation16 + $0x798] sm:$0xf0]  ;;  %v14771_v6 = vld [vmem:[#allocation16 + $0x94c] sm:$0xf] }
 0x77a   :  { %9419 = vmatpush.bf16.msrb.mxu2 %v12161_v53  ;;  %9432 = vmatpush.bf16.msra.mxu3 %v12289_v47  ;;  %v12494_v53 = vld [vmem:[#allocation16 + $0x6b8] sm:$0xf0]  ;;  %v14743_v47 = vld [vmem:[#allocation16 + $0x86c] sm:$0xf]  ;;  %v12609_v46 = vor.u32 %v14715_v43, %v12606_v54 }
 0x77b   :  { %v12830_v62 = vld [vmem:[#allocation16 + $0x958] sm:$0xf0]  ;;  %v14679_v16 = vld [vmem:[#allocation16 + $0x66c] sm:$0xf] }
 0x77c   :  { %9392 = vmatpush.bf16.msra.mxu0 %v11921_v40  ;;  %9405 = vmatpush.bf16.msra.mxu1 %v12049_v11  ;;  %v14683_v40 = vld [vmem:[#allocation16 + $0x68c] sm:$0xf]  ;;  %v12849_v11 = vor.u32 %v14775_v1, %v12846_v19  ;;  %v12833_v2 = vor.u32 %v14771_v6, %v12830_v62  ;;  %v12574_v39 = vld [vmem:[#allocation16 + $0x758] sm:$0xf0] }
 0x77d   :  { %9420 = vmatmul.bf16.vlgmr.msrb.gmra.mxu2 %v16130_v31  ;;  %9433 = vmatmul.bf16.vlgmr.msra.gmra.mxu3 %v16132_v48  ;;  %v12513_v31 = vor.u32 %v14691_v36, %v12510_v18  ;;  %v14687_v48 = vld [vmem:[#allocation16 + $0x6ac] sm:$0xf]  ;;  %v12481_v30 = vor.u32 %v14683_v40, %v12478_v63  ;;  %v12430_v19 = vld [vmem:[#allocation16 + $0x638] sm:$0xf0] }
 0x77e   :  { %9464 = vmatpush.bf16.msra.mxu2 %v12785_v26  ;;  %9477 = vmatpush.bf16.msrb.mxu3 %v12913_v34  ;;  %v12718_v26 = vld [vmem:[#allocation16 + $0x878] sm:$0xf0]  ;;  %v12497_v14 = vor.u32 %v14687_v48, %v12494_v53  ;;  %v12625_v34 = vor.u32 %v14719_v20, %v12622_v17  ;;  %v14711_v9 = vld [vmem:[#allocation16 + $0x76c] sm:$0xf] }
 0x77f   :  { %v14767_v18 = vld [vmem:[#allocation16 + $0x92c] sm:$0xf]  ;;  %v12670_v48 = vld [vmem:[#allocation16 + $0x818] sm:$0xf0] }
 0x780   :  { %9393 = vmatpush.bf16.msra.mxu0 %v11905_v27  ;;  %9406 = vmatpush.bf16.msra.mxu1 %v12033_v28  ;;  %v9187_v27 = vpop.f32.mrf.mxu0  ;;  %v9213_v24 = vpop.f32.mrf.mxu2  ;;  %v14735_v28 = vld [vmem:[#allocation16 + $0x82c] sm:$0xf]  ;;  %v12798_v53 = vld [vmem:[#allocation16 + $0x918] sm:$0xf0] }
 0x781   :  { %v9188_v12 = vadd.f32 %v9187_v27, %v16244_v37  ;;  %v9200_v61 = vpop.f32.mrf.mxu1  ;;  %v14675_v35 = vld [vmem:[#allocation16 + $0x64c] sm:$0xf]  ;;  %v12414_v27 = vld [vmem:[#allocation16 + $0x618] sm:$0xf0] }
 0x782   :  { %9465 = vmatpush.bf16.msra.mxu2 %v12769_v21  ;;  %9478 = vmatpush.bf16.msrb.mxu3 %v12897_v8  ;;  %v12462_v21 = vld [vmem:[#allocation16 + $0x678] sm:$0xf0]  ;;  %v14731_v23 = vld [vmem:[#allocation16 + $0x80c] sm:$0xf] }
 0x783   :  { %9394 = vmatmul.bf16.vlgmr.msra.gmra.mxu0 %v16107_v60  ;;  %9407 = vmatmul.bf16.vlgmr.msra.gmra.mxu1 %v16109_v29  ;;  %v12721_v60 = vor.u32 %v14743_v47, %v12718_v26  ;;  %v12702_v29 = vld [vmem:[#allocation16 + $0x858] sm:$0xf0]  ;;  %v12465_v36 = vor.u32 %v14679_v16, %v12462_v21  ;;  %v9201_v7 = vadd.f32 %v9200_v61, %v9188_v12  ;;  %v14763_v37 = vld [vmem:[#allocation16 + $0x90c] sm:$0xf] }
 0x784   :  { %9438 = vmatpush.bf16.msrb.mxu0 %v12529_v58  ;;  %9451 = vmatpush.bf16.msrb.mxu1 %v12657_v41  ;;  %v12705_v56 = vor.u32 %v14739_v4, %v12702_v29  ;;  %v12590_v8 = vld [vmem:[#allocation16 + $0x778] sm:$0xf0]  ;;  %v9226_v41 = vpop.f32.mrf.mxu3  ;;  %v14887_v17 = vld [vmem:[#allocation16 + $0xcec] sm:$0xf]  ;;  %v12673_v40 = vor.u32 %v14731_v23, %v12670_v48 }
 0x785   :  { %v12686_v58 = vld [vmem:[#allocation16 + $0x838] sm:$0xf0]  ;;  %v12593_v3 = vor.u32 %v14711_v9, %v12590_v8  ;;  %v14919_v47 = vld [vmem:[#allocation16 + $0xdec] sm:$0xf] }
 0x786   :  { %9466 = vmatpush.bf16.msra.mxu2 %v12753_v59  ;;  %9479 = vmatpush.bf16.msrb.mxu3 %v12881_v57  ;;  %v12814_v59 = vld [vmem:[#allocation16 + $0x938] sm:$0xf0]  ;;  %v12689_v5 = vor.u32 %v14735_v28, %v12686_v58  ;;  %v14671_v1 = vld [vmem:[#allocation16 + $0x62c] sm:$0xf] }
 0x787   :  { %v12446_v57 = vld [vmem:[#allocation16 + $0x658] sm:$0xf0]  ;;  %v14703_v63 = vld [vmem:[#allocation16 + $0x72c] sm:$0xf] }
 0x788   :  { %9439 = vmatpush.bf16.msrb.mxu0 %v12513_v31  ;;  %9452 = vmatpush.bf16.msrb.mxu1 %v12641_v50  ;;  %v14707_v31 = vld [vmem:[#allocation16 + $0x74c] sm:$0xf]  ;;  %v12817_v50 = vor.u32 %v14767_v18, %v12814_v59  ;;  %v12449_v20 = vor.u32 %v14675_v35, %v12446_v57  ;;  %v9189_v43 = vpop.f32.mrf.mxu0  ;;  %v9215_v54 = vpop.f32.mrf.mxu2  ;;  %v13278_v16 = vld [vmem:[#allocation16 + $0xcd8] sm:$0xf0] }
 0x789   :  { %v12577_v26 = vor.u32 %v14707_v31, %v12574_v39  ;;  %v14883_v29 = vld [vmem:[#allocation16 + $0xccc] sm:$0xf]  ;;  %v13038_v58 = vld [vmem:[#allocation16 + $0xaf8] sm:$0xf0] }
 0x78a   :  { %9467 = vmatpush.bf16.msra.mxu2 %v12737_v25  ;;  %9480 = vmatpush.bf16.msrb.mxu3 %v12865_v33  ;;  %v9214_v25 = vadd.f32 %v9213_v24, %v9201_v7  ;;  %v13294_v33 = vld [vmem:[#allocation16 + $0xcf8] sm:$0xf0]  ;;  %v14915_v21 = vld [vmem:[#allocation16 + $0xdcc] sm:$0xf]  ;;  %v13281_v12 = vor.u32 %v14883_v29, %v13278_v16 }
 0x78b   :  { %v13297_v4 = vor.u32 %v14887_v17, %v13294_v33  ;;  %v14667_v8 = vld [vmem:[#allocation16 + $0x60c] sm:$0xf]  ;;  %v13022_v23 = vld [vmem:[#allocation16 + $0xad8] sm:$0xf0] }
 0x78c   :  { %9440 = vmatpush.bf16.msrb.mxu0 %v12497_v14  ;;  %9453 = vmatpush.bf16.msrb.mxu1 %v12625_v34  ;;  %v13422_v14 = vld [vmem:[#allocation16 + $0xdf8] sm:$0xf0]  ;;  %v16251_v34 = vadd.f32 %v9226_v41, %v9214_v25  ;;  %v9228_v6 = vpop.f32.mrf.mxu3  ;;  %v14699_v24 = vld [vmem:[#allocation16 + $0x70c] sm:$0xf]  ;;  %v12417_v18 = vor.u32 %v14667_v8, %v12414_v27 }
 0x78d   :  { %v13425_v62 = vor.u32 %v14919_v47, %v13422_v14  ;;  %v14823_v28 = vld [vmem:[#allocation16 + $0xaec] sm:$0xf]  ;;  %v13166_v41 = vld [vmem:[#allocation16 + $0xbf8] sm:$0xf0] }
 0x78e   :  { %9468 = vmatpush.bf16.msra.mxu2 %v12721_v60  ;;  %9481 = vmatpush.bf16.msrb.mxu3 %v12849_v11  ;;  %v12558_v60 = vld [vmem:[#allocation16 + $0x738] sm:$0xf0]  ;;  %v12801_v11 = vor.u32 %v14763_v37, %v12798_v53  ;;  %v14855_v61 = vld [vmem:[#allocation16 + $0xbec] sm:$0xf]  ;;  %v13041_v57 = vor.u32 %v14823_v28, %v13038_v58 }
 0x78f   :  { %v12561_v9 = vor.u32 %v14703_v63, %v12558_v60  ;;  %v14879_v59 = vld [vmem:[#allocation16 + $0xcac] sm:$0xf]  ;;  %v13169_v31 = vor.u32 %v14855_v61, %v13166_v41  ;;  %v13150_v37 = vld [vmem:[#allocation16 + $0xbd8] sm:$0xf0] }
 0x790   :  { %9441 = vmatpush.bf16.msrb.mxu0 %v12481_v30  ;;  %9454 = vmatpush.bf16.msrb.mxu1 %v12609_v46  ;;  %v9202_v30 = vpop.f32.mrf.mxu1  ;;  %v12433_v46 = vor.u32 %v14671_v1, %v12430_v19  ;;  %v14911_v7 = vld [vmem:[#allocation16 + $0xdac] sm:$0xf]  ;;  %v13374_v33 = vld [vmem:[#allocation16 + $0xd98] sm:$0xf0] }
 0x791   :  { %v14819_v39 = vld [vmem:[#allocation16 + $0xacc] sm:$0xf]  ;;  %v13134_v19 = vld [vmem:[#allocation16 + $0xbb8] sm:$0xf0] }
 0x792   :  { %9469 = vmatpush.bf16.msra.mxu2 %v12705_v56  ;;  %9482 = vmatpush.bf16.msrb.mxu3 %v12833_v2  ;;  %v13406_v56 = vld [vmem:[#allocation16 + $0xdd8] sm:$0xf0]  ;;  %v14851_v48 = vld [vmem:[#allocation16 + $0xbcc] sm:$0xf] }
 0x793   :  { %v12542_v2 = vld [vmem:[#allocation16 + $0x718] sm:$0xf0]  ;;  %v14875_v25 = vld [vmem:[#allocation16 + $0xc8c] sm:$0xf]  ;;  %v13153_v47 = vor.u32 %v14851_v48, %v13150_v37 }
 0x794   :  { %9442 = vmatpush.bf16.msrb.mxu0 %v12465_v36  ;;  %9455 = vmatpush.bf16.msrb.mxu1 %v12593_v3  ;;  %v13409_v36 = vor.u32 %v14915_v21, %v13406_v56  ;;  %v13262_v3 = vld [vmem:[#allocation16 + $0xcb8] sm:$0xf0]  ;;  %v12545_v35 = vor.u32 %v14699_v24, %v12542_v2  ;;  %v14907_v17 = vld [vmem:[#allocation16 + $0xd8c] sm:$0xf] }
 0x795   :  { %v14847_v1 = vld [vmem:[#allocation16 + $0xbac] sm:$0xf]  ;;  %v13230_v60 = vld [vmem:[#allocation16 + $0xc78] sm:$0xf0] }
 0x796   :  { %9470 = vmatpush.bf16.msra.mxu2 %v12689_v5  ;;  %9483 = vmatpush.bf16.msrb.mxu3 %v12817_v50  ;;  %v13390_v5 = vld [vmem:[#allocation16 + $0xdb8] sm:$0xf0]  ;;  %v13265_v50 = vor.u32 %v14879_v59, %v13262_v3  ;;  %v14871_v63 = vld [vmem:[#allocation16 + $0xc6c] sm:$0xf] }
 0x797   :  { %v13393_v53 = vor.u32 %v14911_v7, %v13390_v5  ;;  %v14903_v54 = vld [vmem:[#allocation16 + $0xd6c] sm:$0xf]  ;;  %v12990_v30 = vld [vmem:[#allocation16 + $0xa98] sm:$0xf0] }
 0x798   :  { %9443 = vmatpush.bf16.msrb.mxu0 %v12449_v20  ;;  %9456 = vmatpush.bf16.msrb.mxu1 %v12577_v26  ;;  %v13246_v20 = vld [vmem:[#allocation16 + $0xc98] sm:$0xf0]  ;;  %v14811_v29 = vld [vmem:[#allocation16 + $0xa8c] sm:$0xf] }
 0x799   :  { %v13006_v26 = vld [vmem:[#allocation16 + $0xab8] sm:$0xf0]  ;;  %v13249_v14 = vor.u32 %v14875_v25, %v13246_v20  ;;  %v14843_v6 = vld [vmem:[#allocation16 + $0xb8c] sm:$0xf]  ;;  %v12993_v21 = vor.u32 %v14811_v29, %v12990_v30 }
 0x79a   :  { %9471 = vmatpush.bf16.msra.mxu2 %v12673_v40  ;;  %9484 = vmatpush.bf16.msrb.mxu3 %v12801_v11  ;;  %v13377_v40 = vor.u32 %v14907_v17, %v13374_v33  ;;  %v13358_v11 = vld [vmem:[#allocation16 + $0xd78] sm:$0xf0]  ;;  %v14867_v16 = vld [vmem:[#allocation16 + $0xc4c] sm:$0xf] }
 0x79b   :  { %v14899_v56 = vld [vmem:[#allocation16 + $0xd4c] sm:$0xf]  ;;  %v12974_v24 = vld [vmem:[#allocation16 + $0xa78] sm:$0xf0] }
 0x79c   :  { %9444 = vmatpush.bf16.msrb.mxu0 %v12433_v46  ;;  %9457 = vmatpush.bf16.msrb.mxu1 %v12561_v9  ;;  %v13361_v46 = vor.u32 %v14903_v54, %v13358_v11  ;;  %v13342_v9 = vld [vmem:[#allocation16 + $0xd58] sm:$0xf0]  ;;  %v14807_v27 = vld [vmem:[#allocation16 + $0xa6c] sm:$0xf] }
 0x79d   :  { %9472 = vmatmul.bf16.vlgmr.msra.gmra.mxu2 %v16148_v15  ;;  %9485 = vmatmul.bf16.vlgmr.msrb.gmra.mxu3 %v16150_v52  ;;  %v13025_v15 = vor.u32 %v14819_v39, %v13022_v23  ;;  %v14815_v52 = vld [vmem:[#allocation16 + $0xaac] sm:$0xf]  ;;  %v13102_v58 = vld [vmem:[#allocation16 + $0xb78] sm:$0xf0]  ;;  %v13345_v41 = vor.u32 %v14899_v56, %v13342_v9 }
 0x79e   :  { %9516 = vmatpush.bf16.msrb.mxu2 %v13297_v4  ;;  %9529 = vmatpush.bf16.msra.mxu3 %v13425_v62  ;;  %v13009_v43 = vor.u32 %v14815_v52, %v13006_v26  ;;  %v13137_v4 = vor.u32 %v14847_v1, %v13134_v19  ;;  %v13118_v62 = vld [vmem:[#allocation16 + $0xb98] sm:$0xf0]  ;;  %v14839_v28 = vld [vmem:[#allocation16 + $0xb6c] sm:$0xf] }
 0x79f   :  { %v13121_v8 = vor.u32 %v14843_v6, %v13118_v62  ;;  %v13326_v7 = vld [vmem:[#allocation16 + $0xd38] sm:$0xf0]  ;;  %v13105_v5 = vor.u32 %v14839_v28, %v13102_v58  ;;  %v14859_v37 = vld [vmem:[#allocation16 + $0xc0c] sm:$0xf] }
 0x7a0   :  { %9445 = vmatpush.bf16.msrb.mxu0 %v12417_v18  ;;  %9458 = vmatpush.bf16.msrb.mxu1 %v12545_v35  ;;  %v16259_v61 = vpop.f32.mrf.mxu2  ;;  %v13198_v18 = vld [vmem:[#allocation16 + $0xc38] sm:$0xf0]  ;;  %v16261_v59 = vpop.f32.mrf.mxu1  ;;  %v12977_v35 = vor.u32 %v14807_v27, %v12974_v24  ;;  %v14891_v20 = vld [vmem:[#allocation16 + $0xd0c] sm:$0xf] }
 0x7a1   :  { %v16263_v3 = vpop.f32.mrf.mxu3  ;;  %v12958_v39 = vld [vmem:[#allocation16 + $0xa58] sm:$0xf0]  ;;  %v15015_v33 = vld [vmem:[#allocation16 + $0x10ec] sm:$0xf] }
 0x7a2   :  { %9517 = vmatpush.bf16.msrb.mxu2 %v13281_v12  ;;  %9530 = vmatpush.bf16.msra.mxu3 %v13409_v36  ;;  %v16257_v12 = vpop.f32.mrf.mxu0  ;;  %v14863_v36 = vld [vmem:[#allocation16 + $0xc2c] sm:$0xf]  ;;  %v13086_v48 = vld [vmem:[#allocation16 + $0xb58] sm:$0xf0] }
 0x7a3   :  { %9446 = vmatmul.bf16.vlgmr.msrb.gmra.mxu0 %v16123_v0  ;;  %9459 = vmatmul.bf16.vlgmr.msrb.gmra.mxu1 %v16125_v10  ;;  %v13233_v0 = vor.u32 %v14871_v63, %v13230_v60  ;;  %v13214_v10 = vld [vmem:[#allocation16 + $0xc58] sm:$0xf0]  ;;  %v13201_v23 = vor.u32 %v14863_v36, %v13198_v18  ;;  %v15047_v52 = vld [vmem:[#allocation16 + $0x11ec] sm:$0xf] }
 0x7a4   :  { %9490 = vmatpush.bf16.msra.mxu0 %v13041_v57  ;;  %9503 = vmatpush.bf16.msra.mxu1 %v13169_v31  ;;  %v13217_v2 = vor.u32 %v14867_v16, %v13214_v10  ;;  %v14895_v57 = vld [vmem:[#allocation16 + $0xd2c] sm:$0xf]  ;;  %v13182_v25 = vld [vmem:[#allocation16 + $0xc18] sm:$0xf0] }
 0x7a5   :  { %v14803_v31 = vld [vmem:[#allocation16 + $0xa4c] sm:$0xf]  ;;  %v12942_v19 = vld [vmem:[#allocation16 + $0xa38] sm:$0xf0] }
 0x7a6   :  { %9518 = vmatpush.bf16.msrb.mxu2 %v13265_v50  ;;  %9531 = vmatpush.bf16.msra.mxu3 %v13393_v53  ;;  %v14835_v50 = vld [vmem:[#allocation16 + $0xb4c] sm:$0xf]  ;;  %v13329_v53 = vor.u32 %v14895_v57, %v13326_v7  ;;  %v12961_v17 = vor.u32 %v14803_v31, %v12958_v39  ;;  %v13070_v60 = vld [vmem:[#allocation16 + $0xb38] sm:$0xf0] }
 0x7a7   :  { %v13089_v26 = vor.u32 %v14835_v50, %v13086_v48  ;;  %v14799_v1 = vld [vmem:[#allocation16 + $0xa2c] sm:$0xf]  ;;  %v13918_v10 = vld [vmem:[#allocation16 + $0x11d8] sm:$0xf0] }
 0x7a8   :  { %9491 = vmatpush.bf16.msra.mxu0 %v13025_v15  ;;  %9504 = vmatpush.bf16.msra.mxu1 %v13153_v47  ;;  %v13310_v15 = vld [vmem:[#allocation16 + $0xd18] sm:$0xf0]  ;;  %v14831_v63 = vld [vmem:[#allocation16 + $0xb2c] sm:$0xf]  ;;  %v9267_v54 = vpop.f32.mrf.mxu2  ;;  %v9254_v30 = vpop.f32.mrf.mxu1  ;;  %v12945_v62 = vor.u32 %v14799_v1, %v12942_v19 }
 0x7a9   :  { %v13806_v47 = vld [vmem:[#allocation16 + $0x10f8] sm:$0xf0]  ;;  %v13313_v11 = vor.u32 %v14891_v20, %v13310_v15  ;;  %v15011_v29 = vld [vmem:[#allocation16 + $0x10cc] sm:$0xf] }
 0x7aa   :  { %9519 = vmatpush.bf16.msrb.mxu2 %v13249_v14  ;;  %9532 = vmatpush.bf16.msra.mxu3 %v13377_v40  ;;  %v13934_v14 = vld [vmem:[#allocation16 + $0x11f8] sm:$0xf0]  ;;  %v13185_v40 = vor.u32 %v14859_v37, %v13182_v25  ;;  %v15043_v16 = vld [vmem:[#allocation16 + $0x11cc] sm:$0xf] }
 0x7ab   :  { %v13937_v6 = vor.u32 %v15047_v52, %v13934_v14  ;;  %v14795_v56 = vld [vmem:[#allocation16 + $0xa0c] sm:$0xf]  ;;  %v12926_v9 = vld [vmem:[#allocation16 + $0xa18] sm:$0xf0]  ;;  %v13921_v36 = vor.u32 %v15043_v16, %v13918_v10 }
 0x7ac   :  { %9492 = vmatpush.bf16.msra.mxu0 %v13009_v43  ;;  %9505 = vmatpush.bf16.msra.mxu1 %v13137_v4  ;;  %v9241_v43 = vpop.f32.mrf.mxu0  ;;  %v13809_v4 = vor.u32 %v15015_v33, %v13806_v47  ;;  %v13054_v27 = vld [vmem:[#allocation16 + $0xb18] sm:$0xf0]  ;;  %v14951_v24 = vld [vmem:[#allocation16 + $0xeec] sm:$0xf]  ;;  %v12929_v18 = vor.u32 %v14795_v56, %v12926_v9 }
 0x7ad   :  { %v14983_v58 = vld [vmem:[#allocation16 + $0xfec] sm:$0xf]  ;;  %v13774_v57 = vld [vmem:[#allocation16 + $0x10b8] sm:$0xf0] }
 0x7ae   :  { %9520 = vmatpush.bf16.msrb.mxu2 %v13233_v0  ;;  %9533 = vmatpush.bf16.msra.mxu3 %v13361_v46  ;;  %v9280_v0 = vpop.f32.mrf.mxu3  ;;  %v13790_v46 = vld [vmem:[#allocation16 + $0x10d8] sm:$0xf0]  ;;  %v15039_v31 = vld [vmem:[#allocation16 + $0x11ac] sm:$0xf] }
 0x7af   :  { %v13793_v28 = vor.u32 %v15011_v29, %v13790_v46  ;;  %v13902_v39 = vld [vmem:[#allocation16 + $0x11b8] sm:$0xf0]  ;;  %v14947_v50 = vld [vmem:[#allocation16 + $0xecc] sm:$0xf] }
 0x7b0   :  { %9493 = vmatpush.bf16.msra.mxu0 %v12993_v21  ;;  %9506 = vmatpush.bf16.msra.mxu1 %v13121_v8  ;;  %v13073_v21 = vor.u32 %v14831_v63, %v13070_v60  ;;  %v14827_v8 = vld [vmem:[#allocation16 + $0xb0c] sm:$0xf]  ;;  %v13534_v48 = vld [vmem:[#allocation16 + $0xed8] sm:$0xf0]  ;;  %v13905_v20 = vor.u32 %v15039_v31, %v13902_v39  ;;  %v9240_v39 = vadd.f32 %v16257_v12, %v16251_v34 }
 0x7b1   :  { %v13057_v7 = vor.u32 %v14827_v8, %v13054_v27  ;;  %v13662_v25 = vld [vmem:[#allocation16 + $0xfd8] sm:$0xf0]  ;;  %v15003_v15 = vld [vmem:[#allocation16 + $0x108c] sm:$0xf] }
 0x7b2   :  { %9521 = vmatpush.bf16.msrb.mxu2 %v13217_v2  ;;  %9534 = vmatpush.bf16.msra.mxu3 %v13345_v41  ;;  %v13550_v2 = vld [vmem:[#allocation16 + $0xef8] sm:$0xf0]  ;;  %v15035_v33 = vld [vmem:[#allocation16 + $0x118c] sm:$0xf] }
 0x7b3   :  { %v13678_v41 = vld [vmem:[#allocation16 + $0xff8] sm:$0xf0]  ;;  %v14975_v1 = vld [vmem:[#allocation16 + $0xfac] sm:$0xf] }
 0x7b4   :  { %9494 = vmatpush.bf16.msra.mxu0 %v12977_v35  ;;  %9507 = vmatpush.bf16.msra.mxu1 %v13105_v5  ;;  %v15007_v35 = vld [vmem:[#allocation16 + $0x10ac] sm:$0xf]  ;;  %v13553_v5 = vor.u32 %v14951_v24, %v13550_v2  ;;  %v13886_v47 = vld [vmem:[#allocation16 + $0x1198] sm:$0xf0] }
 0x7b5   :  { %v13777_v37 = vor.u32 %v15007_v35, %v13774_v57  ;;  %v13646_v19 = vld [vmem:[#allocation16 + $0xfb8] sm:$0xf0]  ;;  %v14999_v63 = vld [vmem:[#allocation16 + $0x106c] sm:$0xf] }
 0x7b6   :  { %9522 = vmatpush.bf16.msrb.mxu2 %v13201_v23  ;;  %9535 = vmatpush.bf16.msra.mxu3 %v13329_v53  ;;  %v13681_v23 = vor.u32 %v14983_v58, %v13678_v41  ;;  %v14979_v53 = vld [vmem:[#allocation16 + $0xfcc] sm:$0xf]  ;;  %v13742_v60 = vld [vmem:[#allocation16 + $0x1078] sm:$0xf0] }
 0x7b7   :  { %v13665_v52 = vor.u32 %v14979_v53, %v13662_v25  ;;  %v15031_v54 = vld [vmem:[#allocation16 + $0x116c] sm:$0xf]  ;;  %v13502_v30 = vld [vmem:[#allocation16 + $0xe98] sm:$0xf0] }
 0x7b8   :  { %9495 = vmatpush.bf16.msra.mxu0 %v12961_v17  ;;  %9508 = vmatpush.bf16.msra.mxu1 %v13089_v26  ;;  %v13758_v17 = vld [vmem:[#allocation16 + $0x1098] sm:$0xf0]  ;;  %v14939_v29 = vld [vmem:[#allocation16 + $0xe8c] sm:$0xf] }
 0x7b9   :  { %v13518_v26 = vld [vmem:[#allocation16 + $0xeb8] sm:$0xf0]  ;;  %v13761_v14 = vor.u32 %v15003_v15, %v13758_v17  ;;  %v14971_v0 = vld [vmem:[#allocation16 + $0xf8c] sm:$0xf]  ;;  %v13505_v16 = vor.u32 %v14939_v29, %v13502_v30 }
 0x7ba   :  { %9523 = vmatpush.bf16.msrb.mxu2 %v13185_v40  ;;  %9536 = vmatpush.bf16.msra.mxu3 %v13313_v11  ;;  %v13889_v40 = vor.u32 %v15035_v33, %v13886_v47  ;;  %v13870_v11 = vld [vmem:[#allocation16 + $0x1178] sm:$0xf0]  ;;  %v14995_v46 = vld [vmem:[#allocation16 + $0x104c] sm:$0xf] }
 0x7bb   :  { %v15027_v10 = vld [vmem:[#allocation16 + $0x114c] sm:$0xf]  ;;  %v13486_v8 = vld [vmem:[#allocation16 + $0xe78] sm:$0xf0] }
 0x7bc   :  { %9496 = vmatpush.bf16.msra.mxu0 %v12945_v62  ;;  %9509 = vmatpush.bf16.msra.mxu1 %v13073_v21  ;;  %v13873_v62 = vor.u32 %v15031_v54, %v13870_v11  ;;  %v13854_v21 = vld [vmem:[#allocation16 + $0x1158] sm:$0xf0]  ;;  %v14935_v9 = vld [vmem:[#allocation16 + $0xe6c] sm:$0xf] }
 0x7bd   :  { %9524 = vmatmul.bf16.vlgmr.msrb.gmra.mxu2 %v16164_v49  ;;  %9537 = vmatmul.bf16.vlgmr.msra.gmra.mxu3 %v16168_v55  ;;  %v13537_v49 = vor.u32 %v14947_v50, %v13534_v48  ;;  %v14943_v55 = vld [vmem:[#allocation16 + $0xeac] sm:$0xf]  ;;  %v13614_v2 = vld [vmem:[#allocation16 + $0xf78] sm:$0xf0]  ;;  %v13857_v41 = vor.u32 %v15027_v10, %v13854_v21 }
 0x7be   :  { %9568 = vmatpush.bf16.msra.mxu2 %v13809_v4  ;;  %9581 = vmatpush.bf16.msrb.mxu3 %v13937_v6  ;;  %v13521_v43 = vor.u32 %v14943_v55, %v13518_v26  ;;  %v13649_v4 = vor.u32 %v14975_v1, %v13646_v19  ;;  %v13630_v6 = vld [vmem:[#allocation16 + $0xf98] sm:$0xf0]  ;;  %v14967_v24 = vld [vmem:[#allocation16 + $0xf6c] sm:$0xf] }
 0x7bf   :  { %v13633_v56 = vor.u32 %v14971_v0, %v13630_v6  ;;  %v13838_v31 = vld [vmem:[#allocation16 + $0x1138] sm:$0xf0]  ;;  %v14931_v50 = vld [vmem:[#allocation16 + $0xe4c] sm:$0xf] }
 0x7c0   :  { %9497 = vmatpush.bf16.msra.mxu0 %v12929_v18  ;;  %9510 = vmatpush.bf16.msra.mxu1 %v13057_v7  ;;  %v16271_v58 = vpop.f32.mrf.mxu2  ;;  %v13710_v18 = vld [vmem:[#allocation16 + $0x1038] sm:$0xf0]  ;;  %v16273_v35 = vpop.f32.mrf.mxu1  ;;  %v13489_v7 = vor.u32 %v14935_v9, %v13486_v8  ;;  %v14963_v53 = vld [vmem:[#allocation16 + $0xf4c] sm:$0xf] }
 0x7c1   :  { %v16275_v57 = vpop.f32.mrf.mxu3  ;;  %v13470_v48 = vld [vmem:[#allocation16 + $0xe58] sm:$0xf0]  ;;  %v14987_v15 = vld [vmem:[#allocation16 + $0x100c] sm:$0xf] }
 0x7c2   :  { %9569 = vmatpush.bf16.msra.mxu2 %v13793_v28  ;;  %9582 = vmatpush.bf16.msrb.mxu3 %v13921_v36  ;;  %v16269_v28 = vpop.f32.mrf.mxu0  ;;  %v14991_v36 = vld [vmem:[#allocation16 + $0x102c] sm:$0xf]  ;;  %v13598_v25 = vld [vmem:[#allocation16 + $0xf58] sm:$0xf0] }
 0x7c3   :  { %9498 = vmatmul.bf16.vlgmr.msra.gmra.mxu0 %v16141_v42  ;;  %9511 = vmatmul.bf16.vlgmr.msra.gmra.mxu1 %v16143_v44  ;;  %v13745_v42 = vor.u32 %v14999_v63, %v13742_v60  ;;  %v13726_v44 = vld [vmem:[#allocation16 + $0x1058] sm:$0xf0]  ;;  %v15019_v33 = vld [vmem:[#allocation16 + $0x110c] sm:$0xf]  ;;  %v13601_v34 = vor.u32 %v14963_v53, %v13598_v25  ;;  %v9594_v60 = vmax.f32 %v16210_v32, 0.0 }
 0x7c4   :  { %9542 = vmatpush.bf16.msrb.mxu0 %v13553_v5  ;;  %9555 = vmatpush.bf16.msrb.mxu1 %v13681_v23  ;;  %v13729_v27 = vor.u32 %v14995_v46, %v13726_v44  ;;  %v15023_v5 = vld [vmem:[#allocation16 + $0x112c] sm:$0xf]  ;;  %v13617_v23 = vor.u32 %v14967_v24, %v13614_v2  ;;  %v13694_v17 = vld [vmem:[#allocation16 + $0x1018] sm:$0xf0] }
 0x7c5   :  { %v13822_v47 = vld [vmem:[#allocation16 + $0x1118] sm:$0xf0]  ;;  %v14927_v12 = vld [vmem:[#allocation16 + $0xe2c] sm:$0xf]  ;;  %v13697_v26 = vor.u32 %v14987_v15, %v13694_v17 }
 0x7c6   :  { %9570 = vmatpush.bf16.msra.mxu2 %v13777_v37  ;;  %9583 = vmatpush.bf16.msrb.mxu3 %v13905_v20  ;;  %v13713_v37 = vor.u32 %v14991_v36, %v13710_v18  ;;  %v13841_v20 = vor.u32 %v15023_v5, %v13838_v31  ;;  %v13454_v55 = vld [vmem:[#allocation16 + $0xe38] sm:$0xf0]  ;;  %v13825_v63 = vor.u32 %v15019_v33, %v13822_v47  ;;  %v14923_v30 = vld [vmem:[#allocation16 + $0xe0c] sm:$0xf] }
 0x7c7   :  { %v13582_v1 = vld [vmem:[#allocation16 + $0xf38] sm:$0xf0]  ;;  %v13457_v11 = vor.u32 %v14927_v12, %v13454_v55  ;;  %v14955_v0 = vld [vmem:[#allocation16 + $0xf0c] sm:$0xf] }
 0x7c8   :  { %9543 = vmatpush.bf16.msrb.mxu0 %v13537_v49  ;;  %9556 = vmatpush.bf16.msrb.mxu1 %v13665_v52  ;;  %v13473_v49 = vor.u32 %v14931_v50, %v13470_v48  ;;  %v9253_v52 = vadd.f32 %v16261_v59, %v9240_v39  ;;  %v9595_v59 = vmax.f32 %v16238_v22, 0.0  ;;  %v13566_v6 = vld [vmem:[#allocation16 + $0xf18] sm:$0xf0] }
 0x7c9   :  { %v9332_v54 = vpop.f32.mrf.mxu3  ;;  %v13569_v22 = vor.u32 %v14955_v0, %v13566_v6  ;;  %v15072_v6 = vld [vmem:[#allocation21 + $0xb0] sm:$0xff] }
 0x7ca   :  { %9571 = vmatpush.bf16.msra.mxu2 %v13761_v14  ;;  %9584 = vmatpush.bf16.msrb.mxu3 %v13889_v40  ;;  %v14959_v14 = vld [vmem:[#allocation16 + $0xf2c] sm:$0xf]  ;;  %v9293_v19 = vpop.f32.mrf.mxu0  ;;  %v9319_v40 = vpop.f32.mrf.mxu2  ;;  %v9599_v32 = vpack.c.bf16 %v9595_v59, %v9595_v59 }
 0x7cb   :  { %v13585_v29 = vor.u32 %v14959_v14, %v13582_v1 }
 0x7cc   :  { %9544 = vmatpush.bf16.msrb.mxu0 %v13521_v43  ;;  %9557 = vmatpush.bf16.msrb.mxu1 %v13649_v4  ;;  %v9306_v43 = vpop.f32.mrf.mxu1  ;;  %v9266_v4 = vadd.f32 %v16259_v61, %v9253_v52  ;;  %v9612_v10 = vsel %vm9607_vm1, %v9599_v32, 0 }
 0x7ce   :  { %9572 = vmatpush.bf16.msra.mxu2 %v13745_v42  ;;  %9585 = vmatpush.bf16.msrb.mxu3 %v13873_v62  ;;  %v13438_v42 = vld [vmem:[#allocation16 + $0xe18] sm:$0xf0]  ;;  %v9598_v62 = vpack.c.bf16 %v9594_v60, %v9594_v60  ;;  %v9279_v44 = vadd.f32 %v16263_v3, %v9266_v4  ;;  %v15104_v3 = vld [vmem:[#allocation18] sm:$0xf] }
 0x7cf   :  { %v13441_v46 = vor.u32 %v14923_v30, %v13438_v42  ;;  %v15073_v42 = vld [vmem:[#allocation21 + $0xb8] sm:$0xff] }
 0x7d0   :  { %9545 = vmatpush.bf16.msrb.mxu0 %v13505_v16  ;;  %9558 = vmatpush.bf16.msrb.mxu1 %v13633_v56  ;;  %v9292_v61 = vadd.f32 %v16269_v28, %v9279_v44  ;;  %v9609_v16 = vsel %vm9607_vm1, %v9598_v62, 0  ;;  %v15057_v62 = vld [vmem:[#allocation21 + $0x38] sm:$0xff]  ;;  %v15071_v44 = vld [vmem:[#allocation21 + $0xa8] sm:$0xff] }
 0x7d2   :  { %9573 = vmatpush.bf16.msra.mxu2 %v13729_v27  ;;  %9586 = vmatpush.bf16.msrb.mxu3 %v13857_v41  ;;  %v9305_v21 = vadd.f32 %v16273_v35, %v9292_v61  ;;  %v15064_v61 = vld [vmem:[#allocation21 + $0x70] sm:$0xff] }
 0x7d4   :  { %9546 = vmatpush.bf16.msrb.mxu0 %v13489_v7  ;;  %9559 = vmatpush.bf16.msrb.mxu1 %v13617_v23 }
 0x7d6   :  { %9574 = vmatpush.bf16.msra.mxu2 %v13713_v37  ;;  %9587 = vmatpush.bf16.msrb.mxu3 %v13841_v20 }
 0x7d8   :  { %9547 = vmatpush.bf16.msrb.mxu0 %v13473_v49  ;;  %9560 = vmatpush.bf16.msrb.mxu1 %v13601_v34 }
 0x7da   :  { %9575 = vmatpush.bf16.msra.mxu2 %v13697_v26  ;;  %9588 = vmatpush.bf16.msrb.mxu3 %v13825_v63 }
 0x7dc   :  { %9548 = vmatpush.bf16.msrb.mxu0 %v13457_v11  ;;  %9561 = vmatpush.bf16.msrb.mxu1 %v13585_v29  ;;  %v16295_v11 = vld [vmem:[#allocation19] sm:$0xf] }
 0x7dd   :  { %9576 = vmatmul.bf16.vlgmr.msra.gmra.mxu2 %v16176_v45  ;;  %9589 = vmatmul.bf16.vlgmr.msrb.gmra.mxu3 %v16178_v38  ;;  %v9318_v45 = vadd.f32 %v16271_v58, %v9305_v21  ;;  %v5710_v38 = vperm.slane %v15104_v3, 3  ;;  %v15055_v21 = vld [vmem:[#allocation21 + $0x28] sm:$0xff] }
 0x7df   :  { %v9331_v56 = vadd.f32 %v16275_v57, %v9318_v45  ;;  %v15063_v45 = vld [vmem:[#allocation21 + $0x68] sm:$0xff] }
 0x7e0   :  { %9549 = vmatpush.bf16.msrb.mxu0 %v13441_v46  ;;  %9562 = vmatpush.bf16.msrb.mxu1 %v13569_v22  ;;  %v9343_v9 = vpop.f32.mrf.mxu0  ;;  %v9369_v8 = vpop.f32.mrf.mxu2  ;;  %v15065_v46 = vld [vmem:[#allocation21 + $0x78] sm:$0xff]  ;;  %v15056_v22 = vld [vmem:[#allocation21 + $0x30] sm:$0xff] }
 0x7e1   :  { %v9344_v27 = vadd.f32 %v9343_v9, %v9331_v56  ;;  %v9356_v24 = vpop.f32.mrf.mxu1  ;;  %v9370_v2 = vadd.f32 %v9369_v8, %v5710_v38  ;;  %v9382_v28 = vpop.f32.mrf.mxu3  ;;  %v15069_v38 = vld [vmem:[#allocation21 + $0x98] sm:$0xff]  ;;  %v15054_v56 = vld [vmem:[#allocation21 + $0x20] sm:$0xff] }
 0x7e2   :  { %v15062_v9 = vld [vmem:[#allocation21 + $0x60] sm:$0xff] }
 0x7e3   :  { %9550 = vmatmul.bf16.vlgmr.msrb.gmra.mxu0 %v16156_v13  ;;  %9563 = vmatmul.bf16.vlgmr.msrb.gmra.mxu1 %v16158_v51  ;;  %v9357_v41 = vadd.f32 %v9356_v24, %v9344_v27  ;;  %v9383_v36 = vadd.f32 %v9382_v28, %v9370_v2 }
 0x7e4   :  { %9627 = vmatpush.bf16.msra.mxu0 %v9609_v16  ;;  %9640 = vmatpush.bf16.msra.mxu1 %v9612_v10  ;;  %v15070_v10 = vld [vmem:[#allocation21 + $0xa0] sm:$0xff] }
 0x7e5   :  { %v9596_v18 = vmax.f32 %v9357_v41, 0.0 }
 0x7e7   :  { %v9600_v35 = vpack.c.bf16 %v9596_v18, %v9596_v18  ;;  %v15053_v18 = vld [vmem:[#allocation21 + $0x18] sm:$0xff] }
 0x7e8   :  { %v9345_v7 = vpop.f32.mrf.mxu0  ;;  %v9371_v13 = vpop.f32.mrf.mxu2  ;;  %9936 = vmatpush.bf16.msrb.mxu0 %v15057_v62  ;;  %9949 = vmatpush.bf16.msrb.mxu1 %v15065_v46 }
 0x7e9   :  { %v9358_v5 = vpop.f32.mrf.mxu1  ;;  %v9384_v51 = vpop.f32.mrf.mxu3  ;;  %v9615_v58 = vsel %vm9607_vm1, %v9600_v35, 0  ;;  %v15061_v35 = vld [vmem:[#allocation21 + $0x58] sm:$0xff] }
 0x7ea   :  { %9653 = vmatpush.bf16.msrb.mxu2 %v9615_v58  ;;  %v15067_v5 = vld [vmem:[#allocation21 + $0x88] sm:$0xff]  ;;  %v15052_v51 = vld [vmem:[#allocation21 + $0x10] sm:$0xff] }
 0x7eb   :  { %v15060_v58 = vld [vmem:[#allocation21 + $0x50] sm:$0xff] }
 0x7ec   :  { %9937 = vmatpush.bf16.msrb.mxu0 %v15056_v22  ;;  %9950 = vmatpush.bf16.msrb.mxu1 %v15064_v61 }
 0x7ed   :  { %13940 = vmatmul.msk.bf16.vlgmr.msrb.gmra.mxu2 %vm9603_vm2, %v16295_v11 }
 0x7ee   :  { %9962 = vmatpush.bf16.msra.mxu2 %v15073_v42 }
 0x7f0   :  { %9938 = vmatpush.bf16.msrb.mxu0 %v15055_v21  ;;  %9951 = vmatpush.bf16.msrb.mxu1 %v15063_v45 }
 0x7f2   :  { %9963 = vmatpush.bf16.msra.mxu2 %v15072_v6 }
 0x7f3   :  { %13938 = vmatmul.msk.bf16.vlgmr.msra.gmra.mxu0 %vm9603_vm2, %v16295_v11  ;;  %13939 = vmatmul.msk.bf16.vlgmr.msra.gmra.mxu1 %vm9603_vm2, %v16295_v11 }
 0x7f4   :  { %9939 = vmatpush.bf16.msrb.mxu0 %v15054_v56  ;;  %9952 = vmatpush.bf16.msrb.mxu1 %v15062_v9 }
 0x7f6   :  { %9964 = vmatpush.bf16.msra.mxu2 %v15071_v44 }
 0x7f8   :  { %9940 = vmatpush.bf16.msrb.mxu0 %v15053_v18  ;;  %9953 = vmatpush.bf16.msrb.mxu1 %v15061_v35 }
 0x7fa   :  { %9965 = vmatpush.bf16.msra.mxu2 %v15070_v10 }
 0x7fc   :  { %9941 = vmatpush.bf16.msrb.mxu0 %v15052_v51  ;;  %9954 = vmatpush.bf16.msrb.mxu1 %v15060_v58 }
 0x7fe   :  { %9966 = vmatpush.bf16.msra.mxu2 %v15069_v38 }
 0x800   :  { %v9395_v31 = vpop.f32.mrf.mxu0  ;;  %v9421_v39 = vpop.f32.mrf.mxu2 }
 0x801   :  { %v9396_v57 = vadd.f32 %v9395_v31, %v9383_v36  ;;  %v9408_v23 = vpop.f32.mrf.mxu1  ;;  %v9434_v50 = vpop.f32.mrf.mxu3  ;;  %v15068_v36 = vld [vmem:[#allocation21 + $0x90] sm:$0xff] }
 0x802   :  { %9967 = vmatpush.bf16.msra.mxu2 %v15068_v36 }
 0x803   :  { %v9409_v48 = vadd.f32 %v9408_v23, %v9396_v57 }
 0x805   :  { %v9422_v37 = vadd.f32 %v9421_v39, %v9409_v48 }
 0x806   :  { %9968 = vmatpush.bf16.msra.mxu2 %v15067_v5 }
 0x807   :  { %v9435_v53 = vadd.f32 %v9434_v50, %v9422_v37  ;;  %v15081_v37 = vld [vmem:[#allocation21 + $0xf8] sm:$0xff] }
 0x808   :  { %v9397_v25 = vpop.f32.mrf.mxu0  ;;  %v9423_v20 = vpop.f32.mrf.mxu2 }
 0x809   :  { %v9410_v15 = vpop.f32.mrf.mxu1  ;;  %v9436_v17 = vpop.f32.mrf.mxu3  ;;  %v15080_v25 = vld [vmem:[#allocation21 + $0xf0] sm:$0xff]  ;;  %v15079_v20 = vld [vmem:[#allocation21 + $0xe8] sm:$0xff] }
 0x80a   :  { %v15078_v15 = vld [vmem:[#allocation21 + $0xe0] sm:$0xff]  ;;  %v15077_v17 = vld [vmem:[#allocation21 + $0xd8] sm:$0xff] }
 0x820   :  { %v9447_v49 = vpop.f32.mrf.mxu0  ;;  %v9473_v33 = vpop.f32.mrf.mxu2 }
 0x821   :  { %v9460_v47 = vpop.f32.mrf.mxu1  ;;  %v9486_v52 = vpop.f32.mrf.mxu3  ;;  %v9448_v63 = vadd.f32 %v9447_v49, %v9435_v53  ;;  %v15076_v49 = vld [vmem:[#allocation21 + $0xd0] sm:$0xff] }
 0x823   :  { %v9461_v60 = vadd.f32 %v9460_v47, %v9448_v63  ;;  %v15066_v47 = vld [vmem:[#allocation21 + $0x80] sm:$0xff] }
 0x824   :  { %9969 = vmatpush.bf16.msra.mxu2 %v15066_v47 }
 0x825   :  { %v9474_v29 = vadd.f32 %v9473_v33, %v9461_v60  ;;  %v15075_v33 = vld [vmem:[#allocation21 + $0xc8] sm:$0xff] }
 0x827   :  { %v9487_v30 = vadd.f32 %v9486_v52, %v9474_v29  ;;  %v15051_v52 = vld [vmem:[#allocation21 + $0x8] sm:$0xff] }
 0x828   :  { %v9449_v34 = vpop.f32.mrf.mxu0  ;;  %v9475_v12 = vpop.f32.mrf.mxu2  ;;  %9942 = vmatpush.bf16.msrb.mxu0 %v15051_v52 }
 0x829   :  { %v9462_v55 = vpop.f32.mrf.mxu1  ;;  %v9488_v26 = vpop.f32.mrf.mxu3  ;;  %v15059_v12 = vld [vmem:[#allocation21 + $0x48] sm:$0xff] }
 0x82a   :  { %9955 = vmatpush.bf16.msrb.mxu1 %v15059_v12  ;;  %v15050_v26 = vld [vmem:[#allocation21] sm:$0xff] }
 0x82c   :  { %9943 = vmatpush.bf16.msrb.mxu0 %v15050_v26 }
 0x840   :  { %v9499_v14 = vpop.f32.mrf.mxu0  ;;  %v9525_v1 = vpop.f32.mrf.mxu2 }
 0x841   :  { %v9512_v19 = vpop.f32.mrf.mxu1  ;;  %v9538_v40 = vpop.f32.mrf.mxu3  ;;  %v9500_v0 = vadd.f32 %v9499_v14, %v9487_v30  ;;  %v15058_v14 = vld [vmem:[#allocation21 + $0x40] sm:$0xff] }
 0x842   :  { %9956 = vmatpush.bf16.msrb.mxu1 %v15058_v14 }
 0x843   :  { %v9513_v32 = vadd.f32 %v9512_v19, %v9500_v0  ;;  %v15074_v19 = vld [vmem:[#allocation21 + $0xc0] sm:$0xff] }
 0x845   :  { %v9526_v16 = vadd.f32 %v9525_v1, %v9513_v32  ;;  %v15101_v32 = vld [vmem:[#allocation22] ss:$0 sm:$0xff] }
 0x847   :  { %v9539_v3 = vadd.f32 %v9538_v40, %v9526_v16 }
 0x848   :  { %v9501_v43 = vpop.f32.mrf.mxu0  ;;  %v9527_v54 = vpop.f32.mrf.mxu2 }
 0x849   :  { %v9514_v59 = vpop.f32.mrf.mxu1  ;;  %v9540_v4 = vpop.f32.mrf.mxu3 }
 0x860   :  { %v9551_v8 = vpop.f32.mrf.mxu0  ;;  %v9577_v27 = vpop.f32.mrf.mxu2 }
 0x861   :  { %v9552_v24 = vadd.f32 %v9551_v8, %v9539_v3  ;;  %v9564_v2 = vpop.f32.mrf.mxu1  ;;  %v9590_v28 = vpop.f32.mrf.mxu3 }
 0x863   :  { %v9565_v41 = vadd.f32 %v9564_v2, %v9552_v24 }
 0x865   :  { %v9578_v7 = vadd.f32 %v9577_v27, %v9565_v41 }
 0x867   :  { %v9591_v13 = vadd.f32 %v9590_v28, %v9578_v7 }
 0x868   :  { %v9553_v31 = vpop.f32.mrf.mxu0  ;;  %v9579_v39 = vpop.f32.mrf.mxu2 }
 0x869   :  { %v9597_v57 = vmax.f32 %v9591_v13, 0.0  ;;  %v9566_v23 = vpop.f32.mrf.mxu1  ;;  %v9592_v50 = vpop.f32.mrf.mxu3 }
 0x86b   :  { %v9601_v48 = vpack.c.bf16 %v9597_v57, %v9597_v57 }
 0x86d   :  { %v9618_v53 = vsel %vm9607_vm1, %v9601_v48, 0 }
 0x86e   :  { %9666 = vmatpush.bf16.msra.mxu3 %v9618_v53 }
 0x870   :  { %v9655_v34 = vpop.f32.mrf.mxu2  ;;  %v9629_v1 = vpop.f32.mrf.mxu0 }
 0x871   :  { %13941 = vmatmul.msk.bf16.vlgmr.msra.gmra.mxu3 %vm9603_vm2, %v16295_v11  ;;  %v9674_v55 = vpack.c.bf16 %v9655_v34, %v9655_v34  ;;  %v9672_v40 = vpack.c.bf16 %v9629_v1, %v9629_v1  ;;  %v9642_v63 = vpop.f32.mrf.mxu1 }
 0x872   :  { %9975 = vmatpush.bf16.msrb.mxu3 %v15081_v37  ;;  %v9673_v60 = vpack.c.bf16 %v9642_v63, %v9642_v63 }
 0x873   :  { %9970 = vmatmul.bf16.vlgmr.msra.gmra.mxu2 %v9674_v55  ;;  %9944 = vmatmul.bf16.vlgmr.msrb.gmra.mxu0 %v9672_v40 }
 0x874   :  { %9957 = vmatmul.bf16.vlgmr.msrb.gmra.mxu1 %v9673_v60 }
 0x876   :  { %9976 = vmatpush.bf16.msrb.mxu3 %v15080_v25 }
 0x878   :  { %v9657_v43 = vpop.f32.mrf.mxu2  ;;  %v9631_v54 = vpop.f32.mrf.mxu0 }
 0x879   :  { %v9644_v11 = vpop.f32.mrf.mxu1 }
 0x87a   :  { %9977 = vmatpush.bf16.msrb.mxu3 %v15079_v20 }
 0x87e   :  { %9978 = vmatpush.bf16.msrb.mxu3 %v15078_v15 }
 0x882   :  { %9979 = vmatpush.bf16.msrb.mxu3 %v15077_v17 }
 0x886   :  { %9980 = vmatpush.bf16.msrb.mxu3 %v15076_v49 }
 0x88a   :  { %9981 = vmatpush.bf16.msrb.mxu3 %v15075_v33 }
 0x88e   :  { %9982 = vmatpush.bf16.msrb.mxu3 %v15074_v19 }
 0x8f0   :  { %v9945_v30 = vpop.f32.mrf.mxu0 }
 0x8f1   :  { %v9958_v42 = vpop.f32.mrf.mxu1  ;;  %v9946_v44 = vadd.f32 %v15101_v32, %v9945_v30 }
 0x8f3   :  { %v9959_v22 = vadd.f32 %v9958_v42, %v9946_v44 }
 0x8f4   :  { %v9668_v59 = vpop.f32.mrf.mxu3 }
 0x8f5   :  { %v9675_v4 = vpack.c.bf16 %v9668_v59, %v9668_v59 }
 0x8f6   :  { %v9971_v0 = vpop.f32.mrf.mxu2 }
 0x8f7   :  { %9983 = vmatmul.bf16.vlgmr.msrb.gmra.mxu3 %v9675_v4  ;;  %v9972_v61 = vadd.f32 %v9971_v0, %v9959_v22 }
 0x8f8   :  { %v9947_v6 = vpop.f32.mrf.mxu0 }
 0x8f9   :  { %v9960_v62 = vpop.f32.mrf.mxu1 }
 0x8fc   :  { %v9670_v29 = vpop.f32.mrf.mxu3 }
 0x8fe   :  { %v9973_v46 = vpop.f32.mrf.mxu2 }
 0x97a   :  { %v9984_v16 = vpop.f32.mrf.mxu3 }
 0x97b   :  { %v9985_v10 = vadd.f32 %v9984_v16, %v9972_v61 }
 0x97d   :  { %9988 = vst [vmem:[%s16322_s13] sm:$0xff] %v9985_v10 }
 0x982   :  { %v9986_v21 = vpop.f32.mrf.mxu3 }
 0x983   :  { %9993 = vsyncpa [#allocation6], 1 }
 0x984   :  { %9994 = vsyncpa [#allocation8], 1 }
 0x985   :  { %9995 = vsyncpa [#allocation11], 1 }
 0x986   :  { %9996 = vsyncpa [#allocation14], 1 }
 0x987   :  { %9997 = vsyncpa [#allocation17], 1 }
 0x988   :  { %9998 = vsyncpa [#allocation20], 1 }
 0x989   :  { %9999 = vsyncpa [#allocation23], 1 }

</bundles_post_ra>
